<compile_context>
chip_gen: v5e
topology: v5e:2x2
jax: 0.10.0
libtpu: 0.0.40
codegen_flags: <defaults>
</compile_context>

<pallas_src>
import functools
import jax
import jax.numpy as jnp
from jax import lax
from jax.experimental import pallas as pl
from jax.experimental.pallas import tpu as pltpu


def _ru(x, m):
    return ((x + m - 1) // m) * m


def _pick_tm(M):
    """M-tile: big enough to amortize per-step pipeline overhead, but always >=2 grid steps."""
    tm = min(512, _ru(M, 8))
    if tm >= M and M > 8:            # would give a 1-step grid -> split so both TCs get work
        tm = max(8, _ru(-(-M // 2), 8))
    return tm


_COMPILER_PARAMS = pltpu.CompilerParams(
    dimension_semantics=("parallel",),
    vmem_limit_bytes=32 * 1024 * 1024,
)


# --------------------------- Pallas kernels ---------------------------

def _mm_bias_relu_kernel(a_ref, b_ref, bias_ref, o_ref):
    # bf16 x bf16 -> f32 on the MXU, then bias add + ReLU in f32 on the VPU.
    acc = jnp.dot(a_ref[...], b_ref[...], preferred_element_type=jnp.float32)
    o_ref[...] = jnp.maximum(acc + bias_ref[...], 0.0)


def matmul_bias_relu(A, B, bias2d):
    """ReLU(A @ B + bias).  A: (M, K) bf16, B: (K, Cout) bf16, bias2d: (1, Cout) f32."""
    M, K = A.shape
    Cout = B.shape[1]
    tm = _pick_tm(M)
    return pl.pallas_call(
        _mm_bias_relu_kernel,
        out_shape=jax.ShapeDtypeStruct((M, Cout), jnp.float32),
        grid=(pl.cdiv(M, tm),),
        in_specs=[
            pl.BlockSpec((tm, K), lambda i: (i, 0)),      # K = full dim -> no padding needed
            pl.BlockSpec((K, Cout), lambda i: (0, 0)),    # weights resident
            pl.BlockSpec((1, Cout), lambda i: (0, 0)),
        ],
        out_specs=pl.BlockSpec((tm, Cout), lambda i: (i, 0)),
        compiler_params=_COMPILER_PARAMS,
    )(A, B, bias2d)


def _max_reduce_kernel(p_ref, o_ref):
    # max over the window-tap axis (leading dim), elementwise on the VPU.
    o_ref[...] = jnp.max(p_ref[...], axis=0)


def max_over_taps(P):
    """P: (T, M, C) -> (M, C) max over axis 0. No padding; edge blocks are masked."""
    T, M, C = P.shape
    tm = _pick_tm(M)
    return pl.pallas_call(
        _max_reduce_kernel,
        out_shape=jax.ShapeDtypeStruct((M, C), P.dtype),
        grid=(pl.cdiv(M, tm),),
        in_specs=[pl.BlockSpec((T, tm, C), lambda i: (0, i, 0))],
        out_specs=pl.BlockSpec((tm, C), lambda i: (i, 0)),
        compiler_params=_COMPILER_PARAMS,
    )(P)


# --------------------------- conv / pool wrappers (layout glue only) ---------------------------

def conv2d_relu(x, Bmat, bias2d, *, ksize, stride=1, padding=0):
    """x: (N,H,W,Cin) NHWC f32; Bmat: (KH*KW*Cin, Cout) bf16 (prepared); bias2d: (1,Cout) f32."""
    N, H, W, Cin = x.shape
    Cout = Bmat.shape[1]
    xb = x.astype(jnp.bfloat16)                  # halve im2col HBM traffic; MXU-native dtype
    if padding > 0:
        xb = jnp.pad(xb, ((0, 0), (padding, padding), (padding, padding), (0, 0)))
    Hp, Wp = xb.shape[1], xb.shape[2]
    Ho = (Hp - ksize) // stride + 1
    Wo = (Wp - ksize) // stride + 1
    if ksize == 1 and stride == 1:
        A = xb.reshape(N * Ho * Wo, Cin)         # 1x1 conv: im2col is a free reshape
    else:
        taps = []
        for dy in range(ksize):
            for dx in range(ksize):
                taps.append(
                    lax.slice(
                        xb,
                        (0, dy, dx, 0),
                        (N, dy + (Ho - 1) * stride + 1, dx + (Wo - 1) * stride + 1, Cin),
                        (1, stride, stride, 1),
                    )
                )
        A = jnp.concatenate(taps, axis=-1).reshape(N * Ho * Wo, ksize * ksize * Cin)
    out = matmul_bias_relu(A, Bmat, bias2d)
    return out.reshape(N, Ho, Wo, Cout)


def maxpool_3x3_s2_ceil(x):
    """MaxPool2d(kernel_size=3, stride=2, ceil_mode=True), padding=0.  x: NHWC f32."""
    k, s = 3, 2
    N, H, W, C = x.shape
    Ho = -(-(H - k) // s) + 1
    Wo = -(-(W - k) // s) + 1
    pad_h = max(0, (Ho - 1) * s + k - H)
    pad_w = max(0, (Wo - 1) * s + k - W)
    xp = jnp.pad(x, ((0, 0), (0, pad_h), (0, pad_w), (0, 0)),
                 constant_values=-jnp.inf)       # -inf => partial (ceil) windows ignore OOB
    taps = []
    for dy in range(k):
        for dx in range(k):
            taps.append(
                lax.slice(
                    xp,
                    (0, dy, dx, 0),
                    (N, dy + (Ho - 1) * s + 1, dx + (Wo - 1) * s + 1, C),
                    (1, s, s, 1),
                )
            )
    P = jnp.stack(taps, axis=0).reshape(k * k, N * Ho * Wo, C)
    out = max_over_taps(P)
    return out.reshape(N, Ho, Wo, C)


# --------------------------- parameters (prepared once) ---------------------------

def _raw_conv(key, kh, kw, cin, cout):
    kw_, kb_ = jax.random.split(key)
    fan_in = kh * kw * cin
    w = jax.random.normal(kw_, (kh, kw, cin, cout), jnp.float32) * jnp.sqrt(2.0 / fan_in)
    b = jax.random.normal(kb_, (cout,), jnp.float32) * 0.01
    return w, b


def _prep_conv(w_hwio, b):
    kh, kw, cin, cout = w_hwio.shape
    return dict(
        B=w_hwio.reshape(kh * kw * cin, cout).astype(jnp.bfloat16),   # MXU operand, prepped once
        bias=b.reshape(1, cout).astype(jnp.float32),
        ksize=kh,
    )


def _prep_fire(key, cin, sq, e1, e3):
    k1, k2, k3 = jax.random.split(key, 3)
    sw, sb = _raw_conv(k1, 1, 1, cin, sq)
    w1, b1 = _raw_conv(k2, 1, 1, sq, e1)
    w3, b3 = _raw_conv(k3, 3, 3, sq, e3)
    # Fuse expand1x1 into the centre tap of a single 3x3 filter -> one conv, one concat-free
    # lane-dense output with channel order [expand1x1, expand3x3] (exactly like torch Fire).
    wf = jnp.zeros((3, 3, sq, e1 + e3), jnp.float32)
    wf = wf.at[1, 1, :, :e1].set(w1[0, 0])
    wf = wf.at[:, :, :, e1:].set(w3)
    bf = jnp.concatenate([b1, b3])
    return dict(squeeze=_prep_conv(sw, sb), expand=_prep_conv(wf, bf))


def make_params(key):
    keys = jax.random.split(key, 9)
    params = {}
    params["conv1"] = _prep_conv(*_raw_conv(keys[0], 3, 3, 3, 64))    # features[0]
    fire_cfg = [  # (cin, squeeze, expand1x1, expand3x3) -- squeezenet1_1
        (64, 16, 64, 64),     # features[3]
        (128, 16, 64, 64),    # features[4]
        (128, 32, 128, 128),  # features[6]
        (256, 32, 128, 128),  # features[7]
        (256, 48, 192, 192),  # features[9]
        (384, 48, 192, 192),  # features[10]
        (384, 64, 256, 256),  # features[11]
        (512, 64, 256, 256),  # features[12]
    ]
    params["fires"] = [_prep_fire(keys[i + 1], *cfg) for i, cfg in enumerate(fire_cfg)]
    return params


# --------------------------- SqueezeNet 1.1 features ---------------------------

def fire(x, p):
    s = conv2d_relu(x, p["squeeze"]["B"], p["squeeze"]["bias"], ksize=1, stride=1, padding=0)
    return conv2d_relu(s, p["expand"]["B"], p["expand"]["bias"], ksize=3, stride=1, padding=1)


def squeezenet_forward(X_nchw, params):
    """Returns (relu1..relu7) exactly as the lpips squeezenet slices, all NCHW."""
    x = jnp.transpose(X_nchw, (0, 2, 3, 1)).astype(jnp.float32)   # -> NHWC
    f = params["fires"]

    h = conv2d_relu(x, params["conv1"]["B"], params["conv1"]["bias"],
                    ksize=3, stride=2, padding=0)
    relu1 = h                                   # slice1 = features[0:2]

    h = maxpool_3x3_s2_ceil(h)
    h = fire(h, f[0])
    h = fire(h, f[1])
    relu2 = h                                   # slice2 = features[2:5]

    h = maxpool_3x3_s2_ceil(h)
    h = fire(h, f[2])
    h = fire(h, f[3])
    relu3 = h                                   # slice3 = features[5:8]

    h = maxpool_3x3_s2_ceil(h)
    h = fire(h, f[4])
    relu4 = h                                   # slice4 = features[8:10]

    h = fire(h, f[5])
    relu5 = h                                   # slice5 = features[10:11]

    h = fire(h, f[6])
    relu6 = h                                   # slice6 = features[11:12]

    h = fire(h, f[7])
    relu7 = h                                   # slice7 = features[12:13]

    to_nchw = lambda t: jnp.transpose(t, (0, 3, 1, 2))
    return tuple(to_nchw(t) for t in (relu1, relu2, relu3, relu4, relu5, relu6, relu7))


if __name__ == "__main__":
    key = jax.random.PRNGKey(0)
    k_param, k_input = jax.random.split(key)
    params = make_params(k_param)
    # SqueezeNet needs 3 input channels; 64x64 spatial keeps all layers valid and small.
    X = jax.random.normal(k_input, (2, 3, 64, 64), jnp.float32)

    fwd = jax.jit(functools.partial(squeezenet_forward, params=params))
    outs = fwd(X)
    outs = jax.block_until_ready(outs)

    expected = [(2, 64, 31, 31), (2, 128, 15, 15), (2, 256, 7, 7),
                (2, 384, 3, 3), (2, 384, 3, 3), (2, 512, 3, 3), (2, 512, 3, 3)]
    assert [tuple(o.shape) for o in outs] == expected, [tuple(o.shape) for o in outs]
    assert all(bool(jnp.all(jnp.isfinite(o))) for o in outs)
    print("KERNEL_OK")
</pallas_src>

<mosaic_0001>
module attributes {stable_mosaic.version = 11 : i64} {
  func.func @_mm_bias_relu_kernel(%arg0: i32, %arg1: memref<512x27xbf16, #tpu.memory_space<vmem>>, %arg2: memref<27x64xbf16, #tpu.memory_space<vmem>>, %arg3: memref<1x64xf32, #tpu.memory_space<vmem>>, %arg4: memref<512x64xf32, #tpu.memory_space<vmem>>) attributes {dimension_semantics = [#tpu.dimension_semantics<parallel>], iteration_bounds = array<i64: 4>, scalar_prefetch = 0 : i64, scratch_operands = 0 : i64, tpu.core_type = #tpu.core_type<tc>, window_params = [{transform_indices = @transform_0, window_bounds = array<i64: 512, 27>}, {pipeline_mode = #tpu.pipeline_mode<synchronous>, transform_indices = @transform_1, window_bounds = array<i64: 27, 64>}, {pipeline_mode = #tpu.pipeline_mode<synchronous>, transform_indices = @transform_2, window_bounds = array<i64: 1, 64>}, {transform_indices = @transform_3, window_bounds = array<i64: 512, 64>}]} {
    %c0 = arith.constant 0 : index
    %c0_0 = arith.constant 0 : index
    %0 = vector.load %arg1[%c0, %c0_0] : memref<512x27xbf16, #tpu.memory_space<vmem>>, vector<512x27xbf16>
    %c0_1 = arith.constant 0 : index
    %c0_2 = arith.constant 0 : index
    %1 = vector.load %arg2[%c0_1, %c0_2] : memref<27x64xbf16, #tpu.memory_space<vmem>>, vector<27x64xbf16>
    %cst = arith.constant dense<0.000000e+00> : vector<512x64xf32>
    %2 = tpu.matmul %0, %1, %cst {dimension_numbers = #tpu.dot_dimension_numbers<[1], [0], [0], [1], [0, 0, 1, 1], [], []>} : vector<512x27xbf16>, vector<27x64xbf16>, vector<512x64xf32> -> vector<512x64xf32>
    %c0_3 = arith.constant 0 : index
    %c0_4 = arith.constant 0 : index
    %3 = vector.load %arg3[%c0_3, %c0_4] : memref<1x64xf32, #tpu.memory_space<vmem>>, vector<1x64xf32>
    %4 = vector.broadcast %3 : vector<1x64xf32> to vector<512x64xf32>
    %5 = arith.addf %2, %4 : vector<512x64xf32>
    %cst_5 = arith.constant 0.000000e+00 : f32
    %6 = vector.broadcast %cst_5 : f32 to vector<512x64xf32>
    %7 = arith.maximumf %5, %6 : vector<512x64xf32>
    %c0_6 = arith.constant 0 : index
    %c0_7 = arith.constant 0 : index
    %8 = vector.load %arg4[%c0_6, %c0_7] : memref<512x64xf32, #tpu.memory_space<vmem>>, vector<512x64xf32>
    tpu.vector_store %arg4[%c0_6, %c0_7], %7 {strides = array<i32>} : memref<512x64xf32, #tpu.memory_space<vmem>>, vector<512x64xf32>,
    return
  }
  func.func @transform_0(%arg0: i32) -> (i32, i32) {
    %c0_i32 = arith.constant 0 : i32
    %c0_i32_0 = arith.constant 0 : i32
    return %arg0, %c0_i32 : i32, i32
  }
  func.func @transform_1(%arg0: i32) -> (i32, i32) {
    %c0_i32 = arith.constant 0 : i32
    %c0_i32_0 = arith.constant 0 : i32
    %c0_i32_1 = arith.constant 0 : i32
    return %c0_i32, %c0_i32_0 : i32, i32
  }
  func.func @transform_2(%arg0: i32) -> (i32, i32) {
    %c0_i32 = arith.constant 0 : i32
    %c0_i32_0 = arith.constant 0 : i32
    %c0_i32_1 = arith.constant 0 : i32
    return %c0_i32, %c0_i32_0 : i32, i32
  }
  func.func @transform_3(%arg0: i32) -> (i32, i32) {
    %c0_i32 = arith.constant 0 : i32
    %c0_i32_0 = arith.constant 0 : i32
    return %arg0, %c0_i32 : i32, i32
  }
}

module attributes {stable_mosaic.version = 11 : i64} {
  func.func @_max_reduce_kernel(%arg0: i32, %arg1: memref<9x232x64xf32, #tpu.memory_space<vmem>>, %arg2: memref<232x64xf32, #tpu.memory_space<vmem>>) attributes {dimension_semantics = [#tpu.dimension_semantics<parallel>], iteration_bounds = array<i64: 2>, scalar_prefetch = 0 : i64, scratch_operands = 0 : i64, tpu.core_type = #tpu.core_type<tc>, window_params = [{transform_indices = @transform_0, window_bounds = array<i64: 9, 232, 64>}, {transform_indices = @transform_1, window_bounds = array<i64: 232, 64>}]} {
    %c0 = arith.constant 0 : index
    %c0_0 = arith.constant 0 : index
    %c0_1 = arith.constant 0 : index
    %0 = vector.load %arg1[%c0, %c0_0, %c0_1] : memref<9x232x64xf32, #tpu.memory_space<vmem>>, vector<9x232x64xf32>
    %cst = arith.constant dense<0xFF800000> : vector<232x64xf32>
    %1 = vector.multi_reduction <maximumf>, %0, %cst [0] : vector<9x232x64xf32> to vector<232x64xf32>
    %c0_2 = arith.constant 0 : index
    %c0_3 = arith.constant 0 : index
    %2 = vector.load %arg2[%c0_2, %c0_3] : memref<232x64xf32, #tpu.memory_space<vmem>>, vector<232x64xf32>
    tpu.vector_store %arg2[%c0_2, %c0_3], %1 {strides = array<i32>} : memref<232x64xf32, #tpu.memory_space<vmem>>, vector<232x64xf32>,
    return
  }
  func.func @transform_0(%arg0: i32) -> (i32, i32, i32) {
    %c0_i32 = arith.constant 0 : i32
    %c0_i32_0 = arith.constant 0 : i32
    %c0_i32_1 = arith.constant 0 : i32
    return %c0_i32, %arg0, %c0_i32_0 : i32, i32, i32
  }
  func.func @transform_1(%arg0: i32) -> (i32, i32) {
    %c0_i32 = arith.constant 0 : i32
    %c0_i32_0 = arith.constant 0 : i32
    return %arg0, %c0_i32 : i32, i32
  }
}

module attributes {stable_mosaic.version = 11 : i64} {
  func.func @_mm_bias_relu_kernel(%arg0: i32, %arg1: memref<232x64xbf16, #tpu.memory_space<vmem>>, %arg2: memref<64x16xbf16, #tpu.memory_space<vmem>>, %arg3: memref<1x16xf32, #tpu.memory_space<vmem>>, %arg4: memref<232x16xf32, #tpu.memory_space<vmem>>) attributes {dimension_semantics = [#tpu.dimension_semantics<parallel>], iteration_bounds = array<i64: 2>, scalar_prefetch = 0 : i64, scratch_operands = 0 : i64, tpu.core_type = #tpu.core_type<tc>, window_params = [{transform_indices = @transform_0, window_bounds = array<i64: 232, 64>}, {pipeline_mode = #tpu.pipeline_mode<synchronous>, transform_indices = @transform_1, window_bounds = array<i64: 64, 16>}, {pipeline_mode = #tpu.pipeline_mode<synchronous>, transform_indices = @transform_2, window_bounds = array<i64: 1, 16>}, {transform_indices = @transform_3, window_bounds = array<i64: 232, 16>}]} {
    %c0 = arith.constant 0 : index
    %c0_0 = arith.constant 0 : index
    %0 = vector.load %arg1[%c0, %c0_0] : memref<232x64xbf16, #tpu.memory_space<vmem>>, vector<232x64xbf16>
    %c0_1 = arith.constant 0 : index
    %c0_2 = arith.constant 0 : index
    %1 = vector.load %arg2[%c0_1, %c0_2] : memref<64x16xbf16, #tpu.memory_space<vmem>>, vector<64x16xbf16>
    %cst = arith.constant dense<0.000000e+00> : vector<232x16xf32>
    %2 = tpu.matmul %0, %1, %cst {dimension_numbers = #tpu.dot_dimension_numbers<[1], [0], [0], [1], [0, 0, 1, 1], [], []>} : vector<232x64xbf16>, vector<64x16xbf16>, vector<232x16xf32> -> vector<232x16xf32>
    %c0_3 = arith.constant 0 : index
    %c0_4 = arith.constant 0 : index
    %3 = vector.load %arg3[%c0_3, %c0_4] : memref<1x16xf32, #tpu.memory_space<vmem>>, vector<1x16xf32>
    %4 = vector.broadcast %3 : vector<1x16xf32> to vector<232x16xf32>
    %5 = arith.addf %2, %4 : vector<232x16xf32>
    %cst_5 = arith.constant 0.000000e+00 : f32
    %6 = vector.broadcast %cst_5 : f32 to vector<232x16xf32>
    %7 = arith.maximumf %5, %6 : vector<232x16xf32>
    %c0_6 = arith.constant 0 : index
    %c0_7 = arith.constant 0 : index
    %8 = vector.load %arg4[%c0_6, %c0_7] : memref<232x16xf32, #tpu.memory_space<vmem>>, vector<232x16xf32>
    tpu.vector_store %arg4[%c0_6, %c0_7], %7 {strides = array<i32>} : memref<232x16xf32, #tpu.memory_space<vmem>>, vector<232x16xf32>,
    return
  }
  func.func @transform_0(%arg0: i32) -> (i32, i32) {
    %c0_i32 = arith.constant 0 : i32
    %c0_i32_0 = arith.constant 0 : i32
    return %arg0, %c0_i32 : i32, i32
  }
  func.func @transform_1(%arg0: i32) -> (i32, i32) {
    %c0_i32 = arith.constant 0 : i32
    %c0_i32_0 = arith.constant 0 : i32
    %c0_i32_1 = arith.constant 0 : i32
    return %c0_i32, %c0_i32_0 : i32, i32
  }
  func.func @transform_2(%arg0: i32) -> (i32, i32) {
    %c0_i32 = arith.constant 0 : i32
    %c0_i32_0 = arith.constant 0 : i32
    %c0_i32_1 = arith.constant 0 : i32
    return %c0_i32, %c0_i32_0 : i32, i32
  }
  func.func @transform_3(%arg0: i32) -> (i32, i32) {
    %c0_i32 = arith.constant 0 : i32
    %c0_i32_0 = arith.constant 0 : i32
    return %arg0, %c0_i32 : i32, i32
  }
}

module attributes {stable_mosaic.version = 11 : i64} {
  func.func @_mm_bias_relu_kernel(%arg0: i32, %arg1: memref<232x128xbf16, #tpu.memory_space<vmem>>, %arg2: memref<128x16xbf16, #tpu.memory_space<vmem>>, %arg3: memref<1x16xf32, #tpu.memory_space<vmem>>, %arg4: memref<232x16xf32, #tpu.memory_space<vmem>>) attributes {dimension_semantics = [#tpu.dimension_semantics<parallel>], iteration_bounds = array<i64: 2>, scalar_prefetch = 0 : i64, scratch_operands = 0 : i64, tpu.core_type = #tpu.core_type<tc>, window_params = [{transform_indices = @transform_0, window_bounds = array<i64: 232, 128>}, {pipeline_mode = #tpu.pipeline_mode<synchronous>, transform_indices = @transform_1, window_bounds = array<i64: 128, 16>}, {pipeline_mode = #tpu.pipeline_mode<synchronous>, transform_indices = @transform_2, window_bounds = array<i64: 1, 16>}, {transform_indices = @transform_3, window_bounds = array<i64: 232, 16>}]} {
    %c0 = arith.constant 0 : index
    %c0_0 = arith.constant 0 : index
    %0 = vector.load %arg1[%c0, %c0_0] : memref<232x128xbf16, #tpu.memory_space<vmem>>, vector<232x128xbf16>
    %c0_1 = arith.constant 0 : index
    %c0_2 = arith.constant 0 : index
    %1 = vector.load %arg2[%c0_1, %c0_2] : memref<128x16xbf16, #tpu.memory_space<vmem>>, vector<128x16xbf16>
    %cst = arith.constant dense<0.000000e+00> : vector<232x16xf32>
    %2 = tpu.matmul %0, %1, %cst {dimension_numbers = #tpu.dot_dimension_numbers<[1], [0], [0], [1], [0, 0, 1, 1], [], []>} : vector<232x128xbf16>, vector<128x16xbf16>, vector<232x16xf32> -> vector<232x16xf32>
    %c0_3 = arith.constant 0 : index
    %c0_4 = arith.constant 0 : index
    %3 = vector.load %arg3[%c0_3, %c0_4] : memref<1x16xf32, #tpu.memory_space<vmem>>, vector<1x16xf32>
    %4 = vector.broadcast %3 : vector<1x16xf32> to vector<232x16xf32>
    %5 = arith.addf %2, %4 : vector<232x16xf32>
    %cst_5 = arith.constant 0.000000e+00 : f32
    %6 = vector.broadcast %cst_5 : f32 to vector<232x16xf32>
    %7 = arith.maximumf %5, %6 : vector<232x16xf32>
    %c0_6 = arith.constant 0 : index
    %c0_7 = arith.constant 0 : index
    %8 = vector.load %arg4[%c0_6, %c0_7] : memref<232x16xf32, #tpu.memory_space<vmem>>, vector<232x16xf32>
    tpu.vector_store %arg4[%c0_6, %c0_7], %7 {strides = array<i32>} : memref<232x16xf32, #tpu.memory_space<vmem>>, vector<232x16xf32>,
    return
  }
  func.func @transform_0(%arg0: i32) -> (i32, i32) {
    %c0_i32 = arith.constant 0 : i32
    %c0_i32_0 = arith.constant 0 : i32
    return %arg0, %c0_i32 : i32, i32
  }
  func.func @transform_1(%arg0: i32) -> (i32, i32) {
    %c0_i32 = arith.constant 0 : i32
    %c0_i32_0 = arith.constant 0 : i32
    %c0_i32_1 = arith.constant 0 : i32
    return %c0_i32, %c0_i32_0 : i32, i32
  }
  func.func @transform_2(%arg0: i32) -> (i32, i32) {
    %c0_i32 = arith.constant 0 : i32
    %c0_i32_0 = arith.constant 0 : i32
    %c0_i32_1 = arith.constant 0 : i32
    return %c0_i32, %c0_i32_0 : i32, i32
  }
  func.func @transform_3(%arg0: i32) -> (i32, i32) {
    %c0_i32 = arith.constant 0 : i32
    %c0_i32_0 = arith.constant 0 : i32
    return %arg0, %c0_i32 : i32, i32
  }
}

module attributes {stable_mosaic.version = 11 : i64} {
  func.func @_mm_bias_relu_kernel(%arg0: i32, %arg1: memref<232x144xbf16, #tpu.memory_space<vmem>>, %arg2: memref<144x128xbf16, #tpu.memory_space<vmem>>, %arg3: memref<1x128xf32, #tpu.memory_space<vmem>>, %arg4: memref<232x128xf32, #tpu.memory_space<vmem>>) attributes {dimension_semantics = [#tpu.dimension_semantics<parallel>], iteration_bounds = array<i64: 2>, scalar_prefetch = 0 : i64, scratch_operands = 0 : i64, tpu.core_type = #tpu.core_type<tc>, window_params = [{transform_indices = @transform_0, window_bounds = array<i64: 232, 144>}, {pipeline_mode = #tpu.pipeline_mode<synchronous>, transform_indices = @transform_1, window_bounds = array<i64: 144, 128>}, {pipeline_mode = #tpu.pipeline_mode<synchronous>, transform_indices = @transform_2, window_bounds = array<i64: 1, 128>}, {transform_indices = @transform_3, window_bounds = array<i64: 232, 128>}]} {
    %c0 = arith.constant 0 : index
    %c0_0 = arith.constant 0 : index
    %0 = vector.load %arg1[%c0, %c0_0] : memref<232x144xbf16, #tpu.memory_space<vmem>>, vector<232x144xbf16>
    %c0_1 = arith.constant 0 : index
    %c0_2 = arith.constant 0 : index
    %1 = vector.load %arg2[%c0_1, %c0_2] : memref<144x128xbf16, #tpu.memory_space<vmem>>, vector<144x128xbf16>
    %cst = arith.constant dense<0.000000e+00> : vector<232x128xf32>
    %2 = tpu.matmul %0, %1, %cst {dimension_numbers = #tpu.dot_dimension_numbers<[1], [0], [0], [1], [0, 0, 1, 1], [], []>} : vector<232x144xbf16>, vector<144x128xbf16>, vector<232x128xf32> -> vector<232x128xf32>
    %c0_3 = arith.constant 0 : index
    %c0_4 = arith.constant 0 : index
    %3 = vector.load %arg3[%c0_3, %c0_4] : memref<1x128xf32, #tpu.memory_space<vmem>>, vector<1x128xf32>
    %4 = vector.broadcast %3 : vector<1x128xf32> to vector<232x128xf32>
    %5 = arith.addf %2, %4 : vector<232x128xf32>
    %cst_5 = arith.constant 0.000000e+00 : f32
    %6 = vector.broadcast %cst_5 : f32 to vector<232x128xf32>
    %7 = arith.maximumf %5, %6 : vector<232x128xf32>
    %c0_6 = arith.constant 0 : index
    %c0_7 = arith.constant 0 : index
    %8 = vector.load %arg4[%c0_6, %c0_7] : memref<232x128xf32, #tpu.memory_space<vmem>>, vector<232x128xf32>
    tpu.vector_store %arg4[%c0_6, %c0_7], %7 {strides = array<i32>} : memref<232x128xf32, #tpu.memory_space<vmem>>, vector<232x128xf32>,
    return
  }
  func.func @transform_0(%arg0: i32) -> (i32, i32) {
    %c0_i32 = arith.constant 0 : i32
    %c0_i32_0 = arith.constant 0 : i32
    return %arg0, %c0_i32 : i32, i32
  }
  func.func @transform_1(%arg0: i32) -> (i32, i32) {
    %c0_i32 = arith.constant 0 : i32
    %c0_i32_0 = arith.constant 0 : i32
    %c0_i32_1 = arith.constant 0 : i32
    return %c0_i32, %c0_i32_0 : i32, i32
  }
  func.func @transform_2(%arg0: i32) -> (i32, i32) {
    %c0_i32 = arith.constant 0 : i32
    %c0_i32_0 = arith.constant 0 : i32
    %c0_i32_1 = arith.constant 0 : i32
    return %c0_i32, %c0_i32_0 : i32, i32
  }
  func.func @transform_3(%arg0: i32) -> (i32, i32) {
    %c0_i32 = arith.constant 0 : i32
    %c0_i32_0 = arith.constant 0 : i32
    return %arg0, %c0_i32 : i32, i32
  }
}

module attributes {stable_mosaic.version = 11 : i64} {
  func.func @_mm_bias_relu_kernel(%arg0: i32, %arg1: memref<56x128xbf16, #tpu.memory_space<vmem>>, %arg2: memref<128x32xbf16, #tpu.memory_space<vmem>>, %arg3: memref<1x32xf32, #tpu.memory_space<vmem>>, %arg4: memref<56x32xf32, #tpu.memory_space<vmem>>) attributes {dimension_semantics = [#tpu.dimension_semantics<parallel>], iteration_bounds = array<i64: 2>, scalar_prefetch = 0 : i64, scratch_operands = 0 : i64, tpu.core_type = #tpu.core_type<tc>, window_params = [{transform_indices = @transform_0, window_bounds = array<i64: 56, 128>}, {pipeline_mode = #tpu.pipeline_mode<synchronous>, transform_indices = @transform_1, window_bounds = array<i64: 128, 32>}, {pipeline_mode = #tpu.pipeline_mode<synchronous>, transform_indices = @transform_2, window_bounds = array<i64: 1, 32>}, {transform_indices = @transform_3, window_bounds = array<i64: 56, 32>}]} {
    %c0 = arith.constant 0 : index
    %c0_0 = arith.constant 0 : index
    %0 = vector.load %arg1[%c0, %c0_0] : memref<56x128xbf16, #tpu.memory_space<vmem>>, vector<56x128xbf16>
    %c0_1 = arith.constant 0 : index
    %c0_2 = arith.constant 0 : index
    %1 = vector.load %arg2[%c0_1, %c0_2] : memref<128x32xbf16, #tpu.memory_space<vmem>>, vector<128x32xbf16>
    %cst = arith.constant dense<0.000000e+00> : vector<56x32xf32>
    %2 = tpu.matmul %0, %1, %cst {dimension_numbers = #tpu.dot_dimension_numbers<[1], [0], [0], [1], [0, 0, 1, 1], [], []>} : vector<56x128xbf16>, vector<128x32xbf16>, vector<56x32xf32> -> vector<56x32xf32>
    %c0_3 = arith.constant 0 : index
    %c0_4 = arith.constant 0 : index
    %3 = vector.load %arg3[%c0_3, %c0_4] : memref<1x32xf32, #tpu.memory_space<vmem>>, vector<1x32xf32>
    %4 = vector.broadcast %3 : vector<1x32xf32> to vector<56x32xf32>
    %5 = arith.addf %2, %4 : vector<56x32xf32>
    %cst_5 = arith.constant 0.000000e+00 : f32
    %6 = vector.broadcast %cst_5 : f32 to vector<56x32xf32>
    %7 = arith.maximumf %5, %6 : vector<56x32xf32>
    %c0_6 = arith.constant 0 : index
    %c0_7 = arith.constant 0 : index
    %8 = vector.load %arg4[%c0_6, %c0_7] : memref<56x32xf32, #tpu.memory_space<vmem>>, vector<56x32xf32>
    tpu.vector_store %arg4[%c0_6, %c0_7], %7 {strides = array<i32>} : memref<56x32xf32, #tpu.memory_space<vmem>>, vector<56x32xf32>,
    return
  }
  func.func @transform_0(%arg0: i32) -> (i32, i32) {
    %c0_i32 = arith.constant 0 : i32
    %c0_i32_0 = arith.constant 0 : i32
    return %arg0, %c0_i32 : i32, i32
  }
  func.func @transform_1(%arg0: i32) -> (i32, i32) {
    %c0_i32 = arith.constant 0 : i32
    %c0_i32_0 = arith.constant 0 : i32
    %c0_i32_1 = arith.constant 0 : i32
    return %c0_i32, %c0_i32_0 : i32, i32
  }
  func.func @transform_2(%arg0: i32) -> (i32, i32) {
    %c0_i32 = arith.constant 0 : i32
    %c0_i32_0 = arith.constant 0 : i32
    %c0_i32_1 = arith.constant 0 : i32
    return %c0_i32, %c0_i32_0 : i32, i32
  }
  func.func @transform_3(%arg0: i32) -> (i32, i32) {
    %c0_i32 = arith.constant 0 : i32
    %c0_i32_0 = arith.constant 0 : i32
    return %arg0, %c0_i32 : i32, i32
  }
}

module attributes {stable_mosaic.version = 11 : i64} {
  func.func @_max_reduce_kernel(%arg0: i32, %arg1: memref<9x56x128xf32, #tpu.memory_space<vmem>>, %arg2: memref<56x128xf32, #tpu.memory_space<vmem>>) attributes {dimension_semantics = [#tpu.dimension_semantics<parallel>], iteration_bounds = array<i64: 2>, scalar_prefetch = 0 : i64, scratch_operands = 0 : i64, tpu.core_type = #tpu.core_type<tc>, window_params = [{transform_indices = @transform_0, window_bounds = array<i64: 9, 56, 128>}, {transform_indices = @transform_1, window_bounds = array<i64: 56, 128>}]} {
    %c0 = arith.constant 0 : index
    %c0_0 = arith.constant 0 : index
    %c0_1 = arith.constant 0 : index
    %0 = vector.load %arg1[%c0, %c0_0, %c0_1] : memref<9x56x128xf32, #tpu.memory_space<vmem>>, vector<9x56x128xf32>
    %cst = arith.constant dense<0xFF800000> : vector<56x128xf32>
    %1 = vector.multi_reduction <maximumf>, %0, %cst [0] : vector<9x56x128xf32> to vector<56x128xf32>
    %c0_2 = arith.constant 0 : index
    %c0_3 = arith.constant 0 : index
    %2 = vector.load %arg2[%c0_2, %c0_3] : memref<56x128xf32, #tpu.memory_space<vmem>>, vector<56x128xf32>
    tpu.vector_store %arg2[%c0_2, %c0_3], %1 {strides = array<i32>} : memref<56x128xf32, #tpu.memory_space<vmem>>, vector<56x128xf32>,
    return
  }
  func.func @transform_0(%arg0: i32) -> (i32, i32, i32) {
    %c0_i32 = arith.constant 0 : i32
    %c0_i32_0 = arith.constant 0 : i32
    %c0_i32_1 = arith.constant 0 : i32
    return %c0_i32, %arg0, %c0_i32_0 : i32, i32, i32
  }
  func.func @transform_1(%arg0: i32) -> (i32, i32) {
    %c0_i32 = arith.constant 0 : i32
    %c0_i32_0 = arith.constant 0 : i32
    return %arg0, %c0_i32 : i32, i32
  }
}

module attributes {stable_mosaic.version = 11 : i64} {
  func.func @_mm_bias_relu_kernel(%arg0: i32, %arg1: memref<56x288xbf16, #tpu.memory_space<vmem>>, %arg2: memref<288x256xbf16, #tpu.memory_space<vmem>>, %arg3: memref<1x256xf32, #tpu.memory_space<vmem>>, %arg4: memref<56x256xf32, #tpu.memory_space<vmem>>) attributes {dimension_semantics = [#tpu.dimension_semantics<parallel>], iteration_bounds = array<i64: 2>, scalar_prefetch = 0 : i64, scratch_operands = 0 : i64, tpu.core_type = #tpu.core_type<tc>, window_params = [{transform_indices = @transform_0, window_bounds = array<i64: 56, 288>}, {pipeline_mode = #tpu.pipeline_mode<synchronous>, transform_indices = @transform_1, window_bounds = array<i64: 288, 256>}, {pipeline_mode = #tpu.pipeline_mode<synchronous>, transform_indices = @transform_2, window_bounds = array<i64: 1, 256>}, {transform_indices = @transform_3, window_bounds = array<i64: 56, 256>}]} {
    %c0 = arith.constant 0 : index
    %c0_0 = arith.constant 0 : index
    %0 = vector.load %arg1[%c0, %c0_0] : memref<56x288xbf16, #tpu.memory_space<vmem>>, vector<56x288xbf16>
    %c0_1 = arith.constant 0 : index
    %c0_2 = arith.constant 0 : index
    %1 = vector.load %arg2[%c0_1, %c0_2] : memref<288x256xbf16, #tpu.memory_space<vmem>>, vector<288x256xbf16>
    %cst = arith.constant dense<0.000000e+00> : vector<56x256xf32>
    %2 = tpu.matmul %0, %1, %cst {dimension_numbers = #tpu.dot_dimension_numbers<[1], [0], [0], [1], [0, 0, 1, 1], [], []>} : vector<56x288xbf16>, vector<288x256xbf16>, vector<56x256xf32> -> vector<56x256xf32>
    %c0_3 = arith.constant 0 : index
    %c0_4 = arith.constant 0 : index
    %3 = vector.load %arg3[%c0_3, %c0_4] : memref<1x256xf32, #tpu.memory_space<vmem>>, vector<1x256xf32>
    %4 = vector.broadcast %3 : vector<1x256xf32> to vector<56x256xf32>
    %5 = arith.addf %2, %4 : vector<56x256xf32>
    %cst_5 = arith.constant 0.000000e+00 : f32
    %6 = vector.broadcast %cst_5 : f32 to vector<56x256xf32>
    %7 = arith.maximumf %5, %6 : vector<56x256xf32>
    %c0_6 = arith.constant 0 : index
    %c0_7 = arith.constant 0 : index
    %8 = vector.load %arg4[%c0_6, %c0_7] : memref<56x256xf32, #tpu.memory_space<vmem>>, vector<56x256xf32>
    tpu.vector_store %arg4[%c0_6, %c0_7], %7 {strides = array<i32>} : memref<56x256xf32, #tpu.memory_space<vmem>>, vector<56x256xf32>,
    return
  }
  func.func @transform_0(%arg0: i32) -> (i32, i32) {
    %c0_i32 = arith.constant 0 : i32
    %c0_i32_0 = arith.constant 0 : i32
    return %arg0, %c0_i32 : i32, i32
  }
  func.func @transform_1(%arg0: i32) -> (i32, i32) {
    %c0_i32 = arith.constant 0 : i32
    %c0_i32_0 = arith.constant 0 : i32
    %c0_i32_1 = arith.constant 0 : i32
    return %c0_i32, %c0_i32_0 : i32, i32
  }
  func.func @transform_2(%arg0: i32) -> (i32, i32) {
    %c0_i32 = arith.constant 0 : i32
    %c0_i32_0 = arith.constant 0 : i32
    %c0_i32_1 = arith.constant 0 : i32
    return %c0_i32, %c0_i32_0 : i32, i32
  }
  func.func @transform_3(%arg0: i32) -> (i32, i32) {
    %c0_i32 = arith.constant 0 : i32
    %c0_i32_0 = arith.constant 0 : i32
    return %arg0, %c0_i32 : i32, i32
  }
}

module attributes {stable_mosaic.version = 11 : i64} {
  func.func @_mm_bias_relu_kernel(%arg0: i32, %arg1: memref<56x256xbf16, #tpu.memory_space<vmem>>, %arg2: memref<256x32xbf16, #tpu.memory_space<vmem>>, %arg3: memref<1x32xf32, #tpu.memory_space<vmem>>, %arg4: memref<56x32xf32, #tpu.memory_space<vmem>>) attributes {dimension_semantics = [#tpu.dimension_semantics<parallel>], iteration_bounds = array<i64: 2>, scalar_prefetch = 0 : i64, scratch_operands = 0 : i64, tpu.core_type = #tpu.core_type<tc>, window_params = [{transform_indices = @transform_0, window_bounds = array<i64: 56, 256>}, {pipeline_mode = #tpu.pipeline_mode<synchronous>, transform_indices = @transform_1, window_bounds = array<i64: 256, 32>}, {pipeline_mode = #tpu.pipeline_mode<synchronous>, transform_indices = @transform_2, window_bounds = array<i64: 1, 32>}, {transform_indices = @transform_3, window_bounds = array<i64: 56, 32>}]} {
    %c0 = arith.constant 0 : index
    %c0_0 = arith.constant 0 : index
    %0 = vector.load %arg1[%c0, %c0_0] : memref<56x256xbf16, #tpu.memory_space<vmem>>, vector<56x256xbf16>
    %c0_1 = arith.constant 0 : index
    %c0_2 = arith.constant 0 : index
    %1 = vector.load %arg2[%c0_1, %c0_2] : memref<256x32xbf16, #tpu.memory_space<vmem>>, vector<256x32xbf16>
    %cst = arith.constant dense<0.000000e+00> : vector<56x32xf32>
    %2 = tpu.matmul %0, %1, %cst {dimension_numbers = #tpu.dot_dimension_numbers<[1], [0], [0], [1], [0, 0, 1, 1], [], []>} : vector<56x256xbf16>, vector<256x32xbf16>, vector<56x32xf32> -> vector<56x32xf32>
    %c0_3 = arith.constant 0 : index
    %c0_4 = arith.constant 0 : index
    %3 = vector.load %arg3[%c0_3, %c0_4] : memref<1x32xf32, #tpu.memory_space<vmem>>, vector<1x32xf32>
    %4 = vector.broadcast %3 : vector<1x32xf32> to vector<56x32xf32>
    %5 = arith.addf %2, %4 : vector<56x32xf32>
    %cst_5 = arith.constant 0.000000e+00 : f32
    %6 = vector.broadcast %cst_5 : f32 to vector<56x32xf32>
    %7 = arith.maximumf %5, %6 : vector<56x32xf32>
    %c0_6 = arith.constant 0 : index
    %c0_7 = arith.constant 0 : index
    %8 = vector.load %arg4[%c0_6, %c0_7] : memref<56x32xf32, #tpu.memory_space<vmem>>, vector<56x32xf32>
    tpu.vector_store %arg4[%c0_6, %c0_7], %7 {strides = array<i32>} : memref<56x32xf32, #tpu.memory_space<vmem>>, vector<56x32xf32>,
    return
  }
  func.func @transform_0(%arg0: i32) -> (i32, i32) {
    %c0_i32 = arith.constant 0 : i32
    %c0_i32_0 = arith.constant 0 : i32
    return %arg0, %c0_i32 : i32, i32
  }
  func.func @transform_1(%arg0: i32) -> (i32, i32) {
    %c0_i32 = arith.constant 0 : i32
    %c0_i32_0 = arith.constant 0 : i32
    %c0_i32_1 = arith.constant 0 : i32
    return %c0_i32, %c0_i32_0 : i32, i32
  }
  func.func @transform_2(%arg0: i32) -> (i32, i32) {
    %c0_i32 = arith.constant 0 : i32
    %c0_i32_0 = arith.constant 0 : i32
    %c0_i32_1 = arith.constant 0 : i32
    return %c0_i32, %c0_i32_0 : i32, i32
  }
  func.func @transform_3(%arg0: i32) -> (i32, i32) {
    %c0_i32 = arith.constant 0 : i32
    %c0_i32_0 = arith.constant 0 : i32
    return %arg0, %c0_i32 : i32, i32
  }
}

module attributes {stable_mosaic.version = 11 : i64} {
  func.func @_max_reduce_kernel(%arg0: i32, %arg1: memref<9x16x256xf32, #tpu.memory_space<vmem>>, %arg2: memref<16x256xf32, #tpu.memory_space<vmem>>) attributes {dimension_semantics = [#tpu.dimension_semantics<parallel>], iteration_bounds = array<i64: 2>, scalar_prefetch = 0 : i64, scratch_operands = 0 : i64, tpu.core_type = #tpu.core_type<tc>, window_params = [{transform_indices = @transform_0, window_bounds = array<i64: 9, 16, 256>}, {transform_indices = @transform_1, window_bounds = array<i64: 16, 256>}]} {
    %c0 = arith.constant 0 : index
    %c0_0 = arith.constant 0 : index
    %c0_1 = arith.constant 0 : index
    %0 = vector.load %arg1[%c0, %c0_0, %c0_1] : memref<9x16x256xf32, #tpu.memory_space<vmem>>, vector<9x16x256xf32>
    %cst = arith.constant dense<0xFF800000> : vector<16x256xf32>
    %1 = vector.multi_reduction <maximumf>, %0, %cst [0] : vector<9x16x256xf32> to vector<16x256xf32>
    %c0_2 = arith.constant 0 : index
    %c0_3 = arith.constant 0 : index
    %2 = vector.load %arg2[%c0_2, %c0_3] : memref<16x256xf32, #tpu.memory_space<vmem>>, vector<16x256xf32>
    tpu.vector_store %arg2[%c0_2, %c0_3], %1 {strides = array<i32>} : memref<16x256xf32, #tpu.memory_space<vmem>>, vector<16x256xf32>,
    return
  }
  func.func @transform_0(%arg0: i32) -> (i32, i32, i32) {
    %c0_i32 = arith.constant 0 : i32
    %c0_i32_0 = arith.constant 0 : i32
    %c0_i32_1 = arith.constant 0 : i32
    return %c0_i32, %arg0, %c0_i32_0 : i32, i32, i32
  }
  func.func @transform_1(%arg0: i32) -> (i32, i32) {
    %c0_i32 = arith.constant 0 : i32
    %c0_i32_0 = arith.constant 0 : i32
    return %arg0, %c0_i32 : i32, i32
  }
}

module attributes {stable_mosaic.version = 11 : i64} {
  func.func @_mm_bias_relu_kernel(%arg0: i32, %arg1: memref<16x256xbf16, #tpu.memory_space<vmem>>, %arg2: memref<256x48xbf16, #tpu.memory_space<vmem>>, %arg3: memref<1x48xf32, #tpu.memory_space<vmem>>, %arg4: memref<16x48xf32, #tpu.memory_space<vmem>>) attributes {dimension_semantics = [#tpu.dimension_semantics<parallel>], iteration_bounds = array<i64: 2>, scalar_prefetch = 0 : i64, scratch_operands = 0 : i64, tpu.core_type = #tpu.core_type<tc>, window_params = [{transform_indices = @transform_0, window_bounds = array<i64: 16, 256>}, {pipeline_mode = #tpu.pipeline_mode<synchronous>, transform_indices = @transform_1, window_bounds = array<i64: 256, 48>}, {pipeline_mode = #tpu.pipeline_mode<synchronous>, transform_indices = @transform_2, window_bounds = array<i64: 1, 48>}, {transform_indices = @transform_3, window_bounds = array<i64: 16, 48>}]} {
    %c0 = arith.constant 0 : index
    %c0_0 = arith.constant 0 : index
    %0 = vector.load %arg1[%c0, %c0_0] : memref<16x256xbf16, #tpu.memory_space<vmem>>, vector<16x256xbf16>
    %c0_1 = arith.constant 0 : index
    %c0_2 = arith.constant 0 : index
    %1 = vector.load %arg2[%c0_1, %c0_2] : memref<256x48xbf16, #tpu.memory_space<vmem>>, vector<256x48xbf16>
    %cst = arith.constant dense<0.000000e+00> : vector<16x48xf32>
    %2 = tpu.matmul %0, %1, %cst {dimension_numbers = #tpu.dot_dimension_numbers<[1], [0], [0], [1], [0, 0, 1, 1], [], []>} : vector<16x256xbf16>, vector<256x48xbf16>, vector<16x48xf32> -> vector<16x48xf32>
    %c0_3 = arith.constant 0 : index
    %c0_4 = arith.constant 0 : index
    %3 = vector.load %arg3[%c0_3, %c0_4] : memref<1x48xf32, #tpu.memory_space<vmem>>, vector<1x48xf32>
    %4 = vector.broadcast %3 : vector<1x48xf32> to vector<16x48xf32>
    %5 = arith.addf %2, %4 : vector<16x48xf32>
    %cst_5 = arith.constant 0.000000e+00 : f32
    %6 = vector.broadcast %cst_5 : f32 to vector<16x48xf32>
    %7 = arith.maximumf %5, %6 : vector<16x48xf32>
    %c0_6 = arith.constant 0 : index
    %c0_7 = arith.constant 0 : index
    %8 = vector.load %arg4[%c0_6, %c0_7] : memref<16x48xf32, #tpu.memory_space<vmem>>, vector<16x48xf32>
    tpu.vector_store %arg4[%c0_6, %c0_7], %7 {strides = array<i32>} : memref<16x48xf32, #tpu.memory_space<vmem>>, vector<16x48xf32>,
    return
  }
  func.func @transform_0(%arg0: i32) -> (i32, i32) {
    %c0_i32 = arith.constant 0 : i32
    %c0_i32_0 = arith.constant 0 : i32
    return %arg0, %c0_i32 : i32, i32
  }
  func.func @transform_1(%arg0: i32) -> (i32, i32) {
    %c0_i32 = arith.constant 0 : i32
    %c0_i32_0 = arith.constant 0 : i32
    %c0_i32_1 = arith.constant 0 : i32
    return %c0_i32, %c0_i32_0 : i32, i32
  }
  func.func @transform_2(%arg0: i32) -> (i32, i32) {
    %c0_i32 = arith.constant 0 : i32
    %c0_i32_0 = arith.constant 0 : i32
    %c0_i32_1 = arith.constant 0 : i32
    return %c0_i32, %c0_i32_0 : i32, i32
  }
  func.func @transform_3(%arg0: i32) -> (i32, i32) {
    %c0_i32 = arith.constant 0 : i32
    %c0_i32_0 = arith.constant 0 : i32
    return %arg0, %c0_i32 : i32, i32
  }
}

module attributes {stable_mosaic.version = 11 : i64} {
  func.func @_mm_bias_relu_kernel(%arg0: i32, %arg1: memref<16x384xbf16, #tpu.memory_space<vmem>>, %arg2: memref<384x48xbf16, #tpu.memory_space<vmem>>, %arg3: memref<1x48xf32, #tpu.memory_space<vmem>>, %arg4: memref<16x48xf32, #tpu.memory_space<vmem>>) attributes {dimension_semantics = [#tpu.dimension_semantics<parallel>], iteration_bounds = array<i64: 2>, scalar_prefetch = 0 : i64, scratch_operands = 0 : i64, tpu.core_type = #tpu.core_type<tc>, window_params = [{transform_indices = @transform_0, window_bounds = array<i64: 16, 384>}, {pipeline_mode = #tpu.pipeline_mode<synchronous>, transform_indices = @transform_1, window_bounds = array<i64: 384, 48>}, {pipeline_mode = #tpu.pipeline_mode<synchronous>, transform_indices = @transform_2, window_bounds = array<i64: 1, 48>}, {transform_indices = @transform_3, window_bounds = array<i64: 16, 48>}]} {
    %c0 = arith.constant 0 : index
    %c0_0 = arith.constant 0 : index
    %0 = vector.load %arg1[%c0, %c0_0] : memref<16x384xbf16, #tpu.memory_space<vmem>>, vector<16x384xbf16>
    %c0_1 = arith.constant 0 : index
    %c0_2 = arith.constant 0 : index
    %1 = vector.load %arg2[%c0_1, %c0_2] : memref<384x48xbf16, #tpu.memory_space<vmem>>, vector<384x48xbf16>
    %cst = arith.constant dense<0.000000e+00> : vector<16x48xf32>
    %2 = tpu.matmul %0, %1, %cst {dimension_numbers = #tpu.dot_dimension_numbers<[1], [0], [0], [1], [0, 0, 1, 1], [], []>} : vector<16x384xbf16>, vector<384x48xbf16>, vector<16x48xf32> -> vector<16x48xf32>
    %c0_3 = arith.constant 0 : index
    %c0_4 = arith.constant 0 : index
    %3 = vector.load %arg3[%c0_3, %c0_4] : memref<1x48xf32, #tpu.memory_space<vmem>>, vector<1x48xf32>
    %4 = vector.broadcast %3 : vector<1x48xf32> to vector<16x48xf32>
    %5 = arith.addf %2, %4 : vector<16x48xf32>
    %cst_5 = arith.constant 0.000000e+00 : f32
    %6 = vector.broadcast %cst_5 : f32 to vector<16x48xf32>
    %7 = arith.maximumf %5, %6 : vector<16x48xf32>
    %c0_6 = arith.constant 0 : index
    %c0_7 = arith.constant 0 : index
    %8 = vector.load %arg4[%c0_6, %c0_7] : memref<16x48xf32, #tpu.memory_space<vmem>>, vector<16x48xf32>
    tpu.vector_store %arg4[%c0_6, %c0_7], %7 {strides = array<i32>} : memref<16x48xf32, #tpu.memory_space<vmem>>, vector<16x48xf32>,
    return
  }
  func.func @transform_0(%arg0: i32) -> (i32, i32) {
    %c0_i32 = arith.constant 0 : i32
    %c0_i32_0 = arith.constant 0 : i32
    return %arg0, %c0_i32 : i32, i32
  }
  func.func @transform_1(%arg0: i32) -> (i32, i32) {
    %c0_i32 = arith.constant 0 : i32
    %c0_i32_0 = arith.constant 0 : i32
    %c0_i32_1 = arith.constant 0 : i32
    return %c0_i32, %c0_i32_0 : i32, i32
  }
  func.func @transform_2(%arg0: i32) -> (i32, i32) {
    %c0_i32 = arith.constant 0 : i32
    %c0_i32_0 = arith.constant 0 : i32
    %c0_i32_1 = arith.constant 0 : i32
    return %c0_i32, %c0_i32_0 : i32, i32
  }
  func.func @transform_3(%arg0: i32) -> (i32, i32) {
    %c0_i32 = arith.constant 0 : i32
    %c0_i32_0 = arith.constant 0 : i32
    return %arg0, %c0_i32 : i32, i32
  }
}

module attributes {stable_mosaic.version = 11 : i64} {
  func.func @_mm_bias_relu_kernel(%arg0: i32, %arg1: memref<16x432xbf16, #tpu.memory_space<vmem>>, %arg2: memref<432x384xbf16, #tpu.memory_space<vmem>>, %arg3: memref<1x384xf32, #tpu.memory_space<vmem>>, %arg4: memref<16x384xf32, #tpu.memory_space<vmem>>) attributes {dimension_semantics = [#tpu.dimension_semantics<parallel>], iteration_bounds = array<i64: 2>, scalar_prefetch = 0 : i64, scratch_operands = 0 : i64, tpu.core_type = #tpu.core_type<tc>, window_params = [{transform_indices = @transform_0, window_bounds = array<i64: 16, 432>}, {pipeline_mode = #tpu.pipeline_mode<synchronous>, transform_indices = @transform_1, window_bounds = array<i64: 432, 384>}, {pipeline_mode = #tpu.pipeline_mode<synchronous>, transform_indices = @transform_2, window_bounds = array<i64: 1, 384>}, {transform_indices = @transform_3, window_bounds = array<i64: 16, 384>}]} {
    %c0 = arith.constant 0 : index
    %c0_0 = arith.constant 0 : index
    %0 = vector.load %arg1[%c0, %c0_0] : memref<16x432xbf16, #tpu.memory_space<vmem>>, vector<16x432xbf16>
    %c0_1 = arith.constant 0 : index
    %c0_2 = arith.constant 0 : index
    %1 = vector.load %arg2[%c0_1, %c0_2] : memref<432x384xbf16, #tpu.memory_space<vmem>>, vector<432x384xbf16>
    %cst = arith.constant dense<0.000000e+00> : vector<16x384xf32>
    %2 = tpu.matmul %0, %1, %cst {dimension_numbers = #tpu.dot_dimension_numbers<[1], [0], [0], [1], [0, 0, 1, 1], [], []>} : vector<16x432xbf16>, vector<432x384xbf16>, vector<16x384xf32> -> vector<16x384xf32>
    %c0_3 = arith.constant 0 : index
    %c0_4 = arith.constant 0 : index
    %3 = vector.load %arg3[%c0_3, %c0_4] : memref<1x384xf32, #tpu.memory_space<vmem>>, vector<1x384xf32>
    %4 = vector.broadcast %3 : vector<1x384xf32> to vector<16x384xf32>
    %5 = arith.addf %2, %4 : vector<16x384xf32>
    %cst_5 = arith.constant 0.000000e+00 : f32
    %6 = vector.broadcast %cst_5 : f32 to vector<16x384xf32>
    %7 = arith.maximumf %5, %6 : vector<16x384xf32>
    %c0_6 = arith.constant 0 : index
    %c0_7 = arith.constant 0 : index
    %8 = vector.load %arg4[%c0_6, %c0_7] : memref<16x384xf32, #tpu.memory_space<vmem>>, vector<16x384xf32>
    tpu.vector_store %arg4[%c0_6, %c0_7], %7 {strides = array<i32>} : memref<16x384xf32, #tpu.memory_space<vmem>>, vector<16x384xf32>,
    return
  }
  func.func @transform_0(%arg0: i32) -> (i32, i32) {
    %c0_i32 = arith.constant 0 : i32
    %c0_i32_0 = arith.constant 0 : i32
    return %arg0, %c0_i32 : i32, i32
  }
  func.func @transform_1(%arg0: i32) -> (i32, i32) {
    %c0_i32 = arith.constant 0 : i32
    %c0_i32_0 = arith.constant 0 : i32
    %c0_i32_1 = arith.constant 0 : i32
    return %c0_i32, %c0_i32_0 : i32, i32
  }
  func.func @transform_2(%arg0: i32) -> (i32, i32) {
    %c0_i32 = arith.constant 0 : i32
    %c0_i32_0 = arith.constant 0 : i32
    %c0_i32_1 = arith.constant 0 : i32
    return %c0_i32, %c0_i32_0 : i32, i32
  }
  func.func @transform_3(%arg0: i32) -> (i32, i32) {
    %c0_i32 = arith.constant 0 : i32
    %c0_i32_0 = arith.constant 0 : i32
    return %arg0, %c0_i32 : i32, i32
  }
}

module attributes {stable_mosaic.version = 11 : i64} {
  func.func @_mm_bias_relu_kernel(%arg0: i32, %arg1: memref<16x384xbf16, #tpu.memory_space<vmem>>, %arg2: memref<384x64xbf16, #tpu.memory_space<vmem>>, %arg3: memref<1x64xf32, #tpu.memory_space<vmem>>, %arg4: memref<16x64xf32, #tpu.memory_space<vmem>>) attributes {dimension_semantics = [#tpu.dimension_semantics<parallel>], iteration_bounds = array<i64: 2>, scalar_prefetch = 0 : i64, scratch_operands = 0 : i64, tpu.core_type = #tpu.core_type<tc>, window_params = [{transform_indices = @transform_0, window_bounds = array<i64: 16, 384>}, {pipeline_mode = #tpu.pipeline_mode<synchronous>, transform_indices = @transform_1, window_bounds = array<i64: 384, 64>}, {pipeline_mode = #tpu.pipeline_mode<synchronous>, transform_indices = @transform_2, window_bounds = array<i64: 1, 64>}, {transform_indices = @transform_3, window_bounds = array<i64: 16, 64>}]} {
    %c0 = arith.constant 0 : index
    %c0_0 = arith.constant 0 : index
    %0 = vector.load %arg1[%c0, %c0_0] : memref<16x384xbf16, #tpu.memory_space<vmem>>, vector<16x384xbf16>
    %c0_1 = arith.constant 0 : index
    %c0_2 = arith.constant 0 : index
    %1 = vector.load %arg2[%c0_1, %c0_2] : memref<384x64xbf16, #tpu.memory_space<vmem>>, vector<384x64xbf16>
    %cst = arith.constant dense<0.000000e+00> : vector<16x64xf32>
    %2 = tpu.matmul %0, %1, %cst {dimension_numbers = #tpu.dot_dimension_numbers<[1], [0], [0], [1], [0, 0, 1, 1], [], []>} : vector<16x384xbf16>, vector<384x64xbf16>, vector<16x64xf32> -> vector<16x64xf32>
    %c0_3 = arith.constant 0 : index
    %c0_4 = arith.constant 0 : index
    %3 = vector.load %arg3[%c0_3, %c0_4] : memref<1x64xf32, #tpu.memory_space<vmem>>, vector<1x64xf32>
    %4 = vector.broadcast %3 : vector<1x64xf32> to vector<16x64xf32>
    %5 = arith.addf %2, %4 : vector<16x64xf32>
    %cst_5 = arith.constant 0.000000e+00 : f32
    %6 = vector.broadcast %cst_5 : f32 to vector<16x64xf32>
    %7 = arith.maximumf %5, %6 : vector<16x64xf32>
    %c0_6 = arith.constant 0 : index
    %c0_7 = arith.constant 0 : index
    %8 = vector.load %arg4[%c0_6, %c0_7] : memref<16x64xf32, #tpu.memory_space<vmem>>, vector<16x64xf32>
    tpu.vector_store %arg4[%c0_6, %c0_7], %7 {strides = array<i32>} : memref<16x64xf32, #tpu.memory_space<vmem>>, vector<16x64xf32>,
    return
  }
  func.func @transform_0(%arg0: i32) -> (i32, i32) {
    %c0_i32 = arith.constant 0 : i32
    %c0_i32_0 = arith.constant 0 : i32
    return %arg0, %c0_i32 : i32, i32
  }
  func.func @transform_1(%arg0: i32) -> (i32, i32) {
    %c0_i32 = arith.constant 0 : i32
    %c0_i32_0 = arith.constant 0 : i32
    %c0_i32_1 = arith.constant 0 : i32
    return %c0_i32, %c0_i32_0 : i32, i32
  }
  func.func @transform_2(%arg0: i32) -> (i32, i32) {
    %c0_i32 = arith.constant 0 : i32
    %c0_i32_0 = arith.constant 0 : i32
    %c0_i32_1 = arith.constant 0 : i32
    return %c0_i32, %c0_i32_0 : i32, i32
  }
  func.func @transform_3(%arg0: i32) -> (i32, i32) {
    %c0_i32 = arith.constant 0 : i32
    %c0_i32_0 = arith.constant 0 : i32
    return %arg0, %c0_i32 : i32, i32
  }
}

module attributes {stable_mosaic.version = 11 : i64} {
  func.func @_mm_bias_relu_kernel(%arg0: i32, %arg1: memref<16x512xbf16, #tpu.memory_space<vmem>>, %arg2: memref<512x64xbf16, #tpu.memory_space<vmem>>, %arg3: memref<1x64xf32, #tpu.memory_space<vmem>>, %arg4: memref<16x64xf32, #tpu.memory_space<vmem>>) attributes {dimension_semantics = [#tpu.dimension_semantics<parallel>], iteration_bounds = array<i64: 2>, scalar_prefetch = 0 : i64, scratch_operands = 0 : i64, tpu.core_type = #tpu.core_type<tc>, window_params = [{transform_indices = @transform_0, window_bounds = array<i64: 16, 512>}, {pipeline_mode = #tpu.pipeline_mode<synchronous>, transform_indices = @transform_1, window_bounds = array<i64: 512, 64>}, {pipeline_mode = #tpu.pipeline_mode<synchronous>, transform_indices = @transform_2, window_bounds = array<i64: 1, 64>}, {transform_indices = @transform_3, window_bounds = array<i64: 16, 64>}]} {
    %c0 = arith.constant 0 : index
    %c0_0 = arith.constant 0 : index
    %0 = vector.load %arg1[%c0, %c0_0] : memref<16x512xbf16, #tpu.memory_space<vmem>>, vector<16x512xbf16>
    %c0_1 = arith.constant 0 : index
    %c0_2 = arith.constant 0 : index
    %1 = vector.load %arg2[%c0_1, %c0_2] : memref<512x64xbf16, #tpu.memory_space<vmem>>, vector<512x64xbf16>
    %cst = arith.constant dense<0.000000e+00> : vector<16x64xf32>
    %2 = tpu.matmul %0, %1, %cst {dimension_numbers = #tpu.dot_dimension_numbers<[1], [0], [0], [1], [0, 0, 1, 1], [], []>} : vector<16x512xbf16>, vector<512x64xbf16>, vector<16x64xf32> -> vector<16x64xf32>
    %c0_3 = arith.constant 0 : index
    %c0_4 = arith.constant 0 : index
    %3 = vector.load %arg3[%c0_3, %c0_4] : memref<1x64xf32, #tpu.memory_space<vmem>>, vector<1x64xf32>
    %4 = vector.broadcast %3 : vector<1x64xf32> to vector<16x64xf32>
    %5 = arith.addf %2, %4 : vector<16x64xf32>
    %cst_5 = arith.constant 0.000000e+00 : f32
    %6 = vector.broadcast %cst_5 : f32 to vector<16x64xf32>
    %7 = arith.maximumf %5, %6 : vector<16x64xf32>
    %c0_6 = arith.constant 0 : index
    %c0_7 = arith.constant 0 : index
    %8 = vector.load %arg4[%c0_6, %c0_7] : memref<16x64xf32, #tpu.memory_space<vmem>>, vector<16x64xf32>
    tpu.vector_store %arg4[%c0_6, %c0_7], %7 {strides = array<i32>} : memref<16x64xf32, #tpu.memory_space<vmem>>, vector<16x64xf32>,
    return
  }
  func.func @transform_0(%arg0: i32) -> (i32, i32) {
    %c0_i32 = arith.constant 0 : i32
    %c0_i32_0 = arith.constant 0 : i32
    return %arg0, %c0_i32 : i32, i32
  }
  func.func @transform_1(%arg0: i32) -> (i32, i32) {
    %c0_i32 = arith.constant 0 : i32
    %c0_i32_0 = arith.constant 0 : i32
    %c0_i32_1 = arith.constant 0 : i32
    return %c0_i32, %c0_i32_0 : i32, i32
  }
  func.func @transform_2(%arg0: i32) -> (i32, i32) {
    %c0_i32 = arith.constant 0 : i32
    %c0_i32_0 = arith.constant 0 : i32
    %c0_i32_1 = arith.constant 0 : i32
    return %c0_i32, %c0_i32_0 : i32, i32
  }
  func.func @transform_3(%arg0: i32) -> (i32, i32) {
    %c0_i32 = arith.constant 0 : i32
    %c0_i32_0 = arith.constant 0 : i32
    return %arg0, %c0_i32 : i32, i32
  }
}

module attributes {stable_mosaic.version = 11 : i64} {
  func.func @_mm_bias_relu_kernel(%arg0: i32, %arg1: memref<16x576xbf16, #tpu.memory_space<vmem>>, %arg2: memref<576x512xbf16, #tpu.memory_space<vmem>>, %arg3: memref<1x512xf32, #tpu.memory_space<vmem>>, %arg4: memref<16x512xf32, #tpu.memory_space<vmem>>) attributes {dimension_semantics = [#tpu.dimension_semantics<parallel>], iteration_bounds = array<i64: 2>, scalar_prefetch = 0 : i64, scratch_operands = 0 : i64, tpu.core_type = #tpu.core_type<tc>, window_params = [{transform_indices = @transform_0, window_bounds = array<i64: 16, 576>}, {pipeline_mode = #tpu.pipeline_mode<synchronous>, transform_indices = @transform_1, window_bounds = array<i64: 576, 512>}, {pipeline_mode = #tpu.pipeline_mode<synchronous>, transform_indices = @transform_2, window_bounds = array<i64: 1, 512>}, {transform_indices = @transform_3, window_bounds = array<i64: 16, 512>}]} {
    %c0 = arith.constant 0 : index
    %c0_0 = arith.constant 0 : index
    %0 = vector.load %arg1[%c0, %c0_0] : memref<16x576xbf16, #tpu.memory_space<vmem>>, vector<16x576xbf16>
    %c0_1 = arith.constant 0 : index
    %c0_2 = arith.constant 0 : index
    %1 = vector.load %arg2[%c0_1, %c0_2] : memref<576x512xbf16, #tpu.memory_space<vmem>>, vector<576x512xbf16>
    %cst = arith.constant dense<0.000000e+00> : vector<16x512xf32>
    %2 = tpu.matmul %0, %1, %cst {dimension_numbers = #tpu.dot_dimension_numbers<[1], [0], [0], [1], [0, 0, 1, 1], [], []>} : vector<16x576xbf16>, vector<576x512xbf16>, vector<16x512xf32> -> vector<16x512xf32>
    %c0_3 = arith.constant 0 : index
    %c0_4 = arith.constant 0 : index
    %3 = vector.load %arg3[%c0_3, %c0_4] : memref<1x512xf32, #tpu.memory_space<vmem>>, vector<1x512xf32>
    %4 = vector.broadcast %3 : vector<1x512xf32> to vector<16x512xf32>
    %5 = arith.addf %2, %4 : vector<16x512xf32>
    %cst_5 = arith.constant 0.000000e+00 : f32
    %6 = vector.broadcast %cst_5 : f32 to vector<16x512xf32>
    %7 = arith.maximumf %5, %6 : vector<16x512xf32>
    %c0_6 = arith.constant 0 : index
    %c0_7 = arith.constant 0 : index
    %8 = vector.load %arg4[%c0_6, %c0_7] : memref<16x512xf32, #tpu.memory_space<vmem>>, vector<16x512xf32>
    tpu.vector_store %arg4[%c0_6, %c0_7], %7 {strides = array<i32>} : memref<16x512xf32, #tpu.memory_space<vmem>>, vector<16x512xf32>,
    return
  }
  func.func @transform_0(%arg0: i32) -> (i32, i32) {
    %c0_i32 = arith.constant 0 : i32
    %c0_i32_0 = arith.constant 0 : i32
    return %arg0, %c0_i32 : i32, i32
  }
  func.func @transform_1(%arg0: i32) -> (i32, i32) {
    %c0_i32 = arith.constant 0 : i32
    %c0_i32_0 = arith.constant 0 : i32
    %c0_i32_1 = arith.constant 0 : i32
    return %c0_i32, %c0_i32_0 : i32, i32
  }
  func.func @transform_2(%arg0: i32) -> (i32, i32) {
    %c0_i32 = arith.constant 0 : i32
    %c0_i32_0 = arith.constant 0 : i32
    %c0_i32_1 = arith.constant 0 : i32
    return %c0_i32, %c0_i32_0 : i32, i32
  }
  func.func @transform_3(%arg0: i32) -> (i32, i32) {
    %c0_i32 = arith.constant 0 : i32
    %c0_i32_0 = arith.constant 0 : i32
    return %arg0, %c0_i32 : i32, i32
  }
}

</mosaic_0001>

<bundles_post_ra>
// kernel: squeezenet_forward.20
= control target key start
LH: loop header
LB: loop body
LE: loop exit
PB: predicated region body
PF: predicated region fallthrough
CT: control target
= control target key end

     0   :  { %s1612_s12 = smov 0   ;;  %s1614_s13 = smov 0   ;;  %s2066_s0 = inlined_call_operand.vmem [shape: bf16[1922,27], index: 0, kind: input, shape index: {}]   ;;  %s2067_s1 = inlined_call_operand.vmem [shape: bf16[27,64], index: 1, kind: input, shape index: {}]   ;;  %s2068_s2 = inlined_call_operand.vmem [shape: f32[1,64], index: 2, kind: input, shape index: {}]   ;;  %s2069_s3 = inlined_call_operand.vmem [shape: f32[1922,64], index: 3, kind: output, shape index: {}]  }
   0x1   :  { %s1616_s14 = smov 0  }
   0x2 LB: > { %s1625_s15 = sadd.s32 4294967295, %s1557_s14   ;;  %s1627_s16 = sadd.s32 1, %s1557_s14   ;;  %s1557_s14 = sphi %s1616_s14, %s2078_s14   ;;  %s1553_s13 = sphi %s1614_s13, %s2077_s13   ;;  %s1549_s12 = sphi %s1612_s12, %s2076_s12  }
   0x3   : > { %s85_s17 = ssub.s32 %s1557_s14, %s1627_s16  ;;  %s88_s18 = sadd.s32 1, %s1553_s13 }
   0x4   : > { %p86_p0 = scmp.eq.s32.totalorder %s85_s17, 0  ;;  %p98_p1 = scmp.ne.s32.totalorder %s1553_s13, %s1549_s12 }
   0x5   : > { %p99_p2 = scmp.eq.s32.totalorder %s1625_s15, 3  ;;  %p1181_p3 = scmp.ge.s32.totalorder %s1557_s14, 1 }
   0x6   : > { %s1635_s19 = scalar_select %p86_p0, %s1553_s13, %s88_s18  }
   0x7   : > { %p1637_p4 = por %p99_p2, %p98_p1  ;;  %p146_p5 = scmp.lt.s32.totalorder %s1557_s14, 5 }
   0x9   : > { %p147_p6 = pnand %p1181_p3, %p146_p5 }
   0xa   : > { %s1648_s25 = sshll.u32 (!%p147_p6), %s1625_s15, 6  ;;  %s170_s6 = sand.u32 (!%p147_p6), 1, %s1549_s12  }
   0xb   : > { %150 = sbr.rel (%p147_p6) target bundleno = 352 (0x160), region = 32  ;;  %p178_p7 = scmp.lt.s32.totalorder (!%p147_p6), %s1648_s25, 240 }
   0xc   : > { %s1182_s9 = sshll.u32 (!%p147_p6), %s170_s6, 9 }
   0xd   : > { %s1732_s10 = scalar_lea.vmem (!%p147_p6), [#allocation2], %s1182_s9  }
  0x10   : > { %v1319_v0 = vld [vmem:[%s2067_s1 + $0x8] sm:$0xf]  ;;  %v1403_v1 = vld [vmem:[%s2067_s1 + $0x8] sm:$0x30]  ;;  %vm533_vm0 = vcmask 1044480   ;;  %vm534_vm1 = vcmask 1045504  }
  0x11   : > { %v1320_v2 = vor.u32 %v1403_v1, %v1319_v0  ;;  %v1591_v3 = vmov 65535   ;;  %s179_s26 = scalar_select %p178_p7, %s1648_s25, 240  ;;  %v1402_v7 = vld [vmem:[%s2067_s1] sm:$0xff]  ;;  %vm436_vm2 = vcmask 220160   ;;  %vm773_vm3 = vcmask 523264  }
  0x12   : > { %v535_v4 = vsel %vm533_vm0, 4294967295, %v1591_v3  ;;  %v1728_v40 = vld [vmem:[%s2068_s2] ss:$0 sm:$0xff]  ;;  %s846_s11 = ssub.s32 (%p1637_p4), 241, %s1648_s25  ;;  %s1404_s12 = sshll.u32 (%p1637_p4), %s1625_s15, 9 }
  0x13   : > { %v536_v5 = vsel %vm534_vm1, %v535_v4, 0  ;;  %s1184_s29 = sshll.u32 %s179_s26, 2  ;;  %p847_p8 = scmp.lt.s32.totalorder (%p1637_p4), %s846_s11, 64 }
  0x14   : > { %v538_v6 = vand.u32 %v1320_v2, %v536_v5  ;;  %s1658_s5 = scalar_lea.vmem %s2066_s0, %s1184_s29  ;;  %s1931_s18 = scalar_lea.vmem (%p1637_p4), %s2069_s3, %s1404_s12  }
  0x15   : > { %v1370_v8 = vld [vmem:[%s1658_s5] sm:$0xff]  ;;  %v1371_v12 = vld [vmem:[%s1658_s5 + $0x8] sm:$0xff]  ;;  %v1372_v16 = vld [vmem:[%s1658_s5 + $0x10] sm:$0xff] }
  0x16   : > { %546 = vmatpush.bf16.msra.mxu0 %v538_v6  ;;  %1407 = vmatpush.bf16.msra.mxu1 %v538_v6  ;;  %v1378_v9 = vld [vmem:[%s1658_s5 + $0x40] sm:$0xff]  ;;  %v1379_v13 = vld [vmem:[%s1658_s5 + $0x48] sm:$0xff]  ;;  %v1380_v17 = vld [vmem:[%s1658_s5 + $0x50] sm:$0xff] }
  0x17   : > { %1408 = vmatpush.bf16.msra.mxu2 %v538_v6  ;;  %1409 = vmatpush.bf16.msra.mxu3 %v538_v6  ;;  %v1386_v10 = vld [vmem:[%s1658_s5 + $0x80] sm:$0xff]  ;;  %v1387_v14 = vld [vmem:[%s1658_s5 + $0x88] sm:$0xff]  ;;  %v1388_v18 = vld [vmem:[%s1658_s5 + $0x90] sm:$0xff] }
  0x18   : > { %v1394_v11 = vld [vmem:[%s1658_s5 + $0xc0] sm:$0xff]  ;;  %v1395_v15 = vld [vmem:[%s1658_s5 + $0xc8] sm:$0xff]  ;;  %v1396_v19 = vld [vmem:[%s1658_s5 + $0xd0] sm:$0xff] }
  0x19   : > { %v1373_v20 = vld [vmem:[%s1658_s5 + $0x18] sm:$0xff]  ;;  %v1374_v24 = vld [vmem:[%s1658_s5 + $0x20] sm:$0xff]  ;;  %v1375_v28 = vld [vmem:[%s1658_s5 + $0x28] sm:$0xff] }
  0x1a   : > { %547 = vmatpush.bf16.msra.mxu0 %v1402_v7  ;;  %1410 = vmatpush.bf16.msra.mxu1 %v1402_v7  ;;  %v1381_v21 = vld [vmem:[%s1658_s5 + $0x58] sm:$0xff]  ;;  %v1382_v25 = vld [vmem:[%s1658_s5 + $0x60] sm:$0xff]  ;;  %v1383_v29 = vld [vmem:[%s1658_s5 + $0x68] sm:$0xff] }
  0x1b   : > { %1411 = vmatpush.bf16.msra.mxu2 %v1402_v7  ;;  %1412 = vmatpush.bf16.msra.mxu3 %v1402_v7  ;;  %v1389_v22 = vld [vmem:[%s1658_s5 + $0x98] sm:$0xff]  ;;  %v1390_v26 = vld [vmem:[%s1658_s5 + $0xa0] sm:$0xff]  ;;  %v1391_v30 = vld [vmem:[%s1658_s5 + $0xa8] sm:$0xff] }
  0x1c   : > { %v1397_v23 = vld [vmem:[%s1658_s5 + $0xd8] sm:$0xff]  ;;  %v1398_v27 = vld [vmem:[%s1658_s5 + $0xe0] sm:$0xff]  ;;  %v1399_v31 = vld [vmem:[%s1658_s5 + $0xe8] sm:$0xff] }
  0x1d   : > { %1321 = vmatmul.msk.bf16.vlgmr.msra.gmra.mxu0 %vm436_vm2, %v1370_v8  ;;  %1329 = vmatmul.msk.bf16.vlgmr.msra.gmra.mxu1 %vm436_vm2, %v1378_v9  ;;  %v1376_v32 = vld [vmem:[%s1658_s5 + $0x30] sm:$0xff]  ;;  %v1377_v36 = vld [vmem:[%s1658_s5 + $0x38] sm:$0xff] }
  0x1e   : > { %1337 = vmatmul.msk.bf16.vlgmr.msra.gmra.mxu2 %vm436_vm2, %v1386_v10  ;;  %1345 = vmatmul.msk.bf16.vlgmr.msra.gmra.mxu3 %vm436_vm2, %v1394_v11  ;;  %v1384_v33 = vld [vmem:[%s1658_s5 + $0x70] sm:$0xff]  ;;  %v1385_v37 = vld [vmem:[%s1658_s5 + $0x78] sm:$0xff] }
  0x1f   : > { %v1392_v34 = vld [vmem:[%s1658_s5 + $0xb0] sm:$0xff]  ;;  %v1393_v38 = vld [vmem:[%s1658_s5 + $0xb8] sm:$0xff] }
  0x20   : > { %v1400_v35 = vld [vmem:[%s1658_s5 + $0xf0] sm:$0xff]  ;;  %v1401_v39 = vld [vmem:[%s1658_s5 + $0xf8] sm:$0xff] }
  0x2d   : > { %1322 = vmatmul.msk.bf16.gmra.mxu0 %vm436_vm2, %v1371_v12  ;;  %1330 = vmatmul.msk.bf16.gmra.mxu1 %vm436_vm2, %v1379_v13 }
  0x2e   : > { %1338 = vmatmul.msk.bf16.gmra.mxu2 %vm436_vm2, %v1387_v14  ;;  %1346 = vmatmul.msk.bf16.gmra.mxu3 %vm436_vm2, %v1395_v15 }
  0x3d   : > { %1323 = vmatmul.msk.bf16.gmra.mxu0 %vm436_vm2, %v1372_v16  ;;  %1331 = vmatmul.msk.bf16.gmra.mxu1 %vm436_vm2, %v1380_v17 }
  0x3e   : > { %1339 = vmatmul.msk.bf16.gmra.mxu2 %vm436_vm2, %v1388_v18  ;;  %1347 = vmatmul.msk.bf16.gmra.mxu3 %vm436_vm2, %v1396_v19 }
  0x4d   : > { %1324 = vmatmul.msk.bf16.gmra.mxu0 %vm436_vm2, %v1373_v20  ;;  %1332 = vmatmul.msk.bf16.gmra.mxu1 %vm436_vm2, %v1381_v21 }
  0x4e   : > { %1340 = vmatmul.msk.bf16.gmra.mxu2 %vm436_vm2, %v1389_v22  ;;  %1348 = vmatmul.msk.bf16.gmra.mxu3 %vm436_vm2, %v1397_v23 }
  0x5d   : > { %1325 = vmatmul.msk.bf16.gmra.mxu0 %vm436_vm2, %v1374_v24  ;;  %1333 = vmatmul.msk.bf16.gmra.mxu1 %vm436_vm2, %v1382_v25 }
  0x5e   : > { %1341 = vmatmul.msk.bf16.gmra.mxu2 %vm436_vm2, %v1390_v26  ;;  %1349 = vmatmul.msk.bf16.gmra.mxu3 %vm436_vm2, %v1398_v27 }
  0x6d   : > { %1326 = vmatmul.msk.bf16.gmra.mxu0 %vm436_vm2, %v1375_v28  ;;  %1334 = vmatmul.msk.bf16.gmra.mxu1 %vm436_vm2, %v1383_v29 }
  0x6e   : > { %1342 = vmatmul.msk.bf16.gmra.mxu2 %vm436_vm2, %v1391_v30  ;;  %1350 = vmatmul.msk.bf16.gmra.mxu3 %vm436_vm2, %v1399_v31 }
  0x7d   : > { %1327 = vmatmul.msk.bf16.gmra.mxu0 %vm436_vm2, %v1376_v32  ;;  %1335 = vmatmul.msk.bf16.gmra.mxu1 %vm436_vm2, %v1384_v33 }
  0x7e   : > { %1343 = vmatmul.msk.bf16.gmra.mxu2 %vm436_vm2, %v1392_v34  ;;  %1351 = vmatmul.msk.bf16.gmra.mxu3 %vm436_vm2, %v1400_v35 }
  0x8d   : > { %1328 = vmatmul.msk.bf16.gmra.mxu0 %vm436_vm2, %v1377_v36  ;;  %1336 = vmatmul.msk.bf16.gmra.mxu1 %vm436_vm2, %v1385_v37 }
  0x8e   : > { %1344 = vmatmul.msk.bf16.gmra.mxu2 %vm436_vm2, %v1393_v38  ;;  %1352 = vmatmul.msk.bf16.gmra.mxu3 %vm436_vm2, %v1401_v39 }
  0x9a   : > { %v549_v41 = vpop.f32.mrf.mxu0  ;;  %v589_v42 = vpop.f32.mrf.mxu1 }
  0x9b   : > { %v550_v43 = vadd.f32 %v1728_v40, %v549_v41  ;;  %v590_v44 = vadd.f32 %v1728_v40, %v589_v42 }
  0x9d   : > { %v709_v45 = vmax.f32 %v550_v43, 0.0  ;;  %v725_v46 = vmax.f32 %v590_v44, 0.0 }
  0x9f   : > { %774 = vst.msk [vmem:[%s1732_s10] sm:$0xff] %vm773_vm3, %v709_v45 }
  0xa0   : > { %790 = vst.msk [vmem:[%s1732_s10 + $0x80] sm:$0xff] %vm773_vm3, %v725_v46 }
  0xa1   : > { %v629_v47 = vpop.f32.mrf.mxu2  ;;  %v669_v48 = vpop.f32.mrf.mxu3 }
  0xa2   : > { %v630_v49 = vadd.f32 %v1728_v40, %v629_v47  ;;  %v670_v50 = vadd.f32 %v1728_v40, %v669_v48  ;;  %v551_v51 = vpop.f32.mrf.mxu0  ;;  %v591_v52 = vpop.f32.mrf.mxu1 }
  0xa3   : > { %v552_v53 = vadd.f32 %v1728_v40, %v551_v51  ;;  %v592_v54 = vadd.f32 %v1728_v40, %v591_v52 }
  0xa4   : > { %v741_v55 = vmax.f32 %v630_v49, 0.0  ;;  %v757_v56 = vmax.f32 %v670_v50, 0.0 }
  0xa5   : > { %v710_v57 = vmax.f32 %v552_v53, 0.0  ;;  %v726_v58 = vmax.f32 %v592_v54, 0.0 }
  0xa6   : > { %806 = vst.msk [vmem:[%s1732_s10 + $0x100] sm:$0xff] %vm773_vm3, %v741_v55 }
  0xa7   : > { %822 = vst.msk [vmem:[%s1732_s10 + $0x180] sm:$0xff] %vm773_vm3, %v757_v56 }
  0xa8   : > { %775 = vst.msk [vmem:[%s1732_s10 + $0x8] sm:$0xff] %vm773_vm3, %v710_v57 }
  0xa9   : > { %791 = vst.msk [vmem:[%s1732_s10 + $0x88] sm:$0xff] %vm773_vm3, %v726_v58  ;;  %v631_v59 = vpop.f32.mrf.mxu2  ;;  %v671_v60 = vpop.f32.mrf.mxu3 }
  0xaa   : > { %v632_v61 = vadd.f32 %v1728_v40, %v631_v59  ;;  %v672_v62 = vadd.f32 %v1728_v40, %v671_v60  ;;  %v554_v63 = vpop.f32.mrf.mxu0  ;;  %v594_v0 = vpop.f32.mrf.mxu1 }
  0xab   : > { %v555_v1 = vadd.f32 %v1728_v40, %v554_v63  ;;  %v595_v2 = vadd.f32 %v1728_v40, %v594_v0 }
  0xac   : > { %v742_v3 = vmax.f32 %v632_v61, 0.0  ;;  %v758_v4 = vmax.f32 %v672_v62, 0.0 }
  0xad   : > { %v711_v5 = vmax.f32 %v555_v1, 0.0  ;;  %v727_v6 = vmax.f32 %v595_v2, 0.0 }
  0xae   : > { %807 = vst.msk [vmem:[%s1732_s10 + $0x108] sm:$0xff] %vm773_vm3, %v742_v3 }
  0xaf   : > { %823 = vst.msk [vmem:[%s1732_s10 + $0x188] sm:$0xff] %vm773_vm3, %v758_v4 }
  0xb0   : > { %776 = vst.msk [vmem:[%s1732_s10 + $0x10] sm:$0xff] %vm773_vm3, %v711_v5 }
  0xb1   : > { %792 = vst.msk [vmem:[%s1732_s10 + $0x90] sm:$0xff] %vm773_vm3, %v727_v6  ;;  %v634_v7 = vpop.f32.mrf.mxu2  ;;  %v674_v8 = vpop.f32.mrf.mxu3 }
  0xb2   : > { %v635_v9 = vadd.f32 %v1728_v40, %v634_v7  ;;  %v675_v10 = vadd.f32 %v1728_v40, %v674_v8  ;;  %v556_v11 = vpop.f32.mrf.mxu0  ;;  %v596_v12 = vpop.f32.mrf.mxu1 }
  0xb3   : > { %v557_v13 = vadd.f32 %v1728_v40, %v556_v11  ;;  %v597_v14 = vadd.f32 %v1728_v40, %v596_v12 }
  0xb4   : > { %v743_v15 = vmax.f32 %v635_v9, 0.0  ;;  %v759_v16 = vmax.f32 %v675_v10, 0.0 }
  0xb5   : > { %v712_v17 = vmax.f32 %v557_v13, 0.0  ;;  %v728_v18 = vmax.f32 %v597_v14, 0.0 }
  0xb6   : > { %808 = vst.msk [vmem:[%s1732_s10 + $0x110] sm:$0xff] %vm773_vm3, %v743_v15 }
  0xb7   : > { %824 = vst.msk [vmem:[%s1732_s10 + $0x190] sm:$0xff] %vm773_vm3, %v759_v16 }
  0xb8   : > { %777 = vst.msk [vmem:[%s1732_s10 + $0x18] sm:$0xff] %vm773_vm3, %v712_v17 }
  0xb9   : > { %793 = vst.msk [vmem:[%s1732_s10 + $0x98] sm:$0xff] %vm773_vm3, %v728_v18  ;;  %v636_v19 = vpop.f32.mrf.mxu2  ;;  %v676_v20 = vpop.f32.mrf.mxu3 }
  0xba   : > { %v637_v21 = vadd.f32 %v1728_v40, %v636_v19  ;;  %v677_v22 = vadd.f32 %v1728_v40, %v676_v20  ;;  %v559_v23 = vpop.f32.mrf.mxu0  ;;  %v599_v24 = vpop.f32.mrf.mxu1 }
  0xbb   : > { %v560_v25 = vadd.f32 %v1728_v40, %v559_v23  ;;  %v600_v26 = vadd.f32 %v1728_v40, %v599_v24 }
  0xbc   : > { %v744_v27 = vmax.f32 %v637_v21, 0.0  ;;  %v760_v28 = vmax.f32 %v677_v22, 0.0 }
  0xbd   : > { %v713_v29 = vmax.f32 %v560_v25, 0.0  ;;  %v729_v30 = vmax.f32 %v600_v26, 0.0 }
  0xbe   : > { %809 = vst.msk [vmem:[%s1732_s10 + $0x118] sm:$0xff] %vm773_vm3, %v744_v27 }
  0xbf   : > { %825 = vst.msk [vmem:[%s1732_s10 + $0x198] sm:$0xff] %vm773_vm3, %v760_v28 }
  0xc0   : > { %778 = vst.msk [vmem:[%s1732_s10 + $0x20] sm:$0xff] %vm773_vm3, %v713_v29 }
  0xc1   : > { %794 = vst.msk [vmem:[%s1732_s10 + $0xa0] sm:$0xff] %vm773_vm3, %v729_v30  ;;  %v639_v31 = vpop.f32.mrf.mxu2  ;;  %v679_v32 = vpop.f32.mrf.mxu3 }
  0xc2   : > { %v640_v33 = vadd.f32 %v1728_v40, %v639_v31  ;;  %v680_v34 = vadd.f32 %v1728_v40, %v679_v32  ;;  %v561_v35 = vpop.f32.mrf.mxu0  ;;  %v601_v36 = vpop.f32.mrf.mxu1 }
  0xc3   : > { %v562_v37 = vadd.f32 %v1728_v40, %v561_v35  ;;  %v602_v38 = vadd.f32 %v1728_v40, %v601_v36 }
  0xc4   : > { %v745_v39 = vmax.f32 %v640_v33, 0.0  ;;  %v761_v41 = vmax.f32 %v680_v34, 0.0 }
  0xc5   : > { %v714_v42 = vmax.f32 %v562_v37, 0.0  ;;  %v730_v43 = vmax.f32 %v602_v38, 0.0 }
  0xc6   : > { %810 = vst.msk [vmem:[%s1732_s10 + $0x120] sm:$0xff] %vm773_vm3, %v745_v39 }
  0xc7   : > { %826 = vst.msk [vmem:[%s1732_s10 + $0x1a0] sm:$0xff] %vm773_vm3, %v761_v41 }
  0xc8   : > { %779 = vst.msk [vmem:[%s1732_s10 + $0x28] sm:$0xff] %vm773_vm3, %v714_v42 }
  0xc9   : > { %795 = vst.msk [vmem:[%s1732_s10 + $0xa8] sm:$0xff] %vm773_vm3, %v730_v43  ;;  %v641_v44 = vpop.f32.mrf.mxu2  ;;  %v681_v45 = vpop.f32.mrf.mxu3 }
  0xca   : > { %v642_v46 = vadd.f32 %v1728_v40, %v641_v44  ;;  %v682_v47 = vadd.f32 %v1728_v40, %v681_v45  ;;  %v564_v48 = vpop.f32.mrf.mxu0  ;;  %v604_v49 = vpop.f32.mrf.mxu1 }
  0xcb   : > { %v565_v50 = vadd.f32 %v1728_v40, %v564_v48  ;;  %v605_v51 = vadd.f32 %v1728_v40, %v604_v49 }
  0xcc   : > { %v746_v52 = vmax.f32 %v642_v46, 0.0  ;;  %v762_v53 = vmax.f32 %v682_v47, 0.0 }
  0xcd   : > { %v715_v54 = vmax.f32 %v565_v50, 0.0  ;;  %v731_v55 = vmax.f32 %v605_v51, 0.0 }
  0xce   : > { %811 = vst.msk [vmem:[%s1732_s10 + $0x128] sm:$0xff] %vm773_vm3, %v746_v52 }
  0xcf   : > { %827 = vst.msk [vmem:[%s1732_s10 + $0x1a8] sm:$0xff] %vm773_vm3, %v762_v53 }
  0xd0   : > { %780 = vst.msk [vmem:[%s1732_s10 + $0x30] sm:$0xff] %vm773_vm3, %v715_v54 }
  0xd1   : > { %796 = vst.msk [vmem:[%s1732_s10 + $0xb0] sm:$0xff] %vm773_vm3, %v731_v55  ;;  %v644_v56 = vpop.f32.mrf.mxu2  ;;  %v684_v57 = vpop.f32.mrf.mxu3 }
  0xd2   : > { %v645_v58 = vadd.f32 %v1728_v40, %v644_v56  ;;  %v685_v59 = vadd.f32 %v1728_v40, %v684_v57  ;;  %v566_v60 = vpop.f32.mrf.mxu0  ;;  %v606_v61 = vpop.f32.mrf.mxu1 }
  0xd3   : > { %v567_v62 = vadd.f32 %v1728_v40, %v566_v60  ;;  %v607_v63 = vadd.f32 %v1728_v40, %v606_v61 }
  0xd4   : > { %v747_v0 = vmax.f32 %v645_v58, 0.0  ;;  %v763_v1 = vmax.f32 %v685_v59, 0.0 }
  0xd5   : > { %v716_v2 = vmax.f32 %v567_v62, 0.0  ;;  %v732_v3 = vmax.f32 %v607_v63, 0.0 }
  0xd6   : > { %812 = vst.msk [vmem:[%s1732_s10 + $0x130] sm:$0xff] %vm773_vm3, %v747_v0 }
  0xd7   : > { %828 = vst.msk [vmem:[%s1732_s10 + $0x1b0] sm:$0xff] %vm773_vm3, %v763_v1 }
  0xd8   : > { %781 = vst.msk [vmem:[%s1732_s10 + $0x38] sm:$0xff] %vm773_vm3, %v716_v2 }
  0xd9   : > { %797 = vst.msk [vmem:[%s1732_s10 + $0xb8] sm:$0xff] %vm773_vm3, %v732_v3  ;;  %v646_v4 = vpop.f32.mrf.mxu2  ;;  %v686_v5 = vpop.f32.mrf.mxu3 }
  0xda   : > { %v647_v6 = vadd.f32 %v1728_v40, %v646_v4  ;;  %v687_v7 = vadd.f32 %v1728_v40, %v686_v5  ;;  %v569_v8 = vpop.f32.mrf.mxu0  ;;  %v609_v9 = vpop.f32.mrf.mxu1 }
  0xdb   : > { %v570_v10 = vadd.f32 %v1728_v40, %v569_v8  ;;  %v610_v11 = vadd.f32 %v1728_v40, %v609_v9 }
  0xdc   : > { %v748_v12 = vmax.f32 %v647_v6, 0.0  ;;  %v764_v13 = vmax.f32 %v687_v7, 0.0 }
  0xdd   : > { %v717_v14 = vmax.f32 %v570_v10, 0.0  ;;  %v733_v15 = vmax.f32 %v610_v11, 0.0 }
  0xde   : > { %813 = vst.msk [vmem:[%s1732_s10 + $0x138] sm:$0xff] %vm773_vm3, %v748_v12 }
  0xdf   : > { %829 = vst.msk [vmem:[%s1732_s10 + $0x1b8] sm:$0xff] %vm773_vm3, %v764_v13 }
  0xe0   : > { %782 = vst.msk [vmem:[%s1732_s10 + $0x40] sm:$0xff] %vm773_vm3, %v717_v14 }
  0xe1   : > { %798 = vst.msk [vmem:[%s1732_s10 + $0xc0] sm:$0xff] %vm773_vm3, %v733_v15  ;;  %v649_v16 = vpop.f32.mrf.mxu2  ;;  %v689_v17 = vpop.f32.mrf.mxu3 }
  0xe2   : > { %v650_v18 = vadd.f32 %v1728_v40, %v649_v16  ;;  %v690_v19 = vadd.f32 %v1728_v40, %v689_v17  ;;  %v571_v20 = vpop.f32.mrf.mxu0  ;;  %v611_v21 = vpop.f32.mrf.mxu1 }
  0xe3   : > { %v572_v22 = vadd.f32 %v1728_v40, %v571_v20  ;;  %v612_v23 = vadd.f32 %v1728_v40, %v611_v21 }
  0xe4   : > { %v749_v24 = vmax.f32 %v650_v18, 0.0  ;;  %v765_v25 = vmax.f32 %v690_v19, 0.0 }
  0xe5   : > { %v718_v26 = vmax.f32 %v572_v22, 0.0  ;;  %v734_v27 = vmax.f32 %v612_v23, 0.0 }
  0xe6   : > { %814 = vst.msk [vmem:[%s1732_s10 + $0x140] sm:$0xff] %vm773_vm3, %v749_v24 }
  0xe7   : > { %830 = vst.msk [vmem:[%s1732_s10 + $0x1c0] sm:$0xff] %vm773_vm3, %v765_v25 }
  0xe8   : > { %783 = vst.msk [vmem:[%s1732_s10 + $0x48] sm:$0xff] %vm773_vm3, %v718_v26 }
  0xe9   : > { %799 = vst.msk [vmem:[%s1732_s10 + $0xc8] sm:$0xff] %vm773_vm3, %v734_v27  ;;  %v651_v28 = vpop.f32.mrf.mxu2  ;;  %v691_v29 = vpop.f32.mrf.mxu3 }
  0xea   : > { %v652_v30 = vadd.f32 %v1728_v40, %v651_v28  ;;  %v692_v31 = vadd.f32 %v1728_v40, %v691_v29  ;;  %v574_v32 = vpop.f32.mrf.mxu0  ;;  %v614_v33 = vpop.f32.mrf.mxu1 }
  0xeb   : > { %v575_v34 = vadd.f32 %v1728_v40, %v574_v32  ;;  %v615_v35 = vadd.f32 %v1728_v40, %v614_v33 }
  0xec   : > { %v750_v36 = vmax.f32 %v652_v30, 0.0  ;;  %v766_v37 = vmax.f32 %v692_v31, 0.0 }
  0xed   : > { %v719_v38 = vmax.f32 %v575_v34, 0.0  ;;  %v735_v39 = vmax.f32 %v615_v35, 0.0 }
  0xee   : > { %815 = vst.msk [vmem:[%s1732_s10 + $0x148] sm:$0xff] %vm773_vm3, %v750_v36 }
  0xef   : > { %831 = vst.msk [vmem:[%s1732_s10 + $0x1c8] sm:$0xff] %vm773_vm3, %v766_v37 }
  0xf0   : > { %784 = vst.msk [vmem:[%s1732_s10 + $0x50] sm:$0xff] %vm773_vm3, %v719_v38 }
  0xf1   : > { %800 = vst.msk [vmem:[%s1732_s10 + $0xd0] sm:$0xff] %vm773_vm3, %v735_v39  ;;  %v654_v41 = vpop.f32.mrf.mxu2  ;;  %v694_v42 = vpop.f32.mrf.mxu3 }
  0xf2   : > { %v655_v43 = vadd.f32 %v1728_v40, %v654_v41  ;;  %v695_v44 = vadd.f32 %v1728_v40, %v694_v42  ;;  %v576_v45 = vpop.f32.mrf.mxu0  ;;  %v616_v46 = vpop.f32.mrf.mxu1 }
  0xf3   : > { %v577_v47 = vadd.f32 %v1728_v40, %v576_v45  ;;  %v617_v48 = vadd.f32 %v1728_v40, %v616_v46 }
  0xf4   : > { %v751_v49 = vmax.f32 %v655_v43, 0.0  ;;  %v767_v50 = vmax.f32 %v695_v44, 0.0 }
  0xf5   : > { %v720_v51 = vmax.f32 %v577_v47, 0.0  ;;  %v736_v52 = vmax.f32 %v617_v48, 0.0 }
  0xf6   : > { %816 = vst.msk [vmem:[%s1732_s10 + $0x150] sm:$0xff] %vm773_vm3, %v751_v49 }
  0xf7   : > { %832 = vst.msk [vmem:[%s1732_s10 + $0x1d0] sm:$0xff] %vm773_vm3, %v767_v50 }
  0xf8   : > { %785 = vst.msk [vmem:[%s1732_s10 + $0x58] sm:$0xff] %vm773_vm3, %v720_v51 }
  0xf9   : > { %801 = vst.msk [vmem:[%s1732_s10 + $0xd8] sm:$0xff] %vm773_vm3, %v736_v52  ;;  %v656_v53 = vpop.f32.mrf.mxu2  ;;  %v696_v54 = vpop.f32.mrf.mxu3 }
  0xfa   : > { %v657_v55 = vadd.f32 %v1728_v40, %v656_v53  ;;  %v697_v56 = vadd.f32 %v1728_v40, %v696_v54  ;;  %v579_v57 = vpop.f32.mrf.mxu0  ;;  %v619_v58 = vpop.f32.mrf.mxu1 }
  0xfb   : > { %v580_v59 = vadd.f32 %v1728_v40, %v579_v57  ;;  %v620_v60 = vadd.f32 %v1728_v40, %v619_v58 }
  0xfc   : > { %v752_v61 = vmax.f32 %v657_v55, 0.0  ;;  %v768_v62 = vmax.f32 %v697_v56, 0.0 }
  0xfd   : > { %v721_v63 = vmax.f32 %v580_v59, 0.0  ;;  %v737_v0 = vmax.f32 %v620_v60, 0.0 }
  0xfe   : > { %817 = vst.msk [vmem:[%s1732_s10 + $0x158] sm:$0xff] %vm773_vm3, %v752_v61 }
  0xff   : > { %833 = vst.msk [vmem:[%s1732_s10 + $0x1d8] sm:$0xff] %vm773_vm3, %v768_v62 }
 0x100   : > { %786 = vst.msk [vmem:[%s1732_s10 + $0x60] sm:$0xff] %vm773_vm3, %v721_v63 }
 0x101   : > { %802 = vst.msk [vmem:[%s1732_s10 + $0xe0] sm:$0xff] %vm773_vm3, %v737_v0  ;;  %v659_v1 = vpop.f32.mrf.mxu2  ;;  %v699_v2 = vpop.f32.mrf.mxu3 }
 0x102   : > { %v660_v3 = vadd.f32 %v1728_v40, %v659_v1  ;;  %v700_v4 = vadd.f32 %v1728_v40, %v699_v2  ;;  %v581_v5 = vpop.f32.mrf.mxu0  ;;  %v621_v6 = vpop.f32.mrf.mxu1 }
 0x103   : > { %v582_v7 = vadd.f32 %v1728_v40, %v581_v5  ;;  %v622_v8 = vadd.f32 %v1728_v40, %v621_v6 }
 0x104   : > { %v753_v9 = vmax.f32 %v660_v3, 0.0  ;;  %v769_v10 = vmax.f32 %v700_v4, 0.0 }
 0x105   : > { %v722_v11 = vmax.f32 %v582_v7, 0.0  ;;  %v738_v12 = vmax.f32 %v622_v8, 0.0 }
 0x106   : > { %818 = vst.msk [vmem:[%s1732_s10 + $0x160] sm:$0xff] %vm773_vm3, %v753_v9 }
 0x107   : > { %834 = vst.msk [vmem:[%s1732_s10 + $0x1e0] sm:$0xff] %vm773_vm3, %v769_v10 }
 0x108   : > { %787 = vst.msk [vmem:[%s1732_s10 + $0x68] sm:$0xff] %vm773_vm3, %v722_v11 }
 0x109   : > { %803 = vst.msk [vmem:[%s1732_s10 + $0xe8] sm:$0xff] %vm773_vm3, %v738_v12  ;;  %v661_v13 = vpop.f32.mrf.mxu2  ;;  %v701_v14 = vpop.f32.mrf.mxu3 }
 0x10a   : > { %v662_v15 = vadd.f32 %v1728_v40, %v661_v13  ;;  %v702_v16 = vadd.f32 %v1728_v40, %v701_v14  ;;  %v584_v17 = vpop.f32.mrf.mxu0  ;;  %v624_v18 = vpop.f32.mrf.mxu1 }
 0x10b   : > { %v585_v19 = vadd.f32 %v1728_v40, %v584_v17  ;;  %v625_v20 = vadd.f32 %v1728_v40, %v624_v18 }
 0x10c   : > { %v754_v21 = vmax.f32 %v662_v15, 0.0  ;;  %v770_v22 = vmax.f32 %v702_v16, 0.0 }
 0x10d   : > { %v723_v23 = vmax.f32 %v585_v19, 0.0  ;;  %v739_v24 = vmax.f32 %v625_v20, 0.0 }
 0x10e   : > { %819 = vst.msk [vmem:[%s1732_s10 + $0x168] sm:$0xff] %vm773_vm3, %v754_v21 }
 0x10f   : > { %835 = vst.msk [vmem:[%s1732_s10 + $0x1e8] sm:$0xff] %vm773_vm3, %v770_v22 }
 0x110   : > { %788 = vst.msk [vmem:[%s1732_s10 + $0x70] sm:$0xff] %vm773_vm3, %v723_v23 }
 0x111   : > { %804 = vst.msk [vmem:[%s1732_s10 + $0xf0] sm:$0xff] %vm773_vm3, %v739_v24  ;;  %v664_v25 = vpop.f32.mrf.mxu2  ;;  %v704_v26 = vpop.f32.mrf.mxu3 }
 0x112   : > { %v665_v27 = vadd.f32 %v1728_v40, %v664_v25  ;;  %v705_v28 = vadd.f32 %v1728_v40, %v704_v26  ;;  %v586_v29 = vpop.f32.mrf.mxu0  ;;  %v626_v30 = vpop.f32.mrf.mxu1 }
 0x113   : > { %v587_v31 = vadd.f32 %v1728_v40, %v586_v29  ;;  %v627_v32 = vadd.f32 %v1728_v40, %v626_v30 }
 0x114   : > { %v755_v33 = vmax.f32 %v665_v27, 0.0  ;;  %v771_v34 = vmax.f32 %v705_v28, 0.0 }
 0x115   : > { %v724_v35 = vmax.f32 %v587_v31, 0.0  ;;  %v740_v36 = vmax.f32 %v627_v32, 0.0 }
 0x116   : > { %820 = vst.msk [vmem:[%s1732_s10 + $0x170] sm:$0xff] %vm773_vm3, %v755_v33 }
 0x117   : > { %836 = vst.msk [vmem:[%s1732_s10 + $0x1f0] sm:$0xff] %vm773_vm3, %v771_v34 }
 0x118   : > { %789 = vst.msk [vmem:[%s1732_s10 + $0x78] sm:$0xff] %vm773_vm3, %v724_v35 }
 0x119   : > { %805 = vst.msk [vmem:[%s1732_s10 + $0xf8] sm:$0xff] %vm773_vm3, %v740_v36  ;;  %v666_v37 = vpop.f32.mrf.mxu2  ;;  %v706_v38 = vpop.f32.mrf.mxu3 }
 0x11a   : > { %v667_v39 = vadd.f32 %v1728_v40, %v666_v37  ;;  %v707_v41 = vadd.f32 %v1728_v40, %v706_v38 }
 0x11b   : > { %844 = sbr.rel (!%p1637_p4) target bundleno = 352 (0x160), region = 36 }
 0x11c   : > { %v756_v42 = vmax.f32 %v667_v39, 0.0  ;;  %v772_v43 = vmax.f32 %v707_v41, 0.0 }
 0x11e   : > { %821 = vst.msk [vmem:[%s1732_s10 + $0x178] sm:$0xff] %vm773_vm3, %v756_v42 }
 0x11f   : > { %837 = vst.msk [vmem:[%s1732_s10 + $0x1f8] sm:$0xff] %vm773_vm3, %v772_v43 }
 0x120   : > { %s2080_s11 = smov (!%p847_p8, %s846_s11), 64 }
 0x121   : > { %s1355_s21 = sshll.u32 %s2080_s11, 3 }
 0x122   : > { %p1358_p9 = scmp.eq.s32.totalorder %s1355_s21, 0 }
 0x123   : > { %s1937_s22 = sshrl.u32 (!%p1358_p9), %s2080_s11, 5 }
 0x124   : > { %855 = sbr.rel (%p1358_p9) target bundleno = 352 (0x160), region = 40  ;;  %p1359_p10 = scmp.le.s32.totalorder (!%p1358_p9), %s1937_s22, 0 }
 0x129   : > { %1134 = sbr.rel (%p1359_p10) target bundleno = 335 (0x14f), region = 116  ;;  %s2071_s15 = smov (!%p1359_p10), %s1931_s18 }
 0x12a   : > { %s2072_s20 = smov (!%p1359_p10), %s1732_s10  ;;  %s1946_s23 = smov (!%p1359_p10), 0  }
 0x12b   : > { %s1948_s24 = smov (!%p1359_p10), 0  }
 0x12e LB: >> { %v980_v40 = vld [vmem:[%s1565_s20] sm:$0xff]  ;;  %v982_v44 = vld [vmem:[%s1565_s20 + $0x8] sm:$0xff]  ;;  %v984_v45 = vld [vmem:[%s1565_s20 + $0x10] sm:$0xff]  ;;  %s1044_s25 = sadd.s32 1, %s1569_s23  ;;  %s974_s24 = sadd.s32 1, %s1573_s24   ;;  %s1573_s24 = sphi %s1948_s24, %s974_s24   ;;  %s1569_s23 = sphi %s1946_s23, %s2075_s23   ;;  %s1565_s20 = sphi %s2072_s20, %s2074_s20   ;;  %s1561_s15 = sphi %s2071_s15, %s2073_s15  }
 0x12f   : >> { %981 = vst [vmem:[%s1561_s15] sm:$0xff] %v980_v40  ;;  %v986_v46 = vld [vmem:[%s1565_s20 + $0x18] sm:$0xff]  ;;  %p1045_p11 = scmp.ge.s32.totalorder %s1044_s25, %s1937_s22  ;;  %v988_v47 = vld [vmem:[%s1565_s20 + $0x20] sm:$0xff]  ;;  %v990_v48 = vld [vmem:[%s1565_s20 + $0x28] sm:$0xff]  ;;  %p973_p12 = scmp.ge.s32.totalorder %s974_s24, %s1937_s22 }
 0x130   : >> { %983 = vst [vmem:[%s1561_s15 + $0x8] sm:$0xff] %v982_v44  ;;  %v992_v49 = vld [vmem:[%s1565_s20 + $0x30] sm:$0xff]  ;;  %v994_v50 = vld [vmem:[%s1565_s20 + $0x38] sm:$0xff]  ;;  %v996_v51 = vld [vmem:[%s1565_s20 + $0x40] sm:$0xff] }
 0x131   : >> { %985 = vst [vmem:[%s1561_s15 + $0x10] sm:$0xff] %v984_v45  ;;  %s2082_s25 = smov (%p1045_p11, %s1044_s25), 0  ;;  %v998_v52 = vld [vmem:[%s1565_s20 + $0x48] sm:$0xff]  ;;  %v1000_v53 = vld [vmem:[%s1565_s20 + $0x50] sm:$0xff]  ;;  %v1002_v54 = vld [vmem:[%s1565_s20 + $0x58] sm:$0xff] }
 0x132   : >> { %987 = vst [vmem:[%s1561_s15 + $0x18] sm:$0xff] %v986_v46  ;;  %s1360_s26 = sshll.u32 %s2082_s25, 8  ;;  %v1004_v55 = vld [vmem:[%s1565_s20 + $0x60] sm:$0xff]  ;;  %v1006_v56 = vld [vmem:[%s1565_s20 + $0x68] sm:$0xff]  ;;  %v1008_v57 = vld [vmem:[%s1565_s20 + $0x70] sm:$0xff]  ;;  %s2075_s23 = smov %s2082_s25 }
 0x133   : >> { %989 = vst [vmem:[%s1561_s15 + $0x20] sm:$0xff] %v988_v47  ;;  %s1980_s27 = scalar_lea.vmem %s1732_s10, %s1360_s26 [#allocation2]   ;;  %s1983_s28 = scalar_lea.vmem %s1931_s18, %s1360_s26   ;;  %v1010_v58 = vld [vmem:[%s1565_s20 + $0x78] sm:$0xff]  ;;  %v1012_v59 = vld [vmem:[%s1565_s20 + $0x80] sm:$0xff]  ;;  %v1014_v60 = vld [vmem:[%s1565_s20 + $0x88] sm:$0xff] }
 0x134   : >> { %991 = vst [vmem:[%s1561_s15 + $0x28] sm:$0xff] %v990_v48  ;;  %v1016_v61 = vld [vmem:[%s1565_s20 + $0x90] sm:$0xff]  ;;  %v1018_v62 = vld [vmem:[%s1565_s20 + $0x98] sm:$0xff]  ;;  %v1020_v63 = vld [vmem:[%s1565_s20 + $0xa0] sm:$0xff] }
 0x135   : >> { %993 = vst [vmem:[%s1561_s15 + $0x30] sm:$0xff] %v992_v49  ;;  %v1022_v0 = vld [vmem:[%s1565_s20 + $0xa8] sm:$0xff]  ;;  %v1024_v1 = vld [vmem:[%s1565_s20 + $0xb0] sm:$0xff]  ;;  %v1026_v2 = vld [vmem:[%s1565_s20 + $0xb8] sm:$0xff] }
 0x136   : >> { %995 = vst [vmem:[%s1561_s15 + $0x38] sm:$0xff] %v994_v50  ;;  %v1028_v3 = vld [vmem:[%s1565_s20 + $0xc0] sm:$0xff]  ;;  %v1030_v4 = vld [vmem:[%s1565_s20 + $0xc8] sm:$0xff]  ;;  %v1032_v5 = vld [vmem:[%s1565_s20 + $0xd0] sm:$0xff] }
 0x137   : >> { %997 = vst [vmem:[%s1561_s15 + $0x40] sm:$0xff] %v996_v51  ;;  %v1034_v6 = vld [vmem:[%s1565_s20 + $0xd8] sm:$0xff]  ;;  %v1036_v7 = vld [vmem:[%s1565_s20 + $0xe0] sm:$0xff]  ;;  %v1038_v8 = vld [vmem:[%s1565_s20 + $0xe8] sm:$0xff] }
 0x138   : >> { %999 = vst [vmem:[%s1561_s15 + $0x48] sm:$0xff] %v998_v52  ;;  %v1040_v9 = vld [vmem:[%s1565_s20 + $0xf0] sm:$0xff]  ;;  %v1042_v10 = vld [vmem:[%s1565_s20 + $0xf8] sm:$0xff]  ;;  %s2074_s20 = smov %s1980_s27 }
 0x139   : >> { %1001 = vst [vmem:[%s1561_s15 + $0x50] sm:$0xff] %v1000_v53 }
 0x13a   : >> { %1003 = vst [vmem:[%s1561_s15 + $0x58] sm:$0xff] %v1002_v54 }
 0x13b   : >> { %1005 = vst [vmem:[%s1561_s15 + $0x60] sm:$0xff] %v1004_v55 }
 0x13c   : >> { %1007 = vst [vmem:[%s1561_s15 + $0x68] sm:$0xff] %v1006_v56 }
 0x13d   : >> { %1009 = vst [vmem:[%s1561_s15 + $0x70] sm:$0xff] %v1008_v57 }
 0x13e   : >> { %1011 = vst [vmem:[%s1561_s15 + $0x78] sm:$0xff] %v1010_v58 }
 0x13f   : >> { %1013 = vst [vmem:[%s1561_s15 + $0x80] sm:$0xff] %v1012_v59 }
 0x140   : >> { %1015 = vst [vmem:[%s1561_s15 + $0x88] sm:$0xff] %v1014_v60 }
 0x141   : >> { %1017 = vst [vmem:[%s1561_s15 + $0x90] sm:$0xff] %v1016_v61 }
 0x142   : >> { %1019 = vst [vmem:[%s1561_s15 + $0x98] sm:$0xff] %v1018_v62 }
 0x143   : >> { %1021 = vst [vmem:[%s1561_s15 + $0xa0] sm:$0xff] %v1020_v63 }
 0x144   : >> { %1023 = vst [vmem:[%s1561_s15 + $0xa8] sm:$0xff] %v1022_v0 }
 0x145   : >> { %1025 = vst [vmem:[%s1561_s15 + $0xb0] sm:$0xff] %v1024_v1 }
 0x146   : >> { %1027 = vst [vmem:[%s1561_s15 + $0xb8] sm:$0xff] %v1026_v2 }
 0x147   : >> { %1029 = vst [vmem:[%s1561_s15 + $0xc0] sm:$0xff] %v1028_v3 }
 0x148   : >> { %1031 = vst [vmem:[%s1561_s15 + $0xc8] sm:$0xff] %v1030_v4 }
 0x149   : >> { %1033 = vst [vmem:[%s1561_s15 + $0xd0] sm:$0xff] %v1032_v5 }
 0x14a   : >> { %1035 = vst [vmem:[%s1561_s15 + $0xd8] sm:$0xff] %v1034_v6  ;;  %976 = sbr.rel (!%p973_p12) target bundleno = 302 (0x12e), region = 122 }
 0x14b   : >> { %1037 = vst [vmem:[%s1561_s15 + $0xe0] sm:$0xff] %v1036_v7 }
 0x14c   : >> { %1039 = vst [vmem:[%s1561_s15 + $0xe8] sm:$0xff] %v1038_v8 }
 0x14d   : >> { %1041 = vst [vmem:[%s1561_s15 + $0xf0] sm:$0xff] %v1040_v9 }
 0x14e   : >> { %1043 = vst [vmem:[%s1561_s15 + $0xf8] sm:$0xff] %v1042_v10  ;;  %s2073_s15 = smov %s1983_s28 }
 0x14f PF: > { %s2048_s29 = sand.u32 31, %s2080_s11   ;;  %s1405_s30 = sshll.u32 %s1937_s22, 8 }
 0x150   : > { %s1055_s4 = scalar_lea.vmem %s1732_s10, %s1405_s30 [#allocation2]   ;;  %s1057_s5 = scalar_lea.vmem %s1931_s18, %s1405_s30  }
 0x151   : > { %p1365_p13 = scmp.le.s32.totalorder %s2048_s29, 0 }
 0x152   : > { %s1575_s6 = smov (!%p1365_p13), %s1057_s5   ;;  %s1579_s7 = smov (!%p1365_p13), %s1055_s4  }
 0x153   : > { %1148 = sbr.rel (%p1365_p13) target bundleno = 352 (0x160), region = 127  ;;  %s1583_s8 = smov (!%p1365_p13), 0  }
 0x154   : > { %s1587_s9 = smov (!%p1365_p13), 0  }
 0x158 LB: >> { %v1067_v11 = vld [vmem:[%s1581_s7] sm:$0xff]  ;;  %s1069_s11 = sadd.s32 1, %s1585_s8  ;;  %s1061_s9 = sadd.s32 1, %s1589_s9   ;;  %s1589_s9 = sphi %s1587_s9, %s1061_s9   ;;  %s1585_s8 = sphi %s1583_s8, %s1584_s8   ;;  %s1581_s7 = sphi %s1579_s7, %s1074_s7   ;;  %s1577_s6 = sphi %s1575_s6, %s1075_s6  }
 0x159   : >> { %1068 = vst [vmem:[%s1577_s6] sm:$0xff] %v1067_v11  ;;  %p1070_p0 = scmp.ge.s32.totalorder %s1069_s11, %s2048_s29  ;;  %p1060_p1 = scmp.ge.s32.totalorder %s1061_s9, %s2048_s29 }
 0x15b   : >> { %s2084_s11 = smov (%p1070_p0, %s1069_s11), 0  ;;  %1063 = sbr.rel (!%p1060_p1) target bundleno = 344 (0x158), region = 133 }
 0x15c   : >> { %s1366_s10 = sshll.u32 %s2084_s11, 3  ;;  %s1584_s8 = smov %s2084_s11  }
 0x15d   : >> { %s1074_s7 = scalar_lea.vmem %s1055_s4, %s1366_s10 [#allocation2]   ;;  %s1075_s6 = scalar_lea.vmem %s1057_s5, %s1366_s10  }
 0x160 PF: > { %p10_p2 = scmp.ge.s32.totalorder %s1627_s16, 6   ;;  %s2076_s12 = smov %s1553_s13 }
 0x161   : > { %s2077_s13 = smov %s1635_s19  ;;  %s2078_s14 = smov %s1627_s16 }
 0x162   :  { %12 = sbr.rel (!%p10_p2) target bundleno = 2 (0x2), region = 144 }

// kernel: squeezenet_forward.22
= control target key start
LH: loop header
LB: loop body
LE: loop exit
PB: predicated region body
PF: predicated region fallthrough
CT: control target
= control target key end

     0   :  { %s1189_s12 = smov 0   ;;  %s1191_s13 = smov 0   ;;  %s1500_s0 = inlined_call_operand.vmem [shape: bf16[450,64], index: 0, kind: input, shape index: {}]   ;;  %s1501_s1 = inlined_call_operand.vmem [shape: bf16[64,16], index: 1, kind: input, shape index: {}]   ;;  %s1502_s2 = inlined_call_operand.vmem [shape: f32[1,16], index: 2, kind: input, shape index: {}]   ;;  %s1503_s3 = inlined_call_operand.vmem [shape: f32[450,16], index: 3, kind: output, shape index: {}]  }
   0x1   :  { %s1193_s14 = smov 0  }
   0x2 LB: > { %s1202_s15 = sadd.s32 4294967295, %s1135_s14   ;;  %s1204_s16 = sadd.s32 1, %s1135_s14   ;;  %s1135_s14 = sphi %s1193_s14, %s1512_s14   ;;  %s1131_s13 = sphi %s1191_s13, %s1511_s13   ;;  %s1127_s12 = sphi %s1189_s12, %s1510_s12  }
   0x3   : > { %s85_s17 = ssub.s32 %s1135_s14, %s1204_s16  ;;  %s88_s18 = sadd.s32 1, %s1131_s13 }
   0x4   : > { %p86_p0 = scmp.eq.s32.totalorder %s85_s17, 0  ;;  %p98_p1 = scmp.ne.s32.totalorder %s1131_s13, %s1127_s12 }
   0x5   : > { %p99_p2 = scmp.eq.s32.totalorder %s1202_s15, 1  ;;  %p852_p3 = scmp.ge.s32.totalorder %s1135_s14, 1 }
   0x6   : > { %s1212_s19 = scalar_select %p86_p0, %s1131_s13, %s88_s18  }
   0x7   : > { %p1214_p4 = por %p99_p2, %p98_p1  ;;  %p146_p5 = scmp.lt.s32.totalorder %s1135_s14, 3 }
   0x9   : > { %p147_p6 = pnand %p852_p3, %p146_p5 }
   0xa   : > { %s1222_s23 = smul.u32 (!%p147_p6), 29, %s1202_s15  ;;  %s170_s8 = sand.u32 (!%p147_p6), 1, %s1127_s12  }
   0xb   : > { %150 = sbr.rel (%p147_p6) target bundleno = 302 (0x12e), region = 32 }
   0xc   : > { %p178_p7 = scmp.lt.s32.totalorder (!%p147_p6), %s1222_s23, 56  ;;  %s984_s11 = smul.u32 (!%p147_p6), 232, %s170_s8 }
   0xe   : > { %s1278_s14 = scalar_lea.vmem (!%p147_p6), [#allocation2], %s984_s11  }
  0x10   : > { %v970_v0 = vld [vmem:[%s1501_s1 + $0x18] sm:$0xff]  ;;  %v969_v1 = vld [vmem:[%s1501_s1 + $0x10] sm:$0xff]  ;;  %s179_s26 = scalar_select %p178_p7, %s1222_s23, 56  ;;  %v968_v2 = vld [vmem:[%s1501_s1 + $0x8] sm:$0xff]  ;;  %vm331_vm0 = vcmask 523264   ;;  %vm489_vm1 = vcmask 130048  }
  0x11   : > { %381 = vmatpush.bf16.msra.mxu0 %v970_v0  ;;  %972 = vmatpush.bf16.msra.mxu1 %v970_v0  ;;  %v967_v3 = vld [vmem:[%s1501_s1] sm:$0xff]  ;;  %s527_s12 = ssub.s32 (%p1214_p4), 57, %s1222_s23  ;;  %s971_s17 = smul.u32 (%p1214_p4), 232, %s1202_s15 }
  0x12   : > { %973 = vmatpush.bf16.msra.mxu2 %v970_v0  ;;  %974 = vmatpush.bf16.msra.mxu3 %v970_v0  ;;  %s853_s29 = sshll.u32 %s179_s26, 2  ;;  %v1274_v21 = vld [vmem:[%s1502_s2] ss:$0 sm:$0xff]  ;;  %p528_p8 = scmp.lt.s32.totalorder (%p1214_p4), %s527_s12, 29 }
  0x13   : > { %s1238_s7 = scalar_lea.vmem %s1500_s0, %s853_s29  ;;  %s1372_s22 = scalar_lea.vmem (%p1214_p4), %s1503_s3, %s971_s17  }
  0x14   : > { %v953_v4 = vld [vmem:[%s1238_s7] sm:$0xff]  ;;  %v954_v8 = vld [vmem:[%s1238_s7 + $0x8] sm:$0xff]  ;;  %v221_v12 = vld [vmem:[%s1238_s7 + $0x70] sm:$0xf] }
  0x15   : > { %382 = vmatpush.bf16.msra.mxu0 %v969_v1  ;;  %975 = vmatpush.bf16.msra.mxu1 %v969_v1  ;;  %v957_v5 = vld [vmem:[%s1238_s7 + $0x20] sm:$0xff]  ;;  %v958_v9 = vld [vmem:[%s1238_s7 + $0x28] sm:$0xff]  ;;  %v291_v13 = vunpack.c.l.b16 %v221_v12  ;;  %v955_v14 = vld [vmem:[%s1238_s7 + $0x10] sm:$0xff] }
  0x16   : > { %976 = vmatpush.bf16.msra.mxu2 %v969_v1  ;;  %977 = vmatpush.bf16.msra.mxu3 %v969_v1  ;;  %v961_v6 = vld [vmem:[%s1238_s7 + $0x40] sm:$0xff]  ;;  %v962_v10 = vld [vmem:[%s1238_s7 + $0x48] sm:$0xff]  ;;  %v959_v15 = vld [vmem:[%s1238_s7 + $0x30] sm:$0xff] }
  0x17   : > { %v965_v7 = vld [vmem:[%s1238_s7 + $0x60] sm:$0xff]  ;;  %v966_v11 = vld [vmem:[%s1238_s7 + $0x68] sm:$0xff]  ;;  %v963_v16 = vld [vmem:[%s1238_s7 + $0x50] sm:$0xff]  ;;  %v306_v17 = vpack.c.b16 %v291_v13, %v291_v13 }
  0x18   : > { %v956_v18 = vld [vmem:[%s1238_s7 + $0x18] sm:$0xff] }
  0x19   : > { %383 = vmatpush.bf16.msra.mxu0 %v968_v2  ;;  %978 = vmatpush.bf16.msra.mxu1 %v968_v2  ;;  %v960_v19 = vld [vmem:[%s1238_s7 + $0x38] sm:$0xff] }
  0x1a   : > { %979 = vmatpush.bf16.msra.mxu2 %v968_v2  ;;  %980 = vmatpush.bf16.msra.mxu3 %v968_v2  ;;  %v964_v20 = vld [vmem:[%s1238_s7 + $0x58] sm:$0xff] }
  0x1d   : > { %384 = vmatpush.bf16.msra.mxu0 %v967_v3  ;;  %981 = vmatpush.bf16.msra.mxu1 %v967_v3 }
  0x1e   : > { %982 = vmatpush.bf16.msra.mxu2 %v967_v3  ;;  %983 = vmatpush.bf16.msra.mxu3 %v967_v3 }
  0x20   : > { %926 = vmatmul.msk.bf16.vlgmr.msra.gmra.mxu0 %vm331_vm0, %v953_v4  ;;  %930 = vmatmul.msk.bf16.vlgmr.msra.gmra.mxu1 %vm331_vm0, %v957_v5 }
  0x21   : > { %934 = vmatmul.msk.bf16.vlgmr.msra.gmra.mxu2 %vm331_vm0, %v961_v6  ;;  %938 = vmatmul.msk.bf16.vlgmr.msra.gmra.mxu3 %vm331_vm0, %v965_v7 }
  0x30   : > { %927 = vmatmul.msk.bf16.gmra.mxu0 %vm331_vm0, %v954_v8  ;;  %931 = vmatmul.msk.bf16.gmra.mxu1 %vm331_vm0, %v958_v9 }
  0x31   : > { %935 = vmatmul.msk.bf16.gmra.mxu2 %vm331_vm0, %v962_v10  ;;  %939 = vmatmul.msk.bf16.gmra.mxu3 %vm331_vm0, %v966_v11 }
  0x40   : > { %928 = vmatmul.msk.bf16.gmra.mxu0 %vm331_vm0, %v955_v14  ;;  %932 = vmatmul.msk.bf16.gmra.mxu1 %vm331_vm0, %v959_v15 }
  0x41   : > { %936 = vmatmul.msk.bf16.gmra.mxu2 %vm331_vm0, %v963_v16  ;;  %940 = vmatmul.msk.bf16.gmra.mxu3 %vm331_vm0, %v306_v17 }
  0x50   : > { %929 = vmatmul.msk.bf16.gmra.mxu0 %vm331_vm0, %v956_v18  ;;  %933 = vmatmul.msk.bf16.gmra.mxu1 %vm331_vm0, %v960_v19 }
  0x51   : > { %937 = vmatmul.msk.bf16.gmra.mxu2 %vm331_vm0, %v964_v20 }
  0x9d   : > { %v386_v22 = vpop.f32.mrf.mxu0  ;;  %v406_v23 = vpop.f32.mrf.mxu1 }
  0x9e   : > { %v387_v24 = vadd.f32 %v1274_v21, %v386_v22  ;;  %v407_v25 = vadd.f32 %v1274_v21, %v406_v23 }
  0xa0   : > { %v460_v26 = vmax.f32 %v387_v24, 0.0  ;;  %v468_v27 = vmax.f32 %v407_v25, 0.0 }
  0xa2   : > { %490 = vst.msk [vmem:[%s1278_s14] sm:$0xff] %vm489_vm1, %v460_v26 }
  0xa3   : > { %498 = vst.msk [vmem:[%s1278_s14 + $0x40] sm:$0xff] %vm489_vm1, %v468_v27 }
  0xa4   : > { %v426_v28 = vpop.f32.mrf.mxu2  ;;  %v446_v29 = vpop.f32.mrf.mxu3 }
  0xa5   : > { %v427_v30 = vadd.f32 %v1274_v21, %v426_v28  ;;  %v388_v31 = vpop.f32.mrf.mxu0  ;;  %v408_v32 = vpop.f32.mrf.mxu1  ;;  %v447_v33 = vadd.f32 %v1274_v21, %v446_v29 }
  0xa6   : > { %v389_v34 = vadd.f32 %v1274_v21, %v388_v31  ;;  %v409_v35 = vadd.f32 %v1274_v21, %v408_v32 }
  0xa7   : > { %v476_v36 = vmax.f32 %v427_v30, 0.0  ;;  %v484_v39 = vmax.f32 %v447_v33, 0.0 }
  0xa8   : > { %v461_v37 = vmax.f32 %v389_v34, 0.0  ;;  %v469_v38 = vmax.f32 %v409_v35, 0.0 }
  0xa9   : > { %506 = vst.msk [vmem:[%s1278_s14 + $0x80] sm:$0xff] %vm489_vm1, %v476_v36 }
  0xaa   : > { %491 = vst.msk [vmem:[%s1278_s14 + $0x8] sm:$0xff] %vm489_vm1, %v461_v37 }
  0xab   : > { %499 = vst.msk [vmem:[%s1278_s14 + $0x48] sm:$0xff] %vm489_vm1, %v469_v38 }
  0xac   : > { %v428_v40 = vpop.f32.mrf.mxu2  ;;  %514 = vst.msk [vmem:[%s1278_s14 + $0xc0] sm:$0xff] %vm489_vm1, %v484_v39  ;;  %v448_v41 = vpop.f32.mrf.mxu3 }
  0xad   : > { %v429_v42 = vadd.f32 %v1274_v21, %v428_v40  ;;  %v391_v43 = vpop.f32.mrf.mxu0  ;;  %v411_v44 = vpop.f32.mrf.mxu1  ;;  %v449_v45 = vadd.f32 %v1274_v21, %v448_v41 }
  0xae   : > { %v392_v46 = vadd.f32 %v1274_v21, %v391_v43  ;;  %v412_v47 = vadd.f32 %v1274_v21, %v411_v44 }
  0xaf   : > { %v477_v48 = vmax.f32 %v429_v42, 0.0  ;;  %v485_v51 = vmax.f32 %v449_v45, 0.0 }
  0xb0   : > { %v462_v49 = vmax.f32 %v392_v46, 0.0  ;;  %v470_v50 = vmax.f32 %v412_v47, 0.0 }
  0xb1   : > { %507 = vst.msk [vmem:[%s1278_s14 + $0x88] sm:$0xff] %vm489_vm1, %v477_v48 }
  0xb2   : > { %492 = vst.msk [vmem:[%s1278_s14 + $0x10] sm:$0xff] %vm489_vm1, %v462_v49 }
  0xb3   : > { %500 = vst.msk [vmem:[%s1278_s14 + $0x50] sm:$0xff] %vm489_vm1, %v470_v50 }
  0xb4   : > { %v431_v52 = vpop.f32.mrf.mxu2  ;;  %515 = vst.msk [vmem:[%s1278_s14 + $0xc8] sm:$0xff] %vm489_vm1, %v485_v51  ;;  %v451_v53 = vpop.f32.mrf.mxu3 }
  0xb5   : > { %v432_v54 = vadd.f32 %v1274_v21, %v431_v52  ;;  %v393_v55 = vpop.f32.mrf.mxu0  ;;  %v413_v56 = vpop.f32.mrf.mxu1  ;;  %v452_v57 = vadd.f32 %v1274_v21, %v451_v53 }
  0xb6   : > { %v394_v58 = vadd.f32 %v1274_v21, %v393_v55  ;;  %v414_v59 = vadd.f32 %v1274_v21, %v413_v56 }
  0xb7   : > { %v478_v60 = vmax.f32 %v432_v54, 0.0  ;;  %v486_v63 = vmax.f32 %v452_v57, 0.0 }
  0xb8   : > { %v463_v61 = vmax.f32 %v394_v58, 0.0  ;;  %v471_v62 = vmax.f32 %v414_v59, 0.0 }
  0xb9   : > { %508 = vst.msk [vmem:[%s1278_s14 + $0x90] sm:$0xff] %vm489_vm1, %v478_v60 }
  0xba   : > { %493 = vst.msk [vmem:[%s1278_s14 + $0x18] sm:$0xff] %vm489_vm1, %v463_v61 }
  0xbb   : > { %501 = vst.msk [vmem:[%s1278_s14 + $0x58] sm:$0xff] %vm489_vm1, %v471_v62 }
  0xbc   : > { %v433_v0 = vpop.f32.mrf.mxu2  ;;  %516 = vst.msk [vmem:[%s1278_s14 + $0xd0] sm:$0xff] %vm489_vm1, %v486_v63  ;;  %v453_v1 = vpop.f32.mrf.mxu3 }
  0xbd   : > { %v434_v2 = vadd.f32 %v1274_v21, %v433_v0  ;;  %v396_v3 = vpop.f32.mrf.mxu0  ;;  %v416_v4 = vpop.f32.mrf.mxu1  ;;  %v454_v5 = vadd.f32 %v1274_v21, %v453_v1 }
  0xbe   : > { %v397_v6 = vadd.f32 %v1274_v21, %v396_v3  ;;  %v417_v7 = vadd.f32 %v1274_v21, %v416_v4 }
  0xbf   : > { %v479_v8 = vmax.f32 %v434_v2, 0.0  ;;  %v487_v11 = vmax.f32 %v454_v5, 0.0 }
  0xc0   : > { %v464_v9 = vmax.f32 %v397_v6, 0.0  ;;  %v472_v10 = vmax.f32 %v417_v7, 0.0 }
  0xc1   : > { %509 = vst.msk [vmem:[%s1278_s14 + $0x98] sm:$0xff] %vm489_vm1, %v479_v8 }
  0xc2   : > { %494 = vst.msk [vmem:[%s1278_s14 + $0x20] sm:$0xff] %vm489_vm1, %v464_v9 }
  0xc3   : > { %502 = vst.msk [vmem:[%s1278_s14 + $0x60] sm:$0xff] %vm489_vm1, %v472_v10 }
  0xc4   : > { %v436_v12 = vpop.f32.mrf.mxu2  ;;  %517 = vst.msk [vmem:[%s1278_s14 + $0xd8] sm:$0xff] %vm489_vm1, %v487_v11  ;;  %v456_v13 = vpop.f32.mrf.mxu3 }
  0xc5   : > { %v437_v14 = vadd.f32 %v1274_v21, %v436_v12  ;;  %v398_v15 = vpop.f32.mrf.mxu0  ;;  %v418_v16 = vpop.f32.mrf.mxu1  ;;  %v457_v17 = vadd.f32 %v1274_v21, %v456_v13 }
  0xc6   : > { %v399_v18 = vadd.f32 %v1274_v21, %v398_v15  ;;  %v419_v19 = vadd.f32 %v1274_v21, %v418_v16 }
  0xc7   : > { %v480_v20 = vmax.f32 %v437_v14, 0.0  ;;  %v488_v24 = vmax.f32 %v457_v17, 0.0 }
  0xc8   : > { %v465_v22 = vmax.f32 %v399_v18, 0.0  ;;  %v473_v23 = vmax.f32 %v419_v19, 0.0 }
  0xc9   : > { %510 = vst.msk [vmem:[%s1278_s14 + $0xa0] sm:$0xff] %vm489_vm1, %v480_v20 }
  0xca   : > { %495 = vst.msk [vmem:[%s1278_s14 + $0x28] sm:$0xff] %vm489_vm1, %v465_v22 }
  0xcb   : > { %503 = vst.msk [vmem:[%s1278_s14 + $0x68] sm:$0xff] %vm489_vm1, %v473_v23 }
  0xcc   : > { %v438_v25 = vpop.f32.mrf.mxu2  ;;  %518 = vst.msk [vmem:[%s1278_s14 + $0xe0] sm:$0xff] %vm489_vm1, %v488_v24  ;;  %v458_v26 = vpop.f32.mrf.mxu3 }
  0xcd   : > { %v439_v27 = vadd.f32 %v1274_v21, %v438_v25  ;;  %v401_v28 = vpop.f32.mrf.mxu0  ;;  %v421_v29 = vpop.f32.mrf.mxu1 }
  0xce   : > { %v402_v30 = vadd.f32 %v1274_v21, %v401_v28  ;;  %v422_v31 = vadd.f32 %v1274_v21, %v421_v29 }
  0xcf   : > { %v481_v32 = vmax.f32 %v439_v27, 0.0 }
  0xd0   : > { %v466_v33 = vmax.f32 %v402_v30, 0.0  ;;  %v474_v34 = vmax.f32 %v422_v31, 0.0 }
  0xd1   : > { %511 = vst.msk [vmem:[%s1278_s14 + $0xa8] sm:$0xff] %vm489_vm1, %v481_v32 }
  0xd2   : > { %496 = vst.msk [vmem:[%s1278_s14 + $0x30] sm:$0xff] %vm489_vm1, %v466_v33 }
  0xd3   : > { %504 = vst.msk [vmem:[%s1278_s14 + $0x70] sm:$0xff] %vm489_vm1, %v474_v34 }
  0xd4   : > { %v441_v35 = vpop.f32.mrf.mxu2 }
  0xd5   : > { %v442_v36 = vadd.f32 %v1274_v21, %v441_v35  ;;  %v403_v37 = vpop.f32.mrf.mxu0  ;;  %v423_v38 = vpop.f32.mrf.mxu1 }
  0xd6   : > { %v404_v39 = vadd.f32 %v1274_v21, %v403_v37  ;;  %v424_v40 = vadd.f32 %v1274_v21, %v423_v38 }
  0xd7   : > { %v482_v41 = vmax.f32 %v442_v36, 0.0 }
  0xd8   : > { %v467_v42 = vmax.f32 %v404_v39, 0.0  ;;  %v475_v43 = vmax.f32 %v424_v40, 0.0 }
  0xd9   : > { %512 = vst.msk [vmem:[%s1278_s14 + $0xb0] sm:$0xff] %vm489_vm1, %v482_v41 }
  0xda   : > { %497 = vst.msk [vmem:[%s1278_s14 + $0x38] sm:$0xff] %vm489_vm1, %v467_v42 }
  0xdb   : > { %505 = vst.msk [vmem:[%s1278_s14 + $0x78] sm:$0xff] %vm489_vm1, %v475_v43 }
  0xdc   : > { %v443_v44 = vpop.f32.mrf.mxu2 }
  0xdd   : > { %v444_v45 = vadd.f32 %v1274_v21, %v443_v44  ;;  %525 = sbr.rel (!%p1214_p4) target bundleno = 302 (0x12e), region = 36 }
  0xdf   : > { %v483_v46 = vmax.f32 %v444_v45, 0.0 }
  0xe1   : > { %513 = vst.msk [vmem:[%s1278_s14 + $0xb8] sm:$0xff] %vm489_vm1, %v483_v46 }
  0xe2   : > { %s1514_s12 = smov (!%p528_p8, %s527_s12), 29 }
  0xe3   : > { %s941_s24 = sshll.u32 %s1514_s12, 3 }
  0xe4   : > { %p944_p9 = scmp.eq.s32.totalorder %s941_s24, 0 }
  0xe5   : > { %1075 = sdivrem.u32 (!%p944_p9), %s1514_s12, 29 }
  0xe6   : > { %536 = sbr.rel (%p944_p9) target bundleno = 302 (0x12e), region = 40 }
  0xee   : > { %s1378_s20 = spop.drf %1075 }
  0xef   : > { %s1077_s25 = spop.drf %1075  ;;  %p945_p10 = scmp.le.s32.totalorder %s1378_s20, 0 }
  0xf0   : > { %s1505_s15 = smov (!%p945_p10), %s1372_s22  ;;  %s1506_s23 = smov (!%p945_p10), %s1278_s14 }
  0xf1   : > { %805 = sbr.rel (%p945_p10) target bundleno = 276 (0x114), region = 116  ;;  %s1387_s26 = smov (!%p945_p10), 0  }
  0xf2   : > { %s1389_s27 = smov (!%p945_p10), 0  }
  0xf6 LB: >> { %v657_v21 = vld [vmem:[%s1143_s23] sm:$0xff]  ;;  %v659_v47 = vld [vmem:[%s1143_s23 + $0x8] sm:$0xff]  ;;  %v661_v48 = vld [vmem:[%s1143_s23 + $0x10] sm:$0xff]  ;;  %s715_s28 = sadd.s32 1, %s1147_s26  ;;  %s651_s27 = sadd.s32 1, %s1151_s27   ;;  %s1151_s27 = sphi %s1389_s27, %s651_s27   ;;  %s1147_s26 = sphi %s1387_s26, %s1509_s26   ;;  %s1143_s23 = sphi %s1506_s23, %s1508_s23   ;;  %s1139_s15 = sphi %s1505_s15, %s1507_s15  }
  0xf7   : >> { %658 = vst [vmem:[%s1139_s15] sm:$0xff] %v657_v21  ;;  %v663_v49 = vld [vmem:[%s1143_s23 + $0x18] sm:$0xff]  ;;  %p716_p11 = scmp.ge.s32.totalorder %s715_s28, %s1378_s20  ;;  %v665_v50 = vld [vmem:[%s1143_s23 + $0x20] sm:$0xff]  ;;  %v667_v51 = vld [vmem:[%s1143_s23 + $0x28] sm:$0xff]  ;;  %p650_p12 = scmp.ge.s32.totalorder %s651_s27, %s1378_s20 }
  0xf8   : >> { %660 = vst [vmem:[%s1139_s15 + $0x8] sm:$0xff] %v659_v47  ;;  %v669_v52 = vld [vmem:[%s1143_s23 + $0x30] sm:$0xff]  ;;  %v671_v53 = vld [vmem:[%s1143_s23 + $0x38] sm:$0xff]  ;;  %v673_v54 = vld [vmem:[%s1143_s23 + $0x40] sm:$0xff] }
  0xf9   : >> { %662 = vst [vmem:[%s1139_s15 + $0x10] sm:$0xff] %v661_v48  ;;  %s1516_s28 = smov (%p716_p11, %s715_s28), 0  ;;  %v675_v55 = vld [vmem:[%s1143_s23 + $0x48] sm:$0xff]  ;;  %v677_v56 = vld [vmem:[%s1143_s23 + $0x50] sm:$0xff]  ;;  %v679_v57 = vld [vmem:[%s1143_s23 + $0x58] sm:$0xff] }
  0xfa   : >> { %664 = vst [vmem:[%s1139_s15 + $0x18] sm:$0xff] %v663_v49  ;;  %s718_s29 = smul.u32 232, %s1516_s28  ;;  %v681_v58 = vld [vmem:[%s1143_s23 + $0x60] sm:$0xff]  ;;  %v683_v59 = vld [vmem:[%s1143_s23 + $0x68] sm:$0xff]  ;;  %v685_v60 = vld [vmem:[%s1143_s23 + $0x70] sm:$0xff]  ;;  %s1509_s26 = smov %s1516_s28 }
  0xfb   : >> { %666 = vst [vmem:[%s1139_s15 + $0x20] sm:$0xff] %v665_v50  ;;  %v687_v61 = vld [vmem:[%s1143_s23 + $0x78] sm:$0xff]  ;;  %v689_v62 = vld [vmem:[%s1143_s23 + $0x80] sm:$0xff]  ;;  %v691_v63 = vld [vmem:[%s1143_s23 + $0x88] sm:$0xff] }
  0xfc   : >> { %668 = vst [vmem:[%s1139_s15 + $0x28] sm:$0xff] %v667_v51  ;;  %s1423_s30 = scalar_lea.vmem %s1278_s14, %s718_s29 [#allocation2]   ;;  %s1426_s4 = scalar_lea.vmem %s1372_s22, %s718_s29   ;;  %v693_v0 = vld [vmem:[%s1143_s23 + $0x90] sm:$0xff]  ;;  %v695_v1 = vld [vmem:[%s1143_s23 + $0x98] sm:$0xff]  ;;  %v697_v2 = vld [vmem:[%s1143_s23 + $0xa0] sm:$0xff] }
  0xfd   : >> { %670 = vst [vmem:[%s1139_s15 + $0x30] sm:$0xff] %v669_v52  ;;  %v699_v3 = vld [vmem:[%s1143_s23 + $0xa8] sm:$0xff]  ;;  %v701_v4 = vld [vmem:[%s1143_s23 + $0xb0] sm:$0xff]  ;;  %v703_v5 = vld [vmem:[%s1143_s23 + $0xb8] sm:$0xff] }
  0xfe   : >> { %672 = vst [vmem:[%s1139_s15 + $0x38] sm:$0xff] %v671_v53  ;;  %v705_v6 = vld [vmem:[%s1143_s23 + $0xc0] sm:$0xff]  ;;  %v707_v7 = vld [vmem:[%s1143_s23 + $0xc8] sm:$0xff]  ;;  %v709_v8 = vld [vmem:[%s1143_s23 + $0xd0] sm:$0xff] }
  0xff   : >> { %674 = vst [vmem:[%s1139_s15 + $0x40] sm:$0xff] %v673_v54  ;;  %v711_v9 = vld [vmem:[%s1143_s23 + $0xd8] sm:$0xff]  ;;  %v713_v10 = vld [vmem:[%s1143_s23 + $0xe0] sm:$0xff]  ;;  %s1508_s23 = smov %s1423_s30 }
 0x100   : >> { %676 = vst [vmem:[%s1139_s15 + $0x48] sm:$0xff] %v675_v55 }
 0x101   : >> { %678 = vst [vmem:[%s1139_s15 + $0x50] sm:$0xff] %v677_v56 }
 0x102   : >> { %680 = vst [vmem:[%s1139_s15 + $0x58] sm:$0xff] %v679_v57 }
 0x103   : >> { %682 = vst [vmem:[%s1139_s15 + $0x60] sm:$0xff] %v681_v58 }
 0x104   : >> { %684 = vst [vmem:[%s1139_s15 + $0x68] sm:$0xff] %v683_v59 }
 0x105   : >> { %686 = vst [vmem:[%s1139_s15 + $0x70] sm:$0xff] %v685_v60 }
 0x106   : >> { %688 = vst [vmem:[%s1139_s15 + $0x78] sm:$0xff] %v687_v61 }
 0x107   : >> { %690 = vst [vmem:[%s1139_s15 + $0x80] sm:$0xff] %v689_v62 }
 0x108   : >> { %692 = vst [vmem:[%s1139_s15 + $0x88] sm:$0xff] %v691_v63 }
 0x109   : >> { %694 = vst [vmem:[%s1139_s15 + $0x90] sm:$0xff] %v693_v0 }
 0x10a   : >> { %696 = vst [vmem:[%s1139_s15 + $0x98] sm:$0xff] %v695_v1 }
 0x10b   : >> { %698 = vst [vmem:[%s1139_s15 + $0xa0] sm:$0xff] %v697_v2 }
 0x10c   : >> { %700 = vst [vmem:[%s1139_s15 + $0xa8] sm:$0xff] %v699_v3 }
 0x10d   : >> { %702 = vst [vmem:[%s1139_s15 + $0xb0] sm:$0xff] %v701_v4 }
 0x10e   : >> { %704 = vst [vmem:[%s1139_s15 + $0xb8] sm:$0xff] %v703_v5 }
 0x10f   : >> { %706 = vst [vmem:[%s1139_s15 + $0xc0] sm:$0xff] %v705_v6  ;;  %653 = sbr.rel (!%p650_p12) target bundleno = 246 (0xf6), region = 122 }
 0x110   : >> { %708 = vst [vmem:[%s1139_s15 + $0xc8] sm:$0xff] %v707_v7 }
 0x111   : >> { %710 = vst [vmem:[%s1139_s15 + $0xd0] sm:$0xff] %v709_v8 }
 0x112   : >> { %712 = vst [vmem:[%s1139_s15 + $0xd8] sm:$0xff] %v711_v9 }
 0x113   : >> { %714 = vst [vmem:[%s1139_s15 + $0xe0] sm:$0xff] %v713_v10  ;;  %s1507_s15 = smov %s1426_s4 }
 0x114 PF: > { %1078 = sdivrem.u32 %s1514_s12, 29 }
 0x115   : > { %s946_s5 = smul.u32 232, %s1378_s20 }
 0x117   : > { %s1485_s6 = scalar_lea.vmem %s1278_s14, %s946_s5 [#allocation2]   ;;  %s728_s7 = scalar_lea.vmem %s1372_s22, %s946_s5  }
 0x11d   : > { %s1079_s8 = spop.drf %1078 }
 0x11e   : > { %s1080_s9 = spop.drf %1078 }
 0x11f   : > { %p948_p13 = scmp.le.s32.totalorder %s1080_s9, 0 }
 0x120   : > { %s1153_s10 = smov (!%p948_p13), %s728_s7   ;;  %s1157_s11 = smov (!%p948_p13), %s1485_s6  }
 0x121   : > { %819 = sbr.rel (%p948_p13) target bundleno = 302 (0x12e), region = 127  ;;  %s1161_s17 = smov (!%p948_p13), 0  }
 0x122   : > { %s1165_s18 = smov (!%p948_p13), 0  }
 0x126 LB: >> { %v738_v11 = vld [vmem:[%s1159_s11] sm:$0xff]  ;;  %s740_s14 = sadd.s32 1, %s1163_s17  ;;  %s732_s18 = sadd.s32 1, %s1167_s18   ;;  %s1167_s18 = sphi %s1165_s18, %s732_s18   ;;  %s1163_s17 = sphi %s1161_s17, %s1162_s17   ;;  %s1159_s11 = sphi %s1157_s11, %s745_s11   ;;  %s1155_s10 = sphi %s1153_s10, %s746_s10  }
 0x127   : >> { %739 = vst [vmem:[%s1155_s10] sm:$0xff] %v738_v11  ;;  %p741_p0 = scmp.ge.s32.totalorder %s740_s14, %s1080_s9  ;;  %p731_p1 = scmp.ge.s32.totalorder %s732_s18, %s1080_s9 }
 0x129   : >> { %s1518_s14 = smov (%p741_p0, %s740_s14), 0  ;;  %734 = sbr.rel (!%p731_p1) target bundleno = 294 (0x126), region = 133 }
 0x12a   : >> { %s949_s12 = sshll.u32 %s1518_s14, 3  ;;  %s1162_s17 = smov %s1518_s14  }
 0x12b   : >> { %s745_s11 = scalar_lea.vmem %s1485_s6, %s949_s12 [#allocation2]   ;;  %s746_s10 = scalar_lea.vmem %s728_s7, %s949_s12  }
 0x12e PF: > { %p10_p2 = scmp.ge.s32.totalorder %s1204_s16, 4   ;;  %s1510_s12 = smov %s1131_s13 }
 0x12f   : > { %s1511_s13 = smov %s1212_s19  ;;  %s1512_s14 = smov %s1204_s16 }
 0x130   :  { %12 = sbr.rel (!%p10_p2) target bundleno = 2 (0x2), region = 144 }

// kernel: squeezenet_forward.21
= control target key start
LH: loop header
LB: loop body
LE: loop exit
PB: predicated region body
PF: predicated region fallthrough
CT: control target
= control target key end

     0   :  { %s1927_s6 = smov 0   ;;  %s1929_s7 = smov 0   ;;  %s2864_s0 = inlined_call_operand.vmem [shape: f32[9,450,64], index: 0, kind: input, shape index: {}]   ;;  %s2865_s1 = inlined_call_operand.vmem [shape: f32[450,64], index: 1, kind: output, shape index: {}]  }
   0x1   :  { %s1931_s8 = smov 0  }
   0x2 LB: > { %s1943_s9 = sadd.s32 4294967295, %s1851_s8   ;;  %s1946_s10 = sadd.s32 1, %s1851_s8   ;;  %s1851_s8 = sphi %s1931_s8, %s2883_s8   ;;  %s1847_s7 = sphi %s1929_s7, %s2882_s7   ;;  %s1843_s6 = sphi %s1927_s6, %s2881_s6  }
   0x3   : > { %s15_s11 = ssub.s32 %s1851_s8, %s1946_s10  ;;  %s18_s12 = sadd.s32 1, %s1847_s7 }
   0x4   : > { %p16_p0 = scmp.eq.s32.totalorder %s15_s11, 0  ;;  %p25_p1 = scmp.ne.s32.totalorder %s1847_s7, %s1843_s6 }
   0x5   : > { %p26_p2 = scmp.eq.s32.totalorder %s1851_s8, 0  ;;  %p55_p3 = scmp.eq.s32.totalorder %s1943_s9, 1 }
   0x6   : > { %s1956_s13 = scalar_select %p16_p0, %s1847_s7, %s18_s12  }
   0x7   : > { %p27_p4 = por %p26_p2, %p25_p1  ;;  %p1958_p5 = por %p55_p3, %p25_p1 }
   0x8   : > { %p1573_p6 = scmp.ge.s32.totalorder %s1851_s8, 2 }
   0xa   : > { %77 = sbr.rel (%p1573_p6) target bundleno = 93 (0x5d), region = 16 }
   0xf   : > { %80 = sbr.rel (!%p27_p4) target bundleno = 93 (0x5d), region = 20  ;;  %s82_s15 = sand.u32 (%p27_p4), 1, %s1847_s7  }
  0x10   : > { %s85_s16 = smul.u32 (%p27_p4), 29, %s1851_s8 }
  0x11   : > { %s1603_s17 = smul.u32 (%p27_p4), 2088, %s82_s15 }
  0x12   : > { %s86_s18 = ssub.s32 (%p27_p4), 57, %s85_s16  ;;  %s1599_s19 = smul.u32 (%p27_p4), 232, %s1851_s8 }
  0x13   : > { %p87_p7 = scmp.lt.s32.totalorder (%p27_p4), %s86_s18, 29  ;;  %s1974_s24 = scalar_lea.vmem (%p27_p4), [#allocation2], %s1603_s17  }
  0x14   : > { %s1969_s22 = scalar_lea.vmem %s2864_s0, %s1599_s19  }
  0x15   : > { %s2885_s18 = smov (!%p87_p7, %s86_s18), 29 }
  0x16   : > { %s89_s23 = smul.u32 72, %s2885_s18 }
  0x18   : > { %p1576_p8 = scmp.eq.s32.totalorder %s89_s23, 0 }
  0x19   : > { %s1977_s25 = sshrl.u32 (!%p1576_p8), %s2885_s18, 2 }
  0x1a   : > { %95 = sbr.rel (%p1576_p8) target bundleno = 93 (0x5d), region = 24  ;;  %p1577_p9 = scmp.le.s32.totalorder (!%p1576_p8), %s1977_s25, 0 }
  0x1f   : > { %1499 = sbr.rel (%p1577_p9) target bundleno = 73 (0x49), region = 173  ;;  %s2867_s26 = smov (!%p1577_p9), %s1974_s24 }
  0x20   : > { %s2868_s27 = smov (!%p1577_p9), %s1969_s22  ;;  %s1986_s28 = smov (!%p1577_p9), 0  }
  0x21   : > { %s1988_s29 = smov (!%p1577_p9), 0  }
  0x24 LB: >> { %v244_v0 = vld [vmem:[%s1859_s27] sm:$0xff]  ;;  %v246_v1 = vld [vmem:[%s1859_s27 + $0x8] sm:$0xff]  ;;  %v248_v2 = vld [vmem:[%s1859_s27 + $0x10] sm:$0xff]  ;;  %s316_s30 = sadd.s32 1, %s1863_s28  ;;  %s238_s29 = sadd.s32 1, %s1867_s29   ;;  %s1867_s29 = sphi %s1988_s29, %s238_s29   ;;  %s1863_s28 = sphi %s1986_s28, %s2871_s28   ;;  %s1859_s27 = sphi %s2868_s27, %s2870_s27   ;;  %s1855_s26 = sphi %s2867_s26, %s2869_s26  }
  0x25   : >> { %245 = vst [vmem:[%s1855_s26] sm:$0xff] %v244_v0  ;;  %v250_v3 = vld [vmem:[%s1859_s27 + $0x18] sm:$0xff]  ;;  %p317_p10 = scmp.ge.s32.totalorder %s316_s30, %s1977_s25  ;;  %v252_v4 = vld [vmem:[%s1859_s27 + $0x1c8] sm:$0xff]  ;;  %v254_v5 = vld [vmem:[%s1859_s27 + $0x1d0] sm:$0xff]  ;;  %p237_p11 = scmp.ge.s32.totalorder %s238_s29, %s1977_s25 }
  0x26   : >> { %247 = vst [vmem:[%s1855_s26 + $0x8] sm:$0xff] %v246_v1  ;;  %v256_v6 = vld [vmem:[%s1859_s27 + $0x1d8] sm:$0xff]  ;;  %v258_v7 = vld [vmem:[%s1859_s27 + $0x1e0] sm:$0xff]  ;;  %v260_v8 = vld [vmem:[%s1859_s27 + $0x390] sm:$0xff] }
  0x27   : >> { %249 = vst [vmem:[%s1855_s26 + $0x10] sm:$0xff] %v248_v2  ;;  %s2887_s30 = smov (%p317_p10, %s316_s30), 0  ;;  %v262_v9 = vld [vmem:[%s1859_s27 + $0x398] sm:$0xff]  ;;  %v264_v10 = vld [vmem:[%s1859_s27 + $0x3a0] sm:$0xff]  ;;  %v266_v11 = vld [vmem:[%s1859_s27 + $0x3a8] sm:$0xff] }
  0x28   : >> { %251 = vst [vmem:[%s1855_s26 + $0x18] sm:$0xff] %v250_v3  ;;  %s1578_s2 = sshll.u32 %s2887_s30, 5  ;;  %v268_v12 = vld [vmem:[%s1859_s27 + $0x558] sm:$0xff]  ;;  %v270_v13 = vld [vmem:[%s1859_s27 + $0x560] sm:$0xff]  ;;  %v272_v14 = vld [vmem:[%s1859_s27 + $0x568] sm:$0xff]  ;;  %s2871_s28 = smov %s2887_s30 }
  0x29   : >> { %253 = vst [vmem:[%s1855_s26 + $0xe8] sm:$0xff] %v252_v4  ;;  %s2020_s3 = scalar_lea.vmem %s1969_s22, %s1578_s2   ;;  %s2023_s4 = scalar_lea.vmem %s1974_s24, %s1578_s2 [#allocation2]   ;;  %v274_v15 = vld [vmem:[%s1859_s27 + $0x570] sm:$0xff]  ;;  %v276_v16 = vld [vmem:[%s1859_s27 + $0x720] sm:$0xff]  ;;  %v278_v17 = vld [vmem:[%s1859_s27 + $0x728] sm:$0xff] }
  0x2a   : >> { %255 = vst [vmem:[%s1855_s26 + $0xf0] sm:$0xff] %v254_v5  ;;  %v280_v18 = vld [vmem:[%s1859_s27 + $0x730] sm:$0xff]  ;;  %v282_v19 = vld [vmem:[%s1859_s27 + $0x738] sm:$0xff]  ;;  %v284_v20 = vld [vmem:[%s1859_s27 + $0x8e8] sm:$0xff] }
  0x2b   : >> { %257 = vst [vmem:[%s1855_s26 + $0xf8] sm:$0xff] %v256_v6  ;;  %v286_v21 = vld [vmem:[%s1859_s27 + $0x8f0] sm:$0xff]  ;;  %v288_v22 = vld [vmem:[%s1859_s27 + $0x8f8] sm:$0xff]  ;;  %v290_v23 = vld [vmem:[%s1859_s27 + $0x900] sm:$0xff] }
  0x2c   : >> { %259 = vst [vmem:[%s1855_s26 + $0x100] sm:$0xff] %v258_v7  ;;  %v292_v24 = vld [vmem:[%s1859_s27 + $0xab0] sm:$0xff]  ;;  %v294_v25 = vld [vmem:[%s1859_s27 + $0xab8] sm:$0xff]  ;;  %v296_v26 = vld [vmem:[%s1859_s27 + $0xac0] sm:$0xff] }
  0x2d   : >> { %261 = vst [vmem:[%s1855_s26 + $0x1d0] sm:$0xff] %v260_v8  ;;  %v298_v27 = vld [vmem:[%s1859_s27 + $0xac8] sm:$0xff]  ;;  %v300_v28 = vld [vmem:[%s1859_s27 + $0xc78] sm:$0xff]  ;;  %v302_v29 = vld [vmem:[%s1859_s27 + $0xc80] sm:$0xff] }
  0x2e   : >> { %263 = vst [vmem:[%s1855_s26 + $0x1d8] sm:$0xff] %v262_v9  ;;  %v304_v30 = vld [vmem:[%s1859_s27 + $0xc88] sm:$0xff]  ;;  %v306_v31 = vld [vmem:[%s1859_s27 + $0xc90] sm:$0xff]  ;;  %v308_v32 = vld [vmem:[%s1859_s27 + $0xe40] sm:$0xff] }
  0x2f   : >> { %265 = vst [vmem:[%s1855_s26 + $0x1e0] sm:$0xff] %v264_v10  ;;  %v310_v33 = vld [vmem:[%s1859_s27 + $0xe48] sm:$0xff]  ;;  %v312_v34 = vld [vmem:[%s1859_s27 + $0xe50] sm:$0xff]  ;;  %v314_v35 = vld [vmem:[%s1859_s27 + $0xe58] sm:$0xff]  ;;  %s2870_s27 = smov %s2020_s3 }
  0x30   : >> { %267 = vst [vmem:[%s1855_s26 + $0x1e8] sm:$0xff] %v266_v11 }
  0x31   : >> { %269 = vst [vmem:[%s1855_s26 + $0x2b8] sm:$0xff] %v268_v12 }
  0x32   : >> { %271 = vst [vmem:[%s1855_s26 + $0x2c0] sm:$0xff] %v270_v13 }
  0x33   : >> { %273 = vst [vmem:[%s1855_s26 + $0x2c8] sm:$0xff] %v272_v14 }
  0x34   : >> { %275 = vst [vmem:[%s1855_s26 + $0x2d0] sm:$0xff] %v274_v15 }
  0x35   : >> { %277 = vst [vmem:[%s1855_s26 + $0x3a0] sm:$0xff] %v276_v16 }
  0x36   : >> { %279 = vst [vmem:[%s1855_s26 + $0x3a8] sm:$0xff] %v278_v17 }
  0x37   : >> { %281 = vst [vmem:[%s1855_s26 + $0x3b0] sm:$0xff] %v280_v18 }
  0x38   : >> { %283 = vst [vmem:[%s1855_s26 + $0x3b8] sm:$0xff] %v282_v19 }
  0x39   : >> { %285 = vst [vmem:[%s1855_s26 + $0x488] sm:$0xff] %v284_v20 }
  0x3a   : >> { %287 = vst [vmem:[%s1855_s26 + $0x490] sm:$0xff] %v286_v21 }
  0x3b   : >> { %289 = vst [vmem:[%s1855_s26 + $0x498] sm:$0xff] %v288_v22 }
  0x3c   : >> { %291 = vst [vmem:[%s1855_s26 + $0x4a0] sm:$0xff] %v290_v23 }
  0x3d   : >> { %293 = vst [vmem:[%s1855_s26 + $0x570] sm:$0xff] %v292_v24 }
  0x3e   : >> { %295 = vst [vmem:[%s1855_s26 + $0x578] sm:$0xff] %v294_v25 }
  0x3f   : >> { %297 = vst [vmem:[%s1855_s26 + $0x580] sm:$0xff] %v296_v26 }
  0x40   : >> { %299 = vst [vmem:[%s1855_s26 + $0x588] sm:$0xff] %v298_v27 }
  0x41   : >> { %301 = vst [vmem:[%s1855_s26 + $0x658] sm:$0xff] %v300_v28 }
  0x42   : >> { %303 = vst [vmem:[%s1855_s26 + $0x660] sm:$0xff] %v302_v29 }
  0x43   : >> { %305 = vst [vmem:[%s1855_s26 + $0x668] sm:$0xff] %v304_v30 }
  0x44   : >> { %307 = vst [vmem:[%s1855_s26 + $0x670] sm:$0xff] %v306_v31  ;;  %240 = sbr.rel (!%p237_p11) target bundleno = 36 (0x24), region = 179 }
  0x45   : >> { %309 = vst [vmem:[%s1855_s26 + $0x740] sm:$0xff] %v308_v32 }
  0x46   : >> { %311 = vst [vmem:[%s1855_s26 + $0x748] sm:$0xff] %v310_v33 }
  0x47   : >> { %313 = vst [vmem:[%s1855_s26 + $0x750] sm:$0xff] %v312_v34 }
  0x48   : >> { %315 = vst [vmem:[%s1855_s26 + $0x758] sm:$0xff] %v314_v35  ;;  %s2869_s26 = smov %s2023_s4 }
  0x49 PF: > { %s2096_s5 = sand.u32 3, %s2885_s18   ;;  %s1600_s11 = sshll.u32 %s1977_s25, 5 }
  0x4a   : > { %s2100_s12 = scalar_lea.vmem %s1969_s22, %s1600_s11   ;;  %s2103_s15 = scalar_lea.vmem %s1974_s24, %s1600_s11 [#allocation2]  }
  0x4b   : > { %p1583_p12 = scmp.le.s32.totalorder %s2096_s5, 0 }
  0x4c   : > { %s2872_s16 = smov (!%p1583_p12), %s2103_s15  ;;  %s2873_s17 = smov (!%p1583_p12), %s2100_s12 }
  0x4d   : > { %1513 = sbr.rel (%p1583_p12) target bundleno = 93 (0x5d), region = 184  ;;  %s2112_s19 = smov (!%p1583_p12), 0  }
  0x4e   : > { %s2114_s20 = smov (!%p1583_p12), 0  }
  0x52 LB: >> { %v339_v36 = vld [vmem:[%s1875_s17] sm:$0xff]  ;;  %v341_v37 = vld [vmem:[%s1875_s17 + $0x1c8] sm:$0xff]  ;;  %v343_v38 = vld [vmem:[%s1875_s17 + $0x390] sm:$0xff]  ;;  %s357_s18 = sadd.s32 1, %s1879_s19  ;;  %s333_s20 = sadd.s32 1, %s1883_s20   ;;  %s1883_s20 = sphi %s2114_s20, %s333_s20   ;;  %s1879_s19 = sphi %s2112_s19, %s2875_s19   ;;  %s1875_s17 = sphi %s2873_s17, %s362_s17   ;;  %s1871_s16 = sphi %s2872_s16, %s2874_s16  }
  0x53   : >> { %340 = vst [vmem:[%s1871_s16] sm:$0xff] %v339_v36  ;;  %v345_v39 = vld [vmem:[%s1875_s17 + $0x558] sm:$0xff]  ;;  %p358_p13 = scmp.ge.s32.totalorder %s357_s18, %s2096_s5  ;;  %v347_v40 = vld [vmem:[%s1875_s17 + $0x720] sm:$0xff]  ;;  %v349_v41 = vld [vmem:[%s1875_s17 + $0x8e8] sm:$0xff]  ;;  %p332_p0 = scmp.ge.s32.totalorder %s333_s20, %s2096_s5 }
  0x54   : >> { %342 = vst [vmem:[%s1871_s16 + $0xe8] sm:$0xff] %v341_v37  ;;  %v351_v42 = vld [vmem:[%s1875_s17 + $0xab0] sm:$0xff]  ;;  %v353_v43 = vld [vmem:[%s1875_s17 + $0xc78] sm:$0xff]  ;;  %v355_v44 = vld [vmem:[%s1875_s17 + $0xe40] sm:$0xff] }
  0x55   : >> { %344 = vst [vmem:[%s1871_s16 + $0x1d0] sm:$0xff] %v343_v38  ;;  %s2889_s18 = smov (%p358_p13, %s357_s18), 0 }
  0x56   : >> { %346 = vst [vmem:[%s1871_s16 + $0x2b8] sm:$0xff] %v345_v39  ;;  %s1584_s21 = sshll.u32 %s2889_s18, 3  ;;  %s2875_s19 = smov %s2889_s18 }
  0x57   : >> { %348 = vst [vmem:[%s1871_s16 + $0x3a0] sm:$0xff] %v347_v40  ;;  %s362_s17 = scalar_lea.vmem %s2100_s12, %s1584_s21   ;;  %s363_s22 = scalar_lea.vmem %s2103_s15, %s1584_s21 [#allocation2]  }
  0x58   : >> { %350 = vst [vmem:[%s1871_s16 + $0x488] sm:$0xff] %v349_v41  ;;  %335 = sbr.rel (!%p332_p0) target bundleno = 82 (0x52), region = 190 }
  0x59   : >> { %352 = vst [vmem:[%s1871_s16 + $0x570] sm:$0xff] %v351_v42 }
  0x5a   : >> { %354 = vst [vmem:[%s1871_s16 + $0x658] sm:$0xff] %v353_v43 }
  0x5b   : >> { %356 = vst [vmem:[%s1871_s16 + $0x740] sm:$0xff] %v355_v44  ;;  %s2874_s16 = smov %s363_s22 }
  0x5d PF: > { %p1586_p1 = scmp.ge.s32.totalorder %s1851_s8, 1  ;;  %p368_p2 = scmp.lt.s32.totalorder %s1851_s8, 3 }
  0x5f   : > { %p369_p3 = pnand %p1586_p1, %p368_p2 }
  0x60   : > { %s375_s23 = sand.u32 (!%p369_p3), 1, %s1843_s6  }
  0x61   : > { %372 = sbr.rel (%p369_p3) target bundleno = 312 (0x138), region = 72 }
  0x62   : > { %s1604_s24 = smul.u32 (!%p369_p3), 2088, %s375_s23 }
  0x63   : > { %s2195_s8 = smul.u32 (!%p369_p3), 232, %s375_s23 }
  0x64   : > { %s2140_s25 = scalar_lea.vmem (!%p369_p3), [#allocation2], %s1604_s24 }
  0x65   : > { %s2224_s6 = scalar_lea.vmem (!%p369_p3), [#allocation3], %s2195_s8  }
  0x66   : > { %vm664_vm0 = vcmask 523264   ;;  %v403_v45 = vld [vmem:[%s2140_s25] sm:$0xff]  ;;  %v432_v46 = vld [vmem:[%s2140_s25 + $0xe8] sm:$0xff]  ;;  %v461_v47 = vld [vmem:[%s2140_s25 + $0x1d0] sm:$0xff]  ;;  %s1194_s26 = smul.u32 (%p1958_p5), 29, %s1943_s9 }
  0x67   : > { %v490_v48 = vld [vmem:[%s2140_s25 + $0x2b8] sm:$0xff]  ;;  %v519_v49 = vld [vmem:[%s2140_s25 + $0x3a0] sm:$0xff]  ;;  %v665_v50 = vsel %vm664_vm0, %v403_v45, -inf  ;;  %v666_v51 = vsel %vm664_vm0, %v432_v46, -inf  ;;  %v668_v52 = vsel %vm664_vm0, %v461_v47, -inf  ;;  %v548_v53 = vld [vmem:[%s2140_s25 + $0x488] sm:$0xff] }
  0x68   : > { %v577_v54 = vld [vmem:[%s2140_s25 + $0x570] sm:$0xff]  ;;  %v606_v55 = vld [vmem:[%s2140_s25 + $0x658] sm:$0xff]  ;;  %v667_v56 = vmax.f32 %v665_v50, %v666_v51  ;;  %v670_v57 = vsel %vm664_vm0, %v490_v48, -inf  ;;  %v404_v58 = vld [vmem:[%s2140_s25 + $0x8] sm:$0xff]  ;;  %v672_v3 = vsel %vm664_vm0, %v519_v49, -inf  ;;  %v674_v4 = vsel %vm664_vm0, %v548_v53, -inf }
  0x69   : > { %v433_v59 = vld [vmem:[%s2140_s25 + $0xf0] sm:$0xff]  ;;  %v462_v60 = vld [vmem:[%s2140_s25 + $0x1d8] sm:$0xff]  ;;  %v635_v61 = vld [vmem:[%s2140_s25 + $0x740] sm:$0xff]  ;;  %v682_v0 = vsel %vm664_vm0, %v404_v58, -inf  ;;  %v676_v10 = vsel %vm664_vm0, %v577_v54, -inf  ;;  %v678_v11 = vsel %vm664_vm0, %v606_v55, -inf }
  0x6a   : > { %v669_v62 = vmax.f32 %v667_v56, %v668_v52  ;;  %v491_v63 = vld [vmem:[%s2140_s25 + $0x2c0] sm:$0xff]  ;;  %v683_v1 = vsel %vm664_vm0, %v433_v59, -inf  ;;  %v685_v2 = vsel %vm664_vm0, %v462_v60, -inf  ;;  %v520_v5 = vld [vmem:[%s2140_s25 + $0x3a8] sm:$0xff]  ;;  %v549_v6 = vld [vmem:[%s2140_s25 + $0x490] sm:$0xff]  ;;  %v680_v23 = vsel %vm664_vm0, %v635_v61, -inf }
  0x6b   : > { %v578_v7 = vld [vmem:[%s2140_s25 + $0x578] sm:$0xff]  ;;  %v684_v8 = vmax.f32 %v682_v0, %v683_v1  ;;  %v687_v12 = vsel %vm664_vm0, %v491_v63, -inf  ;;  %v405_v13 = vld [vmem:[%s2140_s25 + $0x10] sm:$0xff]  ;;  %v463_v15 = vld [vmem:[%s2140_s25 + $0x1e0] sm:$0xff]  ;;  %v689_v25 = vsel %vm664_vm0, %v520_v5, -inf  ;;  %v691_v29 = vsel %vm664_vm0, %v549_v6, -inf }
  0x6c   : > { %v671_v9 = vmax.f32 %v669_v62, %v670_v57  ;;  %v434_v14 = vld [vmem:[%s2140_s25 + $0xf8] sm:$0xff]  ;;  %v607_v16 = vld [vmem:[%s2140_s25 + $0x660] sm:$0xff]  ;;  %v492_v18 = vld [vmem:[%s2140_s25 + $0x2c8] sm:$0xff]  ;;  %v699_v19 = vsel %vm664_vm0, %v405_v13, -inf  ;;  %v702_v21 = vsel %vm664_vm0, %v463_v15, -inf  ;;  %v693_v30 = vsel %vm664_vm0, %v578_v7, -inf }
  0x6d   : > { %v686_v17 = vmax.f32 %v684_v8, %v685_v2  ;;  %v700_v20 = vsel %vm664_vm0, %v434_v14, -inf  ;;  %v636_v24 = vld [vmem:[%s2140_s25 + $0x748] sm:$0xff]  ;;  %v521_v26 = vld [vmem:[%s2140_s25 + $0x3b0] sm:$0xff]  ;;  %v704_v31 = vsel %vm664_vm0, %v492_v18, -inf  ;;  %v406_v32 = vld [vmem:[%s2140_s25 + $0x18] sm:$0xff]  ;;  %v695_v36 = vsel %vm664_vm0, %v607_v16, -inf }
  0x6e   : > { %v673_v22 = vmax.f32 %v671_v9, %v672_v3  ;;  %v701_v27 = vmax.f32 %v699_v19, %v700_v20  ;;  %v435_v33 = vld [vmem:[%s2140_s25 + $0x100] sm:$0xff]  ;;  %v464_v34 = vld [vmem:[%s2140_s25 + $0x1e8] sm:$0xff]  ;;  %v550_v37 = vld [vmem:[%s2140_s25 + $0x498] sm:$0xff]  ;;  %v716_v41 = vsel %vm664_vm0, %v406_v32, -inf  ;;  %v706_v43 = vsel %vm664_vm0, %v521_v26, -inf  ;;  %s1602_s27 = smul.u32 (%p1958_p5), 232, %s1943_s9 }
  0x6f   : > { %v688_v28 = vmax.f32 %v686_v17, %v687_v12  ;;  %v579_v38 = vld [vmem:[%s2140_s25 + $0x580] sm:$0xff]  ;;  %v493_v40 = vld [vmem:[%s2140_s25 + $0x2d0] sm:$0xff]  ;;  %v522_v44 = vld [vmem:[%s2140_s25 + $0x3b8] sm:$0xff]  ;;  %v717_v45 = vsel %vm664_vm0, %v435_v33, -inf  ;;  %v719_v46 = vsel %vm664_vm0, %v464_v34, -inf  ;;  %v697_v48 = vsel %vm664_vm0, %v636_v24, -inf }
  0x70   : > { %v675_v35 = vmax.f32 %v673_v22, %v674_v4  ;;  %v703_v39 = vmax.f32 %v701_v27, %v702_v21  ;;  %v718_v50 = vmax.f32 %v716_v41, %v717_v45  ;;  %v407_v51 = vld [vmem:[%s2140_s25 + $0x20] sm:$0xff]  ;;  %v436_v52 = vld [vmem:[%s2140_s25 + $0x108] sm:$0xff]  ;;  %v465_v53 = vld [vmem:[%s2140_s25 + $0x1f0] sm:$0xff]  ;;  %v708_v55 = vsel %vm664_vm0, %v550_v37, -inf  ;;  %s1195_s28 = ssub.s32 (%p1958_p5), 57, %s1194_s26  ;;  %s2736_s2 = scalar_lea.vmem (%p1958_p5), %s2865_s1, %s1602_s27  }
  0x71   : > { %v690_v42 = vmax.f32 %v688_v28, %v689_v25  ;;  %v710_v56 = vsel %vm664_vm0, %v579_v38, -inf  ;;  %v721_v57 = vsel %vm664_vm0, %v493_v40, -inf  ;;  %v608_v59 = vld [vmem:[%s2140_s25 + $0x668] sm:$0xff]  ;;  %v551_v61 = vld [vmem:[%s2140_s25 + $0x4a0] sm:$0xff]  ;;  %v723_v63 = vsel %vm664_vm0, %v522_v44, -inf  ;;  %v494_v0 = vld [vmem:[%s2140_s25 + $0x2d8] sm:$0xff] }
  0x72   : > { %v677_v47 = vmax.f32 %v675_v35, %v676_v10  ;;  %v705_v49 = vmax.f32 %v703_v39, %v704_v31  ;;  %v720_v62 = vmax.f32 %v718_v50, %v719_v46  ;;  %v637_v2 = vld [vmem:[%s2140_s25 + $0x750] sm:$0xff]  ;;  %v733_v3 = vsel %vm664_vm0, %v407_v51, -inf  ;;  %v580_v8 = vld [vmem:[%s2140_s25 + $0x588] sm:$0xff]  ;;  %v523_v10 = vld [vmem:[%s2140_s25 + $0x3c0] sm:$0xff]  ;;  %p1196_p4 = scmp.lt.s32.totalorder (%p1958_p5), %s1195_s28, 29 }
  0x73   : > { %v692_v54 = vmax.f32 %v690_v42, %v691_v29  ;;  %v734_v4 = vsel %vm664_vm0, %v436_v52, -inf  ;;  %v736_v5 = vsel %vm664_vm0, %v465_v53, -inf  ;;  %v408_v12 = vld [vmem:[%s2140_s25 + $0x28] sm:$0xff]  ;;  %v712_v14 = vsel %vm664_vm0, %v608_v59, -inf  ;;  %v437_v17 = vld [vmem:[%s2140_s25 + $0x110] sm:$0xff]  ;;  %v466_v24 = vld [vmem:[%s2140_s25 + $0x1f8] sm:$0xff] }
  0x74   : > { %v679_v58 = vmax.f32 %v677_v47, %v678_v11  ;;  %v707_v60 = vmax.f32 %v705_v49, %v706_v43  ;;  %v722_v9 = vmax.f32 %v720_v62, %v721_v57  ;;  %v735_v11 = vmax.f32 %v733_v3, %v734_v4  ;;  %v609_v20 = vld [vmem:[%s2140_s25 + $0x670] sm:$0xff]  ;;  %v552_v22 = vld [vmem:[%s2140_s25 + $0x4a8] sm:$0xff]  ;;  %v495_v28 = vld [vmem:[%s2140_s25 + $0x2e0] sm:$0xff] }
  0x75   : > { %v694_v1 = vmax.f32 %v692_v54, %v693_v30  ;;  %v725_v15 = vsel %vm664_vm0, %v551_v61, -inf  ;;  %v738_v16 = vsel %vm664_vm0, %v494_v0, -inf  ;;  %v714_v19 = vsel %vm664_vm0, %v637_v2, -inf  ;;  %v638_v31 = vld [vmem:[%s2140_s25 + $0x758] sm:$0xff]  ;;  %v581_v33 = vld [vmem:[%s2140_s25 + $0x590] sm:$0xff]  ;;  %v524_v35 = vld [vmem:[%s2140_s25 + $0x3c8] sm:$0xff] }
  0x76   : > { %v681_v6 = vmax.f32 %v679_v58, %v680_v23  ;;  %v709_v7 = vmax.f32 %v707_v60, %v708_v55  ;;  %v724_v21 = vmax.f32 %v722_v9, %v723_v63  ;;  %v737_v23 = vmax.f32 %v735_v11, %v736_v5  ;;  %v409_v41 = vld [vmem:[%s2140_s25 + $0x30] sm:$0xff]  ;;  %v438_v42 = vld [vmem:[%s2140_s25 + $0x118] sm:$0xff]  ;;  %v496_v54 = vld [vmem:[%s2140_s25 + $0x2e8] sm:$0xff] }
  0x77   : > { %v696_v13 = vmax.f32 %v694_v1, %v695_v36  ;;  %v727_v26 = vsel %vm664_vm0, %v580_v8, -inf  ;;  %v740_v27 = vsel %vm664_vm0, %v523_v10, -inf  ;;  %v750_v29 = vsel %vm664_vm0, %v408_v12, -inf  ;;  %v610_v45 = vld [vmem:[%s2140_s25 + $0x678] sm:$0xff]  ;;  %v553_v51 = vld [vmem:[%s2140_s25 + $0x4b0] sm:$0xff]  ;;  %v439_v3 = vld [vmem:[%s2140_s25 + $0x120] sm:$0xff] }
  0x78   : > { %1158 = vst.msk [vmem:[%s2224_s6] sm:$0xff] %vm664_vm0, %v681_v6  ;;  %v711_v18 = vmax.f32 %v709_v7, %v710_v56  ;;  %v726_v32 = vmax.f32 %v724_v21, %v725_v15  ;;  %v739_v34 = vmax.f32 %v737_v23, %v738_v16  ;;  %v751_v36 = vsel %vm664_vm0, %v437_v17, -inf  ;;  %v639_v56 = vld [vmem:[%s2140_s25 + $0x760] sm:$0xff]  ;;  %v582_v58 = vld [vmem:[%s2140_s25 + $0x598] sm:$0xff]  ;;  %v525_v63 = vld [vmem:[%s2140_s25 + $0x3d0] sm:$0xff] }
  0x79   : > { %v698_v25 = vmax.f32 %v696_v13, %v697_v48  ;;  %v729_v37 = vsel %vm664_vm0, %v609_v20, -inf  ;;  %v742_v38 = vsel %vm664_vm0, %v552_v22, -inf  ;;  %v752_v39 = vmax.f32 %v750_v29, %v751_v36  ;;  %v467_v48 = vld [vmem:[%s2140_s25 + $0x200] sm:$0xff]  ;;  %v410_v2 = vld [vmem:[%s2140_s25 + $0x38] sm:$0xff]  ;;  %v468_v8 = vld [vmem:[%s2140_s25 + $0x208] sm:$0xff] }
  0x7a   : > { %v713_v30 = vmax.f32 %v711_v18, %v712_v14  ;;  %v753_v40 = vsel %vm664_vm0, %v466_v24, -inf  ;;  %v728_v44 = vmax.f32 %v726_v32, %v727_v26  ;;  %v741_v46 = vmax.f32 %v739_v34, %v740_v27  ;;  %v611_v10 = vld [vmem:[%s2140_s25 + $0x680] sm:$0xff]  ;;  %v554_v13 = vld [vmem:[%s2140_s25 + $0x4b8] sm:$0xff]  ;;  %v497_v15 = vld [vmem:[%s2140_s25 + $0x2f0] sm:$0xff] }
  0x7b   : > { %1159 = vst.msk [vmem:[%s2224_s6 + $0x8] sm:$0xff] %vm664_vm0, %v698_v25  ;;  %v755_v47 = vsel %vm664_vm0, %v495_v28, -inf  ;;  %v731_v49 = vsel %vm664_vm0, %v638_v31, -inf  ;;  %v744_v50 = vsel %vm664_vm0, %v581_v33, -inf  ;;  %v754_v52 = vmax.f32 %v752_v39, %v753_v40  ;;  %v640_v17 = vld [vmem:[%s2140_s25 + $0x768] sm:$0xff]  ;;  %v583_v18 = vld [vmem:[%s2140_s25 + $0x5a0] sm:$0xff] }
  0x7c   : > { %v715_v43 = vmax.f32 %v713_v30, %v714_v19  ;;  %v757_v53 = vsel %vm664_vm0, %v524_v35, -inf  ;;  %v730_v55 = vmax.f32 %v728_v44, %v729_v37  ;;  %v743_v57 = vmax.f32 %v741_v46, %v742_v38  ;;  %v526_v24 = vld [vmem:[%s2140_s25 + $0x3d8] sm:$0xff]  ;;  %v411_v27 = vld [vmem:[%s2140_s25 + $0x40] sm:$0xff]  ;;  %v440_v28 = vld [vmem:[%s2140_s25 + $0x128] sm:$0xff] }
  0x7d   : > { %v767_v59 = vsel %vm664_vm0, %v409_v41, -inf  ;;  %v768_v60 = vsel %vm664_vm0, %v438_v42, -inf  ;;  %v746_v61 = vsel %vm664_vm0, %v610_v45, -inf  ;;  %v756_v62 = vmax.f32 %v754_v52, %v755_v47  ;;  %v612_v31 = vld [vmem:[%s2140_s25 + $0x688] sm:$0xff]  ;;  %v555_v37 = vld [vmem:[%s2140_s25 + $0x4c0] sm:$0xff]  ;;  %v469_v39 = vld [vmem:[%s2140_s25 + $0x210] sm:$0xff] }
  0x7e   : > { %1160 = vst.msk [vmem:[%s2224_s6 + $0x10] sm:$0xff] %vm664_vm0, %v715_v43  ;;  %v769_v0 = vmax.f32 %v767_v59, %v768_v60  ;;  %v770_v1 = vsel %vm664_vm0, %v467_v48, -inf  ;;  %v732_v4 = vmax.f32 %v730_v55, %v731_v49  ;;  %v745_v5 = vmax.f32 %v743_v57, %v744_v50  ;;  %v498_v40 = vld [vmem:[%s2140_s25 + $0x2f8] sm:$0xff]  ;;  %v641_v41 = vld [vmem:[%s2140_s25 + $0x770] sm:$0xff]  ;;  %v584_v48 = vld [vmem:[%s2140_s25 + $0x5a8] sm:$0xff] }
  0x7f   : > { %v759_v6 = vsel %vm664_vm0, %v553_v51, -inf  ;;  %v772_v7 = vsel %vm664_vm0, %v496_v54, -inf  ;;  %v748_v9 = vsel %vm664_vm0, %v639_v56, -inf  ;;  %v758_v11 = vmax.f32 %v756_v62, %v757_v53  ;;  %v527_v50 = vld [vmem:[%s2140_s25 + $0x3e0] sm:$0xff]  ;;  %v412_v52 = vld [vmem:[%s2140_s25 + $0x48] sm:$0xff]  ;;  %v441_v57 = vld [vmem:[%s2140_s25 + $0x130] sm:$0xff] }
  0x80   : > { %v761_v12 = vsel %vm664_vm0, %v582_v58, -inf  ;;  %v771_v14 = vmax.f32 %v769_v0, %v770_v1  ;;  %1161 = vst.msk [vmem:[%s2224_s6 + $0x18] sm:$0xff] %vm664_vm0, %v732_v4  ;;  %v747_v16 = vmax.f32 %v745_v5, %v746_v61  ;;  %v774_v19 = vsel %vm664_vm0, %v525_v63, -inf  ;;  %v613_v60 = vld [vmem:[%s2140_s25 + $0x690] sm:$0xff]  ;;  %v556_v62 = vld [vmem:[%s2140_s25 + $0x4c8] sm:$0xff]  ;;  %v470_v0 = vld [vmem:[%s2140_s25 + $0x218] sm:$0xff] }
  0x81   : > { %v784_v20 = vsel %vm664_vm0, %v410_v2, -inf  ;;  %v785_v21 = vsel %vm664_vm0, %v439_v3, -inf  ;;  %v760_v22 = vmax.f32 %v758_v11, %v759_v6  ;;  %v787_v26 = vsel %vm664_vm0, %v468_v8, -inf  ;;  %v499_v4 = vld [vmem:[%s2140_s25 + $0x300] sm:$0xff]  ;;  %v528_v11 = vld [vmem:[%s2140_s25 + $0x3e8] sm:$0xff] }
  0x82   : > { %v773_v23 = vmax.f32 %v771_v14, %v772_v7  ;;  %v786_v25 = vmax.f32 %v784_v20, %v785_v21  ;;  %v749_v29 = vmax.f32 %v747_v16, %v748_v9  ;;  %v763_v30 = vsel %vm664_vm0, %v611_v10, -inf  ;;  %v642_v7 = vld [vmem:[%s2140_s25 + $0x778] sm:$0xff]  ;;  %v585_v9 = vld [vmem:[%s2140_s25 + $0x5b0] sm:$0xff] }
  0x83   : > { %v776_v32 = vsel %vm664_vm0, %v554_v13, -inf  ;;  %v789_v33 = vsel %vm664_vm0, %v497_v15, -inf  ;;  %v762_v34 = vmax.f32 %v760_v22, %v761_v12  ;;  %v765_v35 = vsel %vm664_vm0, %v640_v17, -inf  ;;  %v413_v17 = vld [vmem:[%s2140_s25 + $0x50] sm:$0xff]  ;;  %v614_v21 = vld [vmem:[%s2140_s25 + $0x698] sm:$0xff] }
  0x84   : > { %v775_v36 = vmax.f32 %v773_v23, %v774_v19  ;;  %v788_v38 = vmax.f32 %v786_v25, %v787_v26  ;;  %1162 = vst.msk [vmem:[%s2224_s6 + $0x20] sm:$0xff] %vm664_vm0, %v749_v29  ;;  %v778_v42 = vsel %vm664_vm0, %v583_v18, -inf  ;;  %v791_v43 = vsel %vm664_vm0, %v526_v24, -inf  ;;  %v442_v18 = vld [vmem:[%s2140_s25 + $0x138] sm:$0xff]  ;;  %v471_v24 = vld [vmem:[%s2140_s25 + $0x220] sm:$0xff] }
  0x85   : > { %v801_v44 = vsel %vm664_vm0, %v411_v27, -inf  ;;  %v802_v45 = vsel %vm664_vm0, %v440_v28, -inf  ;;  %v764_v46 = vmax.f32 %v762_v34, %v763_v30  ;;  %v780_v53 = vsel %vm664_vm0, %v612_v31, -inf  ;;  %v557_v27 = vld [vmem:[%s2140_s25 + $0x4d0] sm:$0xff]  ;;  %v500_v30 = vld [vmem:[%s2140_s25 + $0x308] sm:$0xff]  ;;  %v586_v34 = vld [vmem:[%s2140_s25 + $0x5b8] sm:$0xff] }
  0x86   : > { %v777_v47 = vmax.f32 %v775_v36, %v776_v32  ;;  %v790_v49 = vmax.f32 %v788_v38, %v789_v33  ;;  %v803_v51 = vmax.f32 %v801_v44, %v802_v45  ;;  %v793_v54 = vsel %vm664_vm0, %v555_v37, -inf  ;;  %v643_v32 = vld [vmem:[%s2140_s25 + $0x780] sm:$0xff] }
  0x87   : > { %v804_v55 = vsel %vm664_vm0, %v469_v39, -inf  ;;  %v806_v56 = vsel %vm664_vm0, %v498_v40, -inf  ;;  %v766_v58 = vmax.f32 %v764_v46, %v765_v35  ;;  %v782_v1 = vsel %vm664_vm0, %v641_v41, -inf  ;;  %v529_v39 = vld [vmem:[%s2140_s25 + $0x3f0] sm:$0xff] }
  0x88   : > { %v779_v59 = vmax.f32 %v777_v47, %v778_v42  ;;  %v792_v61 = vmax.f32 %v790_v49, %v791_v43  ;;  %v805_v63 = vmax.f32 %v803_v51, %v804_v55  ;;  %v795_v2 = vsel %vm664_vm0, %v584_v48, -inf  ;;  %v414_v42 = vld [vmem:[%s2140_s25 + $0x58] sm:$0xff]  ;;  %v443_v43 = vld [vmem:[%s2140_s25 + $0x140] sm:$0xff]  ;;  %v472_v48 = vld [vmem:[%s2140_s25 + $0x228] sm:$0xff] }
  0x89   : > { %v808_v3 = vsel %vm664_vm0, %v527_v50, -inf  ;;  %v818_v5 = vsel %vm664_vm0, %v412_v52, -inf  ;;  %1163 = vst.msk [vmem:[%s2224_s6 + $0x28] sm:$0xff] %vm664_vm0, %v766_v58  ;;  %v819_v12 = vsel %vm664_vm0, %v441_v57, -inf  ;;  %v797_v13 = vsel %vm664_vm0, %v613_v60, -inf  ;;  %v615_v50 = vld [vmem:[%s2140_s25 + $0x6a0] sm:$0xff] }
  0x8a   : > { %v781_v6 = vmax.f32 %v779_v59, %v780_v53  ;;  %v794_v8 = vmax.f32 %v792_v61, %v793_v54  ;;  %v807_v10 = vmax.f32 %v805_v63, %v806_v56  ;;  %v810_v14 = vsel %vm664_vm0, %v556_v62, -inf  ;;  %v558_v53 = vld [vmem:[%s2140_s25 + $0x4d8] sm:$0xff]  ;;  %v501_v55 = vld [vmem:[%s2140_s25 + $0x310] sm:$0xff]  ;;  %v644_v57 = vld [vmem:[%s2140_s25 + $0x788] sm:$0xff] }
  0x8b   : > { %v820_v15 = vmax.f32 %v818_v5, %v819_v12  ;;  %v821_v16 = vsel %vm664_vm0, %v470_v0, -inf  ;;  %v823_v23 = vsel %vm664_vm0, %v499_v4, -inf  ;;  %v799_v25 = vsel %vm664_vm0, %v642_v7, -inf  ;;  %v587_v58 = vld [vmem:[%s2140_s25 + $0x5c0] sm:$0xff]  ;;  %v530_v0 = vld [vmem:[%s2140_s25 + $0x3f8] sm:$0xff]  ;;  %v444_v4 = vld [vmem:[%s2140_s25 + $0x148] sm:$0xff] }
  0x8c   : > { %v783_v19 = vmax.f32 %v781_v6, %v782_v1  ;;  %v796_v20 = vmax.f32 %v794_v8, %v795_v2  ;;  %v809_v22 = vmax.f32 %v807_v10, %v808_v3  ;;  %v812_v26 = vsel %vm664_vm0, %v585_v9, -inf  ;;  %v415_v3 = vld [vmem:[%s2140_s25 + $0x60] sm:$0xff]  ;;  %v616_v7 = vld [vmem:[%s2140_s25 + $0x6a8] sm:$0xff] }
  0x8d   : > { %v822_v28 = vmax.f32 %v820_v15, %v821_v16  ;;  %v825_v29 = vsel %vm664_vm0, %v528_v11, -inf  ;;  %v835_v35 = vsel %vm664_vm0, %v413_v17, -inf  ;;  %v836_v36 = vsel %vm664_vm0, %v442_v18, -inf  ;;  %v473_v15 = vld [vmem:[%s2140_s25 + $0x230] sm:$0xff]  ;;  %v502_v16 = vld [vmem:[%s2140_s25 + $0x318] sm:$0xff] }
  0x8e   : > { %1164 = vst.msk [vmem:[%s2224_s6 + $0x30] sm:$0xff] %vm664_vm0, %v783_v19  ;;  %v798_v31 = vmax.f32 %v796_v20, %v797_v13  ;;  %v811_v33 = vmax.f32 %v809_v22, %v810_v14  ;;  %v814_v37 = vsel %vm664_vm0, %v614_v21, -inf  ;;  %v837_v40 = vmax.f32 %v835_v35, %v836_v36  ;;  %v559_v13 = vld [vmem:[%s2140_s25 + $0x4e0] sm:$0xff]  ;;  %v645_v17 = vld [vmem:[%s2140_s25 + $0x790] sm:$0xff] }
  0x8f   : > { %v824_v38 = vmax.f32 %v822_v28, %v823_v23  ;;  %v838_v41 = vsel %vm664_vm0, %v471_v24, -inf  ;;  %v827_v46 = vsel %vm664_vm0, %v557_v27, -inf  ;;  %v840_v47 = vsel %vm664_vm0, %v500_v30, -inf  ;;  %v588_v24 = vld [vmem:[%s2140_s25 + $0x5c8] sm:$0xff]  ;;  %v617_v36 = vld [vmem:[%s2140_s25 + $0x6b0] sm:$0xff] }
  0x90   : > { %v800_v44 = vmax.f32 %v798_v31, %v799_v25  ;;  %v813_v45 = vmax.f32 %v811_v33, %v812_v26  ;;  %v816_v49 = vsel %vm664_vm0, %v643_v32, -inf  ;;  %v829_v52 = vsel %vm664_vm0, %v586_v34, -inf  ;;  %v531_v26 = vld [vmem:[%s2140_s25 + $0x400] sm:$0xff]  ;;  %v416_v28 = vld [vmem:[%s2140_s25 + $0x68] sm:$0xff]  ;;  %v445_v33 = vld [vmem:[%s2140_s25 + $0x150] sm:$0xff] }
  0x91   : > { %v826_v51 = vmax.f32 %v824_v38, %v825_v29  ;;  %v839_v54 = vmax.f32 %v837_v40, %v838_v41  ;;  %v842_v59 = vsel %vm664_vm0, %v529_v39, -inf  ;;  %v852_v60 = vsel %vm664_vm0, %v414_v42, -inf  ;;  %v560_v38 = vld [vmem:[%s2140_s25 + $0x4e8] sm:$0xff]  ;;  %v474_v40 = vld [vmem:[%s2140_s25 + $0x238] sm:$0xff] }
  0x92   : > { %1165 = vst.msk [vmem:[%s2224_s6 + $0x38] sm:$0xff] %vm664_vm0, %v800_v44  ;;  %v815_v56 = vmax.f32 %v813_v45, %v814_v37  ;;  %v853_v61 = vsel %vm664_vm0, %v443_v43, -inf  ;;  %v855_v2 = vsel %vm664_vm0, %v472_v48, -inf  ;;  %v831_v6 = vsel %vm664_vm0, %v615_v50, -inf  ;;  %v503_v44 = vld [vmem:[%s2140_s25 + $0x320] sm:$0xff] }
  0x93   : > { %v828_v62 = vmax.f32 %v826_v51, %v827_v46  ;;  %v841_v63 = vmax.f32 %v839_v54, %v840_v47  ;;  %v854_v1 = vmax.f32 %v852_v60, %v853_v61  ;;  %v844_v8 = vsel %vm664_vm0, %v558_v53, -inf  ;;  %v646_v47 = vld [vmem:[%s2140_s25 + $0x798] sm:$0xff]  ;;  %v532_v51 = vld [vmem:[%s2140_s25 + $0x408] sm:$0xff] }
  0x94   : > { %v817_v5 = vmax.f32 %v815_v56, %v816_v49  ;;  %v857_v9 = vsel %vm664_vm0, %v501_v55, -inf  ;;  %v833_v11 = vsel %vm664_vm0, %v644_v57, -inf  ;;  %v846_v18 = vsel %vm664_vm0, %v587_v58, -inf  ;;  %v589_v49 = vld [vmem:[%s2140_s25 + $0x5d0] sm:$0xff]  ;;  %v446_v58 = vld [vmem:[%s2140_s25 + $0x158] sm:$0xff] }
  0x95   : > { %v830_v10 = vmax.f32 %v828_v62, %v829_v52  ;;  %v843_v12 = vmax.f32 %v841_v63, %v842_v59  ;;  %v856_v14 = vmax.f32 %v854_v1, %v855_v2  ;;  %v859_v19 = vsel %vm664_vm0, %v530_v0, -inf  ;;  %v417_v57 = vld [vmem:[%s2140_s25 + $0x70] sm:$0xff]  ;;  %v618_v61 = vld [vmem:[%s2140_s25 + $0x6b8] sm:$0xff]  ;;  %v475_v0 = vld [vmem:[%s2140_s25 + $0x240] sm:$0xff] }
  0x96   : > { %1166 = vst.msk [vmem:[%s2224_s6 + $0x40] sm:$0xff] %vm664_vm0, %v817_v5  ;;  %v869_v20 = vsel %vm664_vm0, %v415_v3, -inf  ;;  %v870_v21 = vsel %vm664_vm0, %v444_v4, -inf  ;;  %v848_v29 = vsel %vm664_vm0, %v616_v7, -inf  ;;  %v861_v30 = vsel %vm664_vm0, %v559_v13, -inf  ;;  %v561_v3 = vld [vmem:[%s2140_s25 + $0x4f0] sm:$0xff] }
  0x97   : > { %v832_v22 = vmax.f32 %v830_v10, %v831_v6  ;;  %v845_v23 = vmax.f32 %v843_v12, %v844_v8  ;;  %v858_v25 = vmax.f32 %v856_v14, %v857_v9  ;;  %v871_v27 = vmax.f32 %v869_v20, %v870_v21  ;;  %v504_v6 = vld [vmem:[%s2140_s25 + $0x328] sm:$0xff]  ;;  %v647_v8 = vld [vmem:[%s2140_s25 + $0x7a0] sm:$0xff]  ;;  %v590_v10 = vld [vmem:[%s2140_s25 + $0x5d8] sm:$0xff] }
  0x98   : > { %v872_v31 = vsel %vm664_vm0, %v473_v15, -inf  ;;  %v874_v32 = vsel %vm664_vm0, %v502_v16, -inf  ;;  %v850_v41 = vsel %vm664_vm0, %v645_v17, -inf  ;;  %v863_v42 = vsel %vm664_vm0, %v588_v24, -inf  ;;  %v533_v15 = vld [vmem:[%s2140_s25 + $0x410] sm:$0xff]  ;;  %v476_v24 = vld [vmem:[%s2140_s25 + $0x248] sm:$0xff] }
  0x99   : > { %v834_v34 = vmax.f32 %v832_v22, %v833_v11  ;;  %v847_v35 = vmax.f32 %v845_v23, %v846_v18  ;;  %v860_v37 = vmax.f32 %v858_v25, %v859_v19  ;;  %v873_v39 = vmax.f32 %v871_v27, %v872_v31  ;;  %v418_v18 = vld [vmem:[%s2140_s25 + $0x78] sm:$0xff]  ;;  %v447_v19 = vld [vmem:[%s2140_s25 + $0x160] sm:$0xff]  ;;  %v505_v31 = vld [vmem:[%s2140_s25 + $0x330] sm:$0xff] }
  0x9a   : > { %v876_v43 = vsel %vm664_vm0, %v531_v26, -inf  ;;  %v886_v45 = vsel %vm664_vm0, %v416_v28, -inf  ;;  %v887_v52 = vsel %vm664_vm0, %v445_v33, -inf  ;;  %v865_v53 = vsel %vm664_vm0, %v617_v36, -inf  ;;  %v619_v26 = vld [vmem:[%s2140_s25 + $0x6c0] sm:$0xff]  ;;  %v648_v33 = vld [vmem:[%s2140_s25 + $0x7a8] sm:$0xff] }
  0x9b   : > { %1167 = vst.msk [vmem:[%s2224_s6 + $0x48] sm:$0xff] %vm664_vm0, %v834_v34  ;;  %v849_v46 = vmax.f32 %v847_v35, %v848_v29  ;;  %v862_v48 = vmax.f32 %v860_v37, %v861_v30  ;;  %v875_v50 = vmax.f32 %v873_v39, %v874_v32  ;;  %v878_v54 = vsel %vm664_vm0, %v560_v38, -inf  ;;  %v562_v29 = vld [vmem:[%s2140_s25 + $0x4f8] sm:$0xff]  ;;  %v591_v34 = vld [vmem:[%s2140_s25 + $0x5e0] sm:$0xff] }
  0x9c   : > { %v888_v55 = vmax.f32 %v886_v45, %v887_v52  ;;  %v889_v56 = vsel %vm664_vm0, %v474_v40, -inf  ;;  %v891_v63 = vsel %vm664_vm0, %v503_v44, -inf  ;;  %v867_v1 = vsel %vm664_vm0, %v646_v47, -inf  ;;  %v534_v40 = vld [vmem:[%s2140_s25 + $0x418] sm:$0xff]  ;;  %v448_v44 = vld [vmem:[%s2140_s25 + $0x168] sm:$0xff] }
  0x9d   : > { %v851_v59 = vmax.f32 %v849_v46, %v850_v41  ;;  %v864_v60 = vmax.f32 %v862_v48, %v863_v42  ;;  %v877_v62 = vmax.f32 %v875_v50, %v876_v43  ;;  %v880_v2 = vsel %vm664_vm0, %v589_v49, -inf  ;;  %v419_v43 = vld [vmem:[%s2140_s25 + $0x80] sm:$0xff]  ;;  %v620_v47 = vld [vmem:[%s2140_s25 + $0x6c8] sm:$0xff] }
  0x9e   : > { %v890_v4 = vmax.f32 %v888_v55, %v889_v56  ;;  %v893_v5 = vsel %vm664_vm0, %v532_v51, -inf  ;;  %v903_v11 = vsel %vm664_vm0, %v417_v57, -inf  ;;  %v904_v12 = vsel %vm664_vm0, %v446_v58, -inf  ;;  %v477_v55 = vld [vmem:[%s2140_s25 + $0x250] sm:$0xff]  ;;  %v506_v56 = vld [vmem:[%s2140_s25 + $0x338] sm:$0xff] }
  0x9f   : > { %1168 = vst.msk [vmem:[%s2224_s6 + $0x50] sm:$0xff] %vm664_vm0, %v851_v59  ;;  %v866_v7 = vmax.f32 %v864_v60, %v865_v53  ;;  %v879_v9 = vmax.f32 %v877_v62, %v878_v54  ;;  %v882_v13 = vsel %vm664_vm0, %v618_v61, -inf  ;;  %v905_v16 = vmax.f32 %v903_v11, %v904_v12  ;;  %v563_v53 = vld [vmem:[%s2140_s25 + $0x500] sm:$0xff]  ;;  %v649_v57 = vld [vmem:[%s2140_s25 + $0x7b0] sm:$0xff] }
  0xa0   : > { %v892_v14 = vmax.f32 %v890_v4, %v891_v63  ;;  %v906_v17 = vsel %vm664_vm0, %v475_v0, -inf  ;;  %v895_v22 = vsel %vm664_vm0, %v561_v3, -inf  ;;  %v908_v23 = vsel %vm664_vm0, %v504_v6, -inf  ;;  %v592_v0 = vld [vmem:[%s2140_s25 + $0x5e8] sm:$0xff]  ;;  %v621_v12 = vld [vmem:[%s2140_s25 + $0x6d0] sm:$0xff] }
  0xa1   : > { %v868_v20 = vmax.f32 %v866_v7, %v867_v1  ;;  %v881_v21 = vmax.f32 %v879_v9, %v880_v2  ;;  %v884_v25 = vsel %vm664_vm0, %v647_v8, -inf  ;;  %v897_v28 = vsel %vm664_vm0, %v590_v10, -inf  ;;  %v535_v2 = vld [vmem:[%s2140_s25 + $0x420] sm:$0xff]  ;;  %v420_v4 = vld [vmem:[%s2140_s25 + $0x88] sm:$0xff]  ;;  %v449_v9 = vld [vmem:[%s2140_s25 + $0x170] sm:$0xff] }
  0xa2   : > { %v894_v27 = vmax.f32 %v892_v14, %v893_v5  ;;  %v907_v30 = vmax.f32 %v905_v16, %v906_v17  ;;  %v910_v35 = vsel %vm664_vm0, %v533_v15, -inf  ;;  %v920_v36 = vsel %vm664_vm0, %v418_v18, -inf  ;;  %v564_v14 = vld [vmem:[%s2140_s25 + $0x508] sm:$0xff]  ;;  %v478_v16 = vld [vmem:[%s2140_s25 + $0x258] sm:$0xff] }
  0xa3   : > { %1169 = vst.msk [vmem:[%s2224_s6 + $0x58] sm:$0xff] %vm664_vm0, %v868_v20  ;;  %v883_v32 = vmax.f32 %v881_v21, %v882_v13  ;;  %v921_v37 = vsel %vm664_vm0, %v447_v19, -inf  ;;  %v923_v42 = vsel %vm664_vm0, %v476_v24, -inf  ;;  %v899_v46 = vsel %vm664_vm0, %v619_v26, -inf  ;;  %v507_v20 = vld [vmem:[%s2140_s25 + $0x340] sm:$0xff] }
  0xa4   : > { %v896_v38 = vmax.f32 %v894_v27, %v895_v22  ;;  %v909_v39 = vmax.f32 %v907_v30, %v908_v23  ;;  %v922_v41 = vmax.f32 %v920_v36, %v921_v37  ;;  %v912_v48 = vsel %vm664_vm0, %v562_v29, -inf  ;;  %v650_v23 = vld [vmem:[%s2140_s25 + $0x7b8] sm:$0xff]  ;;  %v536_v27 = vld [vmem:[%s2140_s25 + $0x428] sm:$0xff] }
  0xa5   : > { %v885_v45 = vmax.f32 %v883_v32, %v884_v25  ;;  %v925_v49 = vsel %vm664_vm0, %v505_v31, -inf  ;;  %v901_v51 = vsel %vm664_vm0, %v648_v33, -inf  ;;  %v914_v58 = vsel %vm664_vm0, %v591_v34, -inf  ;;  %v593_v25 = vld [vmem:[%s2140_s25 + $0x5f0] sm:$0xff]  ;;  %v450_v34 = vld [vmem:[%s2140_s25 + $0x178] sm:$0xff] }
  0xa6   : > { %v898_v50 = vmax.f32 %v896_v38, %v897_v28  ;;  %v911_v52 = vmax.f32 %v909_v39, %v910_v35  ;;  %v924_v54 = vmax.f32 %v922_v41, %v923_v42  ;;  %v927_v59 = vsel %vm664_vm0, %v534_v40, -inf  ;;  %v421_v33 = vld [vmem:[%s2140_s25 + $0x90] sm:$0xff]  ;;  %v622_v37 = vld [vmem:[%s2140_s25 + $0x6d8] sm:$0xff]  ;;  %v479_v40 = vld [vmem:[%s2140_s25 + $0x260] sm:$0xff] }
  0xa7   : > { %1170 = vst.msk [vmem:[%s2224_s6 + $0x60] sm:$0xff] %vm664_vm0, %v885_v45  ;;  %v937_v60 = vsel %vm664_vm0, %v419_v43, -inf  ;;  %v938_v61 = vsel %vm664_vm0, %v448_v44, -inf  ;;  %v916_v5 = vsel %vm664_vm0, %v620_v47, -inf  ;;  %v929_v6 = vsel %vm664_vm0, %v563_v53, -inf  ;;  %v565_v43 = vld [vmem:[%s2140_s25 + $0x510] sm:$0xff] }
  0xa8   : > { %v900_v62 = vmax.f32 %v898_v50, %v899_v46  ;;  %v913_v63 = vmax.f32 %v911_v52, %v912_v48  ;;  %v926_v1 = vmax.f32 %v924_v54, %v925_v49  ;;  %v939_v3 = vmax.f32 %v937_v60, %v938_v61  ;;  %v508_v46 = vld [vmem:[%s2140_s25 + $0x348] sm:$0xff]  ;;  %v651_v48 = vld [vmem:[%s2140_s25 + $0x7c0] sm:$0xff]  ;;  %v594_v50 = vld [vmem:[%s2140_s25 + $0x5f8] sm:$0xff] }
  0xa9   : > { %v940_v7 = vsel %vm664_vm0, %v477_v55, -inf  ;;  %v942_v8 = vsel %vm664_vm0, %v506_v56, -inf  ;;  %v918_v17 = vsel %vm664_vm0, %v649_v57, -inf  ;;  %v931_v18 = vsel %vm664_vm0, %v592_v0, -inf  ;;  %v537_v55 = vld [vmem:[%s2140_s25 + $0x430] sm:$0xff]  ;;  %v480_v0 = vld [vmem:[%s2140_s25 + $0x268] sm:$0xff] }
  0xaa   : > { %v902_v10 = vmax.f32 %v900_v62, %v901_v51  ;;  %v915_v11 = vmax.f32 %v913_v63, %v914_v58  ;;  %v928_v13 = vmax.f32 %v926_v1, %v927_v59  ;;  %v941_v15 = vmax.f32 %v939_v3, %v940_v7  ;;  %v422_v58 = vld [vmem:[%s2140_s25 + $0x98] sm:$0xff]  ;;  %v451_v59 = vld [vmem:[%s2140_s25 + $0x180] sm:$0xff]  ;;  %v509_v7 = vld [vmem:[%s2140_s25 + $0x350] sm:$0xff] }
  0xab   : > { %v944_v19 = vsel %vm664_vm0, %v535_v2, -inf  ;;  %v954_v21 = vsel %vm664_vm0, %v420_v4, -inf  ;;  %v955_v28 = vsel %vm664_vm0, %v449_v9, -inf  ;;  %v933_v29 = vsel %vm664_vm0, %v621_v12, -inf  ;;  %v623_v2 = vld [vmem:[%s2140_s25 + $0x6e0] sm:$0xff]  ;;  %v652_v9 = vld [vmem:[%s2140_s25 + $0x7c8] sm:$0xff] }
  0xac   : > { %1171 = vst.msk [vmem:[%s2224_s6 + $0x68] sm:$0xff] %vm664_vm0, %v902_v10  ;;  %v917_v22 = vmax.f32 %v915_v11, %v916_v5  ;;  %v930_v24 = vmax.f32 %v928_v13, %v929_v6  ;;  %v943_v26 = vmax.f32 %v941_v15, %v942_v8  ;;  %v946_v30 = vsel %vm664_vm0, %v564_v14, -inf  ;;  %v566_v5 = vld [vmem:[%s2140_s25 + $0x518] sm:$0xff]  ;;  %v595_v10 = vld [vmem:[%s2140_s25 + $0x600] sm:$0xff] }
  0xad   : > { %v956_v31 = vmax.f32 %v954_v21, %v955_v28  ;;  %v957_v32 = vsel %vm664_vm0, %v478_v16, -inf  ;;  %v959_v39 = vsel %vm664_vm0, %v507_v20, -inf  ;;  %v935_v41 = vsel %vm664_vm0, %v650_v23, -inf  ;;  %v538_v16 = vld [vmem:[%s2140_s25 + $0x438] sm:$0xff]  ;;  %v452_v20 = vld [vmem:[%s2140_s25 + $0x188] sm:$0xff] }
  0xae   : > { %v919_v35 = vmax.f32 %v917_v22, %v918_v17  ;;  %v932_v36 = vmax.f32 %v930_v24, %v931_v18  ;;  %v945_v38 = vmax.f32 %v943_v26, %v944_v19  ;;  %v948_v42 = vsel %vm664_vm0, %v593_v25, -inf  ;;  %v423_v19 = vld [vmem:[%s2140_s25 + $0xa0] sm:$0xff]  ;;  %v624_v23 = vld [vmem:[%s2140_s25 + $0x6e8] sm:$0xff] }
  0xaf   : > { %v958_v44 = vmax.f32 %v956_v31, %v957_v32  ;;  %v961_v45 = vsel %vm664_vm0, %v536_v27, -inf  ;;  %v971_v51 = vsel %vm664_vm0, %v421_v33, -inf  ;;  %v972_v52 = vsel %vm664_vm0, %v450_v34, -inf  ;;  %v481_v31 = vld [vmem:[%s2140_s25 + $0x270] sm:$0xff]  ;;  %v510_v32 = vld [vmem:[%s2140_s25 + $0x358] sm:$0xff] }
  0xb0   : > { %1172 = vst.msk [vmem:[%s2224_s6 + $0x70] sm:$0xff] %vm664_vm0, %v919_v35  ;;  %v934_v47 = vmax.f32 %v932_v36, %v933_v29  ;;  %v947_v49 = vmax.f32 %v945_v38, %v946_v30  ;;  %v950_v53 = vsel %vm664_vm0, %v622_v37, -inf  ;;  %v973_v56 = vmax.f32 %v971_v51, %v972_v52  ;;  %v567_v29 = vld [vmem:[%s2140_s25 + $0x520] sm:$0xff]  ;;  %v653_v33 = vld [vmem:[%s2140_s25 + $0x7d0] sm:$0xff] }
  0xb1   : > { %v960_v54 = vmax.f32 %v958_v44, %v959_v39  ;;  %v974_v57 = vsel %vm664_vm0, %v479_v40, -inf  ;;  %v963_v62 = vsel %vm664_vm0, %v565_v43, -inf  ;;  %v976_v63 = vsel %vm664_vm0, %v508_v46, -inf  ;;  %v596_v40 = vld [vmem:[%s2140_s25 + $0x608] sm:$0xff]  ;;  %v625_v52 = vld [vmem:[%s2140_s25 + $0x6f0] sm:$0xff] }
  0xb2   : > { %v936_v60 = vmax.f32 %v934_v47, %v935_v41  ;;  %v949_v61 = vmax.f32 %v947_v49, %v948_v42  ;;  %v952_v1 = vsel %vm664_vm0, %v651_v48, -inf  ;;  %v965_v4 = vsel %vm664_vm0, %v594_v50, -inf  ;;  %v539_v42 = vld [vmem:[%s2140_s25 + $0x440] sm:$0xff]  ;;  %v424_v44 = vld [vmem:[%s2140_s25 + $0xa8] sm:$0xff]  ;;  %v453_v49 = vld [vmem:[%s2140_s25 + $0x190] sm:$0xff] }
  0xb3   : > { %v962_v3 = vmax.f32 %v960_v54, %v961_v45  ;;  %v975_v6 = vmax.f32 %v973_v56, %v974_v57  ;;  %v978_v11 = vsel %vm664_vm0, %v537_v55, -inf  ;;  %v988_v12 = vsel %vm664_vm0, %v422_v58, -inf  ;;  %v568_v54 = vld [vmem:[%s2140_s25 + $0x528] sm:$0xff]  ;;  %v482_v56 = vld [vmem:[%s2140_s25 + $0x278] sm:$0xff] }
  0xb4   : > { %1173 = vst.msk [vmem:[%s2224_s6 + $0x78] sm:$0xff] %vm664_vm0, %v936_v60  ;;  %v951_v8 = vmax.f32 %v949_v61, %v950_v53  ;;  %v989_v13 = vsel %vm664_vm0, %v451_v59, -inf  ;;  %v991_v18 = vsel %vm664_vm0, %v480_v0, -inf  ;;  %v967_v22 = vsel %vm664_vm0, %v623_v2, -inf  ;;  %v511_v60 = vld [vmem:[%s2140_s25 + $0x360] sm:$0xff] }
  0xb5   : > { %v964_v14 = vmax.f32 %v962_v3, %v963_v62  ;;  %v977_v15 = vmax.f32 %v975_v6, %v976_v63  ;;  %v990_v17 = vmax.f32 %v988_v12, %v989_v13  ;;  %v980_v24 = vsel %vm664_vm0, %v566_v5, -inf  ;;  %v654_v63 = vld [vmem:[%s2140_s25 + $0x7d8] sm:$0xff]  ;;  %v540_v3 = vld [vmem:[%s2140_s25 + $0x448] sm:$0xff] }
  0xb6   : > { %v953_v21 = vmax.f32 %v951_v8, %v952_v1  ;;  %v993_v25 = vsel %vm664_vm0, %v509_v7, -inf  ;;  %v969_v27 = vsel %vm664_vm0, %v652_v9, -inf  ;;  %v982_v34 = vsel %vm664_vm0, %v595_v10, -inf  ;;  %v597_v1 = vld [vmem:[%s2140_s25 + $0x610] sm:$0xff]  ;;  %v454_v10 = vld [vmem:[%s2140_s25 + $0x198] sm:$0xff] }
  0xb7   : > { %v966_v26 = vmax.f32 %v964_v14, %v965_v4  ;;  %v979_v28 = vmax.f32 %v977_v15, %v978_v11  ;;  %v992_v30 = vmax.f32 %v990_v17, %v991_v18  ;;  %v995_v35 = vsel %vm664_vm0, %v538_v16, -inf  ;;  %v425_v9 = vld [vmem:[%s2140_s25 + $0xb0] sm:$0xff]  ;;  %v626_v13 = vld [vmem:[%s2140_s25 + $0x6f8] sm:$0xff]  ;;  %v483_v16 = vld [vmem:[%s2140_s25 + $0x280] sm:$0xff] }
  0xb8   : > { %1174 = vst.msk [vmem:[%s2224_s6 + $0x80] sm:$0xff] %vm664_vm0, %v953_v21  ;;  %v1005_v36 = vsel %vm664_vm0, %v423_v19, -inf  ;;  %v1006_v37 = vsel %vm664_vm0, %v452_v20, -inf  ;;  %v984_v45 = vsel %vm664_vm0, %v624_v23, -inf  ;;  %v997_v46 = vsel %vm664_vm0, %v567_v29, -inf  ;;  %v569_v19 = vld [vmem:[%s2140_s25 + $0x530] sm:$0xff] }
  0xb9   : > { %v968_v38 = vmax.f32 %v966_v26, %v967_v22  ;;  %v981_v39 = vmax.f32 %v979_v28, %v980_v24  ;;  %v994_v41 = vmax.f32 %v992_v30, %v993_v25  ;;  %v1007_v43 = vmax.f32 %v1005_v36, %v1006_v37  ;;  %v512_v22 = vld [vmem:[%s2140_s25 + $0x368] sm:$0xff]  ;;  %v655_v24 = vld [vmem:[%s2140_s25 + $0x7e0] sm:$0xff]  ;;  %v598_v26 = vld [vmem:[%s2140_s25 + $0x618] sm:$0xff] }
  0xba   : > { %v1008_v47 = vsel %vm664_vm0, %v481_v31, -inf  ;;  %v1010_v48 = vsel %vm664_vm0, %v510_v32, -inf  ;;  %v986_v57 = vsel %vm664_vm0, %v653_v33, -inf  ;;  %v999_v58 = vsel %vm664_vm0, %v596_v40, -inf  ;;  %v541_v31 = vld [vmem:[%s2140_s25 + $0x450] sm:$0xff]  ;;  %v484_v40 = vld [vmem:[%s2140_s25 + $0x288] sm:$0xff] }
  0xbb   : > { %v970_v50 = vmax.f32 %v968_v38, %v969_v27  ;;  %v983_v51 = vmax.f32 %v981_v39, %v982_v34  ;;  %v996_v53 = vmax.f32 %v994_v41, %v995_v35  ;;  %v1009_v55 = vmax.f32 %v1007_v43, %v1008_v47  ;;  %v426_v34 = vld [vmem:[%s2140_s25 + $0xb8] sm:$0xff]  ;;  %v455_v35 = vld [vmem:[%s2140_s25 + $0x1a0] sm:$0xff]  ;;  %v513_v47 = vld [vmem:[%s2140_s25 + $0x370] sm:$0xff] }
  0xbc   : > { %v1012_v59 = vsel %vm664_vm0, %v539_v42, -inf  ;;  %v1022_v61 = vsel %vm664_vm0, %v424_v44, -inf  ;;  %v1023_v4 = vsel %vm664_vm0, %v453_v49, -inf  ;;  %v1001_v5 = vsel %vm664_vm0, %v625_v52, -inf  ;;  %v627_v42 = vld [vmem:[%s2140_s25 + $0x700] sm:$0xff]  ;;  %v656_v49 = vld [vmem:[%s2140_s25 + $0x7e8] sm:$0xff] }
  0xbd   : > { %1175 = vst.msk [vmem:[%s2224_s6 + $0x88] sm:$0xff] %vm664_vm0, %v970_v50  ;;  %v985_v62 = vmax.f32 %v983_v51, %v984_v45  ;;  %v998_v0 = vmax.f32 %v996_v53, %v997_v46  ;;  %v1011_v2 = vmax.f32 %v1009_v55, %v1010_v48  ;;  %v1014_v6 = vsel %vm664_vm0, %v568_v54, -inf  ;;  %v570_v45 = vld [vmem:[%s2140_s25 + $0x538] sm:$0xff]  ;;  %v599_v50 = vld [vmem:[%s2140_s25 + $0x620] sm:$0xff] }
  0xbe   : > { %v1024_v7 = vmax.f32 %v1022_v61, %v1023_v4  ;;  %v1025_v8 = vsel %vm664_vm0, %v482_v56, -inf  ;;  %v1027_v15 = vsel %vm664_vm0, %v511_v60, -inf  ;;  %v1003_v17 = vsel %vm664_vm0, %v654_v63, -inf  ;;  %v542_v56 = vld [vmem:[%s2140_s25 + $0x458] sm:$0xff]  ;;  %v456_v60 = vld [vmem:[%s2140_s25 + $0x1a8] sm:$0xff] }
  0xbf   : > { %v987_v11 = vmax.f32 %v985_v62, %v986_v57  ;;  %v1000_v12 = vmax.f32 %v998_v0, %v999_v58  ;;  %v1013_v14 = vmax.f32 %v1011_v2, %v1012_v59  ;;  %v1016_v18 = vsel %vm664_vm0, %v597_v1, -inf  ;;  %v427_v59 = vld [vmem:[%s2140_s25 + $0xc0] sm:$0xff]  ;;  %v628_v63 = vld [vmem:[%s2140_s25 + $0x708] sm:$0xff] }
  0xc0   : > { %v1026_v20 = vmax.f32 %v1024_v7, %v1025_v8  ;;  %v1029_v21 = vsel %vm664_vm0, %v540_v3, -inf  ;;  %v1039_v27 = vsel %vm664_vm0, %v425_v9, -inf  ;;  %v1040_v28 = vsel %vm664_vm0, %v454_v10, -inf  ;;  %v485_v7 = vld [vmem:[%s2140_s25 + $0x290] sm:$0xff]  ;;  %v514_v8 = vld [vmem:[%s2140_s25 + $0x378] sm:$0xff] }
  0xc1   : > { %1176 = vst.msk [vmem:[%s2224_s6 + $0x90] sm:$0xff] %vm664_vm0, %v987_v11  ;;  %v1002_v23 = vmax.f32 %v1000_v12, %v1001_v5  ;;  %v1015_v25 = vmax.f32 %v1013_v14, %v1014_v6  ;;  %v1018_v29 = vsel %vm664_vm0, %v626_v13, -inf  ;;  %v1041_v32 = vmax.f32 %v1039_v27, %v1040_v28  ;;  %v571_v5 = vld [vmem:[%s2140_s25 + $0x540] sm:$0xff]  ;;  %v657_v9 = vld [vmem:[%s2140_s25 + $0x7f0] sm:$0xff] }
  0xc2   : > { %v1028_v30 = vmax.f32 %v1026_v20, %v1027_v15  ;;  %v1042_v33 = vsel %vm664_vm0, %v483_v16, -inf  ;;  %v1031_v38 = vsel %vm664_vm0, %v569_v19, -inf  ;;  %v1044_v39 = vsel %vm664_vm0, %v512_v22, -inf  ;;  %v600_v16 = vld [vmem:[%s2140_s25 + $0x628] sm:$0xff]  ;;  %v629_v28 = vld [vmem:[%s2140_s25 + $0x710] sm:$0xff] }
  0xc3   : > { %v1004_v36 = vmax.f32 %v1002_v23, %v1003_v17  ;;  %v1017_v37 = vmax.f32 %v1015_v25, %v1016_v18  ;;  %v1020_v41 = vsel %vm664_vm0, %v655_v24, -inf  ;;  %v1033_v44 = vsel %vm664_vm0, %v598_v26, -inf  ;;  %v543_v18 = vld [vmem:[%s2140_s25 + $0x460] sm:$0xff]  ;;  %v428_v20 = vld [vmem:[%s2140_s25 + $0xc8] sm:$0xff]  ;;  %v457_v25 = vld [vmem:[%s2140_s25 + $0x1b0] sm:$0xff] }
  0xc4   : > { %v1030_v43 = vmax.f32 %v1028_v30, %v1029_v21  ;;  %v1043_v46 = vmax.f32 %v1041_v32, %v1042_v33  ;;  %v1046_v51 = vsel %vm664_vm0, %v541_v31, -inf  ;;  %v1056_v52 = vsel %vm664_vm0, %v426_v34, -inf  ;;  %v572_v30 = vld [vmem:[%s2140_s25 + $0x548] sm:$0xff]  ;;  %v486_v32 = vld [vmem:[%s2140_s25 + $0x298] sm:$0xff] }
  0xc5   : > { %1177 = vst.msk [vmem:[%s2224_s6 + $0x98] sm:$0xff] %vm664_vm0, %v1004_v36  ;;  %v1019_v48 = vmax.f32 %v1017_v37, %v1018_v29  ;;  %v1057_v53 = vsel %vm664_vm0, %v455_v35, -inf  ;;  %v1059_v58 = vsel %vm664_vm0, %v484_v40, -inf  ;;  %v1035_v62 = vsel %vm664_vm0, %v627_v42, -inf  ;;  %v515_v36 = vld [vmem:[%s2140_s25 + $0x380] sm:$0xff] }
  0xc6   : > { %v1032_v54 = vmax.f32 %v1030_v43, %v1031_v38  ;;  %v1045_v55 = vmax.f32 %v1043_v46, %v1044_v39  ;;  %v1058_v57 = vmax.f32 %v1056_v52, %v1057_v53  ;;  %v1048_v0 = vsel %vm664_vm0, %v570_v45, -inf  ;;  %v658_v39 = vld [vmem:[%s2140_s25 + $0x7f8] sm:$0xff]  ;;  %v544_v43 = vld [vmem:[%s2140_s25 + $0x468] sm:$0xff] }
  0xc7   : > { %v1021_v61 = vmax.f32 %v1019_v48, %v1020_v41  ;;  %v1061_v1 = vsel %vm664_vm0, %v513_v47, -inf  ;;  %v1037_v3 = vsel %vm664_vm0, %v656_v49, -inf  ;;  %v1050_v10 = vsel %vm664_vm0, %v599_v50, -inf  ;;  %v601_v41 = vld [vmem:[%s2140_s25 + $0x630] sm:$0xff]  ;;  %v458_v50 = vld [vmem:[%s2140_s25 + $0x1b8] sm:$0xff] }
  0xc8   : > { %v1034_v2 = vmax.f32 %v1032_v54, %v1033_v44  ;;  %v1047_v4 = vmax.f32 %v1045_v55, %v1046_v51  ;;  %v1060_v6 = vmax.f32 %v1058_v57, %v1059_v58  ;;  %v1063_v11 = vsel %vm664_vm0, %v542_v56, -inf  ;;  %v429_v49 = vld [vmem:[%s2140_s25 + $0xd0] sm:$0xff]  ;;  %v630_v53 = vld [vmem:[%s2140_s25 + $0x718] sm:$0xff]  ;;  %v487_v56 = vld [vmem:[%s2140_s25 + $0x2a0] sm:$0xff] }
  0xc9   : > { %1178 = vst.msk [vmem:[%s2224_s6 + $0xa0] sm:$0xff] %vm664_vm0, %v1021_v61  ;;  %v1073_v12 = vsel %vm664_vm0, %v427_v59, -inf  ;;  %v1074_v13 = vsel %vm664_vm0, %v456_v60, -inf  ;;  %v1052_v21 = vsel %vm664_vm0, %v628_v63, -inf  ;;  %v1065_v22 = vsel %vm664_vm0, %v571_v5, -inf  ;;  %v573_v59 = vld [vmem:[%s2140_s25 + $0x550] sm:$0xff] }
  0xca   : > { %v1036_v14 = vmax.f32 %v1034_v2, %v1035_v62  ;;  %v1049_v15 = vmax.f32 %v1047_v4, %v1048_v0  ;;  %v1062_v17 = vmax.f32 %v1060_v6, %v1061_v1  ;;  %v1075_v19 = vmax.f32 %v1073_v12, %v1074_v13  ;;  %v516_v62 = vld [vmem:[%s2140_s25 + $0x388] sm:$0xff]  ;;  %v659_v0 = vld [vmem:[%s2140_s25 + $0x800] sm:$0xff]  ;;  %v602_v2 = vld [vmem:[%s2140_s25 + $0x638] sm:$0xff] }
  0xcb   : > { %v1076_v23 = vsel %vm664_vm0, %v485_v7, -inf  ;;  %v1078_v24 = vsel %vm664_vm0, %v514_v8, -inf  ;;  %v1054_v33 = vsel %vm664_vm0, %v657_v9, -inf  ;;  %v1067_v34 = vsel %vm664_vm0, %v600_v16, -inf  ;;  %v545_v7 = vld [vmem:[%s2140_s25 + $0x470] sm:$0xff]  ;;  %v488_v16 = vld [vmem:[%s2140_s25 + $0x2a8] sm:$0xff] }
  0xcc   : > { %v1038_v26 = vmax.f32 %v1036_v14, %v1037_v3  ;;  %v1051_v27 = vmax.f32 %v1049_v15, %v1050_v10  ;;  %v1064_v29 = vmax.f32 %v1062_v17, %v1063_v11  ;;  %v1077_v31 = vmax.f32 %v1075_v19, %v1076_v23  ;;  %v430_v10 = vld [vmem:[%s2140_s25 + $0xd8] sm:$0xff]  ;;  %v459_v11 = vld [vmem:[%s2140_s25 + $0x1c0] sm:$0xff]  ;;  %v517_v23 = vld [vmem:[%s2140_s25 + $0x390] sm:$0xff] }
  0xcd   : > { %v1080_v35 = vsel %vm664_vm0, %v543_v18, -inf  ;;  %v1090_v37 = vsel %vm664_vm0, %v428_v20, -inf  ;;  %v1091_v44 = vsel %vm664_vm0, %v457_v25, -inf  ;;  %v1069_v45 = vsel %vm664_vm0, %v629_v28, -inf  ;;  %v631_v18 = vld [vmem:[%s2140_s25 + $0x720] sm:$0xff]  ;;  %v660_v25 = vld [vmem:[%s2140_s25 + $0x808] sm:$0xff] }
  0xce   : > { %1179 = vst.msk [vmem:[%s2224_s6 + $0xa8] sm:$0xff] %vm664_vm0, %v1038_v26  ;;  %v1053_v38 = vmax.f32 %v1051_v27, %v1052_v21  ;;  %v1066_v40 = vmax.f32 %v1064_v29, %v1065_v22  ;;  %v1079_v42 = vmax.f32 %v1077_v31, %v1078_v24  ;;  %v1082_v46 = vsel %vm664_vm0, %v572_v30, -inf  ;;  %v574_v21 = vld [vmem:[%s2140_s25 + $0x558] sm:$0xff]  ;;  %v603_v26 = vld [vmem:[%s2140_s25 + $0x640] sm:$0xff] }
  0xcf   : > { %v1092_v47 = vmax.f32 %v1090_v37, %v1091_v44  ;;  %v1093_v48 = vsel %vm664_vm0, %v486_v32, -inf  ;;  %v1095_v55 = vsel %vm664_vm0, %v515_v36, -inf  ;;  %v1071_v57 = vsel %vm664_vm0, %v658_v39, -inf  ;;  %v546_v32 = vld [vmem:[%s2140_s25 + $0x478] sm:$0xff]  ;;  %v460_v36 = vld [vmem:[%s2140_s25 + $0x1c8] sm:$0xff] }
  0xd0   : > { %v1055_v51 = vmax.f32 %v1053_v38, %v1054_v33  ;;  %v1068_v52 = vmax.f32 %v1066_v40, %v1067_v34  ;;  %v1081_v54 = vmax.f32 %v1079_v42, %v1080_v35  ;;  %v1084_v58 = vsel %vm664_vm0, %v601_v41, -inf  ;;  %v431_v35 = vld [vmem:[%s2140_s25 + $0xe0] sm:$0xff]  ;;  %v632_v39 = vld [vmem:[%s2140_s25 + $0x728] sm:$0xff] }
  0xd1   : > { %v1094_v60 = vmax.f32 %v1092_v47, %v1093_v48  ;;  %v1097_v61 = vsel %vm664_vm0, %v544_v43, -inf  ;;  %v1107_v3 = vsel %vm664_vm0, %v429_v49, -inf  ;;  %v1108_v4 = vsel %vm664_vm0, %v458_v50, -inf  ;;  %v489_v47 = vld [vmem:[%s2140_s25 + $0x2b0] sm:$0xff]  ;;  %v518_v48 = vld [vmem:[%s2140_s25 + $0x398] sm:$0xff] }
  0xd2   : > { %1180 = vst.msk [vmem:[%s2224_s6 + $0xb0] sm:$0xff] %vm664_vm0, %v1055_v51  ;;  %v1070_v63 = vmax.f32 %v1068_v52, %v1069_v45  ;;  %v1083_v1 = vmax.f32 %v1081_v54, %v1082_v46  ;;  %v1086_v5 = vsel %vm664_vm0, %v630_v53, -inf  ;;  %v1109_v8 = vmax.f32 %v1107_v3, %v1108_v4  ;;  %v575_v45 = vld [vmem:[%s2140_s25 + $0x560] sm:$0xff]  ;;  %v661_v54 = vld [vmem:[%s2140_s25 + $0x810] sm:$0xff]  ;;  %v576_v4 = vld [vmem:[%s2140_s25 + $0x568] sm:$0xff] }
  0xd3   : > { %v1096_v6 = vmax.f32 %v1094_v60, %v1095_v55  ;;  %v1110_v9 = vsel %vm664_vm0, %v487_v56, -inf  ;;  %v1099_v14 = vsel %vm664_vm0, %v573_v59, -inf  ;;  %v1112_v15 = vsel %vm664_vm0, %v516_v62, -inf  ;;  %v604_v56 = vld [vmem:[%s2140_s25 + $0x648] sm:$0xff] }
  0xd4   : > { %v1072_v12 = vmax.f32 %v1070_v63, %v1071_v57  ;;  %v1085_v13 = vmax.f32 %v1083_v1, %v1084_v58  ;;  %v1088_v17 = vsel %vm664_vm0, %v659_v0, -inf  ;;  %v1101_v20 = vsel %vm664_vm0, %v602_v2, -inf  ;;  %v547_v58 = vld [vmem:[%s2140_s25 + $0x480] sm:$0xff]  ;;  %v633_v2 = vld [vmem:[%s2140_s25 + $0x730] sm:$0xff] }
  0xd5   : > { %v1098_v19 = vmax.f32 %v1096_v6, %v1097_v61  ;;  %v1111_v22 = vmax.f32 %v1109_v8, %v1110_v9  ;;  %v1114_v27 = vsel %vm664_vm0, %v545_v7, -inf  ;;  %v1124_v28 = vsel %vm664_vm0, %v430_v10, -inf  ;;  %v662_v10 = vld [vmem:[%s2140_s25 + $0x818] sm:$0xff] }
  0xd6   : > { %1181 = vst.msk [vmem:[%s2224_s6 + $0xb8] sm:$0xff] %vm664_vm0, %v1072_v12  ;;  %v1087_v24 = vmax.f32 %v1085_v13, %v1086_v5  ;;  %v1125_v29 = vsel %vm664_vm0, %v459_v11, -inf  ;;  %v1127_v34 = vsel %vm664_vm0, %v488_v16, -inf  ;;  %v1103_v38 = vsel %vm664_vm0, %v631_v18, -inf  ;;  %v605_v12 = vld [vmem:[%s2140_s25 + $0x650] sm:$0xff]  ;;  %v634_v18 = vld [vmem:[%s2140_s25 + $0x738] sm:$0xff] }
  0xd7   : > { %v1100_v30 = vmax.f32 %v1098_v19, %v1099_v14  ;;  %v1113_v31 = vmax.f32 %v1111_v22, %v1112_v15  ;;  %v1126_v33 = vmax.f32 %v1124_v28, %v1125_v29  ;;  %v1116_v40 = vsel %vm664_vm0, %v574_v21, -inf }
  0xd8   : > { %v1089_v37 = vmax.f32 %v1087_v24, %v1088_v17  ;;  %v1129_v41 = vsel %vm664_vm0, %v517_v23, -inf  ;;  %v1105_v43 = vsel %vm664_vm0, %v660_v25, -inf  ;;  %v1118_v49 = vsel %vm664_vm0, %v603_v26, -inf  ;;  %v663_v23 = vld [vmem:[%s2140_s25 + $0x820] sm:$0xff] }
  0xd9   : > { %v1102_v42 = vmax.f32 %v1100_v30, %v1101_v20  ;;  %v1115_v44 = vmax.f32 %v1113_v31, %v1114_v27  ;;  %v1128_v46 = vmax.f32 %v1126_v33, %v1127_v34  ;;  %v1131_v50 = vsel %vm664_vm0, %v546_v32, -inf }
  0xda   : > { %1182 = vst.msk [vmem:[%s2224_s6 + $0xc0] sm:$0xff] %vm664_vm0, %v1089_v37  ;;  %v1141_v51 = vsel %vm664_vm0, %v431_v35, -inf  ;;  %v1142_v52 = vsel %vm664_vm0, %v460_v36, -inf  ;;  %v1120_v60 = vsel %vm664_vm0, %v632_v39, -inf  ;;  %v1133_v61 = vsel %vm664_vm0, %v575_v45, -inf }
  0xdb   : > { %v1104_v53 = vmax.f32 %v1102_v42, %v1103_v38  ;;  %v1117_v55 = vmax.f32 %v1115_v44, %v1116_v40  ;;  %v1130_v57 = vmax.f32 %v1128_v46, %v1129_v41  ;;  %v1143_v59 = vmax.f32 %v1141_v51, %v1142_v52 }
  0xdc   : > { %v1144_v62 = vsel %vm664_vm0, %v489_v47, -inf  ;;  %v1146_v63 = vsel %vm664_vm0, %v518_v48, -inf  ;;  %v1122_v6 = vsel %vm664_vm0, %v661_v54, -inf  ;;  %v1135_v7 = vsel %vm664_vm0, %v604_v56, -inf }
  0xdd   : > { %v1106_v0 = vmax.f32 %v1104_v53, %v1105_v43  ;;  %v1119_v1 = vmax.f32 %v1117_v55, %v1118_v49  ;;  %v1132_v3 = vmax.f32 %v1130_v57, %v1131_v50  ;;  %v1145_v5 = vmax.f32 %v1143_v59, %v1144_v62 }
  0xde   : > { %v1148_v8 = vsel %vm664_vm0, %v547_v58, -inf  ;;  %v1137_v14 = vsel %vm664_vm0, %v633_v2, -inf  ;;  %v1150_v15 = vsel %vm664_vm0, %v576_v4, -inf  ;;  %v1139_v20 = vsel %vm664_vm0, %v662_v10, -inf }
  0xdf   : > { %1183 = vst.msk [vmem:[%s2224_s6 + $0xc8] sm:$0xff] %vm664_vm0, %v1106_v0  ;;  %v1121_v9 = vmax.f32 %v1119_v1, %v1120_v60  ;;  %v1134_v11 = vmax.f32 %v1132_v3, %v1133_v61  ;;  %v1147_v13 = vmax.f32 %v1145_v5, %v1146_v63  ;;  %v1152_v21 = vsel %vm664_vm0, %v605_v12, -inf }
  0xe0   : > { %v1154_v25 = vsel %vm664_vm0, %v634_v18, -inf  ;;  %v1156_v28 = vsel %vm664_vm0, %v663_v23, -inf }
  0xe1   : > { %v1123_v16 = vmax.f32 %v1121_v9, %v1122_v6  ;;  %v1136_v17 = vmax.f32 %v1134_v11, %v1135_v7  ;;  %v1149_v19 = vmax.f32 %v1147_v13, %v1148_v8 }
  0xe3   : > { %1184 = vst.msk [vmem:[%s2224_s6 + $0xd0] sm:$0xff] %vm664_vm0, %v1123_v16  ;;  %v1138_v22 = vmax.f32 %v1136_v17, %v1137_v14  ;;  %v1151_v24 = vmax.f32 %v1149_v19, %v1150_v15 }
  0xe5   : > { %v1140_v26 = vmax.f32 %v1138_v22, %v1139_v20  ;;  %v1153_v27 = vmax.f32 %v1151_v24, %v1152_v21 }
  0xe7   : > { %1185 = vst.msk [vmem:[%s2224_s6 + $0xd8] sm:$0xff] %vm664_vm0, %v1140_v26  ;;  %v1155_v29 = vmax.f32 %v1153_v27, %v1154_v25  ;;  %1193 = sbr.rel (!%p1958_p5) target bundleno = 312 (0x138), region = 80 }
  0xe9   : > { %v1157_v30 = vmax.f32 %v1155_v29, %v1156_v28 }
  0xeb   : > { %1186 = vst.msk [vmem:[%s2224_s6 + $0xe0] sm:$0xff] %vm664_vm0, %v1157_v30 }
  0xec   : > { %s2891_s28 = smov (!%p1196_p4, %s1195_s28), 29 }
  0xed   : > { %s1587_s3 = sshll.u32 %s2891_s28, 3 }
  0xee   : > { %p1590_p6 = scmp.eq.s32.totalorder %s1587_s3, 0 }
  0xef   : > { %1759 = sdivrem.u32 (!%p1590_p6), %s2891_s28, 29 }
  0xf0   : > { %1204 = sbr.rel (%p1590_p6) target bundleno = 312 (0x138), region = 84 }
  0xf8   : > { %s2742_s14 = spop.drf %1759 }
  0xf9   : > { %s1761_s4 = spop.drf %1759  ;;  %p1591_p5 = scmp.le.s32.totalorder %s2742_s14, 0 }
  0xfa   : > { %s2876_s9 = smov (!%p1591_p5), %s2736_s2  ;;  %s2877_s5 = smov (!%p1591_p5), %s2224_s6 }
  0xfb   : > { %1527 = sbr.rel (%p1591_p5) target bundleno = 286 (0x11e), region = 195  ;;  %s2751_s11 = smov (!%p1591_p5), 0  }
  0xfc   : > { %s2753_s12 = smov (!%p1591_p5), 0  }
 0x100 LB: >> { %v1325_v31 = vld [vmem:[%s1891_s5] sm:$0xff]  ;;  %v1327_v32 = vld [vmem:[%s1891_s5 + $0x8] sm:$0xff]  ;;  %v1329_v33 = vld [vmem:[%s1891_s5 + $0x10] sm:$0xff]  ;;  %s1383_s15 = sadd.s32 1, %s1895_s11  ;;  %s1319_s12 = sadd.s32 1, %s1899_s12   ;;  %s1899_s12 = sphi %s2753_s12, %s1319_s12   ;;  %s1895_s11 = sphi %s2751_s11, %s2880_s11   ;;  %s1891_s5 = sphi %s2877_s5, %s2879_s5   ;;  %s1887_s9 = sphi %s2876_s9, %s2878_s9  }
 0x101   : >> { %1326 = vst [vmem:[%s1887_s9] sm:$0xff] %v1325_v31  ;;  %v1331_v34 = vld [vmem:[%s1891_s5 + $0x18] sm:$0xff]  ;;  %p1384_p7 = scmp.ge.s32.totalorder %s1383_s15, %s2742_s14  ;;  %v1333_v35 = vld [vmem:[%s1891_s5 + $0x20] sm:$0xff]  ;;  %v1335_v36 = vld [vmem:[%s1891_s5 + $0x28] sm:$0xff]  ;;  %p1318_p8 = scmp.ge.s32.totalorder %s1319_s12, %s2742_s14 }
 0x102   : >> { %1328 = vst [vmem:[%s1887_s9 + $0x8] sm:$0xff] %v1327_v32  ;;  %v1337_v37 = vld [vmem:[%s1891_s5 + $0x30] sm:$0xff]  ;;  %v1339_v38 = vld [vmem:[%s1891_s5 + $0x38] sm:$0xff]  ;;  %v1341_v39 = vld [vmem:[%s1891_s5 + $0x40] sm:$0xff] }
 0x103   : >> { %1330 = vst [vmem:[%s1887_s9 + $0x10] sm:$0xff] %v1329_v33  ;;  %s2893_s15 = smov (%p1384_p7, %s1383_s15), 0  ;;  %v1343_v40 = vld [vmem:[%s1891_s5 + $0x48] sm:$0xff]  ;;  %v1345_v41 = vld [vmem:[%s1891_s5 + $0x50] sm:$0xff]  ;;  %v1347_v42 = vld [vmem:[%s1891_s5 + $0x58] sm:$0xff] }
 0x104   : >> { %1332 = vst [vmem:[%s1887_s9 + $0x18] sm:$0xff] %v1331_v34  ;;  %s1386_s16 = smul.u32 232, %s2893_s15  ;;  %v1349_v43 = vld [vmem:[%s1891_s5 + $0x60] sm:$0xff]  ;;  %v1351_v44 = vld [vmem:[%s1891_s5 + $0x68] sm:$0xff]  ;;  %v1353_v45 = vld [vmem:[%s1891_s5 + $0x70] sm:$0xff]  ;;  %s2880_s11 = smov %s2893_s15 }
 0x105   : >> { %1334 = vst [vmem:[%s1887_s9 + $0x20] sm:$0xff] %v1333_v35  ;;  %v1355_v46 = vld [vmem:[%s1891_s5 + $0x78] sm:$0xff]  ;;  %v1357_v47 = vld [vmem:[%s1891_s5 + $0x80] sm:$0xff]  ;;  %v1359_v48 = vld [vmem:[%s1891_s5 + $0x88] sm:$0xff] }
 0x106   : >> { %1336 = vst [vmem:[%s1887_s9 + $0x28] sm:$0xff] %v1335_v36  ;;  %s2787_s17 = scalar_lea.vmem %s2224_s6, %s1386_s16 [#allocation3]   ;;  %s2790_s19 = scalar_lea.vmem %s2736_s2, %s1386_s16   ;;  %v1361_v49 = vld [vmem:[%s1891_s5 + $0x90] sm:$0xff]  ;;  %v1363_v50 = vld [vmem:[%s1891_s5 + $0x98] sm:$0xff]  ;;  %v1365_v51 = vld [vmem:[%s1891_s5 + $0xa0] sm:$0xff] }
 0x107   : >> { %1338 = vst [vmem:[%s1887_s9 + $0x30] sm:$0xff] %v1337_v37  ;;  %v1367_v52 = vld [vmem:[%s1891_s5 + $0xa8] sm:$0xff]  ;;  %v1369_v53 = vld [vmem:[%s1891_s5 + $0xb0] sm:$0xff]  ;;  %v1371_v54 = vld [vmem:[%s1891_s5 + $0xb8] sm:$0xff] }
 0x108   : >> { %1340 = vst [vmem:[%s1887_s9 + $0x38] sm:$0xff] %v1339_v38  ;;  %v1373_v55 = vld [vmem:[%s1891_s5 + $0xc0] sm:$0xff]  ;;  %v1375_v56 = vld [vmem:[%s1891_s5 + $0xc8] sm:$0xff]  ;;  %v1377_v57 = vld [vmem:[%s1891_s5 + $0xd0] sm:$0xff] }
 0x109   : >> { %1342 = vst [vmem:[%s1887_s9 + $0x40] sm:$0xff] %v1341_v39  ;;  %v1379_v58 = vld [vmem:[%s1891_s5 + $0xd8] sm:$0xff]  ;;  %v1381_v59 = vld [vmem:[%s1891_s5 + $0xe0] sm:$0xff]  ;;  %s2879_s5 = smov %s2787_s17 }
 0x10a   : >> { %1344 = vst [vmem:[%s1887_s9 + $0x48] sm:$0xff] %v1343_v40 }
 0x10b   : >> { %1346 = vst [vmem:[%s1887_s9 + $0x50] sm:$0xff] %v1345_v41 }
 0x10c   : >> { %1348 = vst [vmem:[%s1887_s9 + $0x58] sm:$0xff] %v1347_v42 }
 0x10d   : >> { %1350 = vst [vmem:[%s1887_s9 + $0x60] sm:$0xff] %v1349_v43 }
 0x10e   : >> { %1352 = vst [vmem:[%s1887_s9 + $0x68] sm:$0xff] %v1351_v44 }
 0x10f   : >> { %1354 = vst [vmem:[%s1887_s9 + $0x70] sm:$0xff] %v1353_v45 }
 0x110   : >> { %1356 = vst [vmem:[%s1887_s9 + $0x78] sm:$0xff] %v1355_v46 }
 0x111   : >> { %1358 = vst [vmem:[%s1887_s9 + $0x80] sm:$0xff] %v1357_v47 }
 0x112   : >> { %1360 = vst [vmem:[%s1887_s9 + $0x88] sm:$0xff] %v1359_v48 }
 0x113   : >> { %1362 = vst [vmem:[%s1887_s9 + $0x90] sm:$0xff] %v1361_v49 }
 0x114   : >> { %1364 = vst [vmem:[%s1887_s9 + $0x98] sm:$0xff] %v1363_v50 }
 0x115   : >> { %1366 = vst [vmem:[%s1887_s9 + $0xa0] sm:$0xff] %v1365_v51 }
 0x116   : >> { %1368 = vst [vmem:[%s1887_s9 + $0xa8] sm:$0xff] %v1367_v52 }
 0x117   : >> { %1370 = vst [vmem:[%s1887_s9 + $0xb0] sm:$0xff] %v1369_v53 }
 0x118   : >> { %1372 = vst [vmem:[%s1887_s9 + $0xb8] sm:$0xff] %v1371_v54 }
 0x119   : >> { %1374 = vst [vmem:[%s1887_s9 + $0xc0] sm:$0xff] %v1373_v55  ;;  %1321 = sbr.rel (!%p1318_p8) target bundleno = 256 (0x100), region = 201 }
 0x11a   : >> { %1376 = vst [vmem:[%s1887_s9 + $0xc8] sm:$0xff] %v1375_v56 }
 0x11b   : >> { %1378 = vst [vmem:[%s1887_s9 + $0xd0] sm:$0xff] %v1377_v57 }
 0x11c   : >> { %1380 = vst [vmem:[%s1887_s9 + $0xd8] sm:$0xff] %v1379_v58 }
 0x11d   : >> { %1382 = vst [vmem:[%s1887_s9 + $0xe0] sm:$0xff] %v1381_v59  ;;  %s2878_s9 = smov %s2790_s19 }
 0x11e PF: > { %1762 = sdivrem.u32 %s2891_s28, 29 }
 0x11f   : > { %s1592_s20 = smul.u32 232, %s2742_s14 }
 0x121   : > { %s2849_s18 = scalar_lea.vmem %s2224_s6, %s1592_s20 [#allocation3]   ;;  %s1396_s21 = scalar_lea.vmem %s2736_s2, %s1592_s20  }
 0x127   : > { %s1763_s22 = spop.drf %1762 }
 0x128   : > { %s1764_s23 = spop.drf %1762 }
 0x129   : > { %p1594_p9 = scmp.le.s32.totalorder %s1764_s23, 0 }
 0x12a   : > { %s1901_s24 = smov (!%p1594_p9), %s1396_s21   ;;  %s1905_s25 = smov (!%p1594_p9), %s2849_s18  }
 0x12b   : > { %1541 = sbr.rel (%p1594_p9) target bundleno = 312 (0x138), region = 206  ;;  %s1909_s8 = smov (!%p1594_p9), 0  }
 0x12c   : > { %s1913_s26 = smov (!%p1594_p9), 0  }
 0x130 LB: >> { %v1406_v60 = vld [vmem:[%s1907_s25] sm:$0xff]  ;;  %s1408_s6 = sadd.s32 1, %s1911_s8  ;;  %s1400_s26 = sadd.s32 1, %s1915_s26   ;;  %s1915_s26 = sphi %s1913_s26, %s1400_s26   ;;  %s1911_s8 = sphi %s1909_s8, %s1910_s8   ;;  %s1907_s25 = sphi %s1905_s25, %s1413_s25   ;;  %s1903_s24 = sphi %s1901_s24, %s1414_s24  }
 0x131   : >> { %1407 = vst [vmem:[%s1903_s24] sm:$0xff] %v1406_v60  ;;  %p1409_p10 = scmp.ge.s32.totalorder %s1408_s6, %s1764_s23  ;;  %p1399_p11 = scmp.ge.s32.totalorder %s1400_s26, %s1764_s23 }
 0x133   : >> { %s2895_s6 = smov (%p1409_p10, %s1408_s6), 0  ;;  %1402 = sbr.rel (!%p1399_p11) target bundleno = 304 (0x130), region = 212 }
 0x134   : >> { %s1595_s27 = sshll.u32 %s2895_s6, 3  ;;  %s1910_s8 = smov %s2895_s6  }
 0x135   : >> { %s1413_s25 = scalar_lea.vmem %s2849_s18, %s1595_s27 [#allocation3]   ;;  %s1414_s24 = scalar_lea.vmem %s1396_s21, %s1595_s27  }
 0x138 PF: > { %p8_p12 = scmp.ge.s32.totalorder %s1946_s10, 4   ;;  %s2881_s6 = smov %s1847_s7 }
 0x139   : > { %s2882_s7 = smov %s1956_s13  ;;  %s2883_s8 = smov %s1946_s10 }
 0x13a   :  { %10 = sbr.rel (!%p8_p12) target bundleno = 2 (0x2), region = 223 }

// kernel: squeezenet_forward.24
= control target key start
LH: loop header
LB: loop body
LE: loop exit
PB: predicated region body
PF: predicated region fallthrough
CT: control target
= control target key end

     0   :  { %s1206_s12 = smov 0   ;;  %s1208_s13 = smov 0   ;;  %s1514_s0 = inlined_call_operand.vmem [shape: bf16[450,128], index: 0, kind: input, shape index: {}]   ;;  %s1515_s1 = inlined_call_operand.vmem [shape: bf16[128,16], index: 1, kind: input, shape index: {}]   ;;  %s1516_s2 = inlined_call_operand.vmem [shape: f32[1,16], index: 2, kind: input, shape index: {}]   ;;  %s1517_s3 = inlined_call_operand.vmem [shape: f32[450,16], index: 3, kind: output, shape index: {}]  }
   0x1   :  { %s1210_s14 = smov 0  }
   0x2 LB: > { %s1219_s15 = sadd.s32 4294967295, %s1152_s14   ;;  %s1221_s16 = sadd.s32 1, %s1152_s14   ;;  %s1152_s14 = sphi %s1210_s14, %s1526_s14   ;;  %s1148_s13 = sphi %s1208_s13, %s1525_s13   ;;  %s1144_s12 = sphi %s1206_s12, %s1524_s12  }
   0x3   : > { %s85_s17 = ssub.s32 %s1152_s14, %s1221_s16  ;;  %s88_s18 = sadd.s32 1, %s1148_s13 }
   0x4   : > { %p86_p0 = scmp.eq.s32.totalorder %s85_s17, 0  ;;  %p98_p1 = scmp.ne.s32.totalorder %s1148_s13, %s1144_s12 }
   0x5   : > { %p99_p2 = scmp.eq.s32.totalorder %s1219_s15, 1  ;;  %p852_p3 = scmp.ge.s32.totalorder %s1152_s14, 1 }
   0x6   : > { %s1229_s19 = scalar_select %p86_p0, %s1148_s13, %s88_s18  }
   0x7   : > { %p1231_p4 = por %p99_p2, %p98_p1  ;;  %p146_p5 = scmp.lt.s32.totalorder %s1152_s14, 3 }
   0x9   : > { %p147_p6 = pnand %p852_p3, %p146_p5 }
   0xa   : > { %s1248_s29 = smul.u32 (!%p147_p6), 29, %s1219_s15  ;;  %s170_s22 = sand.u32 (!%p147_p6), 1, %s1144_s12  }
   0xb   : > { %150 = sbr.rel (%p147_p6) target bundleno = 317 (0x13d), region = 32 }
   0xc   : > { %p178_p7 = scmp.lt.s32.totalorder (!%p147_p6), %s1248_s29, 56  ;;  %s1001_s25 = smul.u32 (!%p147_p6), 232, %s170_s22 }
   0xe   : > { %s1292_s26 = scalar_lea.vmem (!%p147_p6), [#allocation2], %s1001_s25  }
  0x10   : > { %v975_v0 = vld [vmem:[%s1515_s1 + $0x38] sm:$0xff]  ;;  %v974_v1 = vld [vmem:[%s1515_s1 + $0x30] sm:$0xff]  ;;  %v973_v2 = vld [vmem:[%s1515_s1 + $0x28] sm:$0xff]  ;;  %s179_s7 = scalar_select %p178_p7, %s1248_s29, 56  ;;  %vm489_vm0 = vcmask 130048  }
  0x11   : > { %977 = vmatpush.bf16.msra.mxu1 %v975_v0  ;;  %978 = vmatpush.bf16.msra.mxu2 %v975_v0  ;;  %v972_v3 = vld [vmem:[%s1515_s1 + $0x20] sm:$0xff]  ;;  %v971_v4 = vld [vmem:[%s1515_s1 + $0x18] sm:$0xff]  ;;  %v970_v5 = vld [vmem:[%s1515_s1 + $0x10] sm:$0xff]  ;;  %s527_s12 = ssub.s32 (%p1231_p4), 57, %s1248_s29  ;;  %s976_s27 = smul.u32 (%p1231_p4), 232, %s1219_s15 }
  0x12   : > { %979 = vmatpush.bf16.msra.mxu3 %v975_v0  ;;  %377 = vmatpush.bf16.msra.mxu0 %v975_v0  ;;  %v969_v6 = vld [vmem:[%s1515_s1 + $0x8] sm:$0xff]  ;;  %s853_s10 = sshll.u32 %s179_s7, 2  ;;  %v968_v7 = vld [vmem:[%s1515_s1] sm:$0xff]  ;;  %p528_p8 = scmp.lt.s32.totalorder (%p1231_p4), %s527_s12, 29 }
  0x13   : > { %s1267_s21 = scalar_lea.vmem %s1514_s0, %s853_s10  ;;  %v1288_v25 = vld [vmem:[%s1516_s2] ss:$0 sm:$0xff]  ;;  %s1386_s4 = scalar_lea.vmem (%p1231_p4), %s1517_s3, %s976_s27  }
  0x14   : > { %v957_v8 = vld [vmem:[%s1267_s21 + $0x18] sm:$0xff]  ;;  %v954_v11 = vld [vmem:[%s1267_s21] sm:$0xff]  ;;  %v955_v15 = vld [vmem:[%s1267_s21 + $0x8] sm:$0xff] }
  0x15   : > { %980 = vmatpush.bf16.msra.mxu1 %v974_v1  ;;  %981 = vmatpush.bf16.msra.mxu2 %v974_v1  ;;  %v961_v9 = vld [vmem:[%s1267_s21 + $0x38] sm:$0xff]  ;;  %v958_v12 = vld [vmem:[%s1267_s21 + $0x20] sm:$0xff]  ;;  %v959_v16 = vld [vmem:[%s1267_s21 + $0x28] sm:$0xff] }
  0x16   : > { %982 = vmatpush.bf16.msra.mxu3 %v974_v1  ;;  %378 = vmatpush.bf16.msra.mxu0 %v974_v1  ;;  %v965_v10 = vld [vmem:[%s1267_s21 + $0x58] sm:$0xff]  ;;  %v962_v13 = vld [vmem:[%s1267_s21 + $0x40] sm:$0xff]  ;;  %v963_v17 = vld [vmem:[%s1267_s21 + $0x48] sm:$0xff] }
  0x17   : > { %v966_v14 = vld [vmem:[%s1267_s21 + $0x60] sm:$0xff]  ;;  %v967_v18 = vld [vmem:[%s1267_s21 + $0x68] sm:$0xff]  ;;  %v956_v19 = vld [vmem:[%s1267_s21 + $0x10] sm:$0xff] }
  0x18   : > { %v220_v20 = vld [vmem:[%s1267_s21 + $0x70] sm:$0xf] }
  0x19   : > { %983 = vmatpush.bf16.msra.mxu1 %v973_v2  ;;  %984 = vmatpush.bf16.msra.mxu2 %v973_v2  ;;  %v298_v21 = vunpack.c.l.b16 %v220_v20  ;;  %v960_v22 = vld [vmem:[%s1267_s21 + $0x30] sm:$0xff] }
  0x1a   : > { %985 = vmatpush.bf16.msra.mxu3 %v973_v2  ;;  %379 = vmatpush.bf16.msra.mxu0 %v973_v2  ;;  %v964_v23 = vld [vmem:[%s1267_s21 + $0x50] sm:$0xff] }
  0x1b   : > { %v313_v24 = vpack.c.b16 %v298_v21, %v298_v21 }
  0x1d   : > { %986 = vmatpush.bf16.msra.mxu1 %v972_v3  ;;  %987 = vmatpush.bf16.msra.mxu2 %v972_v3 }
  0x1e   : > { %988 = vmatpush.bf16.msra.mxu3 %v972_v3  ;;  %380 = vmatpush.bf16.msra.mxu0 %v972_v3 }
  0x21   : > { %989 = vmatpush.bf16.msra.mxu1 %v971_v4  ;;  %990 = vmatpush.bf16.msra.mxu2 %v971_v4 }
  0x22   : > { %991 = vmatpush.bf16.msra.mxu3 %v971_v4  ;;  %381 = vmatpush.bf16.msra.mxu0 %v971_v4 }
  0x25   : > { %992 = vmatpush.bf16.msra.mxu1 %v970_v5  ;;  %993 = vmatpush.bf16.msra.mxu2 %v970_v5 }
  0x26   : > { %994 = vmatpush.bf16.msra.mxu3 %v970_v5  ;;  %382 = vmatpush.bf16.msra.mxu0 %v970_v5 }
  0x29   : > { %995 = vmatpush.bf16.msra.mxu1 %v969_v6  ;;  %996 = vmatpush.bf16.msra.mxu2 %v969_v6 }
  0x2a   : > { %997 = vmatpush.bf16.msra.mxu3 %v969_v6  ;;  %383 = vmatpush.bf16.msra.mxu0 %v969_v6 }
  0x2d   : > { %998 = vmatpush.bf16.msra.mxu1 %v968_v7  ;;  %999 = vmatpush.bf16.msra.mxu2 %v968_v7 }
  0x2e   : > { %1000 = vmatpush.bf16.msra.mxu3 %v968_v7  ;;  %384 = vmatpush.bf16.msra.mxu0 %v968_v7 }
  0x30   : > { %400 = vmatmul.bf16.vlgmr.msra.gmra.mxu1 %v957_v8  ;;  %420 = vmatmul.bf16.vlgmr.msra.gmra.mxu2 %v961_v9 }
  0x31   : > { %440 = vmatmul.bf16.vlgmr.msra.gmra.mxu3 %v965_v10  ;;  %385 = vmatmul.bf16.vlgmr.msra.gmra.mxu0 %v954_v11 }
  0x40   : > { %405 = vmatmul.bf16.gmra.mxu1 %v958_v12  ;;  %425 = vmatmul.bf16.gmra.mxu2 %v962_v13 }
  0x41   : > { %445 = vmatmul.bf16.gmra.mxu3 %v966_v14  ;;  %390 = vmatmul.bf16.gmra.mxu0 %v955_v15 }
  0x50   : > { %410 = vmatmul.bf16.gmra.mxu1 %v959_v16  ;;  %430 = vmatmul.bf16.gmra.mxu2 %v963_v17 }
  0x51   : > { %450 = vmatmul.bf16.gmra.mxu3 %v967_v18  ;;  %395 = vmatmul.bf16.gmra.mxu0 %v956_v19 }
  0x60   : > { %415 = vmatmul.bf16.gmra.mxu1 %v960_v22  ;;  %435 = vmatmul.bf16.gmra.mxu2 %v964_v23 }
  0x61   : > { %455 = vmatmul.bf16.gmra.mxu3 %v313_v24 }
  0xad   : > { %v401_v26 = vpop.f32.mrf.mxu1 }
  0xae   : > { %v402_v27 = vadd.f32 %v1288_v25, %v401_v26  ;;  %v386_v28 = vpop.f32.mrf.mxu0 }
  0xaf   : > { %v387_v29 = vadd.f32 %v1288_v25, %v386_v28 }
  0xb0   : > { %v466_v30 = vmax.f32 %v402_v27, 0.0 }
  0xb1   : > { %v460_v31 = vmax.f32 %v387_v29, 0.0 }
  0xb2   : > { %496 = vst.msk [vmem:[%s1292_s26 + $0x30] sm:$0xff] %vm489_vm0, %v466_v30 }
  0xb3   : > { %v421_v32 = vpop.f32.mrf.mxu2  ;;  %490 = vst.msk [vmem:[%s1292_s26] sm:$0xff] %vm489_vm0, %v460_v31 }
  0xb4   : > { %v422_v33 = vadd.f32 %v1288_v25, %v421_v32  ;;  %v441_v34 = vpop.f32.mrf.mxu3 }
  0xb5   : > { %v442_v35 = vadd.f32 %v1288_v25, %v441_v34  ;;  %v403_v36 = vpop.f32.mrf.mxu1 }
  0xb6   : > { %v474_v37 = vmax.f32 %v422_v33, 0.0  ;;  %v404_v38 = vadd.f32 %v1288_v25, %v403_v36  ;;  %v388_v39 = vpop.f32.mrf.mxu0 }
  0xb7   : > { %v482_v40 = vmax.f32 %v442_v35, 0.0  ;;  %v389_v41 = vadd.f32 %v1288_v25, %v388_v39 }
  0xb8   : > { %504 = vst.msk [vmem:[%s1292_s26 + $0x70] sm:$0xff] %vm489_vm0, %v474_v37  ;;  %v467_v42 = vmax.f32 %v404_v38, 0.0 }
  0xb9   : > { %512 = vst.msk [vmem:[%s1292_s26 + $0xb0] sm:$0xff] %vm489_vm0, %v482_v40  ;;  %v461_v43 = vmax.f32 %v389_v41, 0.0 }
  0xba   : > { %497 = vst.msk [vmem:[%s1292_s26 + $0x38] sm:$0xff] %vm489_vm0, %v467_v42 }
  0xbb   : > { %v423_v44 = vpop.f32.mrf.mxu2  ;;  %491 = vst.msk [vmem:[%s1292_s26 + $0x8] sm:$0xff] %vm489_vm0, %v461_v43 }
  0xbc   : > { %v424_v45 = vadd.f32 %v1288_v25, %v423_v44  ;;  %v443_v46 = vpop.f32.mrf.mxu3 }
  0xbd   : > { %v444_v47 = vadd.f32 %v1288_v25, %v443_v46  ;;  %v406_v48 = vpop.f32.mrf.mxu1 }
  0xbe   : > { %v475_v49 = vmax.f32 %v424_v45, 0.0  ;;  %v407_v50 = vadd.f32 %v1288_v25, %v406_v48  ;;  %v391_v51 = vpop.f32.mrf.mxu0 }
  0xbf   : > { %v483_v52 = vmax.f32 %v444_v47, 0.0  ;;  %v392_v53 = vadd.f32 %v1288_v25, %v391_v51 }
  0xc0   : > { %505 = vst.msk [vmem:[%s1292_s26 + $0x78] sm:$0xff] %vm489_vm0, %v475_v49  ;;  %v468_v54 = vmax.f32 %v407_v50, 0.0 }
  0xc1   : > { %513 = vst.msk [vmem:[%s1292_s26 + $0xb8] sm:$0xff] %vm489_vm0, %v483_v52  ;;  %v462_v55 = vmax.f32 %v392_v53, 0.0 }
  0xc2   : > { %498 = vst.msk [vmem:[%s1292_s26 + $0x40] sm:$0xff] %vm489_vm0, %v468_v54 }
  0xc3   : > { %v426_v56 = vpop.f32.mrf.mxu2  ;;  %492 = vst.msk [vmem:[%s1292_s26 + $0x10] sm:$0xff] %vm489_vm0, %v462_v55 }
  0xc4   : > { %v427_v57 = vadd.f32 %v1288_v25, %v426_v56  ;;  %v446_v58 = vpop.f32.mrf.mxu3 }
  0xc5   : > { %v447_v59 = vadd.f32 %v1288_v25, %v446_v58  ;;  %v408_v60 = vpop.f32.mrf.mxu1 }
  0xc6   : > { %v476_v61 = vmax.f32 %v427_v57, 0.0  ;;  %v409_v62 = vadd.f32 %v1288_v25, %v408_v60  ;;  %v393_v63 = vpop.f32.mrf.mxu0 }
  0xc7   : > { %v484_v0 = vmax.f32 %v447_v59, 0.0  ;;  %v394_v1 = vadd.f32 %v1288_v25, %v393_v63 }
  0xc8   : > { %506 = vst.msk [vmem:[%s1292_s26 + $0x80] sm:$0xff] %vm489_vm0, %v476_v61  ;;  %v469_v2 = vmax.f32 %v409_v62, 0.0 }
  0xc9   : > { %514 = vst.msk [vmem:[%s1292_s26 + $0xc0] sm:$0xff] %vm489_vm0, %v484_v0  ;;  %v463_v3 = vmax.f32 %v394_v1, 0.0 }
  0xca   : > { %499 = vst.msk [vmem:[%s1292_s26 + $0x48] sm:$0xff] %vm489_vm0, %v469_v2 }
  0xcb   : > { %v428_v4 = vpop.f32.mrf.mxu2  ;;  %493 = vst.msk [vmem:[%s1292_s26 + $0x18] sm:$0xff] %vm489_vm0, %v463_v3 }
  0xcc   : > { %v429_v5 = vadd.f32 %v1288_v25, %v428_v4  ;;  %v448_v6 = vpop.f32.mrf.mxu3 }
  0xcd   : > { %v449_v7 = vadd.f32 %v1288_v25, %v448_v6  ;;  %v411_v8 = vpop.f32.mrf.mxu1 }
  0xce   : > { %v477_v9 = vmax.f32 %v429_v5, 0.0  ;;  %v412_v10 = vadd.f32 %v1288_v25, %v411_v8  ;;  %v396_v11 = vpop.f32.mrf.mxu0 }
  0xcf   : > { %v485_v12 = vmax.f32 %v449_v7, 0.0  ;;  %v397_v13 = vadd.f32 %v1288_v25, %v396_v11 }
  0xd0   : > { %507 = vst.msk [vmem:[%s1292_s26 + $0x88] sm:$0xff] %vm489_vm0, %v477_v9  ;;  %v470_v14 = vmax.f32 %v412_v10, 0.0 }
  0xd1   : > { %515 = vst.msk [vmem:[%s1292_s26 + $0xc8] sm:$0xff] %vm489_vm0, %v485_v12  ;;  %v464_v15 = vmax.f32 %v397_v13, 0.0 }
  0xd2   : > { %500 = vst.msk [vmem:[%s1292_s26 + $0x50] sm:$0xff] %vm489_vm0, %v470_v14 }
  0xd3   : > { %v431_v16 = vpop.f32.mrf.mxu2  ;;  %494 = vst.msk [vmem:[%s1292_s26 + $0x20] sm:$0xff] %vm489_vm0, %v464_v15 }
  0xd4   : > { %v432_v17 = vadd.f32 %v1288_v25, %v431_v16  ;;  %v451_v18 = vpop.f32.mrf.mxu3 }
  0xd5   : > { %v452_v19 = vadd.f32 %v1288_v25, %v451_v18  ;;  %v413_v20 = vpop.f32.mrf.mxu1 }
  0xd6   : > { %v478_v21 = vmax.f32 %v432_v17, 0.0  ;;  %v414_v22 = vadd.f32 %v1288_v25, %v413_v20  ;;  %v398_v23 = vpop.f32.mrf.mxu0 }
  0xd7   : > { %v486_v24 = vmax.f32 %v452_v19, 0.0  ;;  %v399_v26 = vadd.f32 %v1288_v25, %v398_v23 }
  0xd8   : > { %508 = vst.msk [vmem:[%s1292_s26 + $0x90] sm:$0xff] %vm489_vm0, %v478_v21  ;;  %v471_v27 = vmax.f32 %v414_v22, 0.0 }
  0xd9   : > { %516 = vst.msk [vmem:[%s1292_s26 + $0xd0] sm:$0xff] %vm489_vm0, %v486_v24  ;;  %v465_v28 = vmax.f32 %v399_v26, 0.0 }
  0xda   : > { %501 = vst.msk [vmem:[%s1292_s26 + $0x58] sm:$0xff] %vm489_vm0, %v471_v27 }
  0xdb   : > { %v433_v29 = vpop.f32.mrf.mxu2  ;;  %495 = vst.msk [vmem:[%s1292_s26 + $0x28] sm:$0xff] %vm489_vm0, %v465_v28 }
  0xdc   : > { %v434_v30 = vadd.f32 %v1288_v25, %v433_v29  ;;  %v453_v31 = vpop.f32.mrf.mxu3 }
  0xdd   : > { %v454_v32 = vadd.f32 %v1288_v25, %v453_v31  ;;  %v416_v33 = vpop.f32.mrf.mxu1 }
  0xde   : > { %v479_v34 = vmax.f32 %v434_v30, 0.0  ;;  %v417_v35 = vadd.f32 %v1288_v25, %v416_v33 }
  0xdf   : > { %v487_v36 = vmax.f32 %v454_v32, 0.0 }
  0xe0   : > { %509 = vst.msk [vmem:[%s1292_s26 + $0x98] sm:$0xff] %vm489_vm0, %v479_v34  ;;  %v472_v37 = vmax.f32 %v417_v35, 0.0 }
  0xe1   : > { %517 = vst.msk [vmem:[%s1292_s26 + $0xd8] sm:$0xff] %vm489_vm0, %v487_v36 }
  0xe2   : > { %502 = vst.msk [vmem:[%s1292_s26 + $0x60] sm:$0xff] %vm489_vm0, %v472_v37 }
  0xe3   : > { %v436_v38 = vpop.f32.mrf.mxu2 }
  0xe4   : > { %v437_v39 = vadd.f32 %v1288_v25, %v436_v38  ;;  %v456_v40 = vpop.f32.mrf.mxu3 }
  0xe5   : > { %v457_v41 = vadd.f32 %v1288_v25, %v456_v40  ;;  %v418_v42 = vpop.f32.mrf.mxu1 }
  0xe6   : > { %v480_v43 = vmax.f32 %v437_v39, 0.0  ;;  %v419_v44 = vadd.f32 %v1288_v25, %v418_v42 }
  0xe7   : > { %v488_v45 = vmax.f32 %v457_v41, 0.0 }
  0xe8   : > { %510 = vst.msk [vmem:[%s1292_s26 + $0xa0] sm:$0xff] %vm489_vm0, %v480_v43  ;;  %v473_v46 = vmax.f32 %v419_v44, 0.0 }
  0xe9   : > { %518 = vst.msk [vmem:[%s1292_s26 + $0xe0] sm:$0xff] %vm489_vm0, %v488_v45 }
  0xea   : > { %503 = vst.msk [vmem:[%s1292_s26 + $0x68] sm:$0xff] %vm489_vm0, %v473_v46 }
  0xeb   : > { %v438_v47 = vpop.f32.mrf.mxu2 }
  0xec   : > { %v439_v48 = vadd.f32 %v1288_v25, %v438_v47  ;;  %v458_v49 = vpop.f32.mrf.mxu3  ;;  %525 = sbr.rel (!%p1231_p4) target bundleno = 317 (0x13d), region = 36 }
  0xee   : > { %v481_v50 = vmax.f32 %v439_v48, 0.0 }
  0xf0   : > { %511 = vst.msk [vmem:[%s1292_s26 + $0xa8] sm:$0xff] %vm489_vm0, %v481_v50 }
  0xf1   : > { %s1528_s12 = smov (!%p528_p8, %s527_s12), 29 }
  0xf2   : > { %s942_s5 = sshll.u32 %s1528_s12, 3 }
  0xf3   : > { %p945_p9 = scmp.eq.s32.totalorder %s942_s5, 0 }
  0xf4   : > { %1092 = sdivrem.u32 (!%p945_p9), %s1528_s12, 29 }
  0xf5   : > { %536 = sbr.rel (%p945_p9) target bundleno = 317 (0x13d), region = 40 }
  0xfd   : > { %s1392_s20 = spop.drf %1092 }
  0xfe   : > { %s1094_s6 = spop.drf %1092  ;;  %p946_p10 = scmp.le.s32.totalorder %s1392_s20, 0 }
  0xff   : > { %s1519_s15 = smov (!%p946_p10), %s1386_s4  ;;  %s1520_s29 = smov (!%p946_p10), %s1292_s26 }
 0x100   : > { %805 = sbr.rel (%p946_p10) target bundleno = 291 (0x123), region = 116  ;;  %s1401_s7 = smov (!%p946_p10), 0  }
 0x101   : > { %s1403_s8 = smov (!%p946_p10), 0  }
 0x105 LB: >> { %v657_v25 = vld [vmem:[%s1160_s29] sm:$0xff]  ;;  %v659_v51 = vld [vmem:[%s1160_s29 + $0x8] sm:$0xff]  ;;  %v661_v52 = vld [vmem:[%s1160_s29 + $0x10] sm:$0xff]  ;;  %s715_s9 = sadd.s32 1, %s1164_s7  ;;  %s651_s8 = sadd.s32 1, %s1168_s8   ;;  %s1168_s8 = sphi %s1403_s8, %s651_s8   ;;  %s1164_s7 = sphi %s1401_s7, %s1523_s7   ;;  %s1160_s29 = sphi %s1520_s29, %s1522_s29   ;;  %s1156_s15 = sphi %s1519_s15, %s1521_s15  }
 0x106   : >> { %658 = vst [vmem:[%s1156_s15] sm:$0xff] %v657_v25  ;;  %v663_v53 = vld [vmem:[%s1160_s29 + $0x18] sm:$0xff]  ;;  %p716_p11 = scmp.ge.s32.totalorder %s715_s9, %s1392_s20  ;;  %v665_v54 = vld [vmem:[%s1160_s29 + $0x20] sm:$0xff]  ;;  %v667_v55 = vld [vmem:[%s1160_s29 + $0x28] sm:$0xff]  ;;  %p650_p12 = scmp.ge.s32.totalorder %s651_s8, %s1392_s20 }
 0x107   : >> { %660 = vst [vmem:[%s1156_s15 + $0x8] sm:$0xff] %v659_v51  ;;  %v669_v56 = vld [vmem:[%s1160_s29 + $0x30] sm:$0xff]  ;;  %v671_v57 = vld [vmem:[%s1160_s29 + $0x38] sm:$0xff]  ;;  %v673_v58 = vld [vmem:[%s1160_s29 + $0x40] sm:$0xff] }
 0x108   : >> { %662 = vst [vmem:[%s1156_s15 + $0x10] sm:$0xff] %v661_v52  ;;  %s1530_s9 = smov (%p716_p11, %s715_s9), 0  ;;  %v675_v59 = vld [vmem:[%s1160_s29 + $0x48] sm:$0xff]  ;;  %v677_v60 = vld [vmem:[%s1160_s29 + $0x50] sm:$0xff]  ;;  %v679_v61 = vld [vmem:[%s1160_s29 + $0x58] sm:$0xff] }
 0x109   : >> { %664 = vst [vmem:[%s1156_s15 + $0x18] sm:$0xff] %v663_v53  ;;  %s718_s10 = smul.u32 232, %s1530_s9  ;;  %v681_v62 = vld [vmem:[%s1160_s29 + $0x60] sm:$0xff]  ;;  %v683_v63 = vld [vmem:[%s1160_s29 + $0x68] sm:$0xff]  ;;  %v685_v0 = vld [vmem:[%s1160_s29 + $0x70] sm:$0xff]  ;;  %s1523_s7 = smov %s1530_s9 }
 0x10a   : >> { %666 = vst [vmem:[%s1156_s15 + $0x20] sm:$0xff] %v665_v54  ;;  %v687_v1 = vld [vmem:[%s1160_s29 + $0x78] sm:$0xff]  ;;  %v689_v2 = vld [vmem:[%s1160_s29 + $0x80] sm:$0xff]  ;;  %v691_v3 = vld [vmem:[%s1160_s29 + $0x88] sm:$0xff] }
 0x10b   : >> { %668 = vst [vmem:[%s1156_s15 + $0x28] sm:$0xff] %v667_v55  ;;  %s1437_s11 = scalar_lea.vmem %s1292_s26, %s718_s10 [#allocation2]   ;;  %s1440_s14 = scalar_lea.vmem %s1386_s4, %s718_s10   ;;  %v693_v4 = vld [vmem:[%s1160_s29 + $0x90] sm:$0xff]  ;;  %v695_v5 = vld [vmem:[%s1160_s29 + $0x98] sm:$0xff]  ;;  %v697_v6 = vld [vmem:[%s1160_s29 + $0xa0] sm:$0xff] }
 0x10c   : >> { %670 = vst [vmem:[%s1156_s15 + $0x30] sm:$0xff] %v669_v56  ;;  %v699_v7 = vld [vmem:[%s1160_s29 + $0xa8] sm:$0xff]  ;;  %v701_v8 = vld [vmem:[%s1160_s29 + $0xb0] sm:$0xff]  ;;  %v703_v9 = vld [vmem:[%s1160_s29 + $0xb8] sm:$0xff] }
 0x10d   : >> { %672 = vst [vmem:[%s1156_s15 + $0x38] sm:$0xff] %v671_v57  ;;  %v705_v10 = vld [vmem:[%s1160_s29 + $0xc0] sm:$0xff]  ;;  %v707_v11 = vld [vmem:[%s1160_s29 + $0xc8] sm:$0xff]  ;;  %v709_v12 = vld [vmem:[%s1160_s29 + $0xd0] sm:$0xff] }
 0x10e   : >> { %674 = vst [vmem:[%s1156_s15 + $0x40] sm:$0xff] %v673_v58  ;;  %v711_v13 = vld [vmem:[%s1160_s29 + $0xd8] sm:$0xff]  ;;  %v713_v14 = vld [vmem:[%s1160_s29 + $0xe0] sm:$0xff]  ;;  %s1522_s29 = smov %s1437_s11 }
 0x10f   : >> { %676 = vst [vmem:[%s1156_s15 + $0x48] sm:$0xff] %v675_v59 }
 0x110   : >> { %678 = vst [vmem:[%s1156_s15 + $0x50] sm:$0xff] %v677_v60 }
 0x111   : >> { %680 = vst [vmem:[%s1156_s15 + $0x58] sm:$0xff] %v679_v61 }
 0x112   : >> { %682 = vst [vmem:[%s1156_s15 + $0x60] sm:$0xff] %v681_v62 }
 0x113   : >> { %684 = vst [vmem:[%s1156_s15 + $0x68] sm:$0xff] %v683_v63 }
 0x114   : >> { %686 = vst [vmem:[%s1156_s15 + $0x70] sm:$0xff] %v685_v0 }
 0x115   : >> { %688 = vst [vmem:[%s1156_s15 + $0x78] sm:$0xff] %v687_v1 }
 0x116   : >> { %690 = vst [vmem:[%s1156_s15 + $0x80] sm:$0xff] %v689_v2 }
 0x117   : >> { %692 = vst [vmem:[%s1156_s15 + $0x88] sm:$0xff] %v691_v3 }
 0x118   : >> { %694 = vst [vmem:[%s1156_s15 + $0x90] sm:$0xff] %v693_v4 }
 0x119   : >> { %696 = vst [vmem:[%s1156_s15 + $0x98] sm:$0xff] %v695_v5 }
 0x11a   : >> { %698 = vst [vmem:[%s1156_s15 + $0xa0] sm:$0xff] %v697_v6 }
 0x11b   : >> { %700 = vst [vmem:[%s1156_s15 + $0xa8] sm:$0xff] %v699_v7 }
 0x11c   : >> { %702 = vst [vmem:[%s1156_s15 + $0xb0] sm:$0xff] %v701_v8 }
 0x11d   : >> { %704 = vst [vmem:[%s1156_s15 + $0xb8] sm:$0xff] %v703_v9 }
 0x11e   : >> { %706 = vst [vmem:[%s1156_s15 + $0xc0] sm:$0xff] %v705_v10  ;;  %653 = sbr.rel (!%p650_p12) target bundleno = 261 (0x105), region = 122 }
 0x11f   : >> { %708 = vst [vmem:[%s1156_s15 + $0xc8] sm:$0xff] %v707_v11 }
 0x120   : >> { %710 = vst [vmem:[%s1156_s15 + $0xd0] sm:$0xff] %v709_v12 }
 0x121   : >> { %712 = vst [vmem:[%s1156_s15 + $0xd8] sm:$0xff] %v711_v13 }
 0x122   : >> { %714 = vst [vmem:[%s1156_s15 + $0xe0] sm:$0xff] %v713_v14  ;;  %s1521_s15 = smov %s1440_s14 }
 0x123 PF: > { %1095 = sdivrem.u32 %s1528_s12, 29 }
 0x124   : > { %s947_s17 = smul.u32 232, %s1392_s20 }
 0x126   : > { %s1499_s18 = scalar_lea.vmem %s1292_s26, %s947_s17 [#allocation2]   ;;  %s728_s21 = scalar_lea.vmem %s1386_s4, %s947_s17  }
 0x12c   : > { %s1096_s22 = spop.drf %1095 }
 0x12d   : > { %s1097_s23 = spop.drf %1095 }
 0x12e   : > { %p949_p13 = scmp.le.s32.totalorder %s1097_s23, 0 }
 0x12f   : > { %s1170_s24 = smov (!%p949_p13), %s728_s21   ;;  %s1174_s25 = smov (!%p949_p13), %s1499_s18  }
 0x130   : > { %819 = sbr.rel (%p949_p13) target bundleno = 317 (0x13d), region = 127  ;;  %s1178_s27 = smov (!%p949_p13), 0  }
 0x131   : > { %s1182_s28 = smov (!%p949_p13), 0  }
 0x135 LB: >> { %v738_v15 = vld [vmem:[%s1176_s25] sm:$0xff]  ;;  %s740_s26 = sadd.s32 1, %s1180_s27  ;;  %s732_s28 = sadd.s32 1, %s1184_s28   ;;  %s1184_s28 = sphi %s1182_s28, %s732_s28   ;;  %s1180_s27 = sphi %s1178_s27, %s1179_s27   ;;  %s1176_s25 = sphi %s1174_s25, %s745_s25   ;;  %s1172_s24 = sphi %s1170_s24, %s746_s24  }
 0x136   : >> { %739 = vst [vmem:[%s1172_s24] sm:$0xff] %v738_v15  ;;  %p741_p0 = scmp.ge.s32.totalorder %s740_s26, %s1097_s23  ;;  %p731_p1 = scmp.ge.s32.totalorder %s732_s28, %s1097_s23 }
 0x138   : >> { %s1532_s26 = smov (%p741_p0, %s740_s26), 0  ;;  %734 = sbr.rel (!%p731_p1) target bundleno = 309 (0x135), region = 133 }
 0x139   : >> { %s950_s12 = sshll.u32 %s1532_s26, 3  ;;  %s1179_s27 = smov %s1532_s26  }
 0x13a   : >> { %s745_s25 = scalar_lea.vmem %s1499_s18, %s950_s12 [#allocation2]   ;;  %s746_s24 = scalar_lea.vmem %s728_s21, %s950_s12  }
 0x13d PF: > { %p10_p2 = scmp.ge.s32.totalorder %s1221_s16, 4   ;;  %s1524_s12 = smov %s1148_s13 }
 0x13e   : > { %s1525_s13 = smov %s1229_s19  ;;  %s1526_s14 = smov %s1221_s16 }
 0x13f   :  { %12 = sbr.rel (!%p10_p2) target bundleno = 2 (0x2), region = 144 }

// kernel: squeezenet_forward.23
= control target key start
LH: loop header
LB: loop body
LE: loop exit
PB: predicated region body
PF: predicated region fallthrough
CT: control target
= control target key end

     0   :  { %s1472_s12 = smov 0   ;;  %s1474_s13 = smov 0   ;;  %s1841_s0 = inlined_call_operand.vmem [shape: bf16[450,144], index: 0, kind: input, shape index: {}]   ;;  %s1842_s1 = inlined_call_operand.vmem [shape: bf16[144,128], index: 1, kind: input, shape index: {}]   ;;  %s1843_s2 = inlined_call_operand.vmem [shape: f32[1,128], index: 2, kind: input, shape index: {}]   ;;  %s1844_s3 = inlined_call_operand.vmem [shape: f32[450,128], index: 3, kind: output, shape index: {}]  }
   0x1   :  { %s1476_s14 = smov 0  }
   0x2 LB: > { %s1485_s15 = sadd.s32 4294967295, %s1418_s14   ;;  %s1487_s16 = sadd.s32 1, %s1418_s14   ;;  %s1418_s14 = sphi %s1476_s14, %s1853_s14   ;;  %s1414_s13 = sphi %s1474_s13, %s1852_s13   ;;  %s1410_s12 = sphi %s1472_s12, %s1851_s12  }
   0x3   : > { %s85_s17 = ssub.s32 %s1418_s14, %s1487_s16  ;;  %s88_s18 = sadd.s32 1, %s1414_s13 }
   0x4   : > { %p86_p0 = scmp.eq.s32.totalorder %s85_s17, 0  ;;  %p98_p1 = scmp.ne.s32.totalorder %s1414_s13, %s1410_s12 }
   0x5   : > { %p99_p2 = scmp.eq.s32.totalorder %s1485_s15, 1  ;;  %p1041_p3 = scmp.ge.s32.totalorder %s1418_s14, 1 }
   0x6   : > { %s1495_s19 = scalar_select %p86_p0, %s1414_s13, %s88_s18  }
   0x7   : > { %p1497_p4 = por %p99_p2, %p98_p1  ;;  %p149_p5 = scmp.lt.s32.totalorder %s1418_s14, 3 }
   0x9   : > { %p150_p6 = pnand %p1041_p3, %p149_p5 }
   0xa   : > { %s1508_s25 = smul.u32 (!%p150_p6), 29, %s1485_s15  ;;  %s175_s24 = sand.u32 (!%p150_p6), 1, %s1410_s12  }
   0xb   : > { %153 = sbr.rel (%p150_p6) target bundleno = 376 (0x178), region = 32 }
   0xc   : > { %p184_p7 = scmp.lt.s32.totalorder (!%p150_p6), %s1508_s25, 56 }
  0x10   : > { %v1255_v0 = vld [vmem:[%s1842_s1 + $0x38] sm:$0xff]  ;;  %v1256_v1 = vld [vmem:[%s1842_s1 + $0x40] sm:$0xff]  ;;  %v1254_v2 = vld [vmem:[%s1842_s1 + $0x30] sm:$0xff]  ;;  %s185_s28 = scalar_select %p184_p7, %s1508_s25, 56  ;;  %vm438_vm0 = vcmask 130048  }
  0x11   : > { %484 = vmatpush.bf16.msra.mxu0 %v1255_v0  ;;  %1258 = vmatpush.bf16.msra.mxu2 %v1255_v0  ;;  %v1253_v3 = vld [vmem:[%s1842_s1 + $0x28] sm:$0xff]  ;;  %v1252_v7 = vld [vmem:[%s1842_s1 + $0x20] sm:$0xff]  ;;  %v1251_v8 = vld [vmem:[%s1842_s1 + $0x18] sm:$0xff]  ;;  %s716_s12 = ssub.s32 (%p1497_p4), 57, %s1508_s25  ;;  %s1257_s30 = smul.u32 (%p1497_p4), 232, %s1485_s15 }
  0x12   : > { %574 = vmatpush.bf16.msra.mxu1 %v1256_v1  ;;  %1266 = vmatpush.bf16.msra.mxu3 %v1256_v1  ;;  %s1219_s4 = sshll.u32 %s185_s28, 3  ;;  %v1250_v11 = vld [vmem:[%s1842_s1 + $0x10] sm:$0xff]  ;;  %v1249_v15 = vld [vmem:[%s1842_s1 + $0x8] sm:$0xff]  ;;  %v1248_v17 = vld [vmem:[%s1842_s1] sm:$0xff]  ;;  %s1267_s28 = smul.u32 232, %s175_s24 }
  0x13   : > { %s1521_s7 = scalar_lea.vmem %s1841_s0, %s1219_s4  ;;  %p717_p8 = scmp.lt.s32.totalorder (%p1497_p4), %s716_s12, 29 }
  0x14   : > { %v1220_v4 = vld [vmem:[%s1521_s7 + $0x4] sm:$0xf]  ;;  %v1048_v5 = vld [vmem:[%s1521_s7 + $0x8] sm:$0xf0]  ;;  %v1238_v9 = vld [vmem:[%s1521_s7 + $0x94] sm:$0xf]  ;;  %s1713_s6 = scalar_lea.vmem (%p1497_p4), %s1844_s3, %s1257_s30  }
  0x15   : > { %485 = vmatpush.bf16.msra.mxu0 %v1254_v2  ;;  %1259 = vmatpush.bf16.msra.mxu2 %v1254_v2  ;;  %v1051_v6 = vor.u32 %v1220_v4, %v1048_v5  ;;  %v1120_v10 = vld [vmem:[%s1521_s7 + $0x98] sm:$0xf0]  ;;  %v1222_v13 = vld [vmem:[%s1521_s7 + $0x14] sm:$0xf]  ;;  %v1046_v18 = vld [vmem:[%s1521_s7] sm:$0xf] }
  0x16   : > { %v1123_v12 = vor.u32 %v1238_v9, %v1120_v10  ;;  %v1056_v14 = vld [vmem:[%s1521_s7 + $0x18] sm:$0xf0]  ;;  %v1221_v19 = vld [vmem:[%s1521_s7 + $0x4] sm:$0xf0]  ;;  %v1102_v20 = vld [vmem:[%s1521_s7 + $0x70] sm:$0xf] }
  0x17   : > { %1192 = vmatmul.msk.bf16.vlgmr.msra.gmra.mxu1 %vm438_vm0, %v1051_v6  ;;  %v1059_v16 = vor.u32 %v1222_v13, %v1056_v14  ;;  %v1235_v21 = vld [vmem:[%s1521_s7 + $0x74] sm:$0xf0]  ;;  %v1047_v22 = vor.u32 %v1221_v19, %v1046_v18  ;;  %v1240_v24 = vld [vmem:[%s1521_s7 + $0xa4] sm:$0xf]  ;;  %v1128_v25 = vld [vmem:[%s1521_s7 + $0xa8] sm:$0xf0] }
  0x18   : > { %1201 = vmatmul.msk.bf16.vlgmr.msra.gmra.mxu3 %vm438_vm0, %v1123_v12  ;;  %v1103_v23 = vor.u32 %v1235_v21, %v1102_v20  ;;  %v1131_v26 = vor.u32 %v1240_v24, %v1128_v25  ;;  %v1224_v27 = vld [vmem:[%s1521_s7 + $0x24] sm:$0xf]  ;;  %v1064_v28 = vld [vmem:[%s1521_s7 + $0x28] sm:$0xf0]  ;;  %v1054_v30 = vld [vmem:[%s1521_s7 + $0x10] sm:$0xf] }
  0x19   : > { %486 = vmatpush.bf16.msra.mxu0 %v1253_v3  ;;  %1260 = vmatpush.bf16.msra.mxu2 %v1253_v3  ;;  %v1067_v29 = vor.u32 %v1224_v27, %v1064_v28  ;;  %v1223_v31 = vld [vmem:[%s1521_s7 + $0x14] sm:$0xf0]  ;;  %v1110_v32 = vld [vmem:[%s1521_s7 + $0x80] sm:$0xf]  ;;  %v1237_v33 = vld [vmem:[%s1521_s7 + $0x84] sm:$0xf0] }
  0x1a   : > { %v1055_v34 = vor.u32 %v1223_v31, %v1054_v30  ;;  %v1111_v35 = vor.u32 %v1237_v33, %v1110_v32  ;;  %v1242_v36 = vld [vmem:[%s1521_s7 + $0xb4] sm:$0xf]  ;;  %v1136_v37 = vld [vmem:[%s1521_s7 + $0xb8] sm:$0xf0]  ;;  %v1062_v42 = vld [vmem:[%s1521_s7 + $0x20] sm:$0xf] }
  0x1b   : > { %v1139_v38 = vor.u32 %v1242_v36, %v1136_v37  ;;  %v1226_v39 = vld [vmem:[%s1521_s7 + $0x34] sm:$0xf]  ;;  %v1072_v40 = vld [vmem:[%s1521_s7 + $0x38] sm:$0xf0]  ;;  %v1225_v43 = vld [vmem:[%s1521_s7 + $0x24] sm:$0xf0] }
  0x1c   : > { %v1075_v41 = vor.u32 %v1226_v39, %v1072_v40  ;;  %v1118_v44 = vld [vmem:[%s1521_s7 + $0x90] sm:$0xf]  ;;  %v1239_v45 = vld [vmem:[%s1521_s7 + $0x94] sm:$0xf0]  ;;  %v1063_v46 = vor.u32 %v1225_v43, %v1062_v42  ;;  %v1244_v48 = vld [vmem:[%s1521_s7 + $0xc4] sm:$0xf] }
  0x1d   : > { %487 = vmatpush.bf16.msra.mxu0 %v1252_v7  ;;  %1261 = vmatpush.bf16.msra.mxu2 %v1252_v7  ;;  %v1119_v47 = vor.u32 %v1239_v45, %v1118_v44  ;;  %v1144_v49 = vld [vmem:[%s1521_s7 + $0xc8] sm:$0xf0]  ;;  %v1228_v51 = vld [vmem:[%s1521_s7 + $0x44] sm:$0xf]  ;;  %v1070_v54 = vld [vmem:[%s1521_s7 + $0x30] sm:$0xf] }
  0x1e   : > { %v1147_v50 = vor.u32 %v1244_v48, %v1144_v49  ;;  %v1080_v52 = vld [vmem:[%s1521_s7 + $0x48] sm:$0xf0]  ;;  %v1227_v55 = vld [vmem:[%s1521_s7 + $0x34] sm:$0xf0]  ;;  %v1126_v56 = vld [vmem:[%s1521_s7 + $0xa0] sm:$0xf] }
  0x1f   : > { %v1083_v53 = vor.u32 %v1228_v51, %v1080_v52  ;;  %v1241_v57 = vld [vmem:[%s1521_s7 + $0xa4] sm:$0xf0]  ;;  %v1071_v58 = vor.u32 %v1227_v55, %v1070_v54  ;;  %v1246_v60 = vld [vmem:[%s1521_s7 + $0xd4] sm:$0xf]  ;;  %v1152_v61 = vld [vmem:[%s1521_s7 + $0xd8] sm:$0xf0] }
  0x20   : > { %v1127_v59 = vor.u32 %v1241_v57, %v1126_v56  ;;  %v1155_v62 = vor.u32 %v1246_v60, %v1152_v61  ;;  %v1230_v63 = vld [vmem:[%s1521_s7 + $0x54] sm:$0xf]  ;;  %v1088_v0 = vld [vmem:[%s1521_s7 + $0x58] sm:$0xf0]  ;;  %v1078_v2 = vld [vmem:[%s1521_s7 + $0x40] sm:$0xf] }
  0x21   : > { %488 = vmatpush.bf16.msra.mxu0 %v1251_v8  ;;  %1262 = vmatpush.bf16.msra.mxu2 %v1251_v8  ;;  %v1091_v1 = vor.u32 %v1230_v63, %v1088_v0  ;;  %v1229_v3 = vld [vmem:[%s1521_s7 + $0x44] sm:$0xf0]  ;;  %v1134_v4 = vld [vmem:[%s1521_s7 + $0xb0] sm:$0xf]  ;;  %v1243_v5 = vld [vmem:[%s1521_s7 + $0xb4] sm:$0xf0] }
  0x22   : > { %v1079_v6 = vor.u32 %v1229_v3, %v1078_v2  ;;  %v1135_v7 = vor.u32 %v1243_v5, %v1134_v4  ;;  %v1232_v8 = vld [vmem:[%s1521_s7 + $0x64] sm:$0xf]  ;;  %v1096_v9 = vld [vmem:[%s1521_s7 + $0x68] sm:$0xf0]  ;;  %v1086_v14 = vld [vmem:[%s1521_s7 + $0x50] sm:$0xf] }
  0x23   : > { %v229_v10 = vld [vmem:[%s1521_s7 + $0xe0] sm:$0xff]  ;;  %v1099_v12 = vor.u32 %v1232_v8, %v1096_v9  ;;  %v1234_v20 = vld [vmem:[%s1521_s7 + $0x74] sm:$0xf]  ;;  %v1104_v21 = vld [vmem:[%s1521_s7 + $0x78] sm:$0xf0]  ;;  %s1619_s29 = scalar_lea.vmem [#allocation2], %s1267_s28  }
  0x24   : > { %v1233_v24 = vld [vmem:[%s1521_s7 + $0x64] sm:$0xf0]  ;;  %v1150_v25 = vld [vmem:[%s1521_s7 + $0xd0] sm:$0xf]  ;;  %v1112_v30 = vld [vmem:[%s1521_s7 + $0x88] sm:$0xf0]  ;;  %v337_v33 = vunpack.c.l.b16 %v229_v10 }
  0x25   : > { %489 = vmatpush.bf16.msra.mxu0 %v1250_v11  ;;  %1263 = vmatpush.bf16.msra.mxu2 %v1250_v11  ;;  %v338_v11 = vunpack.c.h.b16 %v229_v10  ;;  %v1614_v37 = vld [vmem:[%s1843_s2] ss:$0 sm:$0xff] }
  0x27   : > { %1193 = vmatmul.msk.bf16.gmra.mxu1 %vm438_vm0, %v1059_v16  ;;  %v368_v13 = vpack.c.b16 %v338_v11, %v338_v11  ;;  %v1142_v16 = vld [vmem:[%s1521_s7 + $0xc0] sm:$0xf] }
  0x28   : > { %1202 = vmatmul.msk.bf16.gmra.mxu3 %vm438_vm0, %v1131_v26  ;;  %v1247_v26 = vld [vmem:[%s1521_s7 + $0xd4] sm:$0xf0] }
  0x29   : > { %490 = vmatpush.bf16.msra.mxu0 %v1249_v15  ;;  %1264 = vmatpush.bf16.msra.mxu2 %v1249_v15  ;;  %v1231_v15 = vld [vmem:[%s1521_s7 + $0x54] sm:$0xf0]  ;;  %v1151_v28 = vor.u32 %v1247_v26, %v1150_v25 }
  0x2a   : > { %v1087_v18 = vor.u32 %v1231_v15, %v1086_v14 }
  0x2d   : > { %491 = vmatpush.bf16.msra.mxu0 %v1248_v17  ;;  %1265 = vmatpush.bf16.msra.mxu2 %v1248_v17  ;;  %v1245_v17 = vld [vmem:[%s1521_s7 + $0xc4] sm:$0xf0] }
  0x2e   : > { %v1143_v19 = vor.u32 %v1245_v17, %v1142_v16 }
  0x30   : > { %492 = vmatmul.bf16.vlgmr.msra.gmra.mxu0 %v1047_v22  ;;  %527 = vmatmul.bf16.vlgmr.msra.gmra.mxu2 %v1103_v23  ;;  %v1107_v22 = vor.u32 %v1234_v20, %v1104_v21  ;;  %v1094_v23 = vld [vmem:[%s1521_s7 + $0x60] sm:$0xf] }
  0x31   : > { %v1095_v27 = vor.u32 %v1233_v24, %v1094_v23 }
  0x37   : > { %1194 = vmatmul.msk.bf16.gmra.mxu1 %vm438_vm0, %v1067_v29  ;;  %v1236_v29 = vld [vmem:[%s1521_s7 + $0x84] sm:$0xf] }
  0x38   : > { %1203 = vmatmul.msk.bf16.gmra.mxu3 %vm438_vm0, %v1139_v38  ;;  %v1115_v31 = vor.u32 %v1236_v29, %v1112_v30 }
  0x40   : > { %497 = vmatmul.bf16.gmra.mxu0 %v1055_v34  ;;  %532 = vmatmul.bf16.gmra.mxu2 %v1111_v35  ;;  %v367_v34 = vpack.c.b16 %v337_v33, %v337_v33 }
  0x47   : > { %1195 = vmatmul.msk.bf16.gmra.mxu1 %vm438_vm0, %v1075_v41 }
  0x48   : > { %1204 = vmatmul.msk.bf16.gmra.mxu3 %vm438_vm0, %v1147_v50 }
  0x50   : > { %502 = vmatmul.bf16.gmra.mxu0 %v1063_v46  ;;  %537 = vmatmul.bf16.gmra.mxu2 %v1119_v47 }
  0x57   : > { %1196 = vmatmul.msk.bf16.gmra.mxu1 %vm438_vm0, %v1083_v53 }
  0x58   : > { %1205 = vmatmul.msk.bf16.gmra.mxu3 %vm438_vm0, %v1155_v62 }
  0x60   : > { %507 = vmatmul.bf16.gmra.mxu0 %v1071_v58  ;;  %542 = vmatmul.bf16.gmra.mxu2 %v1127_v59 }
  0x67   : > { %1197 = vmatmul.msk.bf16.gmra.mxu1 %vm438_vm0, %v1091_v1 }
  0x68   : > { %1206 = vmatmul.msk.bf16.gmra.mxu3 %vm438_vm0, %v368_v13 }
  0x70   : > { %512 = vmatmul.bf16.gmra.mxu0 %v1079_v6  ;;  %547 = vmatmul.bf16.gmra.mxu2 %v1135_v7 }
  0x77   : > { %1198 = vmatmul.msk.bf16.gmra.mxu1 %vm438_vm0, %v1099_v12 }
  0x80   : > { %517 = vmatmul.bf16.gmra.mxu0 %v1087_v18  ;;  %552 = vmatmul.bf16.gmra.mxu2 %v1143_v19 }
  0x87   : > { %1199 = vmatmul.msk.bf16.gmra.mxu1 %vm438_vm0, %v1107_v22 }
  0x90   : > { %522 = vmatmul.bf16.gmra.mxu0 %v1095_v27  ;;  %557 = vmatmul.bf16.gmra.mxu2 %v1151_v28 }
  0x94   : > { %v576_v32 = vpop.f32.mrf.mxu1 }
  0x97   : > { %1200 = vmatmul.msk.bf16.gmra.mxu1 %vm438_vm0, %v1115_v31 }
  0x9b   : > { %v621_v38 = vpop.f32.mrf.mxu3 }
  0x9c   : > { %v578_v35 = vpop.f32.mrf.mxu1 }
  0xa0   : > { %562 = vmatmul.bf16.gmra.mxu2 %v367_v34 }
  0xa3   : > { %v623_v45 = vpop.f32.mrf.mxu3 }
  0xa4   : > { %v581_v36 = vpop.f32.mrf.mxu1 }
  0xab   : > { %v626_v52 = vpop.f32.mrf.mxu3 }
  0xac   : > { %v583_v41 = vpop.f32.mrf.mxu1 }
  0xad   : > { %v493_v39 = vpop.f32.mrf.mxu0 }
  0xae   : > { %v494_v40 = vadd.f32 %v1614_v37, %v493_v39 }
  0xb0   : > { %v577_v42 = vadd.f32 %v576_v32, %v494_v40 }
  0xb2   : > { %v650_v43 = vmax.f32 %v577_v42, 0.0 }
  0xb3   : > { %v1617_v44 = vpop.f32.mrf.mxu2  ;;  %v628_v59 = vpop.f32.mrf.mxu3 }
  0xb4   : > { %679 = vst [vmem:[%s1619_s29] sm:$0xff] %v650_v43  ;;  %v586_v48 = vpop.f32.mrf.mxu1 }
  0xb5   : > { %v495_v46 = vpop.f32.mrf.mxu0 }
  0xb6   : > { %v496_v47 = vadd.f32 %v1614_v37, %v495_v46 }
  0xb8   : > { %v579_v49 = vadd.f32 %v578_v35, %v496_v47 }
  0xba   : > { %v651_v50 = vmax.f32 %v579_v49, 0.0 }
  0xbb   : > { %v1623_v51 = vpop.f32.mrf.mxu2  ;;  %v631_v2 = vpop.f32.mrf.mxu3 }
  0xbc   : > { %680 = vst [vmem:[%s1619_s29 + $0x8] sm:$0xff] %v651_v50  ;;  %v588_v55 = vpop.f32.mrf.mxu1 }
  0xbd   : > { %v498_v53 = vpop.f32.mrf.mxu0 }
  0xbe   : > { %v499_v54 = vadd.f32 %v1614_v37, %v498_v53 }
  0xc0   : > { %v582_v56 = vadd.f32 %v581_v36, %v499_v54 }
  0xc2   : > { %v652_v57 = vmax.f32 %v582_v56, 0.0 }
  0xc3   : > { %v1627_v58 = vpop.f32.mrf.mxu2  ;;  %v1635_v9 = vpop.f32.mrf.mxu3 }
  0xc4   : > { %681 = vst [vmem:[%s1619_s29 + $0x10] sm:$0xff] %v652_v57  ;;  %v591_v62 = vpop.f32.mrf.mxu1 }
  0xc5   : > { %v500_v60 = vpop.f32.mrf.mxu0 }
  0xc6   : > { %v501_v61 = vadd.f32 %v1614_v37, %v500_v60 }
  0xc8   : > { %v584_v63 = vadd.f32 %v583_v41, %v501_v61 }
  0xca   : > { %v653_v0 = vmax.f32 %v584_v63, 0.0 }
  0xcb   : > { %v1631_v1 = vpop.f32.mrf.mxu2  ;;  %v1641_v19 = vpop.f32.mrf.mxu3 }
  0xcc   : > { %682 = vst [vmem:[%s1619_s29 + $0x18] sm:$0xff] %v653_v0  ;;  %v593_v5 = vpop.f32.mrf.mxu1 }
  0xcd   : > { %v503_v3 = vpop.f32.mrf.mxu0 }
  0xce   : > { %v504_v4 = vadd.f32 %v1614_v37, %v503_v3 }
  0xd0   : > { %v587_v6 = vadd.f32 %v586_v48, %v504_v4 }
  0xd2   : > { %v654_v7 = vmax.f32 %v587_v6, 0.0 }
  0xd3   : > { %v538_v8 = vpop.f32.mrf.mxu2  ;;  %v1647_v29 = vpop.f32.mrf.mxu3 }
  0xd4   : > { %683 = vst [vmem:[%s1619_s29 + $0x20] sm:$0xff] %v654_v7  ;;  %v539_v10 = vadd.f32 %v1614_v37, %v538_v8  ;;  %v596_v14 = vpop.f32.mrf.mxu1 }
  0xd5   : > { %v505_v11 = vpop.f32.mrf.mxu0 }
  0xd6   : > { %v622_v12 = vadd.f32 %v621_v38, %v539_v10  ;;  %v506_v13 = vadd.f32 %v1614_v37, %v505_v11 }
  0xd8   : > { %v668_v15 = vmax.f32 %v622_v12, 0.0  ;;  %v589_v16 = vadd.f32 %v588_v55, %v506_v13 }
  0xda   : > { %697 = vst [vmem:[%s1619_s29 + $0x90] sm:$0xff] %v668_v15  ;;  %v655_v17 = vmax.f32 %v589_v16, 0.0 }
  0xdb   : > { %v540_v18 = vpop.f32.mrf.mxu2  ;;  %v1655_v41 = vpop.f32.mrf.mxu3 }
  0xdc   : > { %684 = vst [vmem:[%s1619_s29 + $0x28] sm:$0xff] %v655_v17  ;;  %v541_v20 = vadd.f32 %v1614_v37, %v540_v18  ;;  %v598_v24 = vpop.f32.mrf.mxu1 }
  0xdd   : > { %v508_v21 = vpop.f32.mrf.mxu0 }
  0xde   : > { %v624_v22 = vadd.f32 %v623_v45, %v541_v20  ;;  %v509_v23 = vadd.f32 %v1614_v37, %v508_v21 }
  0xe0   : > { %v669_v25 = vmax.f32 %v624_v22, 0.0  ;;  %v592_v26 = vadd.f32 %v591_v62, %v509_v23 }
  0xe2   : > { %698 = vst [vmem:[%s1619_s29 + $0x98] sm:$0xff] %v669_v25  ;;  %v656_v27 = vmax.f32 %v592_v26, 0.0 }
  0xe3   : > { %v543_v28 = vpop.f32.mrf.mxu2  ;;  %v1661_v53 = vpop.f32.mrf.mxu3 }
  0xe4   : > { %685 = vst [vmem:[%s1619_s29 + $0x30] sm:$0xff] %v656_v27  ;;  %v544_v30 = vadd.f32 %v1614_v37, %v543_v28  ;;  %v601_v34 = vpop.f32.mrf.mxu1 }
  0xe5   : > { %v510_v31 = vpop.f32.mrf.mxu0 }
  0xe6   : > { %v627_v32 = vadd.f32 %v626_v52, %v544_v30  ;;  %v511_v33 = vadd.f32 %v1614_v37, %v510_v31 }
  0xe8   : > { %v670_v35 = vmax.f32 %v627_v32, 0.0  ;;  %v594_v36 = vadd.f32 %v593_v5, %v511_v33 }
  0xea   : > { %699 = vst [vmem:[%s1619_s29 + $0xa0] sm:$0xff] %v670_v35  ;;  %v657_v38 = vmax.f32 %v594_v36, 0.0 }
  0xeb   : > { %v545_v39 = vpop.f32.mrf.mxu2  ;;  %v1667_v0 = vpop.f32.mrf.mxu3 }
  0xec   : > { %686 = vst [vmem:[%s1619_s29 + $0x38] sm:$0xff] %v657_v38  ;;  %v546_v40 = vadd.f32 %v1614_v37, %v545_v39  ;;  %v603_v46 = vpop.f32.mrf.mxu1 }
  0xed   : > { %v513_v42 = vpop.f32.mrf.mxu0 }
  0xee   : > { %v629_v43 = vadd.f32 %v628_v59, %v546_v40  ;;  %v514_v45 = vadd.f32 %v1614_v37, %v513_v42 }
  0xf0   : > { %v671_v47 = vmax.f32 %v629_v43, 0.0  ;;  %v597_v48 = vadd.f32 %v596_v14, %v514_v45  ;;  %v529_v14 = vadd.f32 %v1614_v37, %v1617_v44 }
  0xf2   : > { %700 = vst [vmem:[%s1619_s29 + $0xa8] sm:$0xff] %v671_v47  ;;  %v658_v49 = vmax.f32 %v597_v48, 0.0 }
  0xf3   : > { %v548_v50 = vpop.f32.mrf.mxu2  ;;  %v648_v12 = vpop.f32.mrf.mxu3 }
  0xf4   : > { %687 = vst [vmem:[%s1619_s29 + $0x40] sm:$0xff] %v658_v49  ;;  %v549_v52 = vadd.f32 %v1614_v37, %v548_v50  ;;  %v606_v57 = vpop.f32.mrf.mxu1 }
  0xf5   : > { %v515_v54 = vpop.f32.mrf.mxu0 }
  0xf6   : > { %v632_v55 = vadd.f32 %v631_v2, %v549_v52  ;;  %v516_v56 = vadd.f32 %v1614_v37, %v515_v54 }
  0xf8   : > { %v672_v59 = vmax.f32 %v632_v55, 0.0  ;;  %v599_v60 = vadd.f32 %v598_v24, %v516_v56 }
  0xfa   : > { %701 = vst [vmem:[%s1619_s29 + $0xb0] sm:$0xff] %v672_v59  ;;  %v659_v61 = vmax.f32 %v599_v60, 0.0 }
  0xfb   : > { %v550_v62 = vpop.f32.mrf.mxu2 }
  0xfc   : > { %688 = vst [vmem:[%s1619_s29 + $0x48] sm:$0xff] %v659_v61  ;;  %v551_v63 = vadd.f32 %v1614_v37, %v550_v62  ;;  %v608_v5 = vpop.f32.mrf.mxu1 }
  0xfd   : > { %v518_v3 = vpop.f32.mrf.mxu0 }
  0xfe   : > { %v634_v4 = vadd.f32 %v1635_v9, %v551_v63  ;;  %v519_v2 = vadd.f32 %v1614_v37, %v518_v3 }
 0x100   : > { %v673_v6 = vmax.f32 %v634_v4, 0.0  ;;  %v602_v7 = vadd.f32 %v601_v34, %v519_v2 }
 0x102   : > { %702 = vst [vmem:[%s1619_s29 + $0xb8] sm:$0xff] %v673_v6  ;;  %v660_v8 = vmax.f32 %v602_v7, 0.0 }
 0x103   : > { %v553_v10 = vpop.f32.mrf.mxu2 }
 0x104   : > { %689 = vst [vmem:[%s1619_s29 + $0x50] sm:$0xff] %v660_v8  ;;  %v554_v11 = vadd.f32 %v1614_v37, %v553_v10  ;;  %v611_v16 = vpop.f32.mrf.mxu1 }
 0x105   : > { %v520_v13 = vpop.f32.mrf.mxu0  ;;  %v612_v20 = vadd.f32 %v611_v16, %v529_v14 }
 0x106   : > { %v637_v9 = vadd.f32 %v1641_v19, %v554_v11  ;;  %v521_v15 = vadd.f32 %v1614_v37, %v520_v13  ;;  %v531_v19 = vadd.f32 %v1614_v37, %v1623_v51 }
 0x107   : > { %v664_v22 = vmax.f32 %v612_v20, 0.0 }
 0x108   : > { %v674_v17 = vmax.f32 %v637_v9, 0.0  ;;  %v604_v18 = vadd.f32 %v603_v46, %v521_v15 }
 0x109   : > { %693 = vst [vmem:[%s1619_s29 + $0x70] sm:$0xff] %v664_v22 }
 0x10a   : > { %703 = vst [vmem:[%s1619_s29 + $0xc0] sm:$0xff] %v674_v17  ;;  %v661_v21 = vmax.f32 %v604_v18, 0.0 }
 0x10b   : > { %v555_v23 = vpop.f32.mrf.mxu2 }
 0x10c   : > { %690 = vst [vmem:[%s1619_s29 + $0x58] sm:$0xff] %v661_v21  ;;  %v556_v24 = vadd.f32 %v1614_v37, %v555_v23  ;;  %v613_v27 = vpop.f32.mrf.mxu1 }
 0x10d   : > { %v523_v44 = vpop.f32.mrf.mxu0  ;;  %v614_v31 = vadd.f32 %v613_v27, %v531_v19 }
 0x10e   : > { %v639_v25 = vadd.f32 %v1647_v29, %v556_v24  ;;  %v524_v26 = vadd.f32 %v1614_v37, %v523_v44  ;;  %v534_v29 = vadd.f32 %v1614_v37, %v1627_v58  ;;  %v536_v58 = vadd.f32 %v1614_v37, %v1631_v1 }
 0x10f   : > { %v665_v33 = vmax.f32 %v614_v31, 0.0 }
 0x110   : > { %v675_v28 = vmax.f32 %v639_v25, 0.0  ;;  %v607_v30 = vadd.f32 %v606_v57, %v524_v26 }
 0x111   : > { %694 = vst [vmem:[%s1619_s29 + $0x78] sm:$0xff] %v665_v33 }
 0x112   : > { %704 = vst [vmem:[%s1619_s29 + $0xc8] sm:$0xff] %v675_v28  ;;  %v662_v32 = vmax.f32 %v607_v30, 0.0 }
 0x113   : > { %v558_v34 = vpop.f32.mrf.mxu2 }
 0x114   : > { %691 = vst [vmem:[%s1619_s29 + $0x60] sm:$0xff] %v662_v32  ;;  %v559_v35 = vadd.f32 %v1614_v37, %v558_v34  ;;  %v616_v39 = vpop.f32.mrf.mxu1 }
 0x115   : > { %v525_v51 = vpop.f32.mrf.mxu0  ;;  %v617_v43 = vadd.f32 %v616_v39, %v534_v29 }
 0x116   : > { %v642_v36 = vadd.f32 %v1655_v41, %v559_v35  ;;  %v526_v38 = vadd.f32 %v1614_v37, %v525_v51 }
 0x117   : > { %v666_v46 = vmax.f32 %v617_v43, 0.0 }
 0x118   : > { %v676_v40 = vmax.f32 %v642_v36, 0.0  ;;  %v609_v42 = vadd.f32 %v608_v5, %v526_v38 }
 0x119   : > { %695 = vst [vmem:[%s1619_s29 + $0x80] sm:$0xff] %v666_v46 }
 0x11a   : > { %705 = vst [vmem:[%s1619_s29 + $0xd0] sm:$0xff] %v676_v40  ;;  %v663_v45 = vmax.f32 %v609_v42, 0.0 }
 0x11b   : > { %v560_v47 = vpop.f32.mrf.mxu2 }
 0x11c   : > { %692 = vst [vmem:[%s1619_s29 + $0x68] sm:$0xff] %v663_v45  ;;  %v561_v48 = vadd.f32 %v1614_v37, %v560_v47  ;;  %v618_v49 = vpop.f32.mrf.mxu1 }
 0x11d   : > { %v619_v52 = vadd.f32 %v618_v49, %v536_v58 }
 0x11e   : > { %v644_v41 = vadd.f32 %v1661_v53, %v561_v48 }
 0x11f   : > { %v667_v54 = vmax.f32 %v619_v52, 0.0 }
 0x120   : > { %v677_v50 = vmax.f32 %v644_v41, 0.0 }
 0x121   : > { %696 = vst [vmem:[%s1619_s29 + $0x88] sm:$0xff] %v667_v54 }
 0x122   : > { %706 = vst [vmem:[%s1619_s29 + $0xd8] sm:$0xff] %v677_v50 }
 0x123   : > { %v563_v55 = vpop.f32.mrf.mxu2 }
 0x124   : > { %v564_v56 = vadd.f32 %v1614_v37, %v563_v55 }
 0x126   : > { %v647_v57 = vadd.f32 %v1667_v0, %v564_v56 }
 0x127   : > { %714 = sbr.rel (!%p1497_p4) target bundleno = 376 (0x178), region = 36 }
 0x128   : > { %v678_v59 = vmax.f32 %v647_v57, 0.0 }
 0x12a   : > { %707 = vst [vmem:[%s1619_s29 + $0xe0] sm:$0xff] %v678_v59 }
 0x12b   : > { %v565_v60 = vpop.f32.mrf.mxu2 }
 0x12c   : > { %s1855_s12 = smov (!%p717_p8, %s716_s12), 29 }
 0x12d   : > { %s1207_s7 = sshll.u32 %s1855_s12, 3 }
 0x12e   : > { %p1210_p9 = scmp.eq.s32.totalorder %s1207_s7, 0 }
 0x12f   : > { %1358 = sdivrem.u32 (!%p1210_p9), %s1855_s12, 29 }
 0x130   : > { %725 = sbr.rel (%p1210_p9) target bundleno = 376 (0x178), region = 40 }
 0x138   : > { %s1719_s20 = spop.drf %1358 }
 0x139   : > { %s1360_s8 = spop.drf %1358  ;;  %p1211_p10 = scmp.le.s32.totalorder %s1719_s20, 0 }
 0x13a   : > { %s1846_s15 = smov (!%p1211_p10), %s1713_s6  ;;  %s1847_s25 = smov (!%p1211_p10), %s1619_s29 }
 0x13b   : > { %994 = sbr.rel (%p1211_p10) target bundleno = 350 (0x15e), region = 116  ;;  %s1728_s9 = smov (!%p1211_p10), 0  }
 0x13c   : > { %s1730_s10 = smov (!%p1211_p10), 0  }
 0x140 LB: >> { %v846_v37 = vld [vmem:[%s1426_s25] sm:$0xff]  ;;  %v848_v1 = vld [vmem:[%s1426_s25 + $0x8] sm:$0xff]  ;;  %v850_v53 = vld [vmem:[%s1426_s25 + $0x10] sm:$0xff]  ;;  %s904_s11 = sadd.s32 1, %s1430_s9  ;;  %s840_s10 = sadd.s32 1, %s1434_s10   ;;  %s1434_s10 = sphi %s1730_s10, %s840_s10   ;;  %s1430_s9 = sphi %s1728_s9, %s1850_s9   ;;  %s1426_s25 = sphi %s1847_s25, %s1849_s25   ;;  %s1422_s15 = sphi %s1846_s15, %s1848_s15  }
 0x141   : >> { %847 = vst [vmem:[%s1422_s15] sm:$0xff] %v846_v37  ;;  %v852_v61 = vld [vmem:[%s1426_s25 + $0x18] sm:$0xff]  ;;  %p905_p11 = scmp.ge.s32.totalorder %s904_s11, %s1719_s20  ;;  %v854_v62 = vld [vmem:[%s1426_s25 + $0x20] sm:$0xff]  ;;  %v856_v63 = vld [vmem:[%s1426_s25 + $0x28] sm:$0xff]  ;;  %p839_p12 = scmp.ge.s32.totalorder %s840_s10, %s1719_s20 }
 0x142   : >> { %849 = vst [vmem:[%s1422_s15 + $0x8] sm:$0xff] %v848_v1  ;;  %v858_v0 = vld [vmem:[%s1426_s25 + $0x30] sm:$0xff]  ;;  %v860_v3 = vld [vmem:[%s1426_s25 + $0x38] sm:$0xff]  ;;  %v862_v4 = vld [vmem:[%s1426_s25 + $0x40] sm:$0xff] }
 0x143   : >> { %851 = vst [vmem:[%s1422_s15 + $0x10] sm:$0xff] %v850_v53  ;;  %s1857_s11 = smov (%p905_p11, %s904_s11), 0  ;;  %v864_v2 = vld [vmem:[%s1426_s25 + $0x48] sm:$0xff]  ;;  %v866_v5 = vld [vmem:[%s1426_s25 + $0x50] sm:$0xff]  ;;  %v868_v6 = vld [vmem:[%s1426_s25 + $0x58] sm:$0xff] }
 0x144   : >> { %853 = vst [vmem:[%s1422_s15 + $0x18] sm:$0xff] %v852_v61  ;;  %s907_s14 = smul.u32 232, %s1857_s11  ;;  %v870_v7 = vld [vmem:[%s1426_s25 + $0x60] sm:$0xff]  ;;  %v872_v8 = vld [vmem:[%s1426_s25 + $0x68] sm:$0xff]  ;;  %v874_v10 = vld [vmem:[%s1426_s25 + $0x70] sm:$0xff]  ;;  %s1850_s9 = smov %s1857_s11 }
 0x145   : >> { %855 = vst [vmem:[%s1422_s15 + $0x20] sm:$0xff] %v854_v62  ;;  %v876_v11 = vld [vmem:[%s1426_s25 + $0x78] sm:$0xff]  ;;  %v878_v12 = vld [vmem:[%s1426_s25 + $0x80] sm:$0xff]  ;;  %v880_v13 = vld [vmem:[%s1426_s25 + $0x88] sm:$0xff] }
 0x146   : >> { %857 = vst [vmem:[%s1422_s15 + $0x28] sm:$0xff] %v856_v63  ;;  %s1764_s17 = scalar_lea.vmem %s1619_s29, %s907_s14 [#allocation2]   ;;  %s1767_s18 = scalar_lea.vmem %s1713_s6, %s907_s14   ;;  %v882_v14 = vld [vmem:[%s1426_s25 + $0x90] sm:$0xff]  ;;  %v884_v9 = vld [vmem:[%s1426_s25 + $0x98] sm:$0xff]  ;;  %v886_v15 = vld [vmem:[%s1426_s25 + $0xa0] sm:$0xff] }
 0x147   : >> { %859 = vst [vmem:[%s1422_s15 + $0x30] sm:$0xff] %v858_v0  ;;  %v888_v16 = vld [vmem:[%s1426_s25 + $0xa8] sm:$0xff]  ;;  %v890_v17 = vld [vmem:[%s1426_s25 + $0xb0] sm:$0xff]  ;;  %v892_v18 = vld [vmem:[%s1426_s25 + $0xb8] sm:$0xff] }
 0x148   : >> { %861 = vst [vmem:[%s1422_s15 + $0x38] sm:$0xff] %v860_v3  ;;  %v894_v20 = vld [vmem:[%s1426_s25 + $0xc0] sm:$0xff]  ;;  %v896_v21 = vld [vmem:[%s1426_s25 + $0xc8] sm:$0xff]  ;;  %v898_v22 = vld [vmem:[%s1426_s25 + $0xd0] sm:$0xff] }
 0x149   : >> { %863 = vst [vmem:[%s1422_s15 + $0x40] sm:$0xff] %v862_v4  ;;  %v900_v23 = vld [vmem:[%s1426_s25 + $0xd8] sm:$0xff]  ;;  %v902_v24 = vld [vmem:[%s1426_s25 + $0xe0] sm:$0xff]  ;;  %s1849_s25 = smov %s1764_s17 }
 0x14a   : >> { %865 = vst [vmem:[%s1422_s15 + $0x48] sm:$0xff] %v864_v2 }
 0x14b   : >> { %867 = vst [vmem:[%s1422_s15 + $0x50] sm:$0xff] %v866_v5 }
 0x14c   : >> { %869 = vst [vmem:[%s1422_s15 + $0x58] sm:$0xff] %v868_v6 }
 0x14d   : >> { %871 = vst [vmem:[%s1422_s15 + $0x60] sm:$0xff] %v870_v7 }
 0x14e   : >> { %873 = vst [vmem:[%s1422_s15 + $0x68] sm:$0xff] %v872_v8 }
 0x14f   : >> { %875 = vst [vmem:[%s1422_s15 + $0x70] sm:$0xff] %v874_v10 }
 0x150   : >> { %877 = vst [vmem:[%s1422_s15 + $0x78] sm:$0xff] %v876_v11 }
 0x151   : >> { %879 = vst [vmem:[%s1422_s15 + $0x80] sm:$0xff] %v878_v12 }
 0x152   : >> { %881 = vst [vmem:[%s1422_s15 + $0x88] sm:$0xff] %v880_v13 }
 0x153   : >> { %883 = vst [vmem:[%s1422_s15 + $0x90] sm:$0xff] %v882_v14 }
 0x154   : >> { %885 = vst [vmem:[%s1422_s15 + $0x98] sm:$0xff] %v884_v9 }
 0x155   : >> { %887 = vst [vmem:[%s1422_s15 + $0xa0] sm:$0xff] %v886_v15 }
 0x156   : >> { %889 = vst [vmem:[%s1422_s15 + $0xa8] sm:$0xff] %v888_v16 }
 0x157   : >> { %891 = vst [vmem:[%s1422_s15 + $0xb0] sm:$0xff] %v890_v17 }
 0x158   : >> { %893 = vst [vmem:[%s1422_s15 + $0xb8] sm:$0xff] %v892_v18 }
 0x159   : >> { %895 = vst [vmem:[%s1422_s15 + $0xc0] sm:$0xff] %v894_v20  ;;  %842 = sbr.rel (!%p839_p12) target bundleno = 320 (0x140), region = 122 }
 0x15a   : >> { %897 = vst [vmem:[%s1422_s15 + $0xc8] sm:$0xff] %v896_v21 }
 0x15b   : >> { %899 = vst [vmem:[%s1422_s15 + $0xd0] sm:$0xff] %v898_v22 }
 0x15c   : >> { %901 = vst [vmem:[%s1422_s15 + $0xd8] sm:$0xff] %v900_v23 }
 0x15d   : >> { %903 = vst [vmem:[%s1422_s15 + $0xe0] sm:$0xff] %v902_v24  ;;  %s1848_s15 = smov %s1767_s18 }
 0x15e PF: > { %1361 = sdivrem.u32 %s1855_s12, 29 }
 0x15f   : > { %s1212_s21 = smul.u32 232, %s1719_s20 }
 0x161   : > { %s1826_s22 = scalar_lea.vmem %s1619_s29, %s1212_s21 [#allocation2]   ;;  %s917_s23 = scalar_lea.vmem %s1713_s6, %s1212_s21  }
 0x167   : > { %s1362_s24 = spop.drf %1361 }
 0x168   : > { %s1363_s26 = spop.drf %1361 }
 0x169   : > { %p1214_p13 = scmp.le.s32.totalorder %s1363_s26, 0 }
 0x16a   : > { %s1436_s27 = smov (!%p1214_p13), %s917_s23   ;;  %s1440_s28 = smov (!%p1214_p13), %s1826_s22  }
 0x16b   : > { %1008 = sbr.rel (%p1214_p13) target bundleno = 376 (0x178), region = 127  ;;  %s1444_s30 = smov (!%p1214_p13), 0  }
 0x16c   : > { %s1448_s4 = smov (!%p1214_p13), 0  }
 0x170 LB: >> { %v927_v44 = vld [vmem:[%s1442_s28] sm:$0xff]  ;;  %s929_s29 = sadd.s32 1, %s1446_s30  ;;  %s921_s4 = sadd.s32 1, %s1450_s4   ;;  %s1450_s4 = sphi %s1448_s4, %s921_s4   ;;  %s1446_s30 = sphi %s1444_s30, %s1445_s30   ;;  %s1442_s28 = sphi %s1440_s28, %s934_s28   ;;  %s1438_s27 = sphi %s1436_s27, %s935_s27  }
 0x171   : >> { %928 = vst [vmem:[%s1438_s27] sm:$0xff] %v927_v44  ;;  %p930_p0 = scmp.ge.s32.totalorder %s929_s29, %s1363_s26  ;;  %p920_p1 = scmp.ge.s32.totalorder %s921_s4, %s1363_s26 }
 0x173   : >> { %s1859_s29 = smov (%p930_p0, %s929_s29), 0  ;;  %923 = sbr.rel (!%p920_p1) target bundleno = 368 (0x170), region = 133 }
 0x174   : >> { %s1215_s12 = sshll.u32 %s1859_s29, 3  ;;  %s1445_s30 = smov %s1859_s29  }
 0x175   : >> { %s934_s28 = scalar_lea.vmem %s1826_s22, %s1215_s12 [#allocation2]   ;;  %s935_s27 = scalar_lea.vmem %s917_s23, %s1215_s12  }
 0x178 PF: > { %p10_p2 = scmp.ge.s32.totalorder %s1487_s16, 4   ;;  %s1851_s12 = smov %s1414_s13 }
 0x179   : > { %s1852_s13 = smov %s1495_s19  ;;  %s1853_s14 = smov %s1487_s16 }
 0x17a   :  { %12 = sbr.rel (!%p10_p2) target bundleno = 2 (0x2), region = 144 }

// kernel: squeezenet_forward.27
= control target key start
LH: loop header
LB: loop body
LE: loop exit
PB: predicated region body
PF: predicated region fallthrough
CT: control target
= control target key end

     0   :  { %s876_s12 = smov 0   ;;  %s878_s13 = smov 0   ;;  %s1017_s0 = inlined_call_operand.vmem [shape: bf16[98,128], index: 0, kind: input, shape index: {}]   ;;  %s1018_s1 = inlined_call_operand.vmem [shape: bf16[128,32], index: 1, kind: input, shape index: {}]   ;;  %s1019_s2 = inlined_call_operand.vmem [shape: f32[1,32], index: 2, kind: input, shape index: {}]   ;;  %s1020_s3 = inlined_call_operand.vmem [shape: f32[98,32], index: 3, kind: output, shape index: {}]  }
   0x1   :  { %s880_s14 = smov 0  }
   0x2 LB: > { %s889_s15 = sadd.s32 4294967295, %s822_s14   ;;  %s891_s16 = sadd.s32 1, %s822_s14   ;;  %s822_s14 = sphi %s880_s14, %s1027_s14   ;;  %s818_s13 = sphi %s878_s13, %s1026_s13   ;;  %s814_s12 = sphi %s876_s12, %s1025_s12  }
   0x3   : > { %s85_s17 = ssub.s32 %s822_s14, %s891_s16  ;;  %s88_s18 = sadd.s32 1, %s818_s13 }
   0x4   : > { %p86_p0 = scmp.eq.s32.totalorder %s85_s17, 0  ;;  %p98_p1 = scmp.ne.s32.totalorder %s818_s13, %s814_s12 }
   0x5   : > { %p99_p2 = scmp.eq.s32.totalorder %s889_s15, 1  ;;  %p577_p3 = scmp.ge.s32.totalorder %s822_s14, 1 }
   0x6   : > { %s899_s19 = scalar_select %p86_p0, %s818_s13, %s88_s18  }
   0x7   : > { %p901_p4 = por %p99_p2, %p98_p1  ;;  %p146_p5 = scmp.lt.s32.totalorder %s822_s14, 3 }
   0x9   : > { %p147_p6 = pnand %p577_p3, %p146_p5 }
   0xa   : > { %s912_s25 = smul.u32 (!%p147_p6), 7, %s889_s15  ;;  %s170_s22 = sand.u32 (!%p147_p6), 1, %s814_s12  }
   0xb   : > { %150 = sbr.rel (%p147_p6) target bundleno = 248 (0xf8), region = 32 }
   0xc   : > { %p178_p7 = scmp.lt.s32.totalorder (!%p147_p6), %s912_s25, 12  ;;  %s671_s26 = smul.u32 (!%p147_p6), 56, %s170_s22 }
   0xe   : > { %s941_s27 = scalar_lea.vmem (!%p147_p6), [#allocation2], %s671_s26  }
  0x10   : > { %v645_v0 = vld [vmem:[%s1018_s1 + $0x38] sm:$0xff]  ;;  %v644_v1 = vld [vmem:[%s1018_s1 + $0x30] sm:$0xff]  ;;  %v643_v2 = vld [vmem:[%s1018_s1 + $0x28] sm:$0xff]  ;;  %s179_s30 = scalar_select %p178_p7, %s912_s25, 12  ;;  %vm324_vm0 = vcmask 261120  }
  0x11   : > { %289 = vmatpush.bf16.msra.mxu0 %v645_v0  ;;  %647 = vmatpush.bf16.msra.mxu1 %v645_v0  ;;  %v642_v3 = vld [vmem:[%s1018_s1 + $0x20] sm:$0xff]  ;;  %v641_v4 = vld [vmem:[%s1018_s1 + $0x18] sm:$0xff]  ;;  %v640_v5 = vld [vmem:[%s1018_s1 + $0x10] sm:$0xff]  ;;  %s340_s12 = ssub.s32 (%p901_p4), 13, %s912_s25  ;;  %s646_s28 = smul.u32 (%p901_p4), 56, %s889_s15 }
  0x12   : > { %648 = vmatpush.bf16.msra.mxu2 %v645_v0  ;;  %649 = vmatpush.bf16.msra.mxu3 %v645_v0  ;;  %s578_s6 = sshll.u32 %s179_s30, 2  ;;  %v639_v6 = vld [vmem:[%s1018_s1 + $0x8] sm:$0xff]  ;;  %v638_v8 = vld [vmem:[%s1018_s1] sm:$0xff]  ;;  %p341_p8 = scmp.lt.s32.totalorder (%p901_p4), %s340_s12, 7 }
  0x13   : > { %s181_s11 = scalar_lea.vmem %s1017_s0, %s578_s6  ;;  %v761_v14 = vld [vmem:[%s1019_s2] ss:$0 sm:$0xff]  ;;  %s964_s4 = scalar_lea.vmem (%p901_p4), %s1020_s3, %s646_s28  }
  0x14   : > { %v198_v7 = vld [vmem:[%s181_s11 + $0x18] sm:$0xf]  ;;  %v635_v10 = vld [vmem:[%s181_s11] sm:$0xff]  ;;  %v636_v11 = vld [vmem:[%s181_s11 + $0x8] sm:$0xff] }
  0x15   : > { %290 = vmatpush.bf16.msra.mxu0 %v644_v1  ;;  %650 = vmatpush.bf16.msra.mxu1 %v644_v1  ;;  %v232_v9 = vunpack.c.l.b16 %v198_v7  ;;  %v637_v12 = vld [vmem:[%s181_s11 + $0x10] sm:$0xff] }
  0x16   : > { %651 = vmatpush.bf16.msra.mxu2 %v644_v1  ;;  %652 = vmatpush.bf16.msra.mxu3 %v644_v1 }
  0x17   : > { %v236_v13 = vpack.c.b16 %v232_v9, %v232_v9 }
  0x19   : > { %291 = vmatpush.bf16.msra.mxu0 %v643_v2  ;;  %653 = vmatpush.bf16.msra.mxu1 %v643_v2 }
  0x1a   : > { %654 = vmatpush.bf16.msra.mxu2 %v643_v2  ;;  %655 = vmatpush.bf16.msra.mxu3 %v643_v2 }
  0x1d   : > { %292 = vmatpush.bf16.msra.mxu0 %v642_v3  ;;  %656 = vmatpush.bf16.msra.mxu1 %v642_v3 }
  0x1e   : > { %657 = vmatpush.bf16.msra.mxu2 %v642_v3  ;;  %658 = vmatpush.bf16.msra.mxu3 %v642_v3 }
  0x21   : > { %293 = vmatpush.bf16.msra.mxu0 %v641_v4  ;;  %659 = vmatpush.bf16.msra.mxu1 %v641_v4 }
  0x22   : > { %660 = vmatpush.bf16.msra.mxu2 %v641_v4  ;;  %661 = vmatpush.bf16.msra.mxu3 %v641_v4 }
  0x25   : > { %294 = vmatpush.bf16.msra.mxu0 %v640_v5  ;;  %662 = vmatpush.bf16.msra.mxu1 %v640_v5 }
  0x26   : > { %663 = vmatpush.bf16.msra.mxu2 %v640_v5  ;;  %664 = vmatpush.bf16.msra.mxu3 %v640_v5 }
  0x29   : > { %295 = vmatpush.bf16.msra.mxu0 %v639_v6  ;;  %665 = vmatpush.bf16.msra.mxu1 %v639_v6 }
  0x2a   : > { %666 = vmatpush.bf16.msra.mxu2 %v639_v6  ;;  %667 = vmatpush.bf16.msra.mxu3 %v639_v6 }
  0x2d   : > { %296 = vmatpush.bf16.msra.mxu0 %v638_v8  ;;  %668 = vmatpush.bf16.msra.mxu1 %v638_v8 }
  0x2e   : > { %669 = vmatpush.bf16.msra.mxu2 %v638_v8  ;;  %670 = vmatpush.bf16.msra.mxu3 %v638_v8 }
  0x30   : > { %297 = vmatmul.bf16.vlgmr.msra.gmra.mxu0 %v635_v10  ;;  %302 = vmatmul.bf16.vlgmr.msra.gmra.mxu1 %v636_v11 }
  0x31   : > { %307 = vmatmul.bf16.vlgmr.msra.gmra.mxu2 %v637_v12  ;;  %312 = vmatmul.bf16.vlgmr.msra.gmra.mxu3 %v236_v13 }
  0xad   : > { %v298_v15 = vpop.f32.mrf.mxu0  ;;  %v303_v16 = vpop.f32.mrf.mxu1 }
  0xae   : > { %v299_v17 = vadd.f32 %v761_v14, %v298_v15  ;;  %v304_v18 = vadd.f32 %v761_v14, %v303_v16 }
  0xb0   : > { %v317_v19 = vmax.f32 %v299_v17, 0.0  ;;  %v319_v20 = vmax.f32 %v304_v18, 0.0 }
  0xb2   : > { %325 = vst.msk [vmem:[%s941_s27] sm:$0xff] %vm324_vm0, %v317_v19 }
  0xb3   : > { %327 = vst.msk [vmem:[%s941_s27 + $0x10] sm:$0xff] %vm324_vm0, %v319_v20 }
  0xb4   : > { %v308_v21 = vpop.f32.mrf.mxu2  ;;  %v313_v22 = vpop.f32.mrf.mxu3 }
  0xb5   : > { %v309_v23 = vadd.f32 %v761_v14, %v308_v21  ;;  %v314_v24 = vadd.f32 %v761_v14, %v313_v22  ;;  %v300_v25 = vpop.f32.mrf.mxu0  ;;  %v305_v26 = vpop.f32.mrf.mxu1 }
  0xb6   : > { %v301_v27 = vadd.f32 %v761_v14, %v300_v25  ;;  %v306_v28 = vadd.f32 %v761_v14, %v305_v26 }
  0xb7   : > { %v321_v29 = vmax.f32 %v309_v23, 0.0  ;;  %v323_v30 = vmax.f32 %v314_v24, 0.0 }
  0xb8   : > { %v318_v31 = vmax.f32 %v301_v27, 0.0  ;;  %v320_v32 = vmax.f32 %v306_v28, 0.0 }
  0xb9   : > { %329 = vst.msk [vmem:[%s941_s27 + $0x20] sm:$0xff] %vm324_vm0, %v321_v29 }
  0xba   : > { %331 = vst.msk [vmem:[%s941_s27 + $0x30] sm:$0xff] %vm324_vm0, %v323_v30 }
  0xbb   : > { %326 = vst.msk [vmem:[%s941_s27 + $0x8] sm:$0xff] %vm324_vm0, %v318_v31 }
  0xbc   : > { %328 = vst.msk [vmem:[%s941_s27 + $0x18] sm:$0xff] %vm324_vm0, %v320_v32  ;;  %v310_v33 = vpop.f32.mrf.mxu2  ;;  %v315_v34 = vpop.f32.mrf.mxu3 }
  0xbd   : > { %v311_v35 = vadd.f32 %v761_v14, %v310_v33  ;;  %338 = sbr.rel (!%p901_p4) target bundleno = 248 (0xf8), region = 36 }
  0xbf   : > { %v322_v36 = vmax.f32 %v311_v35, 0.0 }
  0xc1   : > { %330 = vst.msk [vmem:[%s941_s27 + $0x28] sm:$0xff] %vm324_vm0, %v322_v36 }
  0xc2   : > { %s1029_s12 = smov (!%p341_p8, %s340_s12), 7 }
  0xc3   : > { %s623_s5 = sshll.u32 %s1029_s12, 3 }
  0xc4   : > { %p626_p9 = scmp.eq.s32.totalorder %s623_s5, 0 }
  0xc5   : > { %762 = sdivrem.u32 (!%p626_p9), %s1029_s12, 7 }
  0xc6   : > { %349 = sbr.rel (%p626_p9) target bundleno = 248 (0xf8), region = 40 }
  0xce   : > { %s970_s20 = spop.drf %762 }
  0xcf   : > { %s764_s6 = spop.drf %762  ;;  %p627_p10 = scmp.le.s32.totalorder %s970_s20, 0 }
  0xd0   : > { %s1022_s15 = smov (!%p627_p10), %s964_s4  ;;  %s1023_s25 = smov (!%p627_p10), %s941_s27 }
  0xd1   : > { %530 = sbr.rel (%p627_p10) target bundleno = 222 (0xde), region = 116  ;;  %s979_s7 = smov (!%p627_p10), 0  }
  0xd2   : > { %s981_s8 = smov (!%p627_p10), 0  }
  0xd6 LB: >> { %v426_v37 = vld [vmem:[%s830_s25] sm:$0xff]  ;;  %v428_v38 = vld [vmem:[%s830_s25 + $0x8] sm:$0xff]  ;;  %v430_v39 = vld [vmem:[%s830_s25 + $0x10] sm:$0xff]  ;;  %s440_s9 = sadd.s32 1, %s834_s7  ;;  %s420_s8 = sadd.s32 1, %s838_s8   ;;  %s838_s8 = sphi %s981_s8, %s420_s8   ;;  %s834_s7 = sphi %s979_s7, %s1024_s7   ;;  %s830_s25 = sphi %s1023_s25, %s445_s25   ;;  %s826_s15 = sphi %s1022_s15, %s446_s15  }
  0xd7   : >> { %427 = vst [vmem:[%s826_s15] sm:$0xff] %v426_v37  ;;  %v432_v40 = vld [vmem:[%s830_s25 + $0x18] sm:$0xff]  ;;  %p441_p11 = scmp.ge.s32.totalorder %s440_s9, %s970_s20  ;;  %v434_v41 = vld [vmem:[%s830_s25 + $0x20] sm:$0xff]  ;;  %v436_v42 = vld [vmem:[%s830_s25 + $0x28] sm:$0xff]  ;;  %p419_p12 = scmp.ge.s32.totalorder %s420_s8, %s970_s20 }
  0xd8   : >> { %429 = vst [vmem:[%s826_s15 + $0x8] sm:$0xff] %v428_v38  ;;  %v438_v43 = vld [vmem:[%s830_s25 + $0x30] sm:$0xff] }
  0xd9   : >> { %431 = vst [vmem:[%s826_s15 + $0x10] sm:$0xff] %v430_v39  ;;  %s1031_s9 = smov (%p441_p11, %s440_s9), 0  ;;  %422 = sbr.rel (!%p419_p12) target bundleno = 214 (0xd6), region = 122 }
  0xda   : >> { %433 = vst [vmem:[%s826_s15 + $0x18] sm:$0xff] %v432_v40  ;;  %s443_s10 = smul.u32 56, %s1031_s9  ;;  %s1024_s7 = smov %s1031_s9 }
  0xdb   : >> { %435 = vst [vmem:[%s826_s15 + $0x20] sm:$0xff] %v434_v41 }
  0xdc   : >> { %437 = vst [vmem:[%s826_s15 + $0x28] sm:$0xff] %v436_v42  ;;  %s445_s25 = scalar_lea.vmem %s941_s27, %s443_s10 [#allocation2]  }
  0xdd   : >> { %439 = vst [vmem:[%s826_s15 + $0x30] sm:$0xff] %v438_v43  ;;  %s446_s15 = scalar_lea.vmem %s964_s4, %s443_s10  }
  0xde PF: > { %765 = sdivrem.u32 %s1029_s12, 7 }
  0xdf   : > { %s628_s11 = smul.u32 56, %s970_s20 }
  0xe1   : > { %s1002_s14 = scalar_lea.vmem %s941_s27, %s628_s11 [#allocation2]   ;;  %s453_s17 = scalar_lea.vmem %s964_s4, %s628_s11  }
  0xe7   : > { %s766_s18 = spop.drf %765 }
  0xe8   : > { %s767_s21 = spop.drf %765 }
  0xe9   : > { %p630_p13 = scmp.le.s32.totalorder %s767_s21, 0 }
  0xea   : > { %s840_s22 = smov (!%p630_p13), %s453_s17   ;;  %s844_s23 = smov (!%p630_p13), %s1002_s14  }
  0xeb   : > { %544 = sbr.rel (%p630_p13) target bundleno = 248 (0xf8), region = 127  ;;  %s848_s24 = smov (!%p630_p13), 0  }
  0xec   : > { %s852_s26 = smov (!%p630_p13), 0  }
  0xf0 LB: >> { %v463_v44 = vld [vmem:[%s846_s23] sm:$0xff]  ;;  %s465_s27 = sadd.s32 1, %s850_s24  ;;  %s457_s26 = sadd.s32 1, %s854_s26   ;;  %s854_s26 = sphi %s852_s26, %s457_s26   ;;  %s850_s24 = sphi %s848_s24, %s849_s24   ;;  %s846_s23 = sphi %s844_s23, %s470_s23   ;;  %s842_s22 = sphi %s840_s22, %s471_s22  }
  0xf1   : >> { %464 = vst [vmem:[%s842_s22] sm:$0xff] %v463_v44  ;;  %p466_p0 = scmp.ge.s32.totalorder %s465_s27, %s767_s21  ;;  %p456_p1 = scmp.ge.s32.totalorder %s457_s26, %s767_s21 }
  0xf3   : >> { %s1033_s27 = smov (%p466_p0, %s465_s27), 0  ;;  %459 = sbr.rel (!%p456_p1) target bundleno = 240 (0xf0), region = 133 }
  0xf4   : >> { %s631_s12 = sshll.u32 %s1033_s27, 3  ;;  %s849_s24 = smov %s1033_s27  }
  0xf5   : >> { %s470_s23 = scalar_lea.vmem %s1002_s14, %s631_s12 [#allocation2]   ;;  %s471_s22 = scalar_lea.vmem %s453_s17, %s631_s12  }
  0xf8 PF: > { %p10_p2 = scmp.ge.s32.totalorder %s891_s16, 4   ;;  %s1025_s12 = smov %s818_s13 }
  0xf9   : > { %s1026_s13 = smov %s899_s19  ;;  %s1027_s14 = smov %s891_s16 }
  0xfa   :  { %12 = sbr.rel (!%p10_p2) target bundleno = 2 (0x2), region = 144 }

// kernel: squeezenet_forward.26
= control target key start
LH: loop header
LB: loop body
LE: loop exit
PB: predicated region body
PF: predicated region fallthrough
CT: control target
= control target key end

     0   :  { %s1181_s6 = smov 0   ;;  %s1183_s7 = smov 0   ;;  %s1533_s0 = inlined_call_operand.vmem [shape: f32[9,98,128], index: 0, kind: input, shape index: {}]   ;;  %s1534_s1 = inlined_call_operand.vmem [shape: f32[98,128], index: 1, kind: output, shape index: {}]  }
   0x1   :  { %s1185_s8 = smov 0  }
   0x2 LB: > { %s1197_s9 = sadd.s32 4294967295, %s1105_s8   ;;  %s1200_s10 = sadd.s32 1, %s1105_s8   ;;  %s1105_s8 = sphi %s1185_s8, %s1550_s8   ;;  %s1101_s7 = sphi %s1183_s7, %s1549_s7   ;;  %s1097_s6 = sphi %s1181_s6, %s1548_s6  }
   0x3   : > { %s15_s11 = ssub.s32 %s1105_s8, %s1200_s10  ;;  %s18_s12 = sadd.s32 1, %s1101_s7 }
   0x4   : > { %p16_p0 = scmp.eq.s32.totalorder %s15_s11, 0  ;;  %p25_p1 = scmp.ne.s32.totalorder %s1101_s7, %s1097_s6 }
   0x5   : > { %p26_p2 = scmp.eq.s32.totalorder %s1105_s8, 0  ;;  %p55_p3 = scmp.eq.s32.totalorder %s1197_s9, 1 }
   0x6   : > { %s1210_s13 = scalar_select %p16_p0, %s1101_s7, %s18_s12  }
   0x7   : > { %p27_p4 = por %p26_p2, %p25_p1  ;;  %p1212_p5 = por %p55_p3, %p25_p1 }
   0x8   : > { %p827_p6 = scmp.ge.s32.totalorder %s1105_s8, 2 }
   0xa   : > { %77 = sbr.rel (%p827_p6) target bundleno = 93 (0x5d), region = 16 }
   0xf   : > { %80 = sbr.rel (!%p27_p4) target bundleno = 93 (0x5d), region = 20  ;;  %s82_s15 = sand.u32 (%p27_p4), 1, %s1101_s7  }
  0x10   : > { %s85_s16 = smul.u32 (%p27_p4), 7, %s1105_s8 }
  0x11   : > { %s857_s17 = smul.u32 (%p27_p4), 504, %s82_s15 }
  0x12   : > { %s86_s18 = ssub.s32 (%p27_p4), 13, %s85_s16  ;;  %s853_s19 = smul.u32 (%p27_p4), 56, %s1105_s8 }
  0x13   : > { %p87_p7 = scmp.lt.s32.totalorder (%p27_p4), %s86_s18, 7  ;;  %s1228_s24 = scalar_lea.vmem (%p27_p4), [#allocation2], %s857_s17  }
  0x14   : > { %s1223_s22 = scalar_lea.vmem %s1533_s0, %s853_s19  }
  0x15   : > { %s1552_s18 = smov (!%p87_p7, %s86_s18), 7 }
  0x16   : > { %s89_s23 = smul.u32 72, %s1552_s18 }
  0x18   : > { %p830_p8 = scmp.eq.s32.totalorder %s89_s23, 0 }
  0x19   : > { %s1231_s25 = sshrl.u32 (!%p830_p8), %s1552_s18, 2 }
  0x1a   : > { %95 = sbr.rel (%p830_p8) target bundleno = 93 (0x5d), region = 24  ;;  %p831_p9 = scmp.le.s32.totalorder (!%p830_p8), %s1231_s25, 0 }
  0x1f   : > { %753 = sbr.rel (%p831_p9) target bundleno = 73 (0x49), region = 173  ;;  %s1536_s26 = smov (!%p831_p9), %s1228_s24 }
  0x20   : > { %s1537_s27 = smov (!%p831_p9), %s1223_s22  ;;  %s1240_s28 = smov (!%p831_p9), 0  }
  0x21   : > { %s1242_s29 = smov (!%p831_p9), 0  }
  0x24 LB: >> { %v244_v0 = vld [vmem:[%s1113_s27] sm:$0xff]  ;;  %v246_v1 = vld [vmem:[%s1113_s27 + $0x8] sm:$0xff]  ;;  %v248_v2 = vld [vmem:[%s1113_s27 + $0x10] sm:$0xff]  ;;  %s316_s30 = sadd.s32 1, %s1117_s28  ;;  %s238_s29 = sadd.s32 1, %s1121_s29   ;;  %s1121_s29 = sphi %s1242_s29, %s238_s29   ;;  %s1117_s28 = sphi %s1240_s28, %s1540_s28   ;;  %s1113_s27 = sphi %s1537_s27, %s1539_s27   ;;  %s1109_s26 = sphi %s1536_s26, %s1538_s26  }
  0x25   : >> { %245 = vst [vmem:[%s1109_s26] sm:$0xff] %v244_v0  ;;  %v250_v3 = vld [vmem:[%s1113_s27 + $0x18] sm:$0xff]  ;;  %p317_p10 = scmp.ge.s32.totalorder %s316_s30, %s1231_s25  ;;  %v252_v4 = vld [vmem:[%s1113_s27 + $0x68] sm:$0xff]  ;;  %v254_v5 = vld [vmem:[%s1113_s27 + $0x70] sm:$0xff]  ;;  %p237_p11 = scmp.ge.s32.totalorder %s238_s29, %s1231_s25 }
  0x26   : >> { %247 = vst [vmem:[%s1109_s26 + $0x8] sm:$0xff] %v246_v1  ;;  %v256_v6 = vld [vmem:[%s1113_s27 + $0x78] sm:$0xff]  ;;  %v258_v7 = vld [vmem:[%s1113_s27 + $0x80] sm:$0xff]  ;;  %v260_v8 = vld [vmem:[%s1113_s27 + $0xd0] sm:$0xff] }
  0x27   : >> { %249 = vst [vmem:[%s1109_s26 + $0x10] sm:$0xff] %v248_v2  ;;  %s1554_s30 = smov (%p317_p10, %s316_s30), 0  ;;  %v262_v9 = vld [vmem:[%s1113_s27 + $0xd8] sm:$0xff]  ;;  %v264_v10 = vld [vmem:[%s1113_s27 + $0xe0] sm:$0xff]  ;;  %v266_v11 = vld [vmem:[%s1113_s27 + $0xe8] sm:$0xff] }
  0x28   : >> { %251 = vst [vmem:[%s1109_s26 + $0x18] sm:$0xff] %v250_v3  ;;  %s832_s2 = sshll.u32 %s1554_s30, 5  ;;  %v268_v12 = vld [vmem:[%s1113_s27 + $0x138] sm:$0xff]  ;;  %v270_v13 = vld [vmem:[%s1113_s27 + $0x140] sm:$0xff]  ;;  %v272_v14 = vld [vmem:[%s1113_s27 + $0x148] sm:$0xff]  ;;  %s1540_s28 = smov %s1554_s30 }
  0x29   : >> { %253 = vst [vmem:[%s1109_s26 + $0x38] sm:$0xff] %v252_v4  ;;  %s1274_s3 = scalar_lea.vmem %s1223_s22, %s832_s2   ;;  %s1277_s4 = scalar_lea.vmem %s1228_s24, %s832_s2 [#allocation2]   ;;  %v274_v15 = vld [vmem:[%s1113_s27 + $0x150] sm:$0xff]  ;;  %v276_v16 = vld [vmem:[%s1113_s27 + $0x1a0] sm:$0xff]  ;;  %v278_v17 = vld [vmem:[%s1113_s27 + $0x1a8] sm:$0xff] }
  0x2a   : >> { %255 = vst [vmem:[%s1109_s26 + $0x40] sm:$0xff] %v254_v5  ;;  %v280_v18 = vld [vmem:[%s1113_s27 + $0x1b0] sm:$0xff]  ;;  %v282_v19 = vld [vmem:[%s1113_s27 + $0x1b8] sm:$0xff]  ;;  %v284_v20 = vld [vmem:[%s1113_s27 + $0x208] sm:$0xff] }
  0x2b   : >> { %257 = vst [vmem:[%s1109_s26 + $0x48] sm:$0xff] %v256_v6  ;;  %v286_v21 = vld [vmem:[%s1113_s27 + $0x210] sm:$0xff]  ;;  %v288_v22 = vld [vmem:[%s1113_s27 + $0x218] sm:$0xff]  ;;  %v290_v23 = vld [vmem:[%s1113_s27 + $0x220] sm:$0xff] }
  0x2c   : >> { %259 = vst [vmem:[%s1109_s26 + $0x50] sm:$0xff] %v258_v7  ;;  %v292_v24 = vld [vmem:[%s1113_s27 + $0x270] sm:$0xff]  ;;  %v294_v25 = vld [vmem:[%s1113_s27 + $0x278] sm:$0xff]  ;;  %v296_v26 = vld [vmem:[%s1113_s27 + $0x280] sm:$0xff] }
  0x2d   : >> { %261 = vst [vmem:[%s1109_s26 + $0x70] sm:$0xff] %v260_v8  ;;  %v298_v27 = vld [vmem:[%s1113_s27 + $0x288] sm:$0xff]  ;;  %v300_v28 = vld [vmem:[%s1113_s27 + $0x2d8] sm:$0xff]  ;;  %v302_v29 = vld [vmem:[%s1113_s27 + $0x2e0] sm:$0xff] }
  0x2e   : >> { %263 = vst [vmem:[%s1109_s26 + $0x78] sm:$0xff] %v262_v9  ;;  %v304_v30 = vld [vmem:[%s1113_s27 + $0x2e8] sm:$0xff]  ;;  %v306_v31 = vld [vmem:[%s1113_s27 + $0x2f0] sm:$0xff]  ;;  %v308_v32 = vld [vmem:[%s1113_s27 + $0x340] sm:$0xff] }
  0x2f   : >> { %265 = vst [vmem:[%s1109_s26 + $0x80] sm:$0xff] %v264_v10  ;;  %v310_v33 = vld [vmem:[%s1113_s27 + $0x348] sm:$0xff]  ;;  %v312_v34 = vld [vmem:[%s1113_s27 + $0x350] sm:$0xff]  ;;  %v314_v35 = vld [vmem:[%s1113_s27 + $0x358] sm:$0xff]  ;;  %s1539_s27 = smov %s1274_s3 }
  0x30   : >> { %267 = vst [vmem:[%s1109_s26 + $0x88] sm:$0xff] %v266_v11 }
  0x31   : >> { %269 = vst [vmem:[%s1109_s26 + $0xa8] sm:$0xff] %v268_v12 }
  0x32   : >> { %271 = vst [vmem:[%s1109_s26 + $0xb0] sm:$0xff] %v270_v13 }
  0x33   : >> { %273 = vst [vmem:[%s1109_s26 + $0xb8] sm:$0xff] %v272_v14 }
  0x34   : >> { %275 = vst [vmem:[%s1109_s26 + $0xc0] sm:$0xff] %v274_v15 }
  0x35   : >> { %277 = vst [vmem:[%s1109_s26 + $0xe0] sm:$0xff] %v276_v16 }
  0x36   : >> { %279 = vst [vmem:[%s1109_s26 + $0xe8] sm:$0xff] %v278_v17 }
  0x37   : >> { %281 = vst [vmem:[%s1109_s26 + $0xf0] sm:$0xff] %v280_v18 }
  0x38   : >> { %283 = vst [vmem:[%s1109_s26 + $0xf8] sm:$0xff] %v282_v19 }
  0x39   : >> { %285 = vst [vmem:[%s1109_s26 + $0x118] sm:$0xff] %v284_v20 }
  0x3a   : >> { %287 = vst [vmem:[%s1109_s26 + $0x120] sm:$0xff] %v286_v21 }
  0x3b   : >> { %289 = vst [vmem:[%s1109_s26 + $0x128] sm:$0xff] %v288_v22 }
  0x3c   : >> { %291 = vst [vmem:[%s1109_s26 + $0x130] sm:$0xff] %v290_v23 }
  0x3d   : >> { %293 = vst [vmem:[%s1109_s26 + $0x150] sm:$0xff] %v292_v24 }
  0x3e   : >> { %295 = vst [vmem:[%s1109_s26 + $0x158] sm:$0xff] %v294_v25 }
  0x3f   : >> { %297 = vst [vmem:[%s1109_s26 + $0x160] sm:$0xff] %v296_v26 }
  0x40   : >> { %299 = vst [vmem:[%s1109_s26 + $0x168] sm:$0xff] %v298_v27 }
  0x41   : >> { %301 = vst [vmem:[%s1109_s26 + $0x188] sm:$0xff] %v300_v28 }
  0x42   : >> { %303 = vst [vmem:[%s1109_s26 + $0x190] sm:$0xff] %v302_v29 }
  0x43   : >> { %305 = vst [vmem:[%s1109_s26 + $0x198] sm:$0xff] %v304_v30 }
  0x44   : >> { %307 = vst [vmem:[%s1109_s26 + $0x1a0] sm:$0xff] %v306_v31  ;;  %240 = sbr.rel (!%p237_p11) target bundleno = 36 (0x24), region = 179 }
  0x45   : >> { %309 = vst [vmem:[%s1109_s26 + $0x1c0] sm:$0xff] %v308_v32 }
  0x46   : >> { %311 = vst [vmem:[%s1109_s26 + $0x1c8] sm:$0xff] %v310_v33 }
  0x47   : >> { %313 = vst [vmem:[%s1109_s26 + $0x1d0] sm:$0xff] %v312_v34 }
  0x48   : >> { %315 = vst [vmem:[%s1109_s26 + $0x1d8] sm:$0xff] %v314_v35  ;;  %s1538_s26 = smov %s1277_s4 }
  0x49 PF: > { %s1350_s5 = sand.u32 3, %s1552_s18   ;;  %s854_s11 = sshll.u32 %s1231_s25, 5 }
  0x4a   : > { %s1354_s12 = scalar_lea.vmem %s1223_s22, %s854_s11   ;;  %s1357_s15 = scalar_lea.vmem %s1228_s24, %s854_s11 [#allocation2]  }
  0x4b   : > { %p837_p12 = scmp.le.s32.totalorder %s1350_s5, 0 }
  0x4c   : > { %s1541_s16 = smov (!%p837_p12), %s1357_s15  ;;  %s1542_s17 = smov (!%p837_p12), %s1354_s12 }
  0x4d   : > { %767 = sbr.rel (%p837_p12) target bundleno = 93 (0x5d), region = 184  ;;  %s1366_s19 = smov (!%p837_p12), 0  }
  0x4e   : > { %s1368_s20 = smov (!%p837_p12), 0  }
  0x52 LB: >> { %v339_v36 = vld [vmem:[%s1129_s17] sm:$0xff]  ;;  %v341_v37 = vld [vmem:[%s1129_s17 + $0x68] sm:$0xff]  ;;  %v343_v38 = vld [vmem:[%s1129_s17 + $0xd0] sm:$0xff]  ;;  %s357_s18 = sadd.s32 1, %s1133_s19  ;;  %s333_s20 = sadd.s32 1, %s1137_s20   ;;  %s1137_s20 = sphi %s1368_s20, %s333_s20   ;;  %s1133_s19 = sphi %s1366_s19, %s1544_s19   ;;  %s1129_s17 = sphi %s1542_s17, %s362_s17   ;;  %s1125_s16 = sphi %s1541_s16, %s1543_s16  }
  0x53   : >> { %340 = vst [vmem:[%s1125_s16] sm:$0xff] %v339_v36  ;;  %v345_v39 = vld [vmem:[%s1129_s17 + $0x138] sm:$0xff]  ;;  %p358_p13 = scmp.ge.s32.totalorder %s357_s18, %s1350_s5  ;;  %v347_v40 = vld [vmem:[%s1129_s17 + $0x1a0] sm:$0xff]  ;;  %v349_v41 = vld [vmem:[%s1129_s17 + $0x208] sm:$0xff]  ;;  %p332_p0 = scmp.ge.s32.totalorder %s333_s20, %s1350_s5 }
  0x54   : >> { %342 = vst [vmem:[%s1125_s16 + $0x38] sm:$0xff] %v341_v37  ;;  %v351_v42 = vld [vmem:[%s1129_s17 + $0x270] sm:$0xff]  ;;  %v353_v43 = vld [vmem:[%s1129_s17 + $0x2d8] sm:$0xff]  ;;  %v355_v44 = vld [vmem:[%s1129_s17 + $0x340] sm:$0xff] }
  0x55   : >> { %344 = vst [vmem:[%s1125_s16 + $0x70] sm:$0xff] %v343_v38  ;;  %s1556_s18 = smov (%p358_p13, %s357_s18), 0 }
  0x56   : >> { %346 = vst [vmem:[%s1125_s16 + $0xa8] sm:$0xff] %v345_v39  ;;  %s838_s21 = sshll.u32 %s1556_s18, 3  ;;  %s1544_s19 = smov %s1556_s18 }
  0x57   : >> { %348 = vst [vmem:[%s1125_s16 + $0xe0] sm:$0xff] %v347_v40  ;;  %s362_s17 = scalar_lea.vmem %s1354_s12, %s838_s21   ;;  %s363_s22 = scalar_lea.vmem %s1357_s15, %s838_s21 [#allocation2]  }
  0x58   : >> { %350 = vst [vmem:[%s1125_s16 + $0x118] sm:$0xff] %v349_v41  ;;  %335 = sbr.rel (!%p332_p0) target bundleno = 82 (0x52), region = 190 }
  0x59   : >> { %352 = vst [vmem:[%s1125_s16 + $0x150] sm:$0xff] %v351_v42 }
  0x5a   : >> { %354 = vst [vmem:[%s1125_s16 + $0x188] sm:$0xff] %v353_v43 }
  0x5b   : >> { %356 = vst [vmem:[%s1125_s16 + $0x1c0] sm:$0xff] %v355_v44  ;;  %s1543_s16 = smov %s363_s22 }
  0x5d PF: > { %p840_p1 = scmp.ge.s32.totalorder %s1105_s8, 1  ;;  %p368_p2 = scmp.lt.s32.totalorder %s1105_s8, 3 }
  0x5f   : > { %p369_p3 = pnand %p840_p1, %p368_p2 }
  0x60   : > { %s375_s23 = sand.u32 (!%p369_p3), 1, %s1097_s6  }
  0x61   : > { %372 = sbr.rel (%p369_p3) target bundleno = 189 (0xbd), region = 72 }
  0x62   : > { %s858_s24 = smul.u32 (!%p369_p3), 504, %s375_s23 }
  0x63   : > { %s1418_s8 = smul.u32 (!%p369_p3), 56, %s375_s23 }
  0x64   : > { %s1394_s25 = scalar_lea.vmem (!%p369_p3), [#allocation2], %s858_s24 }
  0x65   : > { %s1442_s6 = scalar_lea.vmem (!%p369_p3), [#allocation3], %s1418_s8  }
  0x66   : > { %v403_v45 = vld [vmem:[%s1394_s25] sm:$0xff]  ;;  %v410_v46 = vld [vmem:[%s1394_s25 + $0x38] sm:$0xff]  ;;  %v417_v47 = vld [vmem:[%s1394_s25 + $0x70] sm:$0xff]  ;;  %s536_s26 = smul.u32 (%p1212_p5), 7, %s1197_s9 }
  0x67   : > { %v466_v48 = vmax.f32 %v403_v45, %v410_v46  ;;  %v424_v49 = vld [vmem:[%s1394_s25 + $0xa8] sm:$0xff]  ;;  %v411_v52 = vld [vmem:[%s1394_s25 + $0x40] sm:$0xff]  ;;  %v418_v53 = vld [vmem:[%s1394_s25 + $0x78] sm:$0xff]  ;;  %s856_s27 = smul.u32 (%p1212_p5), 56, %s1197_s9 }
  0x68   : > { %v404_v51 = vld [vmem:[%s1394_s25 + $0x8] sm:$0xff]  ;;  %v431_v54 = vld [vmem:[%s1394_s25 + $0xe0] sm:$0xff]  ;;  %v438_v56 = vld [vmem:[%s1394_s25 + $0x118] sm:$0xff]  ;;  %s537_s28 = ssub.s32 (%p1212_p5), 13, %s536_s26 }
  0x69   : > { %v467_v50 = vmax.f32 %v466_v48, %v417_v47  ;;  %v474_v55 = vmax.f32 %v404_v51, %v411_v52  ;;  %v425_v58 = vld [vmem:[%s1394_s25 + $0xb0] sm:$0xff]  ;;  %v412_v61 = vld [vmem:[%s1394_s25 + $0x48] sm:$0xff]  ;;  %v419_v62 = vld [vmem:[%s1394_s25 + $0x80] sm:$0xff]  ;;  %p538_p4 = scmp.lt.s32.totalorder (%p1212_p5), %s537_s28, 7  ;;  %s1480_s2 = scalar_lea.vmem (%p1212_p5), %s1534_s1, %s856_s27  }
  0x6a   : > { %v405_v60 = vld [vmem:[%s1394_s25 + $0x10] sm:$0xff]  ;;  %v432_v0 = vld [vmem:[%s1394_s25 + $0xe8] sm:$0xff]  ;;  %v439_v3 = vld [vmem:[%s1394_s25 + $0x120] sm:$0xff] }
  0x6b   : > { %v468_v57 = vmax.f32 %v467_v50, %v424_v49  ;;  %v475_v59 = vmax.f32 %v474_v55, %v418_v53  ;;  %v482_v1 = vmax.f32 %v405_v60, %v412_v61  ;;  %v445_v2 = vld [vmem:[%s1394_s25 + $0x150] sm:$0xff]  ;;  %v426_v5 = vld [vmem:[%s1394_s25 + $0xb8] sm:$0xff]  ;;  %v420_v10 = vld [vmem:[%s1394_s25 + $0x88] sm:$0xff] }
  0x6c   : > { %v406_v8 = vld [vmem:[%s1394_s25 + $0x18] sm:$0xff]  ;;  %v413_v9 = vld [vmem:[%s1394_s25 + $0x50] sm:$0xff]  ;;  %v452_v11 = vld [vmem:[%s1394_s25 + $0x188] sm:$0xff] }
  0x6d   : > { %v469_v63 = vmax.f32 %v468_v57, %v431_v54  ;;  %v476_v4 = vmax.f32 %v475_v59, %v425_v58  ;;  %v483_v7 = vmax.f32 %v482_v1, %v419_v62  ;;  %v459_v12 = vld [vmem:[%s1394_s25 + $0x1c0] sm:$0xff]  ;;  %v433_v14 = vld [vmem:[%s1394_s25 + $0xf0] sm:$0xff]  ;;  %v490_v15 = vmax.f32 %v406_v8, %v413_v9  ;;  %v446_v17 = vld [vmem:[%s1394_s25 + $0x158] sm:$0xff] }
  0x6e   : > { %v440_v18 = vld [vmem:[%s1394_s25 + $0x128] sm:$0xff]  ;;  %v427_v20 = vld [vmem:[%s1394_s25 + $0xc0] sm:$0xff]  ;;  %v414_v24 = vld [vmem:[%s1394_s25 + $0x58] sm:$0xff] }
  0x6f   : > { %v470_v6 = vmax.f32 %v469_v63, %v438_v56  ;;  %v477_v13 = vmax.f32 %v476_v4, %v432_v0  ;;  %v484_v19 = vmax.f32 %v483_v7, %v426_v5  ;;  %v491_v22 = vmax.f32 %v490_v15, %v420_v10  ;;  %v407_v23 = vld [vmem:[%s1394_s25 + $0x20] sm:$0xff]  ;;  %v421_v25 = vld [vmem:[%s1394_s25 + $0x90] sm:$0xff]  ;;  %v460_v28 = vld [vmem:[%s1394_s25 + $0x1c8] sm:$0xff] }
  0x70   : > { %v453_v27 = vld [vmem:[%s1394_s25 + $0x190] sm:$0xff]  ;;  %v434_v30 = vld [vmem:[%s1394_s25 + $0xf8] sm:$0xff]  ;;  %v498_v31 = vmax.f32 %v407_v23, %v414_v24  ;;  %v447_v33 = vld [vmem:[%s1394_s25 + $0x160] sm:$0xff] }
  0x71   : > { %v471_v16 = vmax.f32 %v470_v6, %v445_v2  ;;  %v478_v21 = vmax.f32 %v477_v13, %v439_v3  ;;  %v485_v29 = vmax.f32 %v484_v19, %v433_v14  ;;  %v441_v34 = vld [vmem:[%s1394_s25 + $0x130] sm:$0xff]  ;;  %v492_v35 = vmax.f32 %v491_v22, %v427_v20  ;;  %v428_v36 = vld [vmem:[%s1394_s25 + $0xc8] sm:$0xff]  ;;  %v415_v41 = vld [vmem:[%s1394_s25 + $0x60] sm:$0xff] }
  0x72   : > { %v499_v39 = vmax.f32 %v498_v31, %v421_v25  ;;  %v408_v40 = vld [vmem:[%s1394_s25 + $0x28] sm:$0xff]  ;;  %v422_v42 = vld [vmem:[%s1394_s25 + $0x98] sm:$0xff]  ;;  %v461_v45 = vld [vmem:[%s1394_s25 + $0x1d0] sm:$0xff] }
  0x73   : > { %v472_v26 = vmax.f32 %v471_v16, %v452_v11  ;;  %v479_v32 = vmax.f32 %v478_v21, %v446_v17  ;;  %v486_v38 = vmax.f32 %v485_v29, %v440_v18  ;;  %v454_v44 = vld [vmem:[%s1394_s25 + $0x198] sm:$0xff]  ;;  %v493_v46 = vmax.f32 %v492_v35, %v434_v30  ;;  %v435_v47 = vld [vmem:[%s1394_s25 + $0x100] sm:$0xff]  ;;  %v448_v50 = vld [vmem:[%s1394_s25 + $0x168] sm:$0xff] }
  0x74   : > { %v506_v48 = vmax.f32 %v408_v40, %v415_v41  ;;  %v442_v51 = vld [vmem:[%s1394_s25 + $0x138] sm:$0xff]  ;;  %v500_v52 = vmax.f32 %v499_v39, %v428_v36  ;;  %v429_v53 = vld [vmem:[%s1394_s25 + $0xd0] sm:$0xff]  ;;  %v416_v58 = vld [vmem:[%s1394_s25 + $0x68] sm:$0xff] }
  0x75   : > { %v473_v37 = vmax.f32 %v472_v26, %v459_v12  ;;  %v480_v43 = vmax.f32 %v479_v32, %v453_v27  ;;  %v487_v49 = vmax.f32 %v486_v38, %v447_v33  ;;  %v494_v55 = vmax.f32 %v493_v46, %v441_v34  ;;  %v409_v57 = vld [vmem:[%s1394_s25 + $0x30] sm:$0xff]  ;;  %v423_v59 = vld [vmem:[%s1394_s25 + $0xa0] sm:$0xff]  ;;  %v436_v63 = vld [vmem:[%s1394_s25 + $0x108] sm:$0xff] }
  0x76   : > { %v507_v56 = vmax.f32 %v506_v48, %v422_v42  ;;  %v455_v61 = vld [vmem:[%s1394_s25 + $0x1a0] sm:$0xff]  ;;  %v501_v62 = vmax.f32 %v500_v52, %v435_v47  ;;  %v514_v0 = vmax.f32 %v409_v57, %v416_v58  ;;  %v449_v2 = vld [vmem:[%s1394_s25 + $0x170] sm:$0xff]  ;;  %v430_v4 = vld [vmem:[%s1394_s25 + $0xd8] sm:$0xff] }
  0x77   : > { %522 = vst [vmem:[%s1442_s6] sm:$0xff] %v473_v37  ;;  %v481_v54 = vmax.f32 %v480_v43, %v460_v28  ;;  %v488_v60 = vmax.f32 %v487_v49, %v454_v44  ;;  %v495_v1 = vmax.f32 %v494_v55, %v448_v50  ;;  %v462_v6 = vld [vmem:[%s1394_s25 + $0x1d8] sm:$0xff]  ;;  %v443_v8 = vld [vmem:[%s1394_s25 + $0x140] sm:$0xff]  ;;  %v456_v11 = vld [vmem:[%s1394_s25 + $0x1a8] sm:$0xff] }
  0x78   : > { %v508_v3 = vmax.f32 %v507_v56, %v429_v53  ;;  %v502_v7 = vmax.f32 %v501_v62, %v442_v51  ;;  %v515_v9 = vmax.f32 %v514_v0, %v423_v59  ;;  %v437_v13 = vld [vmem:[%s1394_s25 + $0x110] sm:$0xff]  ;;  %v450_v15 = vld [vmem:[%s1394_s25 + $0x178] sm:$0xff]  ;;  %v463_v18 = vld [vmem:[%s1394_s25 + $0x1e0] sm:$0xff] }
  0x79   : > { %523 = vst [vmem:[%s1442_s6 + $0x8] sm:$0xff] %v481_v54  ;;  %v489_v5 = vmax.f32 %v488_v60, %v461_v45  ;;  %v496_v10 = vmax.f32 %v495_v1, %v455_v61  ;;  %v444_v20 = vld [vmem:[%s1394_s25 + $0x148] sm:$0xff]  ;;  %v457_v22 = vld [vmem:[%s1394_s25 + $0x1b0] sm:$0xff]  ;;  %v451_v25 = vld [vmem:[%s1394_s25 + $0x180] sm:$0xff] }
  0x7a   : > { %v509_v12 = vmax.f32 %v508_v3, %v436_v63  ;;  %v503_v14 = vmax.f32 %v502_v7, %v449_v2  ;;  %v516_v16 = vmax.f32 %v515_v9, %v430_v4  ;;  %v464_v27 = vld [vmem:[%s1394_s25 + $0x1e8] sm:$0xff]  ;;  %v458_v30 = vld [vmem:[%s1394_s25 + $0x1b8] sm:$0xff]  ;;  %v465_v33 = vld [vmem:[%s1394_s25 + $0x1f0] sm:$0xff] }
  0x7b   : > { %524 = vst [vmem:[%s1442_s6 + $0x10] sm:$0xff] %v489_v5  ;;  %v497_v17 = vmax.f32 %v496_v10, %v462_v6 }
  0x7c   : > { %v510_v19 = vmax.f32 %v509_v12, %v443_v8  ;;  %v504_v21 = vmax.f32 %v503_v14, %v456_v11  ;;  %v517_v23 = vmax.f32 %v516_v16, %v437_v13 }
  0x7d   : > { %525 = vst [vmem:[%s1442_s6 + $0x18] sm:$0xff] %v497_v17 }
  0x7e   : > { %v511_v24 = vmax.f32 %v510_v19, %v450_v15  ;;  %v505_v26 = vmax.f32 %v504_v21, %v463_v18  ;;  %v518_v28 = vmax.f32 %v517_v23, %v444_v20 }
  0x80   : > { %v512_v29 = vmax.f32 %v511_v24, %v457_v22  ;;  %526 = vst [vmem:[%s1442_s6 + $0x20] sm:$0xff] %v505_v26  ;;  %v519_v31 = vmax.f32 %v518_v28, %v451_v25 }
  0x82   : > { %v513_v32 = vmax.f32 %v512_v29, %v464_v27  ;;  %v520_v34 = vmax.f32 %v519_v31, %v458_v30  ;;  %535 = sbr.rel (!%p1212_p5) target bundleno = 189 (0xbd), region = 80 }
  0x84   : > { %527 = vst [vmem:[%s1442_s6 + $0x28] sm:$0xff] %v513_v32  ;;  %v521_v35 = vmax.f32 %v520_v34, %v465_v33 }
  0x86   : > { %528 = vst [vmem:[%s1442_s6 + $0x30] sm:$0xff] %v521_v35 }
  0x87   : > { %s1558_s28 = smov (!%p538_p4, %s537_s28), 7 }
  0x88   : > { %s841_s3 = sshll.u32 %s1558_s28, 3 }
  0x89   : > { %p844_p6 = scmp.eq.s32.totalorder %s841_s3, 0 }
  0x8a   : > { %1013 = sdivrem.u32 (!%p844_p6), %s1558_s28, 7 }
  0x8b   : > { %546 = sbr.rel (%p844_p6) target bundleno = 189 (0xbd), region = 84 }
  0x93   : > { %s1486_s14 = spop.drf %1013 }
  0x94   : > { %s1015_s4 = spop.drf %1013  ;;  %p845_p5 = scmp.le.s32.totalorder %s1486_s14, 0 }
  0x95   : > { %s1545_s9 = smov (!%p845_p5), %s1480_s2  ;;  %s1546_s5 = smov (!%p845_p5), %s1442_s6 }
  0x96   : > { %781 = sbr.rel (%p845_p5) target bundleno = 163 (0xa3), region = 195  ;;  %s1495_s11 = smov (!%p845_p5), 0  }
  0x97   : > { %s1497_s12 = smov (!%p845_p5), 0  }
  0x9b LB: >> { %v623_v36 = vld [vmem:[%s1145_s5] sm:$0xff]  ;;  %v625_v37 = vld [vmem:[%s1145_s5 + $0x8] sm:$0xff]  ;;  %v627_v38 = vld [vmem:[%s1145_s5 + $0x10] sm:$0xff]  ;;  %s637_s15 = sadd.s32 1, %s1149_s11  ;;  %s617_s12 = sadd.s32 1, %s1153_s12   ;;  %s1153_s12 = sphi %s1497_s12, %s617_s12   ;;  %s1149_s11 = sphi %s1495_s11, %s1547_s11   ;;  %s1145_s5 = sphi %s1546_s5, %s642_s5   ;;  %s1141_s9 = sphi %s1545_s9, %s643_s9  }
  0x9c   : >> { %624 = vst [vmem:[%s1141_s9] sm:$0xff] %v623_v36  ;;  %v629_v39 = vld [vmem:[%s1145_s5 + $0x18] sm:$0xff]  ;;  %p638_p7 = scmp.ge.s32.totalorder %s637_s15, %s1486_s14  ;;  %v631_v40 = vld [vmem:[%s1145_s5 + $0x20] sm:$0xff]  ;;  %v633_v41 = vld [vmem:[%s1145_s5 + $0x28] sm:$0xff]  ;;  %p616_p8 = scmp.ge.s32.totalorder %s617_s12, %s1486_s14 }
  0x9d   : >> { %626 = vst [vmem:[%s1141_s9 + $0x8] sm:$0xff] %v625_v37  ;;  %v635_v42 = vld [vmem:[%s1145_s5 + $0x30] sm:$0xff] }
  0x9e   : >> { %628 = vst [vmem:[%s1141_s9 + $0x10] sm:$0xff] %v627_v38  ;;  %s1560_s15 = smov (%p638_p7, %s637_s15), 0  ;;  %619 = sbr.rel (!%p616_p8) target bundleno = 155 (0x9b), region = 201 }
  0x9f   : >> { %630 = vst [vmem:[%s1141_s9 + $0x18] sm:$0xff] %v629_v39  ;;  %s640_s16 = smul.u32 56, %s1560_s15  ;;  %s1547_s11 = smov %s1560_s15 }
  0xa0   : >> { %632 = vst [vmem:[%s1141_s9 + $0x20] sm:$0xff] %v631_v40 }
  0xa1   : >> { %634 = vst [vmem:[%s1141_s9 + $0x28] sm:$0xff] %v633_v41  ;;  %s642_s5 = scalar_lea.vmem %s1442_s6, %s640_s16 [#allocation3]  }
  0xa2   : >> { %636 = vst [vmem:[%s1141_s9 + $0x30] sm:$0xff] %v635_v42  ;;  %s643_s9 = scalar_lea.vmem %s1480_s2, %s640_s16  }
  0xa3 PF: > { %1016 = sdivrem.u32 %s1558_s28, 7 }
  0xa4   : > { %s846_s17 = smul.u32 56, %s1486_s14 }
  0xa6   : > { %s1518_s19 = scalar_lea.vmem %s1442_s6, %s846_s17 [#allocation3]   ;;  %s650_s20 = scalar_lea.vmem %s1480_s2, %s846_s17  }
  0xac   : > { %s1017_s18 = spop.drf %1016 }
  0xad   : > { %s1018_s21 = spop.drf %1016 }
  0xae   : > { %p848_p9 = scmp.le.s32.totalorder %s1018_s21, 0 }
  0xaf   : > { %s1155_s22 = smov (!%p848_p9), %s650_s20   ;;  %s1159_s23 = smov (!%p848_p9), %s1518_s19  }
  0xb0   : > { %795 = sbr.rel (%p848_p9) target bundleno = 189 (0xbd), region = 206  ;;  %s1163_s24 = smov (!%p848_p9), 0  }
  0xb1   : > { %s1167_s25 = smov (!%p848_p9), 0  }
  0xb5 LB: >> { %v660_v43 = vld [vmem:[%s1161_s23] sm:$0xff]  ;;  %s662_s8 = sadd.s32 1, %s1165_s24  ;;  %s654_s25 = sadd.s32 1, %s1169_s25   ;;  %s1169_s25 = sphi %s1167_s25, %s654_s25   ;;  %s1165_s24 = sphi %s1163_s24, %s1164_s24   ;;  %s1161_s23 = sphi %s1159_s23, %s667_s23   ;;  %s1157_s22 = sphi %s1155_s22, %s668_s22  }
  0xb6   : >> { %661 = vst [vmem:[%s1157_s22] sm:$0xff] %v660_v43  ;;  %p663_p10 = scmp.ge.s32.totalorder %s662_s8, %s1018_s21  ;;  %p653_p11 = scmp.ge.s32.totalorder %s654_s25, %s1018_s21 }
  0xb8   : >> { %s1562_s8 = smov (%p663_p10, %s662_s8), 0  ;;  %656 = sbr.rel (!%p653_p11) target bundleno = 181 (0xb5), region = 212 }
  0xb9   : >> { %s849_s6 = sshll.u32 %s1562_s8, 3  ;;  %s1164_s24 = smov %s1562_s8  }
  0xba   : >> { %s667_s23 = scalar_lea.vmem %s1518_s19, %s849_s6 [#allocation3]   ;;  %s668_s22 = scalar_lea.vmem %s650_s20, %s849_s6  }
  0xbd PF: > { %p8_p12 = scmp.ge.s32.totalorder %s1200_s10, 4   ;;  %s1548_s6 = smov %s1101_s7 }
  0xbe   : > { %s1549_s7 = smov %s1210_s13  ;;  %s1550_s8 = smov %s1200_s10 }
  0xbf   :  { %10 = sbr.rel (!%p8_p12) target bundleno = 2 (0x2), region = 223 }

// kernel: squeezenet_forward.28
= control target key start
LH: loop header
LB: loop body
LE: loop exit
PB: predicated region body
PF: predicated region fallthrough
CT: control target
= control target key end

     0   :  { %s1358_s12 = smov 0   ;;  %s1360_s13 = smov 0   ;;  %s1819_s0 = inlined_call_operand.vmem [shape: bf16[98,288], index: 0, kind: input, shape index: {}]   ;;  %s1820_s1 = inlined_call_operand.vmem [shape: bf16[288,256], index: 1, kind: input, shape index: {}]   ;;  %s1821_s2 = inlined_call_operand.vmem [shape: f32[1,256], index: 2, kind: input, shape index: {}]   ;;  %s1822_s3 = inlined_call_operand.vmem [shape: f32[98,256], index: 3, kind: output, shape index: {}]  }
   0x1   :  { %s1362_s14 = smov 0  }
   0x2 LB: > { %s1371_s15 = sadd.s32 4294967295, %s1304_s14   ;;  %s1373_s16 = sadd.s32 1, %s1304_s14   ;;  %s1304_s14 = sphi %s1362_s14, %s1831_s14   ;;  %s1300_s13 = sphi %s1360_s13, %s1830_s13   ;;  %s1296_s12 = sphi %s1358_s12, %s1829_s12  }
   0x3   : > { %s85_s17 = ssub.s32 %s1304_s14, %s1373_s16  ;;  %s88_s18 = sadd.s32 1, %s1300_s13 }
   0x4   : > { %p86_p0 = scmp.eq.s32.totalorder %s85_s17, 0  ;;  %p98_p1 = scmp.ne.s32.totalorder %s1300_s13, %s1296_s12 }
   0x5   : > { %p99_p2 = scmp.eq.s32.totalorder %s1371_s15, 1  ;;  %p890_p3 = scmp.ge.s32.totalorder %s1304_s14, 1 }
   0x6   : > { %s1381_s19 = scalar_select %p86_p0, %s1300_s13, %s88_s18  }
   0x7   : > { %p1383_p4 = por %p99_p2, %p98_p1  ;;  %p149_p5 = scmp.lt.s32.totalorder %s1304_s14, 3 }
   0x9   : > { %p150_p6 = pnand %p890_p3, %p149_p5 }
   0xa   : > { %s1418_s18 = smul.u32 (!%p150_p6), 7, %s1371_s15  ;;  %s175_s9 = sand.u32 (!%p150_p6), 1, %s1296_s12  }
   0xb   : > { %153 = sbr.rel (%p150_p6) target bundleno = 325 (0x145), region = 32 }
   0xc   : > { %p184_p7 = scmp.lt.s32.totalorder (!%p150_p6), %s1418_s18, 12 }
  0x10   : > { %v986_v0 = vld [vmem:[%s1820_s1 + $0x70] sm:$0xf]  ;;  %v1118_v1 = vld [vmem:[%s1820_s1 + $0x74] sm:$0xf0]  ;;  %v978_v2 = vld [vmem:[%s1820_s1 + $0x60] sm:$0xf] }
  0x11   : > { %v987_v3 = vor.u32 %v1118_v1, %v986_v0  ;;  %v1116_v4 = vld [vmem:[%s1820_s1 + $0x64] sm:$0xf0]  ;;  %v1066_v5 = vld [vmem:[%s1820_s1 + $0x110] sm:$0xf]  ;;  %v1138_v6 = vld [vmem:[%s1820_s1 + $0x114] sm:$0xf0] }
  0x12   : > { %v979_v7 = vor.u32 %v1116_v4, %v978_v2  ;;  %v1067_v8 = vor.u32 %v1138_v6, %v1066_v5  ;;  %v1058_v9 = vld [vmem:[%s1820_s1 + $0x100] sm:$0xf]  ;;  %v1136_v10 = vld [vmem:[%s1820_s1 + $0x104] sm:$0xf0]  ;;  %v970_v11 = vld [vmem:[%s1820_s1 + $0x50] sm:$0xf] }
  0x13   : > { %506 = vmatpush.bf16.msra.mxu0 %v987_v3  ;;  %1143 = vmatpush.bf16.msra.mxu1 %v987_v3  ;;  %v1114_v12 = vld [vmem:[%s1820_s1 + $0x54] sm:$0xf0]  ;;  %v1059_v13 = vor.u32 %v1136_v10, %v1058_v9  ;;  %v1117_v14 = vld [vmem:[%s1820_s1 + $0x74] sm:$0xf]  ;;  %v988_v15 = vld [vmem:[%s1820_s1 + $0x78] sm:$0xf0] }
  0x14   : > { %1151 = vmatpush.bf16.msra.mxu3 %v1067_v8  ;;  %568 = vmatpush.bf16.msra.mxu2 %v1067_v8  ;;  %v1133_v16 = vld [vmem:[%s1820_s1 + $0xf4] sm:$0xf]  ;;  %v962_v17 = vld [vmem:[%s1820_s1 + $0x40] sm:$0xf]  ;;  %v991_v18 = vor.u32 %v1117_v14, %v988_v15  ;;  %v1052_v19 = vld [vmem:[%s1820_s1 + $0xf8] sm:$0xf0]  ;;  %v971_v20 = vor.u32 %v1114_v12, %v970_v11 }
  0x15   : > { %v1112_v21 = vld [vmem:[%s1820_s1 + $0x44] sm:$0xf0]  ;;  %v1055_v22 = vor.u32 %v1133_v16, %v1052_v19  ;;  %v1115_v23 = vld [vmem:[%s1820_s1 + $0x64] sm:$0xf]  ;;  %v980_v24 = vld [vmem:[%s1820_s1 + $0x68] sm:$0xf0] }
  0x16   : > { %s185_s10 = scalar_select %p184_p7, %s1418_s18, 12  ;;  %v1131_v25 = vld [vmem:[%s1820_s1 + $0xe4] sm:$0xf]  ;;  %v1044_v26 = vld [vmem:[%s1820_s1 + $0xe8] sm:$0xf0]  ;;  %v983_v27 = vor.u32 %v1115_v23, %v980_v24  ;;  %v963_v30 = vor.u32 %v1112_v21, %v962_v17  ;;  %vm493_vm0 = vcmask 261120  }
  0x17   : > { %507 = vmatpush.bf16.msra.mxu0 %v979_v7  ;;  %1144 = vmatpush.bf16.msra.mxu1 %v979_v7  ;;  %v1047_v28 = vor.u32 %v1131_v25, %v1044_v26  ;;  %v1113_v29 = vld [vmem:[%s1820_s1 + $0x54] sm:$0xf]  ;;  %v972_v31 = vld [vmem:[%s1820_s1 + $0x58] sm:$0xf0]  ;;  %v954_v34 = vld [vmem:[%s1820_s1 + $0x30] sm:$0xf] }
  0x18   : > { %1152 = vmatpush.bf16.msra.mxu3 %v1059_v13  ;;  %569 = vmatpush.bf16.msra.mxu2 %v1059_v13  ;;  %s1154_s22 = smul.u32 12, %s185_s10  ;;  %v1129_v32 = vld [vmem:[%s1820_s1 + $0xd4] sm:$0xf]  ;;  %v1036_v33 = vld [vmem:[%s1820_s1 + $0xd8] sm:$0xf0]  ;;  %v975_v41 = vor.u32 %v1113_v29, %v972_v31  ;;  %s710_s12 = ssub.s32 (%p1383_p4), 13, %s1418_s18 }
  0x19   : > { %v1110_v35 = vld [vmem:[%s1820_s1 + $0x34] sm:$0xf0]  ;;  %v1039_v42 = vor.u32 %v1129_v32, %v1036_v33  ;;  %v1111_v43 = vld [vmem:[%s1820_s1 + $0x44] sm:$0xf]  ;;  %v964_v46 = vld [vmem:[%s1820_s1 + $0x48] sm:$0xf0] }
  0x1a   : > { %s1467_s6 = scalar_lea.vmem %s1819_s0, %s1154_s22  ;;  %v955_v44 = vor.u32 %v1110_v35, %v954_v34  ;;  %v1127_v47 = vld [vmem:[%s1820_s1 + $0xc4] sm:$0xf]  ;;  %v1028_v48 = vld [vmem:[%s1820_s1 + $0xc8] sm:$0xf0]  ;;  %v946_v49 = vld [vmem:[%s1820_s1 + $0x20] sm:$0xf]  ;;  %v967_v51 = vor.u32 %v1111_v43, %v964_v46 }
  0x1b   : > { %508 = vmatpush.bf16.msra.mxu0 %v971_v20  ;;  %1145 = vmatpush.bf16.msra.mxu1 %v971_v20  ;;  %v926_v36 = vld [vmem:[%s1467_s6 + $0x38] sm:$0xf]  ;;  %v1102_v37 = vld [vmem:[%s1467_s6 + $0x40] sm:$0xf0]  ;;  %v902_v38 = vld [vmem:[%s1467_s6 + $0x8] sm:$0xf]  ;;  %v1031_v52 = vor.u32 %v1127_v47, %v1028_v48 }
  0x1c   : > { %590 = vmatpush.bf16.msrb.mxu3 %v991_v18  ;;  %618 = vmatpush.bf16.msrb.mxu2 %v1055_v22  ;;  %v1478_v39 = vor.u32 %v1102_v37, %v926_v36  ;;  %v1096_v40 = vld [vmem:[%s1467_s6 + $0x10] sm:$0xf0]  ;;  %v1108_v50 = vld [vmem:[%s1820_s1 + $0x24] sm:$0xf0]  ;;  %v956_v55 = vld [vmem:[%s1820_s1 + $0x38] sm:$0xf0] }
  0x1d   : > { %v1484_v45 = vor.u32 %v1096_v40, %v902_v38  ;;  %v1109_v53 = vld [vmem:[%s1820_s1 + $0x34] sm:$0xf]  ;;  %v947_v54 = vor.u32 %v1108_v50, %v946_v49  ;;  %v1020_v57 = vld [vmem:[%s1820_s1 + $0xb8] sm:$0xf0]  ;;  %v938_v58 = vld [vmem:[%s1820_s1 + $0x10] sm:$0xf] }
  0x1e   : > { %1074 = vmatmul.msk.bf16.vlgmr.msra.gmra.mxu3 %vm493_vm0, %v1478_v39  ;;  %v1125_v56 = vld [vmem:[%s1820_s1 + $0xb4] sm:$0xf]  ;;  %v1106_v59 = vld [vmem:[%s1820_s1 + $0x14] sm:$0xf0]  ;;  %v215_v60 = vld [vmem:[%s1467_s6 + $0x50] sm:$0xf]  ;;  %v959_v61 = vor.u32 %v1109_v53, %v956_v55 }
  0x1f   : > { %509 = vmatpush.bf16.msra.mxu0 %v963_v30  ;;  %1146 = vmatpush.bf16.msra.mxu1 %v963_v30  ;;  %v1023_v62 = vor.u32 %v1125_v56, %v1020_v57  ;;  %v1107_v63 = vld [vmem:[%s1820_s1 + $0x24] sm:$0xf]  ;;  %v939_v0 = vor.u32 %v1106_v59, %v938_v58  ;;  %v948_v1 = vld [vmem:[%s1820_s1 + $0x28] sm:$0xf0]  ;;  %v930_v4 = vld [vmem:[%s1820_s1] sm:$0xf]  ;;  %v292_v6 = vunpack.c.l.b16 %v215_v60 }
  0x20   : > { %591 = vmatpush.bf16.msrb.mxu3 %v983_v27  ;;  %619 = vmatpush.bf16.msrb.mxu2 %v1047_v28  ;;  %v1123_v2 = vld [vmem:[%s1820_s1 + $0xa4] sm:$0xf]  ;;  %v1012_v3 = vld [vmem:[%s1820_s1 + $0xa8] sm:$0xf0]  ;;  %v1104_v5 = vld [vmem:[%s1820_s1 + $0x4] sm:$0xf0]  ;;  %v951_v15 = vor.u32 %v1107_v63, %v948_v1 }
  0x21   : > { %1072 = vmatmul.msk.bf16.vlgmr.msra.gmra.mxu2 %vm493_vm0, %v1484_v45  ;;  %v894_v7 = vld [vmem:[%s1467_s6] sm:$0xf]  ;;  %v1095_v8 = vld [vmem:[%s1467_s6 + $0x8] sm:$0xf0]  ;;  %v1050_v9 = vld [vmem:[%s1820_s1 + $0xf0] sm:$0xf]  ;;  %v1015_v16 = vor.u32 %v1123_v2, %v1012_v3  ;;  %v931_v17 = vor.u32 %v1104_v5, %v930_v4  ;;  %v1563_v22 = vpack.c.b16 %v292_v6, %v292_v6 }
  0x22   : > { %v1134_v10 = vld [vmem:[%s1820_s1 + $0xf4] sm:$0xf0]  ;;  %v1137_v11 = vld [vmem:[%s1820_s1 + $0x114] sm:$0xf]  ;;  %v1068_v12 = vld [vmem:[%s1820_s1 + $0x118] sm:$0xf0]  ;;  %v895_v30 = vor.u32 %v1095_v8, %v894_v7 }
  0x23   : > { %510 = vmatpush.bf16.msra.mxu0 %v955_v44  ;;  %1147 = vmatpush.bf16.msra.mxu1 %v955_v44  ;;  %v914_v13 = vld [vmem:[%s1467_s6 + $0x20] sm:$0xf]  ;;  %v1099_v14 = vld [vmem:[%s1467_s6 + $0x28] sm:$0xf0]  ;;  %v918_v18 = vld [vmem:[%s1467_s6 + $0x30] sm:$0xf]  ;;  %v1051_v21 = vor.u32 %v1134_v10, %v1050_v9  ;;  %v1071_v26 = vor.u32 %v1137_v11, %v1068_v12 }
  0x24   : > { %592 = vmatpush.bf16.msrb.mxu3 %v975_v41  ;;  %620 = vmatpush.bf16.msrb.mxu2 %v1039_v42  ;;  %v1101_v19 = vld [vmem:[%s1467_s6 + $0x38] sm:$0xf0]  ;;  %v1105_v20 = vld [vmem:[%s1820_s1 + $0x14] sm:$0xf]  ;;  %v1574_v27 = vor.u32 %v1099_v14, %v914_v13  ;;  %v1042_v28 = vld [vmem:[%s1820_s1 + $0xe0] sm:$0xf] }
  0x25   : > { %v940_v23 = vld [vmem:[%s1820_s1 + $0x18] sm:$0xf0]  ;;  %v1121_v24 = vld [vmem:[%s1820_s1 + $0x94] sm:$0xf]  ;;  %v1132_v29 = vld [vmem:[%s1820_s1 + $0xe4] sm:$0xf0]  ;;  %v1582_v31 = vor.u32 %v1101_v19, %v918_v18 }
  0x26   : > { %v1004_v25 = vld [vmem:[%s1820_s1 + $0x98] sm:$0xf0]  ;;  %v1135_v32 = vld [vmem:[%s1820_s1 + $0x104] sm:$0xf]  ;;  %v1060_v33 = vld [vmem:[%s1820_s1 + $0x108] sm:$0xf0]  ;;  %v943_v34 = vor.u32 %v1105_v20, %v940_v23  ;;  %v1043_v37 = vor.u32 %v1132_v29, %v1042_v28 }
  0x27   : > { %511 = vmatpush.bf16.msra.mxu0 %v947_v54  ;;  %1148 = vmatpush.bf16.msra.mxu1 %v947_v54  ;;  %v1007_v35 = vor.u32 %v1121_v24, %v1004_v25  ;;  %v1103_v36 = vld [vmem:[%s1820_s1 + $0x4] sm:$0xf]  ;;  %v932_v38 = vld [vmem:[%s1820_s1 + $0x8] sm:$0xf0]  ;;  %v1034_v42 = vld [vmem:[%s1820_s1 + $0xd0] sm:$0xf]  ;;  %v1063_v44 = vor.u32 %v1135_v32, %v1060_v33 }
  0x28   : > { %593 = vmatpush.bf16.msrb.mxu3 %v967_v51  ;;  %621 = vmatpush.bf16.msrb.mxu2 %v1031_v52  ;;  %v1119_v40 = vld [vmem:[%s1820_s1 + $0x84] sm:$0xf]  ;;  %v996_v41 = vld [vmem:[%s1820_s1 + $0x88] sm:$0xf0]  ;;  %v1130_v43 = vld [vmem:[%s1820_s1 + $0xd4] sm:$0xf0]  ;;  %v935_v46 = vor.u32 %v1103_v36, %v932_v38 }
  0x29   : > { %v999_v47 = vor.u32 %v1119_v40, %v996_v41  ;;  %v1035_v48 = vor.u32 %v1130_v43, %v1034_v42  ;;  %v1026_v49 = vld [vmem:[%s1820_s1 + $0xc0] sm:$0xf]  ;;  %v1128_v50 = vld [vmem:[%s1820_s1 + $0xc4] sm:$0xf0]  ;;  %v1018_v53 = vld [vmem:[%s1820_s1 + $0xb0] sm:$0xf] }
  0x2a   : > { %v214_v51 = vld [vmem:[%s1467_s6 + $0x48] sm:$0xff]  ;;  %v1027_v52 = vor.u32 %v1128_v50, %v1026_v49  ;;  %v1126_v54 = vld [vmem:[%s1820_s1 + $0xb4] sm:$0xf0]  ;;  %v1094_v56 = vld [vmem:[%s1467_s6 + $0x4] sm:$0xf]  ;;  %s1153_s10 = smul.u32 112, %s175_s9 }
  0x2b   : > { %512 = vmatpush.bf16.msra.mxu0 %v939_v0  ;;  %1149 = vmatpush.bf16.msra.mxu1 %v939_v0  ;;  %v290_v55 = vunpack.c.l.b16 %v214_v51  ;;  %v896_v57 = vld [vmem:[%s1467_s6 + $0xc] sm:$0xf0]  ;;  %v906_v58 = vld [vmem:[%s1467_s6 + $0x18] sm:$0xf]  ;;  %v1098_v59 = vld [vmem:[%s1467_s6 + $0x20] sm:$0xf0]  ;;  %v1019_v60 = vor.u32 %v1126_v54, %v1018_v53 }
  0x2c   : > { %594 = vmatpush.bf16.msrb.mxu3 %v959_v61  ;;  %622 = vmatpush.bf16.msrb.mxu2 %v1023_v62  ;;  %v899_v61 = vor.u32 %v1094_v56, %v896_v57  ;;  %v1010_v62 = vld [vmem:[%s1820_s1 + $0xa0] sm:$0xf]  ;;  %v1124_v63 = vld [vmem:[%s1820_s1 + $0xa4] sm:$0xf0]  ;;  %v907_v0 = vor.u32 %v1098_v59, %v906_v58  ;;  %v1002_v3 = vld [vmem:[%s1820_s1 + $0x90] sm:$0xf] }
  0x2d   : > { %v302_v1 = vpack.c.b16 %v290_v55, %v290_v55  ;;  %v1011_v2 = vor.u32 %v1124_v63, %v1010_v62  ;;  %v1122_v4 = vld [vmem:[%s1820_s1 + $0x94] sm:$0xf0]  ;;  %v994_v6 = vld [vmem:[%s1820_s1 + $0x80] sm:$0xf]  ;;  %v1120_v7 = vld [vmem:[%s1820_s1 + $0x84] sm:$0xf0] }
  0x2e   : > { %1075 = vmatmul.msk.bf16.gmra.mxu3 %vm493_vm0, %v1563_v22  ;;  %v1003_v5 = vor.u32 %v1122_v4, %v1002_v3  ;;  %v995_v8 = vor.u32 %v1120_v7, %v994_v6  ;;  %v1097_v9 = vld [vmem:[%s1467_s6 + $0x1c] sm:$0xf]  ;;  %v908_v10 = vld [vmem:[%s1467_s6 + $0x24] sm:$0xf0]  ;;  %v1100_v12 = vld [vmem:[%s1467_s6 + $0x34] sm:$0xf] }
  0x2f   : > { %513 = vmatpush.bf16.msra.mxu0 %v931_v17  ;;  %1150 = vmatpush.bf16.msra.mxu1 %v931_v17  ;;  %v911_v11 = vor.u32 %v1097_v9, %v908_v10  ;;  %v920_v13 = vld [vmem:[%s1467_s6 + $0x3c] sm:$0xf0]  ;;  %s1686_s11 = scalar_lea.vmem [#allocation2], %s1153_s10   ;;  %s1142_s14 = smul.u32 (%p1383_p4), 112, %s1371_s15 }
  0x30   : > { %595 = vmatpush.bf16.msrb.mxu3 %v951_v15  ;;  %623 = vmatpush.bf16.msrb.mxu2 %v1015_v16  ;;  %v923_v14 = vor.u32 %v1100_v12, %v920_v13  ;;  %v291_v15 = vunpack.c.h.b16 %v214_v51  ;;  %v252_v29 = vld [vmem:[%s1821_s2] sm:$0x3]  ;;  %p711_p8 = scmp.lt.s32.totalorder (%p1383_p4), %s710_s12, 7 }
  0x31   : > { %1073 = vmatmul.msk.bf16.gmra.mxu2 %vm493_vm0, %v1574_v27  ;;  %v1681_v36 = vperm.slane %v252_v29, 0  ;;  %s1727_s22 = scalar_lea.vmem (%p1383_p4), %s1822_s3, %s1142_s14  }
  0x32   : > { %514 = vmatmul.bf16.vlgmr.msra.gmra.mxu0 %v895_v30  ;;  %524 = vmatmul.bf16.vlgmr.msra.gmra.mxu1 %v1582_v31  ;;  %v303_v16 = vpack.c.b16 %v291_v15, %v291_v15 }
  0x33   : > { %534 = vmatpush.bf16.msrb.mxu1 %v1051_v21  ;;  %652 = vmatpush.bf16.msrb.mxu0 %v1071_v26 }
  0x34   : > { %596 = vmatpush.bf16.msrb.mxu3 %v943_v34  ;;  %624 = vmatpush.bf16.msrb.mxu2 %v1007_v35 }
  0x37   : > { %535 = vmatpush.bf16.msrb.mxu1 %v1043_v37  ;;  %653 = vmatpush.bf16.msrb.mxu0 %v1063_v44 }
  0x38   : > { %597 = vmatpush.bf16.msrb.mxu3 %v935_v46  ;;  %625 = vmatpush.bf16.msrb.mxu2 %v999_v47 }
  0x3b   : > { %536 = vmatpush.bf16.msrb.mxu1 %v1035_v48 }
  0x3e   : > { %598 = vmatmul.bf16.vlgmr.msrb.gmra.mxu3 %v895_v30 }
  0x3f   : > { %537 = vmatpush.bf16.msrb.mxu1 %v1027_v52 }
  0x41   : > { %626 = vmatmul.bf16.vlgmr.msrb.gmra.mxu2 %v899_v61 }
  0x42   : > { %519 = vmatmul.bf16.gmra.mxu0 %v907_v0  ;;  %529 = vmatmul.bf16.gmra.mxu1 %v302_v1 }
  0x43   : > { %538 = vmatpush.bf16.msrb.mxu1 %v1019_v60 }
  0x47   : > { %539 = vmatpush.bf16.msrb.mxu1 %v1011_v2 }
  0x4b   : > { %540 = vmatpush.bf16.msrb.mxu1 %v1003_v5 }
  0x4e   : > { %603 = vmatmul.bf16.gmra.mxu3 %v907_v0 }
  0x4f   : > { %541 = vmatpush.bf16.msrb.mxu1 %v995_v8 }
  0x51   : > { %631 = vmatmul.bf16.gmra.mxu2 %v911_v11 }
  0x52   : > { %542 = vmatmul.bf16.vlgmr.msrb.gmra.mxu1 %v899_v61  ;;  %1076 = vmatmul.msk.bf16.vlgmr.msrb.gmra.mxu0 %vm493_vm0, %v1484_v45 }
  0x5e   : > { %608 = vmatmul.bf16.gmra.mxu3 %v1582_v31  ;;  %v1678_v31 = vperm.slane %v252_v29, 1 }
  0x61   : > { %636 = vmatmul.bf16.gmra.mxu2 %v923_v14 }
  0x62   : > { %547 = vmatmul.bf16.gmra.mxu1 %v911_v11  ;;  %1077 = vmatmul.msk.bf16.gmra.mxu0 %vm493_vm0, %v1574_v27 }
  0x6e   : > { %613 = vmatmul.bf16.gmra.mxu3 %v302_v1 }
  0x71   : > { %641 = vmatmul.bf16.gmra.mxu2 %v303_v16 }
  0x72   : > { %552 = vmatmul.bf16.gmra.mxu1 %v923_v14  ;;  %1078 = vmatmul.msk.bf16.gmra.mxu0 %vm493_vm0, %v1478_v39 }
  0x82   : > { %557 = vmatmul.bf16.gmra.mxu1 %v303_v16  ;;  %1079 = vmatmul.msk.bf16.gmra.mxu0 %vm493_vm0, %v1563_v22 }
  0xa1   : > { %v1661_v45 = vpop.f32.mrf.mxu3 }
  0xa4   : > { %v571_v17 = vpop.f32.mrf.mxu2 }
  0xa9   : > { %v1663_v18 = vpop.f32.mrf.mxu3 }
  0xac   : > { %v573_v19 = vpop.f32.mrf.mxu2 }
  0xaf   : > { %v515_v20 = vpop.f32.mrf.mxu0  ;;  %v1665_v21 = vpop.f32.mrf.mxu1 }
  0xb0   : > { %v516_v41 = vadd.f32 %v515_v20, %v1681_v36 }
  0xb1   : > { %v1667_v23 = vpop.f32.mrf.mxu3 }
  0xb4   : > { %v576_v24 = vpop.f32.mrf.mxu2 }
  0xb7   : > { %v517_v25 = vpop.f32.mrf.mxu0  ;;  %v1669_v26 = vpop.f32.mrf.mxu1 }
  0xb8   : > { %v518_v53 = vadd.f32 %v517_v25, %v1681_v36 }
  0xb9   : > { %v588_v39 = vpop.f32.mrf.mxu3 }
  0xbc   : > { %v1671_v27 = vpop.f32.mrf.mxu2 }
  0xbf   : > { %v520_v22 = vpop.f32.mrf.mxu0  ;;  %v1673_v28 = vpop.f32.mrf.mxu1 }
  0xc0   : > { %v521_v2 = vadd.f32 %v520_v22, %v1681_v36 }
  0xc1   : > { %v599_v30 = vpop.f32.mrf.mxu3 }
  0xc2   : > { %v600_v35 = vadd.f32 %v599_v30, %v1678_v31 }
  0xc4   : > { %v627_v32 = vpop.f32.mrf.mxu2 }
  0xc5   : > { %v628_v38 = vadd.f32 %v627_v32, %v600_v35  ;;  %v526_v32 = vadd.f32 %v1665_v21, %v1681_v36 }
  0xc7   : > { %v522_v33 = vpop.f32.mrf.mxu0  ;;  %v532_v34 = vpop.f32.mrf.mxu1 }
  0xc8   : > { %v523_v13 = vadd.f32 %v522_v33, %v1681_v36 }
  0xc9   : > { %v601_v37 = vpop.f32.mrf.mxu3 }
  0xca   : > { %v602_v47 = vadd.f32 %v601_v37, %v1678_v31 }
  0xcc   : > { %v629_v40 = vpop.f32.mrf.mxu2 }
  0xcd   : > { %v630_v54 = vadd.f32 %v629_v40, %v602_v47 }
  0xcf   : > { %v543_v42 = vpop.f32.mrf.mxu1  ;;  %v655_v43 = vpop.f32.mrf.mxu0 }
  0xd0   : > { %v544_v44 = vadd.f32 %v543_v42, %v516_v41  ;;  %v656_v46 = vadd.f32 %v655_v43, %v628_v38 }
  0xd1   : > { %v604_v50 = vpop.f32.mrf.mxu3 }
  0xd2   : > { %v572_v48 = vadd.f32 %v571_v17, %v544_v44  ;;  %v675_v49 = vmax.f32 %v656_v46, 0.0  ;;  %v605_v57 = vadd.f32 %v604_v50, %v1678_v31  ;;  %v528_v44 = vadd.f32 %v1669_v26, %v1681_v36 }
  0xd3   : > { %v531_v26 = vadd.f32 %v1673_v28, %v1681_v36 }
  0xd4   : > { %v674_v51 = vmax.f32 %v572_v48, 0.0  ;;  %689 = vst [vmem:[%s1686_s11 + $0x8] sm:$0xff] %v675_v49  ;;  %v632_v52 = vpop.f32.mrf.mxu2 }
  0xd5   : > { %v633_v0 = vadd.f32 %v632_v52, %v605_v57 }
  0xd6   : > { %688 = vst [vmem:[%s1686_s11] sm:$0xff] %v674_v51 }
  0xd7   : > { %v545_v55 = vpop.f32.mrf.mxu1  ;;  %v657_v56 = vpop.f32.mrf.mxu0 }
  0xd8   : > { %v546_v58 = vadd.f32 %v545_v55, %v518_v53  ;;  %v658_v59 = vadd.f32 %v657_v56, %v630_v54 }
  0xd9   : > { %v606_v62 = vpop.f32.mrf.mxu3 }
  0xda   : > { %v574_v60 = vadd.f32 %v573_v19, %v546_v58  ;;  %v677_v61 = vmax.f32 %v658_v59, 0.0  ;;  %v607_v7 = vadd.f32 %v606_v62, %v1678_v31 }
  0xdc   : > { %v676_v63 = vmax.f32 %v574_v60, 0.0  ;;  %691 = vst [vmem:[%s1686_s11 + $0x18] sm:$0xff] %v677_v61  ;;  %v634_v1 = vpop.f32.mrf.mxu2 }
  0xdd   : > { %v635_v14 = vadd.f32 %v634_v1, %v607_v7 }
  0xde   : > { %690 = vst [vmem:[%s1686_s11 + $0x10] sm:$0xff] %v676_v63 }
  0xdf   : > { %v548_v3 = vpop.f32.mrf.mxu1  ;;  %v660_v4 = vpop.f32.mrf.mxu0 }
  0xe0   : > { %v549_v5 = vadd.f32 %v548_v3, %v521_v2  ;;  %v661_v6 = vadd.f32 %v660_v4, %v633_v0 }
  0xe1   : > { %v609_v10 = vpop.f32.mrf.mxu3 }
  0xe2   : > { %v577_v8 = vadd.f32 %v576_v24, %v549_v5  ;;  %v679_v9 = vmax.f32 %v661_v6, 0.0  ;;  %v610_v17 = vadd.f32 %v609_v10, %v1678_v31 }
  0xe4   : > { %v678_v11 = vmax.f32 %v577_v8, 0.0  ;;  %693 = vst [vmem:[%s1686_s11 + $0x28] sm:$0xff] %v679_v9  ;;  %v637_v12 = vpop.f32.mrf.mxu2 }
  0xe5   : > { %v638_v29 = vadd.f32 %v637_v12, %v610_v17 }
  0xe6   : > { %692 = vst [vmem:[%s1686_s11 + $0x20] sm:$0xff] %v678_v11 }
  0xe7   : > { %v550_v15 = vpop.f32.mrf.mxu1  ;;  %v662_v16 = vpop.f32.mrf.mxu0 }
  0xe8   : > { %v551_v19 = vadd.f32 %v550_v15, %v523_v13  ;;  %v663_v20 = vadd.f32 %v662_v16, %v635_v14 }
  0xe9   : > { %v611_v39 = vpop.f32.mrf.mxu3 }
  0xea   : > { %v579_v25 = vadd.f32 %v1671_v27, %v551_v19  ;;  %v681_v24 = vmax.f32 %v663_v20, 0.0  ;;  %v612_v38 = vadd.f32 %v611_v39, %v1678_v31 }
  0xec   : > { %v680_v22 = vmax.f32 %v579_v25, 0.0  ;;  %695 = vst [vmem:[%s1686_s11 + $0x38] sm:$0xff] %v681_v24  ;;  %v639_v30 = vpop.f32.mrf.mxu2 }
  0xed   : > { %v640_v21 = vadd.f32 %v639_v30, %v612_v38 }
  0xee   : > { %694 = vst [vmem:[%s1686_s11 + $0x30] sm:$0xff] %v680_v22 }
  0xef   : > { %v553_v33 = vpop.f32.mrf.mxu1  ;;  %v665_v34 = vpop.f32.mrf.mxu0 }
  0xf0   : > { %v554_v35 = vadd.f32 %v553_v33, %v526_v32  ;;  %v666_v37 = vadd.f32 %v665_v34, %v638_v29 }
  0xf1   : > { %v614_v41 = vpop.f32.mrf.mxu3 }
  0xf2   : > { %v582_v27 = vadd.f32 %v1661_v45, %v554_v35  ;;  %v683_v40 = vmax.f32 %v666_v37, 0.0  ;;  %v615_v48 = vadd.f32 %v614_v41, %v1678_v31 }
  0xf4   : > { %v682_v42 = vmax.f32 %v582_v27, 0.0  ;;  %697 = vst [vmem:[%s1686_s11 + $0x48] sm:$0xff] %v683_v40  ;;  %v642_v43 = vpop.f32.mrf.mxu2 }
  0xf5   : > { %v643_v54 = vadd.f32 %v642_v43, %v615_v48 }
  0xf6   : > { %696 = vst [vmem:[%s1686_s11 + $0x40] sm:$0xff] %v682_v42 }
  0xf7   : > { %v555_v46 = vpop.f32.mrf.mxu1  ;;  %v667_v47 = vpop.f32.mrf.mxu0 }
  0xf8   : > { %v556_v49 = vadd.f32 %v555_v46, %v528_v44  ;;  %v668_v50 = vadd.f32 %v667_v47, %v640_v21 }
  0xf9   : > { %v616_v52 = vpop.f32.mrf.mxu3 }
  0xfa   : > { %v584_v45 = vadd.f32 %v1663_v18, %v556_v49  ;;  %v685_v51 = vmax.f32 %v668_v50, 0.0 }
  0xfc   : > { %v684_v53 = vmax.f32 %v584_v45, 0.0  ;;  %699 = vst [vmem:[%s1686_s11 + $0x58] sm:$0xff] %v685_v51  ;;  %v644_v55 = vpop.f32.mrf.mxu2 }
  0xfe   : > { %698 = vst [vmem:[%s1686_s11 + $0x50] sm:$0xff] %v684_v53 }
  0xff   : > { %v558_v56 = vpop.f32.mrf.mxu1  ;;  %v670_v57 = vpop.f32.mrf.mxu0 }
 0x100   : > { %v559_v58 = vadd.f32 %v558_v56, %v531_v26  ;;  %v671_v31 = vadd.f32 %v670_v57, %v643_v54 }
 0x102   : > { %v587_v59 = vadd.f32 %v1667_v23, %v559_v58  ;;  %v687_v60 = vmax.f32 %v671_v31, 0.0 }
 0x103   : > { %708 = sbr.rel (!%p1383_p4) target bundleno = 325 (0x145), region = 36 }
 0x104   : > { %v686_v18 = vmax.f32 %v587_v59, 0.0  ;;  %701 = vst [vmem:[%s1686_s11 + $0x68] sm:$0xff] %v687_v60 }
 0x106   : > { %700 = vst [vmem:[%s1686_s11 + $0x60] sm:$0xff] %v686_v18 }
 0x107   : > { %v560_v61 = vpop.f32.mrf.mxu1  ;;  %v672_v62 = vpop.f32.mrf.mxu0 }
 0x108   : > { %s1833_s12 = smov (!%p711_p8, %s710_s12), 7 }
 0x109   : > { %s1139_s23 = sshll.u32 %s1833_s12, 4 }
 0x10a   : > { %p1085_p9 = scmp.eq.s32.totalorder %s1139_s23, 0 }
 0x10b   : > { %1244 = sdivrem.u32 (!%p1085_p9), %s1833_s12, 7 }
 0x10c   : > { %721 = sbr.rel (%p1085_p9) target bundleno = 325 (0x145), region = 40 }
 0x114   : > { %s1733_s20 = spop.drf %1244 }
 0x115   : > { %s1246_s24 = spop.drf %1244  ;;  %p1086_p10 = scmp.le.s32.totalorder %s1733_s20, 0 }
 0x116   : > { %s1824_s15 = smov (!%p1086_p10), %s1727_s22  ;;  %s1825_s18 = smov (!%p1086_p10), %s1686_s11 }
 0x117   : > { %843 = sbr.rel (%p1086_p10) target bundleno = 299 (0x12b), region = 88  ;;  %s1742_s25 = smov (!%p1086_p10), 0  }
 0x118   : > { %s1744_s26 = smov (!%p1086_p10), 0  }
 0x11c LB: >> { %v735_v23 = vld [vmem:[%s1312_s18] sm:$0xff]  ;;  %v737_v28 = vld [vmem:[%s1312_s18 + $0x10] sm:$0xff]  ;;  %s763_s27 = sadd.s32 1, %s1316_s25  ;;  %v749_v3 = vld [vmem:[%s1312_s18 + $0x8] sm:$0xff]  ;;  %s729_s26 = sadd.s32 1, %s1320_s26   ;;  %s1320_s26 = sphi %s1744_s26, %s729_s26   ;;  %s1316_s25 = sphi %s1742_s25, %s1828_s25   ;;  %s1312_s18 = sphi %s1825_s18, %s1827_s18   ;;  %s1308_s15 = sphi %s1824_s15, %s1826_s15  }
 0x11d   : >> { %v739_v36 = vld [vmem:[%s1312_s18 + $0x20] sm:$0xff]  ;;  %736 = vst [vmem:[%s1308_s15] sm:$0xff] %v735_v23  ;;  %v741_v63 = vld [vmem:[%s1312_s18 + $0x30] sm:$0xff]  ;;  %p764_p11 = scmp.ge.s32.totalorder %s763_s27, %s1733_s20  ;;  %v751_v4 = vld [vmem:[%s1312_s18 + $0x18] sm:$0xff]  ;;  %p728_p12 = scmp.ge.s32.totalorder %s729_s26, %s1733_s20 }
 0x11e   : >> { %738 = vst [vmem:[%s1308_s15 + $0x10] sm:$0xff] %v737_v28  ;;  %v743_v0 = vld [vmem:[%s1312_s18 + $0x40] sm:$0xff]  ;;  %v745_v1 = vld [vmem:[%s1312_s18 + $0x50] sm:$0xff]  ;;  %v753_v5 = vld [vmem:[%s1312_s18 + $0x28] sm:$0xff] }
 0x11f   : >> { %740 = vst [vmem:[%s1308_s15 + $0x20] sm:$0xff] %v739_v36  ;;  %s1835_s27 = smov (%p764_p11, %s763_s27), 0  ;;  %v747_v2 = vld [vmem:[%s1312_s18 + $0x60] sm:$0xff]  ;;  %v755_v6 = vld [vmem:[%s1312_s18 + $0x38] sm:$0xff]  ;;  %v757_v7 = vld [vmem:[%s1312_s18 + $0x48] sm:$0xff] }
 0x120   : >> { %742 = vst [vmem:[%s1308_s15 + $0x30] sm:$0xff] %v741_v63  ;;  %s766_s28 = smul.u32 112, %s1835_s27  ;;  %v759_v8 = vld [vmem:[%s1312_s18 + $0x58] sm:$0xff]  ;;  %v761_v9 = vld [vmem:[%s1312_s18 + $0x68] sm:$0xff]  ;;  %s1828_s25 = smov %s1835_s27 }
 0x121   : >> { %744 = vst [vmem:[%s1308_s15 + $0x40] sm:$0xff] %v743_v0 }
 0x122   : >> { %746 = vst [vmem:[%s1308_s15 + $0x50] sm:$0xff] %v745_v1  ;;  %s768_s29 = scalar_lea.vmem %s1686_s11, %s766_s28 [#allocation2]   ;;  %s769_s30 = scalar_lea.vmem %s1727_s22, %s766_s28  }
 0x123   : >> { %748 = vst [vmem:[%s1308_s15 + $0x60] sm:$0xff] %v747_v2  ;;  %s1827_s18 = smov %s768_s29 }
 0x124   : >> { %750 = vst [vmem:[%s1308_s15 + $0x8] sm:$0xff] %v749_v3 }
 0x125   : >> { %752 = vst [vmem:[%s1308_s15 + $0x18] sm:$0xff] %v751_v4 }
 0x126   : >> { %754 = vst [vmem:[%s1308_s15 + $0x28] sm:$0xff] %v753_v5  ;;  %731 = sbr.rel (!%p728_p12) target bundleno = 284 (0x11c), region = 94 }
 0x127   : >> { %756 = vst [vmem:[%s1308_s15 + $0x38] sm:$0xff] %v755_v6 }
 0x128   : >> { %758 = vst [vmem:[%s1308_s15 + $0x48] sm:$0xff] %v757_v7 }
 0x129   : >> { %760 = vst [vmem:[%s1308_s15 + $0x58] sm:$0xff] %v759_v8 }
 0x12a   : >> { %762 = vst [vmem:[%s1308_s15 + $0x68] sm:$0xff] %v761_v9  ;;  %s1826_s15 = smov %s769_s30 }
 0x12b PF: > { %1247 = sdivrem.u32 %s1833_s12, 7 }
 0x12c   : > { %s1087_s4 = smul.u32 112, %s1733_s20 }
 0x12e   : > { %s1800_s5 = scalar_lea.vmem %s1686_s11, %s1087_s4 [#allocation2]   ;;  %s1803_s7 = scalar_lea.vmem %s1727_s22, %s1087_s4  }
 0x134   : > { %s1248_s6 = spop.drf %1247 }
 0x135   : > { %s1249_s8 = spop.drf %1247 }
 0x136   : > { %p1089_p13 = scmp.le.s32.totalorder %s1249_s8, 0 }
 0x137   : > { %s1322_s9 = smov (!%p1089_p13), %s1803_s7   ;;  %s1326_s10 = smov (!%p1089_p13), %s1800_s5  }
 0x138   : > { %857 = sbr.rel (%p1089_p13) target bundleno = 325 (0x145), region = 99  ;;  %s1330_s14 = smov (!%p1089_p13), 0  }
 0x139   : > { %s1334_s17 = smov (!%p1089_p13), 0  }
 0x13d LB: >> { %v786_v10 = vld [vmem:[%s1328_s10] sm:$0xff]  ;;  %v788_v11 = vld [vmem:[%s1328_s10 + $0x8] sm:$0xff]  ;;  %s790_s11 = sadd.s32 1, %s1332_s14  ;;  %s780_s17 = sadd.s32 1, %s1336_s17   ;;  %s1336_s17 = sphi %s1334_s17, %s780_s17   ;;  %s1332_s14 = sphi %s1330_s14, %s1331_s14   ;;  %s1328_s10 = sphi %s1326_s10, %s795_s10   ;;  %s1324_s9 = sphi %s1322_s9, %s796_s9  }
 0x13e   : >> { %787 = vst [vmem:[%s1324_s9] sm:$0xff] %v786_v10  ;;  %p791_p0 = scmp.ge.s32.totalorder %s790_s11, %s1249_s8  ;;  %p779_p1 = scmp.ge.s32.totalorder %s780_s17, %s1249_s8 }
 0x13f   : >> { %789 = vst [vmem:[%s1324_s9 + $0x8] sm:$0xff] %v788_v11 }
 0x140   : >> { %s1837_s11 = smov (%p791_p0, %s790_s11), 0  ;;  %782 = sbr.rel (!%p779_p1) target bundleno = 317 (0x13d), region = 105 }
 0x141   : >> { %s1090_s12 = sshll.u32 %s1837_s11, 4  ;;  %s1331_s14 = smov %s1837_s11  }
 0x142   : >> { %s795_s10 = scalar_lea.vmem %s1800_s5, %s1090_s12 [#allocation2]   ;;  %s796_s9 = scalar_lea.vmem %s1803_s7, %s1090_s12  }
 0x145 PF: > { %p10_p2 = scmp.ge.s32.totalorder %s1373_s16, 4   ;;  %s1829_s12 = smov %s1300_s13 }
 0x146   : > { %s1830_s13 = smov %s1381_s19  ;;  %s1831_s14 = smov %s1373_s16 }
 0x147   :  { %12 = sbr.rel (!%p10_p2) target bundleno = 2 (0x2), region = 116 }

// kernel: squeezenet_forward.29
= control target key start
LH: loop header
LB: loop body
LE: loop exit
PB: predicated region body
PF: predicated region fallthrough
CT: control target
= control target key end

     0   :  { %s1040_s12 = smov 0   ;;  %s1042_s13 = smov 0   ;;  %s1220_s0 = inlined_call_operand.vmem [shape: bf16[98,256], index: 0, kind: input, shape index: {}]   ;;  %s1221_s1 = inlined_call_operand.vmem [shape: bf16[256,32], index: 1, kind: input, shape index: {}]   ;;  %s1222_s2 = inlined_call_operand.vmem [shape: f32[1,32], index: 2, kind: input, shape index: {}]   ;;  %s1223_s3 = inlined_call_operand.vmem [shape: f32[98,32], index: 3, kind: output, shape index: {}]  }
   0x1   :  { %s1044_s14 = smov 0  }
   0x2 LB: > { %s1053_s15 = sadd.s32 4294967295, %s986_s14   ;;  %s1055_s16 = sadd.s32 1, %s986_s14   ;;  %s986_s14 = sphi %s1044_s14, %s1230_s14   ;;  %s982_s13 = sphi %s1042_s13, %s1229_s13   ;;  %s978_s12 = sphi %s1040_s12, %s1228_s12  }
   0x3   : > { %s85_s17 = ssub.s32 %s986_s14, %s1055_s16  ;;  %s88_s18 = sadd.s32 1, %s982_s13 }
   0x4   : > { %p86_p0 = scmp.eq.s32.totalorder %s85_s17, 0  ;;  %p98_p1 = scmp.ne.s32.totalorder %s982_s13, %s978_s12 }
   0x5   : > { %p99_p2 = scmp.eq.s32.totalorder %s1053_s15, 1  ;;  %p692_p3 = scmp.ge.s32.totalorder %s986_s14, 1 }
   0x6   : > { %s1063_s19 = scalar_select %p86_p0, %s982_s13, %s88_s18  }
   0x7   : > { %p1065_p4 = por %p99_p2, %p98_p1  ;;  %p149_p5 = scmp.lt.s32.totalorder %s986_s14, 3 }
   0x9   : > { %p150_p6 = pnand %p692_p3, %p149_p5 }
   0xa   : > { %s1088_s6 = smul.u32 (!%p150_p6), 7, %s1053_s15  ;;  %s175_s18 = sand.u32 (!%p150_p6), 1, %s978_s12  }
   0xb   : > { %153 = sbr.rel (%p150_p6) target bundleno = 259 (0x103), region = 32 }
   0xc   : > { %p184_p7 = scmp.lt.s32.totalorder (!%p150_p6), %s1088_s6, 12 }
  0x10   : > { %v809_v0 = vld [vmem:[%s1221_s1 + $0x38] sm:$0xff]  ;;  %v808_v2 = vld [vmem:[%s1221_s1 + $0x30] sm:$0xff]  ;;  %v807_v4 = vld [vmem:[%s1221_s1 + $0x28] sm:$0xff]  ;;  %s185_s21 = scalar_select %p184_p7, %s1088_s6, 12  ;;  %vm439_vm0 = vcmask 261120  }
  0x11   : > { %v817_v1 = vld [vmem:[%s1221_s1 + $0x78] sm:$0xff]  ;;  %376 = vmatpush.bf16.msra.mxu0 %v809_v0  ;;  %819 = vmatpush.bf16.msra.mxu2 %v809_v0  ;;  %v816_v3 = vld [vmem:[%s1221_s1 + $0x70] sm:$0xff]  ;;  %v815_v5 = vld [vmem:[%s1221_s1 + $0x68] sm:$0xff]  ;;  %s455_s12 = ssub.s32 (%p1065_p4), 13, %s1088_s6  ;;  %s818_s23 = smul.u32 (%p1065_p4), 56, %s1053_s15 }
  0x12   : > { %404 = vmatpush.bf16.msra.mxu1 %v817_v1  ;;  %827 = vmatpush.bf16.msra.mxu3 %v817_v1  ;;  %v806_v6 = vld [vmem:[%s1221_s1 + $0x20] sm:$0xff]  ;;  %v805_v8 = vld [vmem:[%s1221_s1 + $0x18] sm:$0xff]  ;;  %v804_v10 = vld [vmem:[%s1221_s1 + $0x10] sm:$0xff]  ;;  %s795_s26 = sshll.u32 %s185_s21, 3  ;;  %s835_s21 = smul.u32 56, %s175_s18 }
  0x13   : > { %v814_v7 = vld [vmem:[%s1221_s1 + $0x60] sm:$0xff]  ;;  %v813_v9 = vld [vmem:[%s1221_s1 + $0x58] sm:$0xff]  ;;  %v812_v11 = vld [vmem:[%s1221_s1 + $0x50] sm:$0xff]  ;;  %s1116_s4 = scalar_lea.vmem %s1220_s0, %s795_s26  ;;  %p456_p8 = scmp.lt.s32.totalorder (%p1065_p4), %s455_s12, 7 }
  0x14   : > { %v803_v12 = vld [vmem:[%s1221_s1 + $0x8] sm:$0xff]  ;;  %v802_v14 = vld [vmem:[%s1221_s1] sm:$0xff]  ;;  %v206_v28 = vld [vmem:[%s1116_s4 + $0x30] sm:$0xff]  ;;  %s1144_s22 = scalar_lea.vmem [#allocation2], %s835_s21   ;;  %s1167_s26 = scalar_lea.vmem (%p1065_p4), %s1223_s3, %s818_s23  }
  0x15   : > { %377 = vmatpush.bf16.msra.mxu0 %v808_v2  ;;  %820 = vmatpush.bf16.msra.mxu2 %v808_v2  ;;  %v811_v13 = vld [vmem:[%s1221_s1 + $0x48] sm:$0xff]  ;;  %v810_v15 = vld [vmem:[%s1221_s1 + $0x40] sm:$0xff]  ;;  %v262_v29 = vunpack.c.l.b16 %v206_v28  ;;  %v705_v30 = vld [vmem:[%s1116_s4 + $0x10] sm:$0xf]  ;;  %v263_v32 = vunpack.c.h.b16 %v206_v28 }
  0x16   : > { %405 = vmatpush.bf16.msra.mxu1 %v816_v3  ;;  %828 = vmatpush.bf16.msra.mxu3 %v816_v3  ;;  %v697_v16 = vld [vmem:[%s1116_s4] sm:$0xf]  ;;  %v797_v17 = vld [vmem:[%s1116_s4 + $0x4] sm:$0xf0]  ;;  %v796_v20 = vld [vmem:[%s1116_s4 + $0x4] sm:$0xf] }
  0x17   : > { %v713_v18 = vld [vmem:[%s1116_s4 + $0x20] sm:$0xf]  ;;  %v801_v19 = vld [vmem:[%s1116_s4 + $0x24] sm:$0xf0]  ;;  %v699_v21 = vld [vmem:[%s1116_s4 + $0x8] sm:$0xf0]  ;;  %v698_v24 = vor.u32 %v797_v17, %v697_v16  ;;  %v270_v36 = vpack.c.b16 %v262_v29, %v262_v29  ;;  %v271_v38 = vpack.c.b16 %v263_v32, %v263_v32 }
  0x18   : > { %v800_v22 = vld [vmem:[%s1116_s4 + $0x24] sm:$0xf]  ;;  %v715_v23 = vld [vmem:[%s1116_s4 + $0x28] sm:$0xf0]  ;;  %v714_v25 = vor.u32 %v801_v19, %v713_v18  ;;  %v702_v26 = vor.u32 %v796_v20, %v699_v21  ;;  %v799_v31 = vld [vmem:[%s1116_s4 + $0x14] sm:$0xf0] }
  0x19   : > { %378 = vmatpush.bf16.msra.mxu0 %v807_v4  ;;  %821 = vmatpush.bf16.msra.mxu2 %v807_v4  ;;  %v718_v27 = vor.u32 %v800_v22, %v715_v23  ;;  %v798_v33 = vld [vmem:[%s1116_s4 + $0x14] sm:$0xf]  ;;  %v707_v34 = vld [vmem:[%s1116_s4 + $0x18] sm:$0xf0]  ;;  %v706_v35 = vor.u32 %v799_v31, %v705_v30  ;;  %v925_v39 = vld [vmem:[%s1222_s2] ss:$0 sm:$0xff] }
  0x1a   : > { %406 = vmatpush.bf16.msra.mxu1 %v815_v5  ;;  %829 = vmatpush.bf16.msra.mxu3 %v815_v5  ;;  %v710_v37 = vor.u32 %v798_v33, %v707_v34 }
  0x1d   : > { %379 = vmatpush.bf16.msra.mxu0 %v806_v6  ;;  %822 = vmatpush.bf16.msra.mxu2 %v806_v6 }
  0x1e   : > { %407 = vmatpush.bf16.msra.mxu1 %v814_v7  ;;  %830 = vmatpush.bf16.msra.mxu3 %v814_v7 }
  0x21   : > { %380 = vmatpush.bf16.msra.mxu0 %v805_v8  ;;  %823 = vmatpush.bf16.msra.mxu2 %v805_v8 }
  0x22   : > { %408 = vmatpush.bf16.msra.mxu1 %v813_v9  ;;  %831 = vmatpush.bf16.msra.mxu3 %v813_v9 }
  0x25   : > { %381 = vmatpush.bf16.msra.mxu0 %v804_v10  ;;  %824 = vmatpush.bf16.msra.mxu2 %v804_v10 }
  0x26   : > { %409 = vmatpush.bf16.msra.mxu1 %v812_v11  ;;  %832 = vmatpush.bf16.msra.mxu3 %v812_v11 }
  0x29   : > { %382 = vmatpush.bf16.msra.mxu0 %v803_v12  ;;  %825 = vmatpush.bf16.msra.mxu2 %v803_v12 }
  0x2a   : > { %410 = vmatpush.bf16.msra.mxu1 %v811_v13  ;;  %833 = vmatpush.bf16.msra.mxu3 %v811_v13 }
  0x2d   : > { %383 = vmatpush.bf16.msra.mxu0 %v802_v14  ;;  %826 = vmatpush.bf16.msra.mxu2 %v802_v14 }
  0x2e   : > { %411 = vmatpush.bf16.msra.mxu1 %v810_v15  ;;  %834 = vmatpush.bf16.msra.mxu3 %v810_v15 }
  0x30   : > { %384 = vmatmul.bf16.vlgmr.msra.gmra.mxu0 %v698_v24  ;;  %394 = vmatmul.bf16.vlgmr.msra.gmra.mxu2 %v714_v25 }
  0x31   : > { %412 = vmatmul.bf16.vlgmr.msra.gmra.mxu1 %v702_v26  ;;  %422 = vmatmul.bf16.vlgmr.msra.gmra.mxu3 %v718_v27 }
  0x40   : > { %389 = vmatmul.bf16.gmra.mxu0 %v706_v35  ;;  %399 = vmatmul.bf16.gmra.mxu2 %v270_v36 }
  0x41   : > { %417 = vmatmul.bf16.gmra.mxu1 %v710_v37  ;;  %427 = vmatmul.bf16.gmra.mxu3 %v271_v38 }
  0xad   : > { %v385_v40 = vpop.f32.mrf.mxu0 }
  0xae   : > { %v386_v41 = vadd.f32 %v925_v39, %v385_v40  ;;  %v413_v42 = vpop.f32.mrf.mxu1 }
  0xb0   : > { %v414_v43 = vadd.f32 %v413_v42, %v386_v41 }
  0xb2   : > { %v432_v44 = vmax.f32 %v414_v43, 0.0 }
  0xb3   : > { %v395_v45 = vpop.f32.mrf.mxu2 }
  0xb4   : > { %440 = vst.msk [vmem:[%s1144_s22] sm:$0xff] %vm439_vm0, %v432_v44  ;;  %v396_v46 = vadd.f32 %v925_v39, %v395_v45  ;;  %v423_v47 = vpop.f32.mrf.mxu3 }
  0xb5   : > { %v387_v48 = vpop.f32.mrf.mxu0 }
  0xb6   : > { %v424_v49 = vadd.f32 %v423_v47, %v396_v46  ;;  %v388_v50 = vadd.f32 %v925_v39, %v387_v48  ;;  %v415_v51 = vpop.f32.mrf.mxu1 }
  0xb8   : > { %v436_v52 = vmax.f32 %v424_v49, 0.0  ;;  %v416_v53 = vadd.f32 %v415_v51, %v388_v50 }
  0xba   : > { %444 = vst.msk [vmem:[%s1144_s22 + $0x20] sm:$0xff] %vm439_vm0, %v436_v52  ;;  %v433_v54 = vmax.f32 %v416_v53, 0.0 }
  0xbb   : > { %v397_v55 = vpop.f32.mrf.mxu2 }
  0xbc   : > { %441 = vst.msk [vmem:[%s1144_s22 + $0x8] sm:$0xff] %vm439_vm0, %v433_v54  ;;  %v398_v56 = vadd.f32 %v925_v39, %v397_v55  ;;  %v425_v57 = vpop.f32.mrf.mxu3 }
  0xbd   : > { %v390_v58 = vpop.f32.mrf.mxu0 }
  0xbe   : > { %v426_v59 = vadd.f32 %v425_v57, %v398_v56  ;;  %v391_v60 = vadd.f32 %v925_v39, %v390_v58  ;;  %v418_v61 = vpop.f32.mrf.mxu1 }
  0xc0   : > { %v437_v62 = vmax.f32 %v426_v59, 0.0  ;;  %v419_v63 = vadd.f32 %v418_v61, %v391_v60 }
  0xc2   : > { %445 = vst.msk [vmem:[%s1144_s22 + $0x28] sm:$0xff] %vm439_vm0, %v437_v62  ;;  %v434_v0 = vmax.f32 %v419_v63, 0.0 }
  0xc3   : > { %v400_v1 = vpop.f32.mrf.mxu2 }
  0xc4   : > { %442 = vst.msk [vmem:[%s1144_s22 + $0x10] sm:$0xff] %vm439_vm0, %v434_v0  ;;  %v401_v2 = vadd.f32 %v925_v39, %v400_v1  ;;  %v428_v3 = vpop.f32.mrf.mxu3 }
  0xc5   : > { %v392_v4 = vpop.f32.mrf.mxu0 }
  0xc6   : > { %v429_v5 = vadd.f32 %v428_v3, %v401_v2  ;;  %v393_v6 = vadd.f32 %v925_v39, %v392_v4  ;;  %v420_v7 = vpop.f32.mrf.mxu1 }
  0xc8   : > { %v438_v8 = vmax.f32 %v429_v5, 0.0  ;;  %v421_v9 = vadd.f32 %v420_v7, %v393_v6  ;;  %453 = sbr.rel (!%p1065_p4) target bundleno = 259 (0x103), region = 36 }
  0xca   : > { %446 = vst.msk [vmem:[%s1144_s22 + $0x30] sm:$0xff] %vm439_vm0, %v438_v8  ;;  %v435_v10 = vmax.f32 %v421_v9, 0.0 }
  0xcb   : > { %v402_v11 = vpop.f32.mrf.mxu2 }
  0xcc   : > { %443 = vst.msk [vmem:[%s1144_s22 + $0x18] sm:$0xff] %vm439_vm0, %v435_v10  ;;  %v430_v12 = vpop.f32.mrf.mxu3 }
  0xcd   : > { %s1232_s12 = smov (!%p456_p8, %s455_s12), 7 }
  0xce   : > { %s783_s27 = sshll.u32 %s1232_s12, 3 }
  0xcf   : > { %p786_p9 = scmp.eq.s32.totalorder %s783_s27, 0 }
  0xd0   : > { %926 = sdivrem.u32 (!%p786_p9), %s1232_s12, 7 }
  0xd1   : > { %464 = sbr.rel (%p786_p9) target bundleno = 259 (0x103), region = 40 }
  0xd9   : > { %s1173_s20 = spop.drf %926 }
  0xda   : > { %s928_s28 = spop.drf %926  ;;  %p787_p10 = scmp.le.s32.totalorder %s1173_s20, 0 }
  0xdb   : > { %s1225_s15 = smov (!%p787_p10), %s1167_s26  ;;  %s1226_s6 = smov (!%p787_p10), %s1144_s22 }
  0xdc   : > { %645 = sbr.rel (%p787_p10) target bundleno = 233 (0xe9), region = 116  ;;  %s1182_s29 = smov (!%p787_p10), 0  }
  0xdd   : > { %s1184_s30 = smov (!%p787_p10), 0  }
  0xe1 LB: >> { %v541_v13 = vld [vmem:[%s994_s6] sm:$0xff]  ;;  %v543_v14 = vld [vmem:[%s994_s6 + $0x8] sm:$0xff]  ;;  %v545_v15 = vld [vmem:[%s994_s6 + $0x10] sm:$0xff]  ;;  %s555_s4 = sadd.s32 1, %s998_s29  ;;  %s535_s30 = sadd.s32 1, %s1002_s30   ;;  %s1002_s30 = sphi %s1184_s30, %s535_s30   ;;  %s998_s29 = sphi %s1182_s29, %s1227_s29   ;;  %s994_s6 = sphi %s1226_s6, %s560_s6   ;;  %s990_s15 = sphi %s1225_s15, %s561_s15  }
  0xe2   : >> { %542 = vst [vmem:[%s990_s15] sm:$0xff] %v541_v13  ;;  %v547_v16 = vld [vmem:[%s994_s6 + $0x18] sm:$0xff]  ;;  %p556_p11 = scmp.ge.s32.totalorder %s555_s4, %s1173_s20  ;;  %v549_v17 = vld [vmem:[%s994_s6 + $0x20] sm:$0xff]  ;;  %v551_v18 = vld [vmem:[%s994_s6 + $0x28] sm:$0xff]  ;;  %p534_p12 = scmp.ge.s32.totalorder %s535_s30, %s1173_s20 }
  0xe3   : >> { %544 = vst [vmem:[%s990_s15 + $0x8] sm:$0xff] %v543_v14  ;;  %v553_v19 = vld [vmem:[%s994_s6 + $0x30] sm:$0xff] }
  0xe4   : >> { %546 = vst [vmem:[%s990_s15 + $0x10] sm:$0xff] %v545_v15  ;;  %s1234_s4 = smov (%p556_p11, %s555_s4), 0  ;;  %537 = sbr.rel (!%p534_p12) target bundleno = 225 (0xe1), region = 122 }
  0xe5   : >> { %548 = vst [vmem:[%s990_s15 + $0x18] sm:$0xff] %v547_v16  ;;  %s558_s5 = smul.u32 56, %s1234_s4  ;;  %s1227_s29 = smov %s1234_s4 }
  0xe6   : >> { %550 = vst [vmem:[%s990_s15 + $0x20] sm:$0xff] %v549_v17 }
  0xe7   : >> { %552 = vst [vmem:[%s990_s15 + $0x28] sm:$0xff] %v551_v18  ;;  %s560_s6 = scalar_lea.vmem %s1144_s22, %s558_s5 [#allocation2]  }
  0xe8   : >> { %554 = vst [vmem:[%s990_s15 + $0x30] sm:$0xff] %v553_v19  ;;  %s561_s15 = scalar_lea.vmem %s1167_s26, %s558_s5  }
  0xe9 PF: > { %929 = sdivrem.u32 %s1232_s12, 7 }
  0xea   : > { %s788_s7 = smul.u32 56, %s1173_s20 }
  0xec   : > { %s1205_s8 = scalar_lea.vmem %s1144_s22, %s788_s7 [#allocation2]   ;;  %s568_s9 = scalar_lea.vmem %s1167_s26, %s788_s7  }
  0xf2   : > { %s930_s10 = spop.drf %929 }
  0xf3   : > { %s931_s11 = spop.drf %929 }
  0xf4   : > { %p790_p13 = scmp.le.s32.totalorder %s931_s11, 0 }
  0xf5   : > { %s1004_s14 = smov (!%p790_p13), %s568_s9   ;;  %s1008_s17 = smov (!%p790_p13), %s1205_s8  }
  0xf6   : > { %659 = sbr.rel (%p790_p13) target bundleno = 259 (0x103), region = 127  ;;  %s1012_s18 = smov (!%p790_p13), 0  }
  0xf7   : > { %s1016_s21 = smov (!%p790_p13), 0  }
  0xfb LB: >> { %v578_v20 = vld [vmem:[%s1010_s17] sm:$0xff]  ;;  %s580_s22 = sadd.s32 1, %s1014_s18  ;;  %s572_s21 = sadd.s32 1, %s1018_s21   ;;  %s1018_s21 = sphi %s1016_s21, %s572_s21   ;;  %s1014_s18 = sphi %s1012_s18, %s1013_s18   ;;  %s1010_s17 = sphi %s1008_s17, %s585_s17   ;;  %s1006_s14 = sphi %s1004_s14, %s586_s14  }
  0xfc   : >> { %579 = vst [vmem:[%s1006_s14] sm:$0xff] %v578_v20  ;;  %p581_p0 = scmp.ge.s32.totalorder %s580_s22, %s931_s11  ;;  %p571_p1 = scmp.ge.s32.totalorder %s572_s21, %s931_s11 }
  0xfe   : >> { %s1236_s22 = smov (%p581_p0, %s580_s22), 0  ;;  %574 = sbr.rel (!%p571_p1) target bundleno = 251 (0xfb), region = 133 }
  0xff   : >> { %s791_s12 = sshll.u32 %s1236_s22, 3  ;;  %s1013_s18 = smov %s1236_s22  }
 0x100   : >> { %s585_s17 = scalar_lea.vmem %s1205_s8, %s791_s12 [#allocation2]   ;;  %s586_s14 = scalar_lea.vmem %s568_s9, %s791_s12  }
 0x103 PF: > { %p10_p2 = scmp.ge.s32.totalorder %s1055_s16, 4   ;;  %s1228_s12 = smov %s982_s13 }
 0x104   : > { %s1229_s13 = smov %s1063_s19  ;;  %s1230_s14 = smov %s1055_s16 }
 0x105   :  { %12 = sbr.rel (!%p10_p2) target bundleno = 2 (0x2), region = 144 }

// kernel: squeezenet_forward.31
= control target key start
LH: loop header
LB: loop body
LE: loop exit
PB: predicated region body
PF: predicated region fallthrough
CT: control target
= control target key end

     0   :  { %s931_s6 = smov 0   ;;  %s933_s7 = smov 0   ;;  %s1294_s0 = inlined_call_operand.vmem [shape: f32[9,18,256], index: 0, kind: input, shape index: {}]   ;;  %s1295_s1 = inlined_call_operand.vmem [shape: f32[18,256], index: 1, kind: output, shape index: {}]  }
   0x1   :  { %s935_s8 = smov 0  }
   0x2 LB: > { %s947_s9 = sadd.s32 4294967295, %s855_s8   ;;  %s950_s10 = sadd.s32 1, %s855_s8   ;;  %s855_s8 = sphi %s935_s8, %s1312_s8   ;;  %s851_s7 = sphi %s933_s7, %s1311_s7   ;;  %s847_s6 = sphi %s931_s6, %s1310_s6  }
   0x3   : > { %s15_s11 = ssub.s32 %s855_s8, %s950_s10  ;;  %s18_s12 = sadd.s32 1, %s851_s7 }
   0x4   : > { %p16_p0 = scmp.eq.s32.totalorder %s15_s11, 0  ;;  %p25_p1 = scmp.ne.s32.totalorder %s851_s7, %s847_s6 }
   0x5   : > { %p26_p2 = scmp.eq.s32.totalorder %s855_s8, 0  ;;  %p55_p3 = scmp.eq.s32.totalorder %s947_s9, 1 }
   0x6   : > { %s960_s13 = scalar_select %p16_p0, %s851_s7, %s18_s12  }
   0x7   : > { %p27_p4 = por %p26_p2, %p25_p1  ;;  %p962_p5 = por %p55_p3, %p25_p1 }
   0x8   : > { %p569_p6 = scmp.ge.s32.totalorder %s855_s8, 2 }
   0xa   : > { %77 = sbr.rel (%p569_p6) target bundleno = 100 (0x64), region = 16 }
   0xf   : > { %80 = sbr.rel (!%p27_p4) target bundleno = 100 (0x64), region = 20  ;;  %s82_s15 = sand.u32 (%p27_p4), 1, %s851_s7  }
  0x10   : > { %s570_s16 = sshll.u32 (%p27_p4), %s855_s8, 1  ;;  %s615_s17 = smul.u32 (%p27_p4), 288, %s82_s15 }
  0x11   : > { %s86_s18 = ssub.s32 (%p27_p4), 3, %s570_s16  ;;  %s607_s19 = sshll.u32 (%p27_p4), %s855_s8, 5 }
  0x12   : > { %p87_p7 = scmp.lt.s32.totalorder (%p27_p4), %s86_s18, 2  ;;  %s973_s22 = scalar_lea.vmem (%p27_p4), %s1294_s0, %s607_s19  }
  0x13   : > { %s978_s24 = scalar_lea.vmem (%p27_p4), [#allocation2], %s615_s17  }
  0x14   : > { %s1314_s18 = smov (!%p87_p7, %s86_s18), 2 }
  0x15   : > { %s571_s23 = smul.u32 144, %s1314_s18 }
  0x17   : > { %p575_p8 = scmp.eq.s32.totalorder %s571_s23, 0 }
  0x18   : > { %s981_s25 = sshrl.u32 (!%p575_p8), %s1314_s18, 1 }
  0x19   : > { %97 = sbr.rel (%p575_p8) target bundleno = 100 (0x64), region = 24  ;;  %p576_p9 = scmp.le.s32.totalorder (!%p575_p8), %s981_s25, 0 }
  0x1e   : > { %495 = sbr.rel (%p576_p9) target bundleno = 72 (0x48), region = 117  ;;  %s1297_s26 = smov (!%p576_p9), %s978_s24 }
  0x1f   : > { %s1298_s27 = smov (!%p576_p9), %s973_s22  ;;  %s990_s28 = smov (!%p576_p9), 0  }
  0x20   : > { %s992_s29 = smov (!%p576_p9), 0  }
  0x23 LB: >> { %v110_v0 = vld [vmem:[%s863_s27] sm:$0xff]  ;;  %v112_v1 = vld [vmem:[%s863_s27 + $0x10] sm:$0xff]  ;;  %v114_v2 = vld [vmem:[%s863_s27 + $0x8] sm:$0xff]  ;;  %s182_s30 = sadd.s32 1, %s867_s28  ;;  %s104_s29 = sadd.s32 1, %s871_s29   ;;  %s871_s29 = sphi %s992_s29, %s104_s29   ;;  %s867_s28 = sphi %s990_s28, %s1301_s28   ;;  %s863_s27 = sphi %s1298_s27, %s1300_s27   ;;  %s859_s26 = sphi %s1297_s26, %s1299_s26  }
  0x24   : >> { %111 = vst [vmem:[%s859_s26] sm:$0xff] %v110_v0  ;;  %v116_v3 = vld [vmem:[%s863_s27 + $0x18] sm:$0xff]  ;;  %p183_p10 = scmp.ge.s32.totalorder %s182_s30, %s981_s25  ;;  %v118_v4 = vld [vmem:[%s863_s27 + $0x30] sm:$0xff]  ;;  %v120_v5 = vld [vmem:[%s863_s27 + $0x40] sm:$0xff]  ;;  %p103_p11 = scmp.ge.s32.totalorder %s104_s29, %s981_s25 }
  0x25   : >> { %113 = vst [vmem:[%s859_s26 + $0x10] sm:$0xff] %v112_v1  ;;  %v122_v6 = vld [vmem:[%s863_s27 + $0x38] sm:$0xff]  ;;  %v124_v7 = vld [vmem:[%s863_s27 + $0x48] sm:$0xff]  ;;  %v126_v8 = vld [vmem:[%s863_s27 + $0x60] sm:$0xff] }
  0x26   : >> { %115 = vst [vmem:[%s859_s26 + $0x8] sm:$0xff] %v114_v2  ;;  %s1316_s30 = smov (%p183_p10, %s182_s30), 0  ;;  %v128_v9 = vld [vmem:[%s863_s27 + $0x70] sm:$0xff]  ;;  %v130_v10 = vld [vmem:[%s863_s27 + $0x68] sm:$0xff]  ;;  %v132_v11 = vld [vmem:[%s863_s27 + $0x78] sm:$0xff] }
  0x27   : >> { %117 = vst [vmem:[%s859_s26 + $0x18] sm:$0xff] %v116_v3  ;;  %s577_s2 = sshll.u32 %s1316_s30, 5  ;;  %v134_v12 = vld [vmem:[%s863_s27 + $0x90] sm:$0xff]  ;;  %v136_v13 = vld [vmem:[%s863_s27 + $0xa0] sm:$0xff]  ;;  %v138_v14 = vld [vmem:[%s863_s27 + $0x98] sm:$0xff]  ;;  %s1301_s28 = smov %s1316_s30 }
  0x28   : >> { %119 = vst [vmem:[%s859_s26 + $0x20] sm:$0xff] %v118_v4  ;;  %s1024_s3 = scalar_lea.vmem %s973_s22, %s577_s2   ;;  %s1027_s4 = scalar_lea.vmem %s978_s24, %s577_s2 [#allocation2]   ;;  %v140_v15 = vld [vmem:[%s863_s27 + $0xa8] sm:$0xff]  ;;  %v142_v16 = vld [vmem:[%s863_s27 + $0xc0] sm:$0xff]  ;;  %v144_v17 = vld [vmem:[%s863_s27 + $0xd0] sm:$0xff] }
  0x29   : >> { %121 = vst [vmem:[%s859_s26 + $0x30] sm:$0xff] %v120_v5  ;;  %v146_v18 = vld [vmem:[%s863_s27 + $0xc8] sm:$0xff]  ;;  %v148_v19 = vld [vmem:[%s863_s27 + $0xd8] sm:$0xff]  ;;  %v150_v20 = vld [vmem:[%s863_s27 + $0xf0] sm:$0xff] }
  0x2a   : >> { %123 = vst [vmem:[%s859_s26 + $0x28] sm:$0xff] %v122_v6  ;;  %v152_v21 = vld [vmem:[%s863_s27 + $0x100] sm:$0xff]  ;;  %v154_v22 = vld [vmem:[%s863_s27 + $0xf8] sm:$0xff]  ;;  %v156_v23 = vld [vmem:[%s863_s27 + $0x108] sm:$0xff] }
  0x2b   : >> { %125 = vst [vmem:[%s859_s26 + $0x38] sm:$0xff] %v124_v7  ;;  %v158_v24 = vld [vmem:[%s863_s27 + $0x120] sm:$0xff]  ;;  %v160_v25 = vld [vmem:[%s863_s27 + $0x130] sm:$0xff]  ;;  %v162_v26 = vld [vmem:[%s863_s27 + $0x128] sm:$0xff] }
  0x2c   : >> { %127 = vst [vmem:[%s859_s26 + $0x40] sm:$0xff] %v126_v8  ;;  %v164_v27 = vld [vmem:[%s863_s27 + $0x138] sm:$0xff]  ;;  %v166_v28 = vld [vmem:[%s863_s27 + $0x150] sm:$0xff]  ;;  %v168_v29 = vld [vmem:[%s863_s27 + $0x160] sm:$0xff] }
  0x2d   : >> { %129 = vst [vmem:[%s859_s26 + $0x50] sm:$0xff] %v128_v9  ;;  %v170_v30 = vld [vmem:[%s863_s27 + $0x158] sm:$0xff]  ;;  %v172_v31 = vld [vmem:[%s863_s27 + $0x168] sm:$0xff]  ;;  %v174_v32 = vld [vmem:[%s863_s27 + $0x180] sm:$0xff] }
  0x2e   : >> { %131 = vst [vmem:[%s859_s26 + $0x48] sm:$0xff] %v130_v10  ;;  %v176_v33 = vld [vmem:[%s863_s27 + $0x190] sm:$0xff]  ;;  %v178_v34 = vld [vmem:[%s863_s27 + $0x188] sm:$0xff]  ;;  %v180_v35 = vld [vmem:[%s863_s27 + $0x198] sm:$0xff]  ;;  %s1300_s27 = smov %s1024_s3 }
  0x2f   : >> { %133 = vst [vmem:[%s859_s26 + $0x58] sm:$0xff] %v132_v11 }
  0x30   : >> { %135 = vst [vmem:[%s859_s26 + $0x60] sm:$0xff] %v134_v12 }
  0x31   : >> { %137 = vst [vmem:[%s859_s26 + $0x70] sm:$0xff] %v136_v13 }
  0x32   : >> { %139 = vst [vmem:[%s859_s26 + $0x68] sm:$0xff] %v138_v14 }
  0x33   : >> { %141 = vst [vmem:[%s859_s26 + $0x78] sm:$0xff] %v140_v15 }
  0x34   : >> { %143 = vst [vmem:[%s859_s26 + $0x80] sm:$0xff] %v142_v16 }
  0x35   : >> { %145 = vst [vmem:[%s859_s26 + $0x90] sm:$0xff] %v144_v17 }
  0x36   : >> { %147 = vst [vmem:[%s859_s26 + $0x88] sm:$0xff] %v146_v18 }
  0x37   : >> { %149 = vst [vmem:[%s859_s26 + $0x98] sm:$0xff] %v148_v19 }
  0x38   : >> { %151 = vst [vmem:[%s859_s26 + $0xa0] sm:$0xff] %v150_v20 }
  0x39   : >> { %153 = vst [vmem:[%s859_s26 + $0xb0] sm:$0xff] %v152_v21 }
  0x3a   : >> { %155 = vst [vmem:[%s859_s26 + $0xa8] sm:$0xff] %v154_v22 }
  0x3b   : >> { %157 = vst [vmem:[%s859_s26 + $0xb8] sm:$0xff] %v156_v23 }
  0x3c   : >> { %159 = vst [vmem:[%s859_s26 + $0xc0] sm:$0xff] %v158_v24 }
  0x3d   : >> { %161 = vst [vmem:[%s859_s26 + $0xd0] sm:$0xff] %v160_v25 }
  0x3e   : >> { %163 = vst [vmem:[%s859_s26 + $0xc8] sm:$0xff] %v162_v26 }
  0x3f   : >> { %165 = vst [vmem:[%s859_s26 + $0xd8] sm:$0xff] %v164_v27 }
  0x40   : >> { %167 = vst [vmem:[%s859_s26 + $0xe0] sm:$0xff] %v166_v28 }
  0x41   : >> { %169 = vst [vmem:[%s859_s26 + $0xf0] sm:$0xff] %v168_v29 }
  0x42   : >> { %171 = vst [vmem:[%s859_s26 + $0xe8] sm:$0xff] %v170_v30 }
  0x43   : >> { %173 = vst [vmem:[%s859_s26 + $0xf8] sm:$0xff] %v172_v31  ;;  %106 = sbr.rel (!%p103_p11) target bundleno = 35 (0x23), region = 123 }
  0x44   : >> { %175 = vst [vmem:[%s859_s26 + $0x100] sm:$0xff] %v174_v32 }
  0x45   : >> { %177 = vst [vmem:[%s859_s26 + $0x110] sm:$0xff] %v176_v33 }
  0x46   : >> { %179 = vst [vmem:[%s859_s26 + $0x108] sm:$0xff] %v178_v34 }
  0x47   : >> { %181 = vst [vmem:[%s859_s26 + $0x118] sm:$0xff] %v180_v35  ;;  %s1299_s26 = smov %s1027_s4 }
  0x48 PF: > { %s1100_s5 = sand.u32 1, %s1314_s18   ;;  %s608_s11 = sshll.u32 %s981_s25, 5 }
  0x49   : > { %s1104_s12 = scalar_lea.vmem %s973_s22, %s608_s11   ;;  %s1107_s15 = scalar_lea.vmem %s978_s24, %s608_s11 [#allocation2]  }
  0x4a   : > { %p582_p12 = scmp.le.s32.totalorder %s1100_s5, 0 }
  0x4b   : > { %s1302_s16 = smov (!%p582_p12), %s1107_s15  ;;  %s1303_s17 = smov (!%p582_p12), %s1104_s12 }
  0x4c   : > { %509 = sbr.rel (%p582_p12) target bundleno = 100 (0x64), region = 128  ;;  %s1116_s19 = smov (!%p582_p12), 0  }
  0x4d   : > { %s1118_s20 = smov (!%p582_p12), 0  }
  0x51 LB: >> { %v205_v36 = vld [vmem:[%s879_s17] sm:$0xff]  ;;  %v207_v37 = vld [vmem:[%s879_s17 + $0x8] sm:$0xff]  ;;  %v209_v38 = vld [vmem:[%s879_s17 + $0x30] sm:$0xff]  ;;  %s241_s18 = sadd.s32 1, %s883_s19  ;;  %s199_s20 = sadd.s32 1, %s887_s20   ;;  %s887_s20 = sphi %s1118_s20, %s199_s20   ;;  %s883_s19 = sphi %s1116_s19, %s1306_s19   ;;  %s879_s17 = sphi %s1303_s17, %s1305_s17   ;;  %s875_s16 = sphi %s1302_s16, %s1304_s16  }
  0x52   : >> { %206 = vst [vmem:[%s875_s16] sm:$0xff] %v205_v36  ;;  %v211_v39 = vld [vmem:[%s879_s17 + $0x38] sm:$0xff]  ;;  %p242_p13 = scmp.ge.s32.totalorder %s241_s18, %s1100_s5  ;;  %v213_v40 = vld [vmem:[%s879_s17 + $0x60] sm:$0xff]  ;;  %v215_v41 = vld [vmem:[%s879_s17 + $0x68] sm:$0xff]  ;;  %p198_p0 = scmp.ge.s32.totalorder %s199_s20, %s1100_s5 }
  0x53   : >> { %208 = vst [vmem:[%s875_s16 + $0x8] sm:$0xff] %v207_v37  ;;  %v217_v42 = vld [vmem:[%s879_s17 + $0x90] sm:$0xff]  ;;  %v219_v43 = vld [vmem:[%s879_s17 + $0x98] sm:$0xff]  ;;  %v221_v44 = vld [vmem:[%s879_s17 + $0xc0] sm:$0xff] }
  0x54   : >> { %210 = vst [vmem:[%s875_s16 + $0x20] sm:$0xff] %v209_v38  ;;  %s1318_s18 = smov (%p242_p13, %s241_s18), 0  ;;  %v223_v45 = vld [vmem:[%s879_s17 + $0xc8] sm:$0xff]  ;;  %v225_v46 = vld [vmem:[%s879_s17 + $0xf0] sm:$0xff]  ;;  %v227_v47 = vld [vmem:[%s879_s17 + $0xf8] sm:$0xff] }
  0x55   : >> { %212 = vst [vmem:[%s875_s16 + $0x28] sm:$0xff] %v211_v39  ;;  %s583_s21 = sshll.u32 %s1318_s18, 4  ;;  %v229_v48 = vld [vmem:[%s879_s17 + $0x120] sm:$0xff]  ;;  %v231_v49 = vld [vmem:[%s879_s17 + $0x128] sm:$0xff]  ;;  %v233_v50 = vld [vmem:[%s879_s17 + $0x150] sm:$0xff]  ;;  %s1306_s19 = smov %s1318_s18 }
  0x56   : >> { %214 = vst [vmem:[%s875_s16 + $0x40] sm:$0xff] %v213_v40  ;;  %s246_s22 = scalar_lea.vmem %s1104_s12, %s583_s21   ;;  %s247_s23 = scalar_lea.vmem %s1107_s15, %s583_s21 [#allocation2]   ;;  %v235_v51 = vld [vmem:[%s879_s17 + $0x158] sm:$0xff]  ;;  %v237_v52 = vld [vmem:[%s879_s17 + $0x180] sm:$0xff]  ;;  %v239_v53 = vld [vmem:[%s879_s17 + $0x188] sm:$0xff] }
  0x57   : >> { %216 = vst [vmem:[%s875_s16 + $0x48] sm:$0xff] %v215_v41  ;;  %s1305_s17 = smov %s246_s22 }
  0x58   : >> { %218 = vst [vmem:[%s875_s16 + $0x60] sm:$0xff] %v217_v42 }
  0x59   : >> { %220 = vst [vmem:[%s875_s16 + $0x68] sm:$0xff] %v219_v43 }
  0x5a   : >> { %222 = vst [vmem:[%s875_s16 + $0x80] sm:$0xff] %v221_v44 }
  0x5b   : >> { %224 = vst [vmem:[%s875_s16 + $0x88] sm:$0xff] %v223_v45 }
  0x5c   : >> { %226 = vst [vmem:[%s875_s16 + $0xa0] sm:$0xff] %v225_v46 }
  0x5d   : >> { %228 = vst [vmem:[%s875_s16 + $0xa8] sm:$0xff] %v227_v47 }
  0x5e   : >> { %230 = vst [vmem:[%s875_s16 + $0xc0] sm:$0xff] %v229_v48 }
  0x5f   : >> { %232 = vst [vmem:[%s875_s16 + $0xc8] sm:$0xff] %v231_v49  ;;  %201 = sbr.rel (!%p198_p0) target bundleno = 81 (0x51), region = 134 }
  0x60   : >> { %234 = vst [vmem:[%s875_s16 + $0xe0] sm:$0xff] %v233_v50 }
  0x61   : >> { %236 = vst [vmem:[%s875_s16 + $0xe8] sm:$0xff] %v235_v51 }
  0x62   : >> { %238 = vst [vmem:[%s875_s16 + $0x100] sm:$0xff] %v237_v52 }
  0x63   : >> { %240 = vst [vmem:[%s875_s16 + $0x108] sm:$0xff] %v239_v53  ;;  %s1304_s16 = smov %s247_s23 }
  0x64 PF: > { %p585_p1 = scmp.ge.s32.totalorder %s855_s8, 1  ;;  %p252_p2 = scmp.lt.s32.totalorder %s855_s8, 3 }
  0x66   : > { %p253_p3 = pnand %p585_p1, %p252_p2 }
  0x67   : > { %s259_s24 = sand.u32 (!%p253_p3), 1, %s847_s6  }
  0x68   : > { %256 = sbr.rel (%p253_p3) target bundleno = 171 (0xab), region = 50  ;;  %s586_s8 = sshll.u32 (!%p253_p3), %s259_s24, 5 }
  0x69   : > { %s616_s25 = smul.u32 (!%p253_p3), 288, %s259_s24  ;;  %s1224_s6 = scalar_lea.vmem (!%p253_p3), [#allocation3], %s586_s8  }
  0x6b   : > { %s1188_s26 = scalar_lea.vmem (!%p253_p3), [#allocation2], %s616_s25 }
  0x6d   : > { %v289_v54 = vld [vmem:[%s1188_s26] sm:$0xff]  ;;  %v290_v60 = vld [vmem:[%s1188_s26 + $0x8] sm:$0xff]  ;;  %v291_v5 = vld [vmem:[%s1188_s26 + $0x10] sm:$0xff]  ;;  %s588_s27 = sshll.u32 (%p962_p5), %s947_s9, 1  ;;  %s612_s28 = sshll.u32 (%p962_p5), %s947_s9, 5 }
  0x6e   : > { %v293_v55 = vld [vmem:[%s1188_s26 + $0x20] sm:$0xff]  ;;  %v294_v61 = vld [vmem:[%s1188_s26 + $0x28] sm:$0xff]  ;;  %v295_v6 = vld [vmem:[%s1188_s26 + $0x30] sm:$0xff]  ;;  %s369_s29 = ssub.s32 (%p962_p5), 3, %s588_s27  ;;  %s1241_s3 = scalar_lea.vmem (%p962_p5), %s1295_s1, %s612_s28  }
  0x6f   : > { %v297_v56 = vld [vmem:[%s1188_s26 + $0x40] sm:$0xff]  ;;  %v325_v57 = vmax.f32 %v289_v54, %v293_v55  ;;  %v298_v62 = vld [vmem:[%s1188_s26 + $0x48] sm:$0xff]  ;;  %v333_v0 = vmax.f32 %v290_v60, %v294_v61  ;;  %v299_v7 = vld [vmem:[%s1188_s26 + $0x50] sm:$0xff]  ;;  %v341_v10 = vmax.f32 %v291_v5, %v295_v6  ;;  %p370_p4 = scmp.lt.s32.totalorder (%p962_p5), %s369_s29, 2 }
  0x70   : > { %v301_v58 = vld [vmem:[%s1188_s26 + $0x60] sm:$0xff]  ;;  %v302_v3 = vld [vmem:[%s1188_s26 + $0x68] sm:$0xff]  ;;  %v303_v14 = vld [vmem:[%s1188_s26 + $0x70] sm:$0xff] }
  0x71   : > { %v326_v59 = vmax.f32 %v325_v57, %v297_v56  ;;  %v305_v63 = vld [vmem:[%s1188_s26 + $0x80] sm:$0xff]  ;;  %v334_v4 = vmax.f32 %v333_v0, %v298_v62  ;;  %v306_v9 = vld [vmem:[%s1188_s26 + $0x88] sm:$0xff]  ;;  %v342_v16 = vmax.f32 %v341_v10, %v299_v7  ;;  %v292_v17 = vld [vmem:[%s1188_s26 + $0x18] sm:$0xff] }
  0x72   : > { %v309_v1 = vld [vmem:[%s1188_s26 + $0xa0] sm:$0xff]  ;;  %v310_v12 = vld [vmem:[%s1188_s26 + $0xa8] sm:$0xff]  ;;  %v296_v18 = vld [vmem:[%s1188_s26 + $0x38] sm:$0xff] }
  0x73   : > { %v327_v2 = vmax.f32 %v326_v59, %v301_v58  ;;  %v313_v11 = vld [vmem:[%s1188_s26 + $0xc0] sm:$0xff]  ;;  %v335_v13 = vmax.f32 %v334_v4, %v302_v3  ;;  %v300_v19 = vld [vmem:[%s1188_s26 + $0x58] sm:$0xff]  ;;  %v307_v22 = vld [vmem:[%s1188_s26 + $0x90] sm:$0xff]  ;;  %v349_v23 = vmax.f32 %v292_v17, %v296_v18  ;;  %v343_v26 = vmax.f32 %v342_v16, %v303_v14 }
  0x74   : > { %v317_v20 = vld [vmem:[%s1188_s26 + $0xe0] sm:$0xff]  ;;  %v314_v25 = vld [vmem:[%s1188_s26 + $0xc8] sm:$0xff]  ;;  %v304_v27 = vld [vmem:[%s1188_s26 + $0x78] sm:$0xff] }
  0x75   : > { %v328_v8 = vmax.f32 %v327_v2, %v305_v63  ;;  %v336_v21 = vmax.f32 %v335_v13, %v306_v9  ;;  %v321_v28 = vld [vmem:[%s1188_s26 + $0x100] sm:$0xff]  ;;  %v311_v30 = vld [vmem:[%s1188_s26 + $0xb0] sm:$0xff]  ;;  %v350_v31 = vmax.f32 %v349_v23, %v300_v19  ;;  %v318_v33 = vld [vmem:[%s1188_s26 + $0xe8] sm:$0xff]  ;;  %v344_v34 = vmax.f32 %v343_v26, %v307_v22 }
  0x76   : > { %v308_v35 = vld [vmem:[%s1188_s26 + $0x98] sm:$0xff]  ;;  %v315_v37 = vld [vmem:[%s1188_s26 + $0xd0] sm:$0xff]  ;;  %v322_v40 = vld [vmem:[%s1188_s26 + $0x108] sm:$0xff] }
  0x77   : > { %v329_v15 = vmax.f32 %v328_v8, %v309_v1  ;;  %v337_v29 = vmax.f32 %v336_v21, %v310_v12  ;;  %v351_v38 = vmax.f32 %v350_v31, %v304_v27  ;;  %v345_v41 = vmax.f32 %v344_v34, %v311_v30  ;;  %v312_v42 = vld [vmem:[%s1188_s26 + $0xb8] sm:$0xff]  ;;  %v319_v44 = vld [vmem:[%s1188_s26 + $0xf0] sm:$0xff] }
  0x78   : > { %v316_v47 = vld [vmem:[%s1188_s26 + $0xd8] sm:$0xff]  ;;  %v323_v49 = vld [vmem:[%s1188_s26 + $0x110] sm:$0xff] }
  0x79   : > { %v330_v24 = vmax.f32 %v329_v15, %v313_v11  ;;  %v338_v36 = vmax.f32 %v337_v29, %v314_v25  ;;  %v352_v45 = vmax.f32 %v351_v38, %v308_v35  ;;  %v346_v46 = vmax.f32 %v345_v41, %v315_v37  ;;  %v320_v52 = vld [vmem:[%s1188_s26 + $0xf8] sm:$0xff] }
  0x7a   : > { %v324_v55 = vld [vmem:[%s1188_s26 + $0x118] sm:$0xff] }
  0x7b   : > { %v331_v32 = vmax.f32 %v330_v24, %v317_v20  ;;  %v339_v43 = vmax.f32 %v338_v36, %v318_v33  ;;  %v353_v50 = vmax.f32 %v352_v45, %v312_v42  ;;  %v347_v51 = vmax.f32 %v346_v46, %v319_v44 }
  0x7d   : > { %v332_v39 = vmax.f32 %v331_v32, %v321_v28  ;;  %v340_v48 = vmax.f32 %v339_v43, %v322_v40  ;;  %v354_v53 = vmax.f32 %v353_v50, %v316_v47  ;;  %v348_v54 = vmax.f32 %v347_v51, %v323_v49 }
  0x7f   : > { %357 = vst [vmem:[%s1224_s6] sm:$0xff] %v332_v39  ;;  %v355_v56 = vmax.f32 %v354_v53, %v320_v52  ;;  %367 = sbr.rel (!%p962_p5) target bundleno = 171 (0xab), region = 58 }
  0x80   : > { %358 = vst [vmem:[%s1224_s6 + $0x8] sm:$0xff] %v340_v48 }
  0x81   : > { %359 = vst [vmem:[%s1224_s6 + $0x10] sm:$0xff] %v348_v54  ;;  %v356_v57 = vmax.f32 %v355_v56, %v324_v55 }
  0x83   : > { %360 = vst [vmem:[%s1224_s6 + $0x18] sm:$0xff] %v356_v57 }
  0x84   : > { %s1320_s29 = smov (!%p370_p4, %s369_s29), 2 }
  0x85   : > { %s610_s4 = sshll.u32 %s1320_s29, 4 }
  0x86   : > { %p594_p6 = scmp.eq.s32.totalorder %s610_s4, 0 }
  0x87   : > { %s1247_s14 = sshrl.u32 (!%p594_p6), %s1320_s29, 1 }
  0x88   : > { %380 = sbr.rel (%p594_p6) target bundleno = 171 (0xab), region = 62  ;;  %p595_p5 = scmp.le.s32.totalorder (!%p594_p6), %s1247_s14, 0 }
  0x8d   : > { %523 = sbr.rel (%p595_p5) target bundleno = 154 (0x9a), region = 139  ;;  %s1307_s9 = smov (!%p595_p5), %s1241_s3 }
  0x8e   : > { %s1308_s5 = smov (!%p595_p5), %s1224_s6  ;;  %s1256_s11 = smov (!%p595_p5), 0  }
  0x8f   : > { %s901_s12 = smov (!%p595_p5), 0  }
  0x92 LB: >> { %v393_v58 = vld [vmem:[%s895_s5] sm:$0xff]  ;;  %v395_v59 = vld [vmem:[%s895_s5 + $0x10] sm:$0xff]  ;;  %v397_v60 = vld [vmem:[%s895_s5 + $0x8] sm:$0xff]  ;;  %s401_s15 = sadd.s32 1, %s899_s11  ;;  %s387_s12 = sadd.s32 1, %s903_s12   ;;  %s903_s12 = sphi %s901_s12, %s387_s12   ;;  %s899_s11 = sphi %s1256_s11, %s1309_s11   ;;  %s895_s5 = sphi %s1308_s5, %s406_s5   ;;  %s891_s9 = sphi %s1307_s9, %s407_s9  }
  0x93   : >> { %394 = vst [vmem:[%s891_s9] sm:$0xff] %v393_v58  ;;  %v399_v61 = vld [vmem:[%s895_s5 + $0x18] sm:$0xff]  ;;  %p402_p7 = scmp.ge.s32.totalorder %s401_s15, %s1247_s14  ;;  %p386_p8 = scmp.ge.s32.totalorder %s387_s12, %s1247_s14 }
  0x94   : >> { %396 = vst [vmem:[%s891_s9 + $0x10] sm:$0xff] %v395_v59 }
  0x95   : >> { %398 = vst [vmem:[%s891_s9 + $0x8] sm:$0xff] %v397_v60  ;;  %s1322_s15 = smov (%p402_p7, %s401_s15), 0  ;;  %389 = sbr.rel (!%p386_p8) target bundleno = 146 (0x92), region = 145 }
  0x96   : >> { %400 = vst [vmem:[%s891_s9 + $0x18] sm:$0xff] %v399_v61  ;;  %s596_s16 = sshll.u32 %s1322_s15, 5  ;;  %s1309_s11 = smov %s1322_s15 }
  0x97   : >> { %s406_s5 = scalar_lea.vmem %s1224_s6, %s596_s16 [#allocation3]   ;;  %s407_s9 = scalar_lea.vmem %s1241_s3, %s596_s16  }
  0x9a PF: > { %s1272_s17 = sand.u32 1, %s1320_s29   ;;  %s613_s19 = sshll.u32 %s1247_s14, 5 }
  0x9b   : > { %s1276_s20 = scalar_lea.vmem %s1224_s6, %s613_s19 [#allocation3]   ;;  %s414_s18 = scalar_lea.vmem %s1241_s3, %s613_s19  }
  0x9c   : > { %p601_p9 = scmp.le.s32.totalorder %s1272_s17, 0 }
  0x9d   : > { %s905_s21 = smov (!%p601_p9), %s414_s18   ;;  %s909_s22 = smov (!%p601_p9), %s1276_s20  }
  0x9e   : > { %537 = sbr.rel (%p601_p9) target bundleno = 171 (0xab), region = 150  ;;  %s913_s23 = smov (!%p601_p9), 0  }
  0x9f   : > { %s917_s24 = smov (!%p601_p9), 0  }
  0xa3 LB: >> { %v424_v62 = vld [vmem:[%s911_s22] sm:$0xff]  ;;  %v426_v63 = vld [vmem:[%s911_s22 + $0x8] sm:$0xff]  ;;  %s428_s25 = sadd.s32 1, %s915_s23  ;;  %s418_s24 = sadd.s32 1, %s919_s24   ;;  %s919_s24 = sphi %s917_s24, %s418_s24   ;;  %s915_s23 = sphi %s913_s23, %s914_s23   ;;  %s911_s22 = sphi %s909_s22, %s433_s22   ;;  %s907_s21 = sphi %s905_s21, %s434_s21  }
  0xa4   : >> { %425 = vst [vmem:[%s907_s21] sm:$0xff] %v424_v62  ;;  %p429_p10 = scmp.ge.s32.totalorder %s428_s25, %s1272_s17  ;;  %p417_p11 = scmp.ge.s32.totalorder %s418_s24, %s1272_s17 }
  0xa5   : >> { %427 = vst [vmem:[%s907_s21 + $0x8] sm:$0xff] %v426_v63 }
  0xa6   : >> { %s1324_s25 = smov (%p429_p10, %s428_s25), 0  ;;  %420 = sbr.rel (!%p417_p11) target bundleno = 163 (0xa3), region = 156 }
  0xa7   : >> { %s602_s26 = sshll.u32 %s1324_s25, 4  ;;  %s914_s23 = smov %s1324_s25  }
  0xa8   : >> { %s433_s22 = scalar_lea.vmem %s1276_s20, %s602_s26 [#allocation3]   ;;  %s434_s21 = scalar_lea.vmem %s414_s18, %s602_s26  }
  0xab PF: > { %p8_p12 = scmp.ge.s32.totalorder %s950_s10, 4   ;;  %s1310_s6 = smov %s851_s7 }
  0xac   : > { %s1311_s7 = smov %s960_s13  ;;  %s1312_s8 = smov %s950_s10 }
  0xad   :  { %10 = sbr.rel (!%p8_p12) target bundleno = 2 (0x2), region = 167 }

// kernel: squeezenet_forward.32
= control target key start
LH: loop header
LB: loop body
LE: loop exit
PB: predicated region body
PF: predicated region fallthrough
CT: control target
= control target key end

     0   :  { %s913_s12 = smov 0   ;;  %s915_s13 = smov 0   ;;  %s1047_s0 = inlined_call_operand.vmem [shape: bf16[18,256], index: 0, kind: input, shape index: {}]   ;;  %s1048_s1 = inlined_call_operand.vmem [shape: bf16[256,48], index: 1, kind: input, shape index: {}]   ;;  %s1049_s2 = inlined_call_operand.vmem [shape: f32[1,48], index: 2, kind: input, shape index: {}]   ;;  %s1050_s3 = inlined_call_operand.vmem [shape: f32[18,48], index: 3, kind: output, shape index: {}]  }
   0x1   :  { %s917_s14 = smov 0  }
   0x2 LB: > { %s926_s15 = sadd.s32 4294967295, %s859_s14   ;;  %s928_s16 = sadd.s32 1, %s859_s14   ;;  %s859_s14 = sphi %s917_s14, %s1054_s14   ;;  %s855_s13 = sphi %s915_s13, %s1053_s13   ;;  %s851_s12 = sphi %s913_s12, %s1052_s12  }
   0x3   : > { %s85_s17 = ssub.s32 %s859_s14, %s928_s16  ;;  %s88_s18 = sadd.s32 1, %s855_s13 }
   0x4   : > { %p86_p0 = scmp.eq.s32.totalorder %s85_s17, 0  ;;  %p98_p1 = scmp.ne.s32.totalorder %s855_s13, %s851_s12 }
   0x5   : > { %p99_p2 = scmp.eq.s32.totalorder %s926_s15, 1  ;;  %p600_p3 = scmp.ge.s32.totalorder %s859_s14, 1 }
   0x6   : > { %s936_s19 = scalar_select %p86_p0, %s855_s13, %s88_s18  }
   0x7   : > { %p938_p4 = por %p99_p2, %p98_p1  ;;  %p149_p5 = scmp.lt.s32.totalorder %s859_s14, 3 }
   0x9   : > { %p150_p6 = pnand %p600_p3, %p149_p5 }
   0xa   : > { %s961_s6 = sshll.u32 (!%p150_p6), %s926_s15, 1  ;;  %s175_s18 = sand.u32 (!%p150_p6), 1, %s851_s12  }
   0xb   : > { %153 = sbr.rel (%p150_p6) target bundleno = 228 (0xe4), region = 32  ;;  %p184_p7 = scmp.lt.s32.totalorder (!%p150_p6), %s961_s6, 2 }
  0x10   : > { %v704_v0 = vld [vmem:[%s1048_s1 + $0x38] sm:$0xff]  ;;  %v703_v2 = vld [vmem:[%s1048_s1 + $0x30] sm:$0xff]  ;;  %v702_v4 = vld [vmem:[%s1048_s1 + $0x28] sm:$0xff]  ;;  %s185_s21 = scalar_select %p184_p7, %s961_s6, 2  ;;  %vm374_vm0 = vcmask 392192  }
  0x11   : > { %v712_v1 = vld [vmem:[%s1048_s1 + $0x78] sm:$0xff]  ;;  %344 = vmatpush.bf16.msra.mxu0 %v704_v0  ;;  %v711_v3 = vld [vmem:[%s1048_s1 + $0x70] sm:$0xff]  ;;  %v710_v5 = vld [vmem:[%s1048_s1 + $0x68] sm:$0xff]  ;;  %s385_s12 = ssub.s32 (%p938_p4), 3, %s961_s6  ;;  %s713_s23 = sshll.u32 (%p938_p4), %s926_s15, 4 }
  0x12   : > { %358 = vmatpush.bf16.msra.mxu1 %v712_v1  ;;  %v701_v6 = vld [vmem:[%s1048_s1 + $0x20] sm:$0xff]  ;;  %v700_v8 = vld [vmem:[%s1048_s1 + $0x18] sm:$0xff]  ;;  %v699_v10 = vld [vmem:[%s1048_s1 + $0x10] sm:$0xff]  ;;  %s694_s26 = sshll.u32 %s185_s21, 3  ;;  %s601_s21 = sshll.u32 %s175_s18, 4 }
  0x13   : > { %v709_v7 = vld [vmem:[%s1048_s1 + $0x60] sm:$0xff]  ;;  %v708_v9 = vld [vmem:[%s1048_s1 + $0x58] sm:$0xff]  ;;  %v707_v11 = vld [vmem:[%s1048_s1 + $0x50] sm:$0xff]  ;;  %s188_s7 = scalar_lea.vmem %s1047_s0, %s694_s26  ;;  %s1002_s22 = scalar_lea.vmem [#allocation2], %s601_s21  }
  0x14   : > { %v698_v12 = vld [vmem:[%s1048_s1 + $0x8] sm:$0xff]  ;;  %v697_v14 = vld [vmem:[%s1048_s1] sm:$0xff]  ;;  %p386_p8 = scmp.lt.s32.totalorder (%p938_p4), %s385_s12, 2  ;;  %s1013_s26 = scalar_lea.vmem (%p938_p4), %s1050_s3, %s713_s23  }
  0x15   : > { %345 = vmatpush.bf16.msra.mxu0 %v703_v2  ;;  %v706_v13 = vld [vmem:[%s1048_s1 + $0x48] sm:$0xff]  ;;  %v705_v15 = vld [vmem:[%s1048_s1 + $0x40] sm:$0xff] }
  0x16   : > { %359 = vmatpush.bf16.msra.mxu1 %v711_v3  ;;  %v607_v16 = vld [vmem:[%s188_s7] sm:$0xf]  ;;  %v696_v17 = vld [vmem:[%s188_s7 + $0x4] sm:$0xf0]  ;;  %v695_v18 = vld [vmem:[%s188_s7 + $0x4] sm:$0xf] }
  0x17   : > { %v609_v19 = vld [vmem:[%s188_s7 + $0x8] sm:$0xf0]  ;;  %v608_v20 = vor.u32 %v696_v17, %v607_v16  ;;  %v804_v22 = vld [vmem:[%s1049_s2] ss:$0 sm:$0xff] }
  0x18   : > { %v612_v21 = vor.u32 %v695_v18, %v609_v19 }
  0x19   : > { %346 = vmatpush.bf16.msra.mxu0 %v702_v4 }
  0x1a   : > { %360 = vmatpush.bf16.msra.mxu1 %v710_v5 }
  0x1d   : > { %347 = vmatpush.bf16.msra.mxu0 %v701_v6 }
  0x1e   : > { %361 = vmatpush.bf16.msra.mxu1 %v709_v7 }
  0x21   : > { %348 = vmatpush.bf16.msra.mxu0 %v700_v8 }
  0x22   : > { %362 = vmatpush.bf16.msra.mxu1 %v708_v9 }
  0x25   : > { %349 = vmatpush.bf16.msra.mxu0 %v699_v10 }
  0x26   : > { %363 = vmatpush.bf16.msra.mxu1 %v707_v11 }
  0x29   : > { %350 = vmatpush.bf16.msra.mxu0 %v698_v12 }
  0x2a   : > { %364 = vmatpush.bf16.msra.mxu1 %v706_v13 }
  0x2d   : > { %351 = vmatpush.bf16.msra.mxu0 %v697_v14 }
  0x2e   : > { %365 = vmatpush.bf16.msra.mxu1 %v705_v15 }
  0x30   : > { %352 = vmatmul.bf16.vlgmr.msra.gmra.mxu0 %v608_v20 }
  0x31   : > { %366 = vmatmul.bf16.vlgmr.msra.gmra.mxu1 %v612_v21 }
  0xad   : > { %v353_v23 = vpop.f32.mrf.mxu0 }
  0xae   : > { %v367_v24 = vpop.f32.mrf.mxu1  ;;  %v354_v25 = vadd.f32 %v804_v22, %v353_v23 }
  0xb0   : > { %v368_v26 = vadd.f32 %v367_v24, %v354_v25 }
  0xb2   : > { %v372_v27 = vmax.f32 %v368_v26, 0.0 }
  0xb4   : > { %375 = vst.msk [vmem:[%s1002_s22] sm:$0xff] %vm374_vm0, %v372_v27 }
  0xb5   : > { %v355_v28 = vpop.f32.mrf.mxu0 }
  0xb6   : > { %v356_v29 = vadd.f32 %v804_v22, %v355_v28  ;;  %v369_v30 = vpop.f32.mrf.mxu1 }
  0xb8   : > { %v370_v31 = vadd.f32 %v369_v30, %v356_v29  ;;  %383 = sbr.rel (!%p938_p4) target bundleno = 228 (0xe4), region = 36 }
  0xba   : > { %v373_v32 = vmax.f32 %v370_v31, 0.0 }
  0xbc   : > { %376 = vst.msk [vmem:[%s1002_s22 + $0x8] sm:$0xff] %vm374_vm0, %v373_v32 }
  0xbd   : > { %s1056_s12 = smov (!%p386_p8, %s385_s12), 2 }
  0xbe   : > { %s679_s27 = sshll.u32 %s1056_s12, 3 }
  0xbf   : > { %p682_p9 = scmp.eq.s32.totalorder %s679_s27, 0 }
  0xc0   : > { %s1019_s28 = sshrl.u32 (!%p682_p9), %s1056_s12, 1 }
  0xc1   : > { %394 = sbr.rel (%p682_p9) target bundleno = 228 (0xe4), region = 40  ;;  %p683_p10 = scmp.le.s32.totalorder (!%p682_p9), %s1019_s28, 0 }
  0xc6   : > { %553 = sbr.rel (%p683_p10) target bundleno = 211 (0xd3), region = 116  ;;  %s861_s15 = smov (!%p683_p10), %s1013_s26  }
  0xc7   : > { %s865_s20 = smov (!%p683_p10), %s1002_s22   ;;  %s869_s6 = smov (!%p683_p10), 0  }
  0xc8   : > { %s873_s29 = smov (!%p683_p10), 0  }
  0xcb LB: >> { %v459_v33 = vld [vmem:[%s867_s20] sm:$0xff]  ;;  %v461_v34 = vld [vmem:[%s867_s20 + $0x8] sm:$0xff]  ;;  %s463_s30 = sadd.s32 1, %s871_s6  ;;  %s453_s29 = sadd.s32 1, %s875_s29   ;;  %s875_s29 = sphi %s873_s29, %s453_s29   ;;  %s871_s6 = sphi %s869_s6, %s870_s6   ;;  %s867_s20 = sphi %s865_s20, %s468_s20   ;;  %s863_s15 = sphi %s861_s15, %s469_s15  }
  0xcc   : >> { %460 = vst [vmem:[%s863_s15] sm:$0xff] %v459_v33  ;;  %p464_p11 = scmp.ge.s32.totalorder %s463_s30, %s1019_s28  ;;  %p452_p12 = scmp.ge.s32.totalorder %s453_s29, %s1019_s28 }
  0xcd   : >> { %462 = vst [vmem:[%s863_s15 + $0x8] sm:$0xff] %v461_v34 }
  0xce   : >> { %s1058_s30 = smov (%p464_p11, %s463_s30), 0  ;;  %455 = sbr.rel (!%p452_p12) target bundleno = 203 (0xcb), region = 122 }
  0xcf   : >> { %s684_s4 = sshll.u32 %s1058_s30, 4  ;;  %s870_s6 = smov %s1058_s30  }
  0xd0   : >> { %s468_s20 = scalar_lea.vmem %s1002_s22, %s684_s4 [#allocation2]   ;;  %s469_s15 = scalar_lea.vmem %s1013_s26, %s684_s4  }
  0xd3 PF: > { %s1029_s5 = sand.u32 1, %s1056_s12   ;;  %s714_s7 = sshll.u32 %s1019_s28, 4 }
  0xd4   : > { %s474_s8 = scalar_lea.vmem %s1002_s22, %s714_s7 [#allocation2]   ;;  %s476_s9 = scalar_lea.vmem %s1013_s26, %s714_s7  }
  0xd5   : > { %p689_p13 = scmp.le.s32.totalorder %s1029_s5, 0 }
  0xd6   : > { %s877_s10 = smov (!%p689_p13), %s476_s9   ;;  %s881_s11 = smov (!%p689_p13), %s474_s8  }
  0xd7   : > { %567 = sbr.rel (%p689_p13) target bundleno = 228 (0xe4), region = 127  ;;  %s885_s14 = smov (!%p689_p13), 0  }
  0xd8   : > { %s889_s17 = smov (!%p689_p13), 0  }
  0xdc LB: >> { %v486_v35 = vld [vmem:[%s883_s11] sm:$0xff]  ;;  %s488_s18 = sadd.s32 1, %s887_s14  ;;  %s480_s17 = sadd.s32 1, %s891_s17   ;;  %s891_s17 = sphi %s889_s17, %s480_s17   ;;  %s887_s14 = sphi %s885_s14, %s886_s14   ;;  %s883_s11 = sphi %s881_s11, %s493_s11   ;;  %s879_s10 = sphi %s877_s10, %s494_s10  }
  0xdd   : >> { %487 = vst [vmem:[%s879_s10] sm:$0xff] %v486_v35  ;;  %p489_p0 = scmp.ge.s32.totalorder %s488_s18, %s1029_s5  ;;  %p479_p1 = scmp.ge.s32.totalorder %s480_s17, %s1029_s5 }
  0xdf   : >> { %s1060_s18 = smov (%p489_p0, %s488_s18), 0  ;;  %482 = sbr.rel (!%p479_p1) target bundleno = 220 (0xdc), region = 133 }
  0xe0   : >> { %s690_s21 = sshll.u32 %s1060_s18, 3  ;;  %s886_s14 = smov %s1060_s18  }
  0xe1   : >> { %s493_s11 = scalar_lea.vmem %s474_s8, %s690_s21 [#allocation2]   ;;  %s494_s10 = scalar_lea.vmem %s476_s9, %s690_s21  }
  0xe4 PF: > { %p10_p2 = scmp.ge.s32.totalorder %s928_s16, 4   ;;  %s1052_s12 = smov %s855_s13 }
  0xe5   : > { %s1053_s13 = smov %s936_s19  ;;  %s1054_s14 = smov %s928_s16 }
  0xe6   :  { %12 = sbr.rel (!%p10_p2) target bundleno = 2 (0x2), region = 144 }

// kernel: squeezenet_forward.34
= control target key start
LH: loop header
LB: loop body
LE: loop exit
PB: predicated region body
PF: predicated region fallthrough
CT: control target
= control target key end

     0   :  { %s1043_s12 = smov 0   ;;  %s1045_s13 = smov 0   ;;  %s1201_s0 = inlined_call_operand.vmem [shape: bf16[18,384], index: 0, kind: input, shape index: {}]   ;;  %s1202_s1 = inlined_call_operand.vmem [shape: bf16[384,48], index: 1, kind: input, shape index: {}]   ;;  %s1203_s2 = inlined_call_operand.vmem [shape: f32[1,48], index: 2, kind: input, shape index: {}]   ;;  %s1204_s3 = inlined_call_operand.vmem [shape: f32[18,48], index: 3, kind: output, shape index: {}]  }
   0x1   :  { %s1047_s14 = smov 0  }
   0x2 LB: > { %s1056_s15 = sadd.s32 4294967295, %s989_s14   ;;  %s1058_s16 = sadd.s32 1, %s989_s14   ;;  %s989_s14 = sphi %s1047_s14, %s1208_s14   ;;  %s985_s13 = sphi %s1045_s13, %s1207_s13   ;;  %s981_s12 = sphi %s1043_s12, %s1206_s12  }
   0x3   : > { %s85_s17 = ssub.s32 %s989_s14, %s1058_s16  ;;  %s88_s18 = sadd.s32 1, %s985_s13 }
   0x4   : > { %p86_p0 = scmp.eq.s32.totalorder %s85_s17, 0  ;;  %p98_p1 = scmp.ne.s32.totalorder %s985_s13, %s981_s12 }
   0x5   : > { %p99_p2 = scmp.eq.s32.totalorder %s1056_s15, 1  ;;  %p686_p3 = scmp.ge.s32.totalorder %s989_s14, 1 }
   0x6   : > { %s1066_s19 = scalar_select %p86_p0, %s985_s13, %s88_s18  }
   0x7   : > { %p1068_p4 = por %p99_p2, %p98_p1  ;;  %p149_p5 = scmp.lt.s32.totalorder %s989_s14, 3 }
   0x9   : > { %p150_p6 = pnand %p686_p3, %p149_p5 }
   0xa   : > { %s1100_s14 = sshll.u32 (!%p150_p6), %s1056_s15, 1 }
   0xb   : > { %153 = sbr.rel (%p150_p6) target bundleno = 234 (0xea), region = 32  ;;  %p184_p7 = scmp.lt.s32.totalorder (!%p150_p6), %s1100_s14, 2 }
  0x10   : > { %v825_v0 = vld [vmem:[%s1202_s1 + $0x38] sm:$0xff]  ;;  %v824_v3 = vld [vmem:[%s1202_s1 + $0x30] sm:$0xff]  ;;  %v823_v6 = vld [vmem:[%s1202_s1 + $0x28] sm:$0xff]  ;;  %s185_s29 = scalar_select %p184_p7, %s1100_s14, 2  ;;  %vm460_vm0 = vcmask 392192  }
  0x11   : > { %v833_v1 = vld [vmem:[%s1202_s1 + $0x78] sm:$0xff]  ;;  %416 = vmatpush.bf16.msra.mxu0 %v825_v0  ;;  %v832_v4 = vld [vmem:[%s1202_s1 + $0x70] sm:$0xff]  ;;  %v831_v7 = vld [vmem:[%s1202_s1 + $0x68] sm:$0xff]  ;;  %s842_s17 = sshll.u32 (%p1068_p4), %s1056_s15, 4 }
  0x12   : > { %v841_v2 = vld [vmem:[%s1202_s1 + $0xb8] sm:$0xff]  ;;  %430 = vmatpush.bf16.msra.mxu1 %v833_v1  ;;  %v840_v5 = vld [vmem:[%s1202_s1 + $0xb0] sm:$0xff]  ;;  %v839_v8 = vld [vmem:[%s1202_s1 + $0xa8] sm:$0xff]  ;;  %s845_s9 = smul.u32 12, %s185_s29  ;;  %s1167_s22 = scalar_lea.vmem (%p1068_p4), %s1204_s3, %s842_s17  }
  0x13   : > { %444 = vmatpush.bf16.msra.mxu2 %v841_v2  ;;  %v822_v9 = vld [vmem:[%s1202_s1 + $0x20] sm:$0xff]  ;;  %v821_v12 = vld [vmem:[%s1202_s1 + $0x18] sm:$0xff]  ;;  %v820_v15 = vld [vmem:[%s1202_s1 + $0x10] sm:$0xff] }
  0x14   : > { %v830_v10 = vld [vmem:[%s1202_s1 + $0x60] sm:$0xff]  ;;  %v829_v13 = vld [vmem:[%s1202_s1 + $0x58] sm:$0xff]  ;;  %v828_v16 = vld [vmem:[%s1202_s1 + $0x50] sm:$0xff]  ;;  %s188_s25 = scalar_lea.vmem %s1201_s0, %s845_s9  ;;  %s175_s9 = sand.u32 1, %s981_s12  }
  0x15   : > { %417 = vmatpush.bf16.msra.mxu0 %v824_v3  ;;  %v838_v11 = vld [vmem:[%s1202_s1 + $0xa0] sm:$0xff]  ;;  %v837_v14 = vld [vmem:[%s1202_s1 + $0x98] sm:$0xff]  ;;  %v836_v17 = vld [vmem:[%s1202_s1 + $0x90] sm:$0xff]  ;;  %s687_s10 = sshll.u32 %s175_s9, 4  ;;  %s471_s12 = ssub.s32 (%p1068_p4), 3, %s1100_s14 }
  0x16   : > { %431 = vmatpush.bf16.msra.mxu1 %v832_v4  ;;  %v819_v18 = vld [vmem:[%s1202_s1 + $0x8] sm:$0xff]  ;;  %v818_v21 = vld [vmem:[%s1202_s1] sm:$0xff]  ;;  %v694_v26 = vld [vmem:[%s188_s25 + $0xc] sm:$0xf0]  ;;  %s1156_s11 = scalar_lea.vmem [#allocation2], %s687_s10   ;;  %p472_p8 = scmp.lt.s32.totalorder (%p1068_p4), %s471_s12, 2 }
  0x17   : > { %445 = vmatpush.bf16.msra.mxu2 %v840_v5  ;;  %v827_v19 = vld [vmem:[%s1202_s1 + $0x48] sm:$0xff]  ;;  %v826_v22 = vld [vmem:[%s1202_s1 + $0x40] sm:$0xff]  ;;  %v817_v29 = vld [vmem:[%s188_s25 + $0x10] sm:$0xf0] }
  0x18   : > { %v835_v20 = vld [vmem:[%s1202_s1 + $0x88] sm:$0xff]  ;;  %v692_v23 = vld [vmem:[%s188_s25] sm:$0xf]  ;;  %v815_v25 = vld [vmem:[%s188_s25 + $0x4] sm:$0xf] }
  0x19   : > { %418 = vmatpush.bf16.msra.mxu0 %v823_v6  ;;  %v816_v24 = vld [vmem:[%s188_s25 + $0x8] sm:$0xf0]  ;;  %v834_v27 = vld [vmem:[%s1202_s1 + $0x80] sm:$0xff]  ;;  %v700_v28 = vld [vmem:[%s188_s25 + $0x8] sm:$0xf]  ;;  %v697_v31 = vor.u32 %v815_v25, %v694_v26 }
  0x1a   : > { %432 = vmatpush.bf16.msra.mxu1 %v831_v7  ;;  %v693_v30 = vor.u32 %v816_v24, %v692_v23  ;;  %v701_v32 = vor.u32 %v817_v29, %v700_v28  ;;  %v934_v33 = vld [vmem:[%s1203_s2] ss:$0 sm:$0xff] }
  0x1b   : > { %446 = vmatpush.bf16.msra.mxu2 %v839_v8 }
  0x1d   : > { %419 = vmatpush.bf16.msra.mxu0 %v822_v9 }
  0x1e   : > { %433 = vmatpush.bf16.msra.mxu1 %v830_v10 }
  0x1f   : > { %447 = vmatpush.bf16.msra.mxu2 %v838_v11 }
  0x21   : > { %420 = vmatpush.bf16.msra.mxu0 %v821_v12 }
  0x22   : > { %434 = vmatpush.bf16.msra.mxu1 %v829_v13 }
  0x23   : > { %448 = vmatpush.bf16.msra.mxu2 %v837_v14 }
  0x25   : > { %421 = vmatpush.bf16.msra.mxu0 %v820_v15 }
  0x26   : > { %435 = vmatpush.bf16.msra.mxu1 %v828_v16 }
  0x27   : > { %449 = vmatpush.bf16.msra.mxu2 %v836_v17 }
  0x29   : > { %422 = vmatpush.bf16.msra.mxu0 %v819_v18 }
  0x2a   : > { %436 = vmatpush.bf16.msra.mxu1 %v827_v19 }
  0x2b   : > { %450 = vmatpush.bf16.msra.mxu2 %v835_v20 }
  0x2d   : > { %423 = vmatpush.bf16.msra.mxu0 %v818_v21 }
  0x2e   : > { %437 = vmatpush.bf16.msra.mxu1 %v826_v22 }
  0x2f   : > { %451 = vmatpush.bf16.msra.mxu2 %v834_v27 }
  0x30   : > { %424 = vmatmul.bf16.vlgmr.msra.gmra.mxu0 %v693_v30 }
  0x31   : > { %438 = vmatmul.bf16.vlgmr.msra.gmra.mxu1 %v697_v31 }
  0x32   : > { %452 = vmatmul.bf16.vlgmr.msra.gmra.mxu2 %v701_v32 }
  0xad   : > { %v425_v34 = vpop.f32.mrf.mxu0 }
  0xae   : > { %v426_v35 = vadd.f32 %v934_v33, %v425_v34  ;;  %v439_v36 = vpop.f32.mrf.mxu1 }
  0xb0   : > { %v440_v37 = vadd.f32 %v439_v36, %v426_v35 }
  0xb5   : > { %v453_v38 = vpop.f32.mrf.mxu2  ;;  %v427_v40 = vpop.f32.mrf.mxu0 }
  0xb6   : > { %v454_v39 = vadd.f32 %v453_v38, %v440_v37  ;;  %v428_v42 = vadd.f32 %v934_v33, %v427_v40  ;;  %v441_v43 = vpop.f32.mrf.mxu1 }
  0xb8   : > { %v458_v41 = vmax.f32 %v454_v39, 0.0  ;;  %v442_v44 = vadd.f32 %v441_v43, %v428_v42 }
  0xba   : > { %461 = vst.msk [vmem:[%s1156_s11] sm:$0xff] %vm460_vm0, %v458_v41 }
  0xbd   : > { %v455_v45 = vpop.f32.mrf.mxu2 }
  0xbe   : > { %v456_v46 = vadd.f32 %v455_v45, %v442_v44  ;;  %469 = sbr.rel (!%p1068_p4) target bundleno = 234 (0xea), region = 36 }
  0xc0   : > { %v459_v47 = vmax.f32 %v456_v46, 0.0 }
  0xc2   : > { %462 = vst.msk [vmem:[%s1156_s11 + $0x8] sm:$0xff] %vm460_vm0, %v459_v47 }
  0xc3   : > { %s1210_s12 = smov (!%p472_p8, %s471_s12), 2 }
  0xc4   : > { %s800_s23 = sshll.u32 %s1210_s12, 3 }
  0xc5   : > { %p803_p9 = scmp.eq.s32.totalorder %s800_s23, 0 }
  0xc6   : > { %s1173_s24 = sshrl.u32 (!%p803_p9), %s1210_s12, 1 }
  0xc7   : > { %480 = sbr.rel (%p803_p9) target bundleno = 234 (0xea), region = 40  ;;  %p804_p10 = scmp.le.s32.totalorder (!%p803_p9), %s1173_s24, 0 }
  0xcc   : > { %639 = sbr.rel (%p804_p10) target bundleno = 217 (0xd9), region = 116  ;;  %s991_s15 = smov (!%p804_p10), %s1167_s22  }
  0xcd   : > { %s995_s20 = smov (!%p804_p10), %s1156_s11   ;;  %s999_s14 = smov (!%p804_p10), 0  }
  0xce   : > { %s1003_s25 = smov (!%p804_p10), 0  }
  0xd1 LB: >> { %v545_v48 = vld [vmem:[%s997_s20] sm:$0xff]  ;;  %v547_v49 = vld [vmem:[%s997_s20 + $0x8] sm:$0xff]  ;;  %s549_s26 = sadd.s32 1, %s1001_s14  ;;  %s539_s25 = sadd.s32 1, %s1005_s25   ;;  %s1005_s25 = sphi %s1003_s25, %s539_s25   ;;  %s1001_s14 = sphi %s999_s14, %s1000_s14   ;;  %s997_s20 = sphi %s995_s20, %s554_s20   ;;  %s993_s15 = sphi %s991_s15, %s555_s15  }
  0xd2   : >> { %546 = vst [vmem:[%s993_s15] sm:$0xff] %v545_v48  ;;  %p550_p11 = scmp.ge.s32.totalorder %s549_s26, %s1173_s24  ;;  %p538_p12 = scmp.ge.s32.totalorder %s539_s25, %s1173_s24 }
  0xd3   : >> { %548 = vst [vmem:[%s993_s15 + $0x8] sm:$0xff] %v547_v49 }
  0xd4   : >> { %s1212_s26 = smov (%p550_p11, %s549_s26), 0  ;;  %541 = sbr.rel (!%p538_p12) target bundleno = 209 (0xd1), region = 122 }
  0xd5   : >> { %s805_s27 = sshll.u32 %s1212_s26, 4  ;;  %s1000_s14 = smov %s1212_s26  }
  0xd6   : >> { %s554_s20 = scalar_lea.vmem %s1156_s11, %s805_s27 [#allocation2]   ;;  %s555_s15 = scalar_lea.vmem %s1167_s22, %s805_s27  }
  0xd9 PF: > { %s1183_s28 = sand.u32 1, %s1210_s12   ;;  %s843_s29 = sshll.u32 %s1173_s24, 4 }
  0xda   : > { %s560_s30 = scalar_lea.vmem %s1156_s11, %s843_s29 [#allocation2]   ;;  %s562_s4 = scalar_lea.vmem %s1167_s22, %s843_s29  }
  0xdb   : > { %p810_p13 = scmp.le.s32.totalorder %s1183_s28, 0 }
  0xdc   : > { %s1007_s5 = smov (!%p810_p13), %s562_s4   ;;  %s1011_s6 = smov (!%p810_p13), %s560_s30  }
  0xdd   : > { %653 = sbr.rel (%p810_p13) target bundleno = 234 (0xea), region = 127  ;;  %s1015_s7 = smov (!%p810_p13), 0  }
  0xde   : > { %s1019_s8 = smov (!%p810_p13), 0  }
  0xe2 LB: >> { %v572_v50 = vld [vmem:[%s1013_s6] sm:$0xff]  ;;  %s574_s9 = sadd.s32 1, %s1017_s7  ;;  %s566_s8 = sadd.s32 1, %s1021_s8   ;;  %s1021_s8 = sphi %s1019_s8, %s566_s8   ;;  %s1017_s7 = sphi %s1015_s7, %s1016_s7   ;;  %s1013_s6 = sphi %s1011_s6, %s579_s6   ;;  %s1009_s5 = sphi %s1007_s5, %s580_s5  }
  0xe3   : >> { %573 = vst [vmem:[%s1009_s5] sm:$0xff] %v572_v50  ;;  %p575_p0 = scmp.ge.s32.totalorder %s574_s9, %s1183_s28  ;;  %p565_p1 = scmp.ge.s32.totalorder %s566_s8, %s1183_s28 }
  0xe5   : >> { %s1214_s9 = smov (%p575_p0, %s574_s9), 0  ;;  %568 = sbr.rel (!%p565_p1) target bundleno = 226 (0xe2), region = 133 }
  0xe6   : >> { %s811_s10 = sshll.u32 %s1214_s9, 3  ;;  %s1016_s7 = smov %s1214_s9  }
  0xe7   : >> { %s579_s6 = scalar_lea.vmem %s560_s30, %s811_s10 [#allocation2]   ;;  %s580_s5 = scalar_lea.vmem %s562_s4, %s811_s10  }
  0xea PF: > { %p10_p2 = scmp.ge.s32.totalorder %s1058_s16, 4   ;;  %s1206_s12 = smov %s985_s13 }
  0xeb   : > { %s1207_s13 = smov %s1066_s19  ;;  %s1208_s14 = smov %s1058_s16 }
  0xec   :  { %12 = sbr.rel (!%p10_p2) target bundleno = 2 (0x2), region = 144 }

// kernel: squeezenet_forward.36
= control target key start
LH: loop header
LB: loop body
LE: loop exit
PB: predicated region body
PF: predicated region fallthrough
CT: control target
= control target key end

     0   :  { %s1043_s12 = smov 0   ;;  %s1045_s13 = smov 0   ;;  %s1201_s0 = inlined_call_operand.vmem [shape: bf16[18,384], index: 0, kind: input, shape index: {}]   ;;  %s1202_s1 = inlined_call_operand.vmem [shape: bf16[384,64], index: 1, kind: input, shape index: {}]   ;;  %s1203_s2 = inlined_call_operand.vmem [shape: f32[1,64], index: 2, kind: input, shape index: {}]   ;;  %s1204_s3 = inlined_call_operand.vmem [shape: f32[18,64], index: 3, kind: output, shape index: {}]  }
   0x1   :  { %s1047_s14 = smov 0  }
   0x2 LB: > { %s1056_s15 = sadd.s32 4294967295, %s989_s14   ;;  %s1058_s16 = sadd.s32 1, %s989_s14   ;;  %s989_s14 = sphi %s1047_s14, %s1208_s14   ;;  %s985_s13 = sphi %s1045_s13, %s1207_s13   ;;  %s981_s12 = sphi %s1043_s12, %s1206_s12  }
   0x3   : > { %s85_s17 = ssub.s32 %s989_s14, %s1058_s16  ;;  %s88_s18 = sadd.s32 1, %s985_s13 }
   0x4   : > { %p86_p0 = scmp.eq.s32.totalorder %s85_s17, 0  ;;  %p98_p1 = scmp.ne.s32.totalorder %s985_s13, %s981_s12 }
   0x5   : > { %p99_p2 = scmp.eq.s32.totalorder %s1056_s15, 1  ;;  %p686_p3 = scmp.ge.s32.totalorder %s989_s14, 1 }
   0x6   : > { %s1066_s19 = scalar_select %p86_p0, %s985_s13, %s88_s18  }
   0x7   : > { %p1068_p4 = por %p99_p2, %p98_p1  ;;  %p149_p5 = scmp.lt.s32.totalorder %s989_s14, 3 }
   0x9   : > { %p150_p6 = pnand %p686_p3, %p149_p5 }
   0xa   : > { %s1100_s14 = sshll.u32 (!%p150_p6), %s1056_s15, 1 }
   0xb   : > { %153 = sbr.rel (%p150_p6) target bundleno = 234 (0xea), region = 32  ;;  %p184_p7 = scmp.lt.s32.totalorder (!%p150_p6), %s1100_s14, 2 }
  0x10   : > { %v825_v0 = vld [vmem:[%s1202_s1 + $0x38] sm:$0xff]  ;;  %v824_v3 = vld [vmem:[%s1202_s1 + $0x30] sm:$0xff]  ;;  %v823_v6 = vld [vmem:[%s1202_s1 + $0x28] sm:$0xff]  ;;  %s185_s29 = scalar_select %p184_p7, %s1100_s14, 2  ;;  %vm460_vm0 = vcmask 523264  }
  0x11   : > { %v833_v1 = vld [vmem:[%s1202_s1 + $0x78] sm:$0xff]  ;;  %416 = vmatpush.bf16.msra.mxu0 %v825_v0  ;;  %v832_v4 = vld [vmem:[%s1202_s1 + $0x70] sm:$0xff]  ;;  %v831_v7 = vld [vmem:[%s1202_s1 + $0x68] sm:$0xff]  ;;  %s842_s17 = sshll.u32 (%p1068_p4), %s1056_s15, 4 }
  0x12   : > { %v841_v2 = vld [vmem:[%s1202_s1 + $0xb8] sm:$0xff]  ;;  %430 = vmatpush.bf16.msra.mxu1 %v833_v1  ;;  %v840_v5 = vld [vmem:[%s1202_s1 + $0xb0] sm:$0xff]  ;;  %v839_v8 = vld [vmem:[%s1202_s1 + $0xa8] sm:$0xff]  ;;  %s845_s9 = smul.u32 12, %s185_s29  ;;  %s1167_s22 = scalar_lea.vmem (%p1068_p4), %s1204_s3, %s842_s17  }
  0x13   : > { %444 = vmatpush.bf16.msra.mxu2 %v841_v2  ;;  %v822_v9 = vld [vmem:[%s1202_s1 + $0x20] sm:$0xff]  ;;  %v821_v12 = vld [vmem:[%s1202_s1 + $0x18] sm:$0xff]  ;;  %v820_v15 = vld [vmem:[%s1202_s1 + $0x10] sm:$0xff] }
  0x14   : > { %v830_v10 = vld [vmem:[%s1202_s1 + $0x60] sm:$0xff]  ;;  %v829_v13 = vld [vmem:[%s1202_s1 + $0x58] sm:$0xff]  ;;  %v828_v16 = vld [vmem:[%s1202_s1 + $0x50] sm:$0xff]  ;;  %s188_s25 = scalar_lea.vmem %s1201_s0, %s845_s9  ;;  %s175_s9 = sand.u32 1, %s981_s12  }
  0x15   : > { %417 = vmatpush.bf16.msra.mxu0 %v824_v3  ;;  %v838_v11 = vld [vmem:[%s1202_s1 + $0xa0] sm:$0xff]  ;;  %v837_v14 = vld [vmem:[%s1202_s1 + $0x98] sm:$0xff]  ;;  %v836_v17 = vld [vmem:[%s1202_s1 + $0x90] sm:$0xff]  ;;  %s687_s10 = sshll.u32 %s175_s9, 4  ;;  %s471_s12 = ssub.s32 (%p1068_p4), 3, %s1100_s14 }
  0x16   : > { %431 = vmatpush.bf16.msra.mxu1 %v832_v4  ;;  %v819_v18 = vld [vmem:[%s1202_s1 + $0x8] sm:$0xff]  ;;  %v818_v21 = vld [vmem:[%s1202_s1] sm:$0xff]  ;;  %v694_v26 = vld [vmem:[%s188_s25 + $0xc] sm:$0xf0]  ;;  %s1156_s11 = scalar_lea.vmem [#allocation2], %s687_s10   ;;  %p472_p8 = scmp.lt.s32.totalorder (%p1068_p4), %s471_s12, 2 }
  0x17   : > { %445 = vmatpush.bf16.msra.mxu2 %v840_v5  ;;  %v827_v19 = vld [vmem:[%s1202_s1 + $0x48] sm:$0xff]  ;;  %v826_v22 = vld [vmem:[%s1202_s1 + $0x40] sm:$0xff]  ;;  %v817_v29 = vld [vmem:[%s188_s25 + $0x10] sm:$0xf0] }
  0x18   : > { %v835_v20 = vld [vmem:[%s1202_s1 + $0x88] sm:$0xff]  ;;  %v692_v23 = vld [vmem:[%s188_s25] sm:$0xf]  ;;  %v815_v25 = vld [vmem:[%s188_s25 + $0x4] sm:$0xf] }
  0x19   : > { %418 = vmatpush.bf16.msra.mxu0 %v823_v6  ;;  %v816_v24 = vld [vmem:[%s188_s25 + $0x8] sm:$0xf0]  ;;  %v834_v27 = vld [vmem:[%s1202_s1 + $0x80] sm:$0xff]  ;;  %v700_v28 = vld [vmem:[%s188_s25 + $0x8] sm:$0xf]  ;;  %v697_v31 = vor.u32 %v815_v25, %v694_v26 }
  0x1a   : > { %432 = vmatpush.bf16.msra.mxu1 %v831_v7  ;;  %v693_v30 = vor.u32 %v816_v24, %v692_v23  ;;  %v701_v32 = vor.u32 %v817_v29, %v700_v28  ;;  %v934_v33 = vld [vmem:[%s1203_s2] ss:$0 sm:$0xff] }
  0x1b   : > { %446 = vmatpush.bf16.msra.mxu2 %v839_v8 }
  0x1d   : > { %419 = vmatpush.bf16.msra.mxu0 %v822_v9 }
  0x1e   : > { %433 = vmatpush.bf16.msra.mxu1 %v830_v10 }
  0x1f   : > { %447 = vmatpush.bf16.msra.mxu2 %v838_v11 }
  0x21   : > { %420 = vmatpush.bf16.msra.mxu0 %v821_v12 }
  0x22   : > { %434 = vmatpush.bf16.msra.mxu1 %v829_v13 }
  0x23   : > { %448 = vmatpush.bf16.msra.mxu2 %v837_v14 }
  0x25   : > { %421 = vmatpush.bf16.msra.mxu0 %v820_v15 }
  0x26   : > { %435 = vmatpush.bf16.msra.mxu1 %v828_v16 }
  0x27   : > { %449 = vmatpush.bf16.msra.mxu2 %v836_v17 }
  0x29   : > { %422 = vmatpush.bf16.msra.mxu0 %v819_v18 }
  0x2a   : > { %436 = vmatpush.bf16.msra.mxu1 %v827_v19 }
  0x2b   : > { %450 = vmatpush.bf16.msra.mxu2 %v835_v20 }
  0x2d   : > { %423 = vmatpush.bf16.msra.mxu0 %v818_v21 }
  0x2e   : > { %437 = vmatpush.bf16.msra.mxu1 %v826_v22 }
  0x2f   : > { %451 = vmatpush.bf16.msra.mxu2 %v834_v27 }
  0x30   : > { %424 = vmatmul.bf16.vlgmr.msra.gmra.mxu0 %v693_v30 }
  0x31   : > { %438 = vmatmul.bf16.vlgmr.msra.gmra.mxu1 %v697_v31 }
  0x32   : > { %452 = vmatmul.bf16.vlgmr.msra.gmra.mxu2 %v701_v32 }
  0xad   : > { %v425_v34 = vpop.f32.mrf.mxu0 }
  0xae   : > { %v426_v35 = vadd.f32 %v934_v33, %v425_v34  ;;  %v439_v36 = vpop.f32.mrf.mxu1 }
  0xb0   : > { %v440_v37 = vadd.f32 %v439_v36, %v426_v35 }
  0xb5   : > { %v453_v38 = vpop.f32.mrf.mxu2  ;;  %v427_v40 = vpop.f32.mrf.mxu0 }
  0xb6   : > { %v454_v39 = vadd.f32 %v453_v38, %v440_v37  ;;  %v428_v42 = vadd.f32 %v934_v33, %v427_v40  ;;  %v441_v43 = vpop.f32.mrf.mxu1 }
  0xb8   : > { %v458_v41 = vmax.f32 %v454_v39, 0.0  ;;  %v442_v44 = vadd.f32 %v441_v43, %v428_v42 }
  0xba   : > { %461 = vst.msk [vmem:[%s1156_s11] sm:$0xff] %vm460_vm0, %v458_v41 }
  0xbd   : > { %v455_v45 = vpop.f32.mrf.mxu2 }
  0xbe   : > { %v456_v46 = vadd.f32 %v455_v45, %v442_v44  ;;  %469 = sbr.rel (!%p1068_p4) target bundleno = 234 (0xea), region = 36 }
  0xc0   : > { %v459_v47 = vmax.f32 %v456_v46, 0.0 }
  0xc2   : > { %462 = vst.msk [vmem:[%s1156_s11 + $0x8] sm:$0xff] %vm460_vm0, %v459_v47 }
  0xc3   : > { %s1210_s12 = smov (!%p472_p8, %s471_s12), 2 }
  0xc4   : > { %s800_s23 = sshll.u32 %s1210_s12, 3 }
  0xc5   : > { %p803_p9 = scmp.eq.s32.totalorder %s800_s23, 0 }
  0xc6   : > { %s1173_s24 = sshrl.u32 (!%p803_p9), %s1210_s12, 1 }
  0xc7   : > { %480 = sbr.rel (%p803_p9) target bundleno = 234 (0xea), region = 40  ;;  %p804_p10 = scmp.le.s32.totalorder (!%p803_p9), %s1173_s24, 0 }
  0xcc   : > { %639 = sbr.rel (%p804_p10) target bundleno = 217 (0xd9), region = 116  ;;  %s991_s15 = smov (!%p804_p10), %s1167_s22  }
  0xcd   : > { %s995_s20 = smov (!%p804_p10), %s1156_s11   ;;  %s999_s14 = smov (!%p804_p10), 0  }
  0xce   : > { %s1003_s25 = smov (!%p804_p10), 0  }
  0xd1 LB: >> { %v545_v48 = vld [vmem:[%s997_s20] sm:$0xff]  ;;  %v547_v49 = vld [vmem:[%s997_s20 + $0x8] sm:$0xff]  ;;  %s549_s26 = sadd.s32 1, %s1001_s14  ;;  %s539_s25 = sadd.s32 1, %s1005_s25   ;;  %s1005_s25 = sphi %s1003_s25, %s539_s25   ;;  %s1001_s14 = sphi %s999_s14, %s1000_s14   ;;  %s997_s20 = sphi %s995_s20, %s554_s20   ;;  %s993_s15 = sphi %s991_s15, %s555_s15  }
  0xd2   : >> { %546 = vst [vmem:[%s993_s15] sm:$0xff] %v545_v48  ;;  %p550_p11 = scmp.ge.s32.totalorder %s549_s26, %s1173_s24  ;;  %p538_p12 = scmp.ge.s32.totalorder %s539_s25, %s1173_s24 }
  0xd3   : >> { %548 = vst [vmem:[%s993_s15 + $0x8] sm:$0xff] %v547_v49 }
  0xd4   : >> { %s1212_s26 = smov (%p550_p11, %s549_s26), 0  ;;  %541 = sbr.rel (!%p538_p12) target bundleno = 209 (0xd1), region = 122 }
  0xd5   : >> { %s805_s27 = sshll.u32 %s1212_s26, 4  ;;  %s1000_s14 = smov %s1212_s26  }
  0xd6   : >> { %s554_s20 = scalar_lea.vmem %s1156_s11, %s805_s27 [#allocation2]   ;;  %s555_s15 = scalar_lea.vmem %s1167_s22, %s805_s27  }
  0xd9 PF: > { %s1183_s28 = sand.u32 1, %s1210_s12   ;;  %s843_s29 = sshll.u32 %s1173_s24, 4 }
  0xda   : > { %s560_s30 = scalar_lea.vmem %s1156_s11, %s843_s29 [#allocation2]   ;;  %s562_s4 = scalar_lea.vmem %s1167_s22, %s843_s29  }
  0xdb   : > { %p810_p13 = scmp.le.s32.totalorder %s1183_s28, 0 }
  0xdc   : > { %s1007_s5 = smov (!%p810_p13), %s562_s4   ;;  %s1011_s6 = smov (!%p810_p13), %s560_s30  }
  0xdd   : > { %653 = sbr.rel (%p810_p13) target bundleno = 234 (0xea), region = 127  ;;  %s1015_s7 = smov (!%p810_p13), 0  }
  0xde   : > { %s1019_s8 = smov (!%p810_p13), 0  }
  0xe2 LB: >> { %v572_v50 = vld [vmem:[%s1013_s6] sm:$0xff]  ;;  %s574_s9 = sadd.s32 1, %s1017_s7  ;;  %s566_s8 = sadd.s32 1, %s1021_s8   ;;  %s1021_s8 = sphi %s1019_s8, %s566_s8   ;;  %s1017_s7 = sphi %s1015_s7, %s1016_s7   ;;  %s1013_s6 = sphi %s1011_s6, %s579_s6   ;;  %s1009_s5 = sphi %s1007_s5, %s580_s5  }
  0xe3   : >> { %573 = vst [vmem:[%s1009_s5] sm:$0xff] %v572_v50  ;;  %p575_p0 = scmp.ge.s32.totalorder %s574_s9, %s1183_s28  ;;  %p565_p1 = scmp.ge.s32.totalorder %s566_s8, %s1183_s28 }
  0xe5   : >> { %s1214_s9 = smov (%p575_p0, %s574_s9), 0  ;;  %568 = sbr.rel (!%p565_p1) target bundleno = 226 (0xe2), region = 133 }
  0xe6   : >> { %s811_s10 = sshll.u32 %s1214_s9, 3  ;;  %s1016_s7 = smov %s1214_s9  }
  0xe7   : >> { %s579_s6 = scalar_lea.vmem %s560_s30, %s811_s10 [#allocation2]   ;;  %s580_s5 = scalar_lea.vmem %s562_s4, %s811_s10  }
  0xea PF: > { %p10_p2 = scmp.ge.s32.totalorder %s1058_s16, 4   ;;  %s1206_s12 = smov %s985_s13 }
  0xeb   : > { %s1207_s13 = smov %s1066_s19  ;;  %s1208_s14 = smov %s1058_s16 }
  0xec   :  { %12 = sbr.rel (!%p10_p2) target bundleno = 2 (0x2), region = 144 }

// kernel: squeezenet_forward.33
= control target key start
LH: loop header
LB: loop body
LE: loop exit
PB: predicated region body
PF: predicated region fallthrough
CT: control target
= control target key end

     0   :  { %s1775_s12 = smov 0   ;;  %s1777_s13 = smov 0   ;;  %s2407_s0 = inlined_call_operand.vmem [shape: bf16[18,432], index: 0, kind: input, shape index: {}]   ;;  %s2408_s1 = inlined_call_operand.vmem [shape: bf16[432,384], index: 1, kind: input, shape index: {}]   ;;  %s2409_s2 = inlined_call_operand.vmem [shape: f32[1,384], index: 2, kind: input, shape index: {}]   ;;  %s2410_s3 = inlined_call_operand.vmem [shape: f32[18,384], index: 3, kind: output, shape index: {}]  }
   0x1   :  { %s1779_s14 = smov 0  }
   0x2 LB: > { %s1788_s15 = sadd.s32 4294967295, %s1721_s14   ;;  %s1790_s16 = sadd.s32 1, %s1721_s14   ;;  %s1721_s14 = sphi %s1779_s14, %s2418_s14   ;;  %s1717_s13 = sphi %s1777_s13, %s2417_s13   ;;  %s1713_s12 = sphi %s1775_s12, %s2416_s12  }
   0x3   : > { %s85_s17 = ssub.s32 %s1721_s14, %s1790_s16  ;;  %s88_s18 = sadd.s32 1, %s1717_s13 }
   0x4   : > { %p86_p0 = scmp.eq.s32.totalorder %s85_s17, 0  ;;  %p98_p1 = scmp.ne.s32.totalorder %s1717_s13, %s1713_s12 }
   0x5   : > { %p99_p2 = scmp.eq.s32.totalorder %s1788_s15, 1  ;;  %p1130_p3 = scmp.ge.s32.totalorder %s1721_s14, 1 }
   0x6   : > { %s1798_s19 = scalar_select %p86_p0, %s1717_s13, %s88_s18  }
   0x7   : > { %p1800_p4 = por %p99_p2, %p98_p1  ;;  %p149_p5 = scmp.lt.s32.totalorder %s1721_s14, 3 }
   0x9   : > { %p150_p6 = pnand %p1130_p3, %p149_p5 }
   0xa   : > { %s2009_s4 = sshll.u32 (!%p150_p6), %s1788_s15, 1  ;;  %s175_s26 = sand.u32 (!%p150_p6), 1, %s1713_s12  }
   0xb   : > { %153 = sbr.rel (%p150_p6) target bundleno = 294 (0x126), region = 32  ;;  %p184_p7 = scmp.lt.s32.totalorder (!%p150_p6), %s2009_s4, 2 }
   0xc   : > { %s1577_s27 = smul.u32 (!%p150_p6), 48, %s175_s26 }
   0xe   : > { %s2325_s28 = scalar_lea.vmem (!%p150_p6), [#allocation2], %s1577_s27  }
  0x10   : > { %v1236_v0 = vld [vmem:[%s2408_s1 + $0xa8] sm:$0xf]  ;;  %v1518_v1 = vld [vmem:[%s2408_s1 + $0xb0] sm:$0xf0]  ;;  %v1464_v5 = vld [vmem:[%s2408_s1 + $0x270] sm:$0xf] }
  0x11   : > { %v1332_v2 = vld [vmem:[%s2408_s1 + $0x168] sm:$0xf]  ;;  %v1237_v3 = vor.u32 %v1518_v1, %v1236_v0  ;;  %v1542_v4 = vld [vmem:[%s2408_s1 + $0x170] sm:$0xf0]  ;;  %v1575_v6 = vld [vmem:[%s2408_s1 + $0x278] sm:$0xf0] }
  0x12   : > { %v1333_v7 = vor.u32 %v1542_v4, %v1332_v2  ;;  %v1465_v8 = vor.u32 %v1575_v6, %v1464_v5  ;;  %v1224_v9 = vld [vmem:[%s2408_s1 + $0x90] sm:$0xf]  ;;  %v1515_v10 = vld [vmem:[%s2408_s1 + $0x98] sm:$0xf0]  ;;  %v1428_v11 = vld [vmem:[%s2408_s1 + $0x228] sm:$0xf] }
  0x13   : > { %777 = vmatpush.bf16.msra.mxu0 %v1237_v3  ;;  %v1225_v12 = vor.u32 %v1515_v10, %v1224_v9  ;;  %v1566_v13 = vld [vmem:[%s2408_s1 + $0x230] sm:$0xf0]  ;;  %v1320_v14 = vld [vmem:[%s2408_s1 + $0x150] sm:$0xf]  ;;  %v1539_v15 = vld [vmem:[%s2408_s1 + $0x158] sm:$0xf0] }
  0x14   : > { %791 = vmatpush.bf16.msra.mxu1 %v1333_v7  ;;  %824 = vmatpush.bf16.msra.mxu3 %v1465_v8  ;;  %v1429_v16 = vor.u32 %v1566_v13, %v1428_v11  ;;  %v1321_v17 = vor.u32 %v1539_v15, %v1320_v14  ;;  %v1452_v18 = vld [vmem:[%s2408_s1 + $0x258] sm:$0xf]  ;;  %v1572_v19 = vld [vmem:[%s2408_s1 + $0x260] sm:$0xf0]  ;;  %v1416_v23 = vld [vmem:[%s2408_s1 + $0x210] sm:$0xf] }
  0x15   : > { %v1212_v20 = vld [vmem:[%s2408_s1 + $0x78] sm:$0xf]  ;;  %v1453_v21 = vor.u32 %v1572_v19, %v1452_v18  ;;  %v1512_v22 = vld [vmem:[%s2408_s1 + $0x80] sm:$0xf0]  ;;  %v1563_v24 = vld [vmem:[%s2408_s1 + $0x218] sm:$0xf0] }
  0x16   : > { %805 = vmatpush.bf16.msra.mxu2 %v1429_v16  ;;  %v1417_v25 = vor.u32 %v1563_v24, %v1416_v23  ;;  %v1308_v26 = vld [vmem:[%s2408_s1 + $0x138] sm:$0xf]  ;;  %v1536_v27 = vld [vmem:[%s2408_s1 + $0x140] sm:$0xf0]  ;;  %v1440_v28 = vld [vmem:[%s2408_s1 + $0x240] sm:$0xf]  ;;  %v1213_v29 = vor.u32 %v1512_v22, %v1212_v20 }
  0x17   : > { %778 = vmatpush.bf16.msra.mxu0 %v1225_v12  ;;  %v1569_v30 = vld [vmem:[%s2408_s1 + $0x248] sm:$0xf0]  ;;  %v1238_v32 = vld [vmem:[%s2408_s1 + $0xb4] sm:$0xf0]  ;;  %v1309_v33 = vor.u32 %v1536_v27, %v1308_v26  ;;  %v1200_v35 = vld [vmem:[%s2408_s1 + $0x60] sm:$0xf] }
  0x18   : > { %v1517_v31 = vld [vmem:[%s2408_s1 + $0xac] sm:$0xf]  ;;  %792 = vmatpush.bf16.msra.mxu1 %v1321_v17  ;;  %825 = vmatpush.bf16.msra.mxu3 %v1453_v21  ;;  %v1441_v34 = vor.u32 %v1569_v30, %v1440_v28  ;;  %v1404_v37 = vld [vmem:[%s2408_s1 + $0x1f8] sm:$0xf]  ;;  %v1560_v39 = vld [vmem:[%s2408_s1 + $0x200] sm:$0xf0] }
  0x19   : > { %v1509_v36 = vld [vmem:[%s2408_s1 + $0x68] sm:$0xf0]  ;;  %v1241_v38 = vor.u32 %v1517_v31, %v1238_v32  ;;  %v1296_v40 = vld [vmem:[%s2408_s1 + $0x120] sm:$0xf]  ;;  %v1405_v42 = vor.u32 %v1560_v39, %v1404_v37  ;;  %v1514_v43 = vld [vmem:[%s2408_s1 + $0x94] sm:$0xf] }
  0x1a   : > { %v1533_v41 = vld [vmem:[%s2408_s1 + $0x128] sm:$0xf0]  ;;  %806 = vmatpush.bf16.msra.mxu2 %v1417_v25  ;;  %v1226_v44 = vld [vmem:[%s2408_s1 + $0x9c] sm:$0xf0]  ;;  %v1201_v45 = vor.u32 %v1509_v36, %v1200_v35  ;;  %v1188_v49 = vld [vmem:[%s2408_s1 + $0x48] sm:$0xf] }
  0x1b   : > { %779 = vmatpush.bf16.msra.mxu0 %v1213_v29  ;;  %v1392_v46 = vld [vmem:[%s2408_s1 + $0x1e0] sm:$0xf]  ;;  %v1557_v47 = vld [vmem:[%s2408_s1 + $0x1e8] sm:$0xf0]  ;;  %v1297_v48 = vor.u32 %v1533_v41, %v1296_v40  ;;  %v1506_v50 = vld [vmem:[%s2408_s1 + $0x50] sm:$0xf0]  ;;  %v1229_v51 = vor.u32 %v1514_v43, %v1226_v44 }
  0x1c   : > { %793 = vmatpush.bf16.msra.mxu1 %v1309_v33  ;;  %826 = vmatpush.bf16.msra.mxu3 %v1441_v34  ;;  %v1284_v52 = vld [vmem:[%s2408_s1 + $0x108] sm:$0xf]  ;;  %v1530_v53 = vld [vmem:[%s2408_s1 + $0x110] sm:$0xf0]  ;;  %v1393_v54 = vor.u32 %v1557_v47, %v1392_v46  ;;  %v1511_v55 = vld [vmem:[%s2408_s1 + $0x7c] sm:$0xf]  ;;  %v1189_v57 = vor.u32 %v1506_v50, %v1188_v49 }
  0x1d   : > { %v1214_v56 = vld [vmem:[%s2408_s1 + $0x84] sm:$0xf0]  ;;  %v1554_v59 = vld [vmem:[%s2408_s1 + $0x1d0] sm:$0xf0]  ;;  %v1285_v60 = vor.u32 %v1530_v53, %v1284_v52  ;;  %v1176_v61 = vld [vmem:[%s2408_s1 + $0x30] sm:$0xf] }
  0x1e   : > { %807 = vmatpush.bf16.msra.mxu2 %v1405_v42  ;;  %v1380_v58 = vld [vmem:[%s2408_s1 + $0x1c8] sm:$0xf]  ;;  %v1503_v62 = vld [vmem:[%s2408_s1 + $0x38] sm:$0xf0]  ;;  %v1217_v63 = vor.u32 %v1511_v55, %v1214_v56  ;;  %v1272_v0 = vld [vmem:[%s2408_s1 + $0xf0] sm:$0xf] }
  0x1f   : > { %780 = vmatpush.bf16.msra.mxu0 %v1201_v45  ;;  %v1527_v1 = vld [vmem:[%s2408_s1 + $0xf8] sm:$0xf0]  ;;  %v1381_v2 = vor.u32 %v1554_v59, %v1380_v58  ;;  %v1508_v3 = vld [vmem:[%s2408_s1 + $0x64] sm:$0xf]  ;;  %v1202_v4 = vld [vmem:[%s2408_s1 + $0x6c] sm:$0xf0]  ;;  %v1177_v5 = vor.u32 %v1503_v62, %v1176_v61 }
  0x20   : > { %833 = vmatpush.bf16.msrb.mxu3 %v1241_v38  ;;  %794 = vmatpush.bf16.msra.mxu1 %v1297_v48  ;;  %v1368_v6 = vld [vmem:[%s2408_s1 + $0x1b0] sm:$0xf]  ;;  %v1551_v7 = vld [vmem:[%s2408_s1 + $0x1b8] sm:$0xf0]  ;;  %v1273_v8 = vor.u32 %v1527_v1, %v1272_v0  ;;  %v1164_v9 = vld [vmem:[%s2408_s1 + $0x18] sm:$0xf]  ;;  %v1205_v11 = vor.u32 %v1508_v3, %v1202_v4 }
  0x21   : > { %v1500_v10 = vld [vmem:[%s2408_s1 + $0x20] sm:$0xf0]  ;;  %v1260_v12 = vld [vmem:[%s2408_s1 + $0xd8] sm:$0xf]  ;;  %v1369_v14 = vor.u32 %v1551_v7, %v1368_v6  ;;  %v1505_v15 = vld [vmem:[%s2408_s1 + $0x4c] sm:$0xf] }
  0x22   : > { %808 = vmatpush.bf16.msra.mxu2 %v1393_v54  ;;  %v1524_v13 = vld [vmem:[%s2408_s1 + $0xe0] sm:$0xf0]  ;;  %v1190_v16 = vld [vmem:[%s2408_s1 + $0x54] sm:$0xf0]  ;;  %v1152_v17 = vld [vmem:[%s2408_s1] sm:$0xf]  ;;  %v1165_v18 = vor.u32 %v1500_v10, %v1164_v9 }
  0x23   : > { %781 = vmatpush.bf16.msra.mxu0 %v1189_v57  ;;  %v1497_v19 = vld [vmem:[%s2408_s1 + $0x8] sm:$0xf0]  ;;  %v1356_v20 = vld [vmem:[%s2408_s1 + $0x198] sm:$0xf]  ;;  %v1548_v21 = vld [vmem:[%s2408_s1 + $0x1a0] sm:$0xf0]  ;;  %v1261_v22 = vor.u32 %v1524_v13, %v1260_v12  ;;  %v1193_v26 = vor.u32 %v1505_v15, %v1190_v16 }
  0x24   : > { %834 = vmatpush.bf16.msrb.mxu3 %v1229_v51  ;;  %795 = vmatpush.bf16.msra.mxu1 %v1285_v60  ;;  %v1541_v23 = vld [vmem:[%s2408_s1 + $0x16c] sm:$0xf]  ;;  %v1334_v24 = vld [vmem:[%s2408_s1 + $0x174] sm:$0xf0]  ;;  %v1248_v25 = vld [vmem:[%s2408_s1 + $0xc0] sm:$0xf]  ;;  %v1357_v30 = vor.u32 %v1548_v21, %v1356_v20  ;;  %v1153_v33 = vor.u32 %v1497_v19, %v1152_v17 }
  0x25   : > { %v1521_v27 = vld [vmem:[%s2408_s1 + $0xc8] sm:$0xf0]  ;;  %v1502_v28 = vld [vmem:[%s2408_s1 + $0x34] sm:$0xf]  ;;  %v1178_v29 = vld [vmem:[%s2408_s1 + $0x3c] sm:$0xf0]  ;;  %v1337_v36 = vor.u32 %v1541_v23, %v1334_v24 }
  0x26   : > { %809 = vmatpush.bf16.msra.mxu2 %v1381_v2  ;;  %v1565_v31 = vld [vmem:[%s2408_s1 + $0x22c] sm:$0xf]  ;;  %v1430_v32 = vld [vmem:[%s2408_s1 + $0x234] sm:$0xf0]  ;;  %v1344_v34 = vld [vmem:[%s2408_s1 + $0x180] sm:$0xf]  ;;  %v1249_v37 = vor.u32 %v1521_v27, %v1248_v25  ;;  %v1181_v41 = vor.u32 %v1502_v28, %v1178_v29 }
  0x27   : > { %782 = vmatpush.bf16.msra.mxu0 %v1177_v5  ;;  %v1545_v35 = vld [vmem:[%s2408_s1 + $0x188] sm:$0xf0]  ;;  %v1538_v38 = vld [vmem:[%s2408_s1 + $0x154] sm:$0xf]  ;;  %v1466_v40 = vld [vmem:[%s2408_s1 + $0x27c] sm:$0xf0]  ;;  %v1433_v42 = vor.u32 %v1565_v31, %v1430_v32 }
  0x28   : > { %835 = vmatpush.bf16.msrb.mxu3 %v1217_v63  ;;  %796 = vmatpush.bf16.msra.mxu1 %v1273_v8  ;;  %v1574_v39 = vld [vmem:[%s2408_s1 + $0x274] sm:$0xf]  ;;  %v1322_v43 = vld [vmem:[%s2408_s1 + $0x15c] sm:$0xf0]  ;;  %v1499_v44 = vld [vmem:[%s2408_s1 + $0x1c] sm:$0xf]  ;;  %v1345_v45 = vor.u32 %v1545_v35, %v1344_v34 }
  0x29   : > { %s185_s25 = scalar_select %p184_p7, %s2009_s4, 2  ;;  %v1166_v46 = vld [vmem:[%s2408_s1 + $0x24] sm:$0xf0]  ;;  %v1562_v47 = vld [vmem:[%s2408_s1 + $0x214] sm:$0xf]  ;;  %v1469_v49 = vor.u32 %v1574_v39, %v1466_v40  ;;  %vm773_vm0 = vcmask 392192   ;;  %v1325_v54 = vor.u32 %v1538_v38, %v1322_v43 }
  0x2a   : > { %810 = vmatpush.bf16.msra.mxu2 %v1369_v14  ;;  %v1418_v48 = vld [vmem:[%s2408_s1 + $0x21c] sm:$0xf0]  ;;  %v1535_v50 = vld [vmem:[%s2408_s1 + $0x13c] sm:$0xf]  ;;  %v1310_v51 = vld [vmem:[%s2408_s1 + $0x144] sm:$0xf0]  ;;  %v1169_v59 = vor.u32 %v1499_v44, %v1166_v46 }
  0x2b   : > { %783 = vmatpush.bf16.msra.mxu0 %v1165_v18  ;;  %s1491_s6 = sshll.u32 %s185_s25, 4  ;;  %v1571_v52 = vld [vmem:[%s2408_s1 + $0x25c] sm:$0xf]  ;;  %v1454_v53 = vld [vmem:[%s2408_s1 + $0x264] sm:$0xf0]  ;;  %v1421_v60 = vor.u32 %v1562_v47, %v1418_v48  ;;  %s965_s12 = ssub.s32 (%p1800_p4), 3, %s2009_s4 }
  0x2c   : > { %836 = vmatpush.bf16.msrb.mxu3 %v1205_v11  ;;  %797 = vmatpush.bf16.msra.mxu1 %v1261_v22  ;;  %s188_s23 = scalar_lea.vmem %s2407_s0, %s1491_s6  ;;  %v1496_v55 = vld [vmem:[%s2408_s1 + $0x4] sm:$0xf]  ;;  %v1154_v56 = vld [vmem:[%s2408_s1 + $0xc] sm:$0xf0]  ;;  %v1559_v57 = vld [vmem:[%s2408_s1 + $0x1fc] sm:$0xf]  ;;  %v1457_v6 = vor.u32 %v1571_v52, %v1454_v53  ;;  %v1313_v11 = vor.u32 %v1535_v50, %v1310_v51 }
  0x2d   : > { %v1406_v58 = vld [vmem:[%s2408_s1 + $0x204] sm:$0xf0]  ;;  %v1493_v61 = vld [vmem:[%s188_s23 + $0xc] sm:$0xf]  ;;  %v1146_v62 = vld [vmem:[%s188_s23 + $0x18] sm:$0xf0]  ;;  %v1157_v16 = vor.u32 %v1496_v55, %v1154_v56 }
  0x2e   : > { %811 = vmatpush.bf16.msra.mxu2 %v1357_v30  ;;  %v1144_v63 = vld [vmem:[%s188_s23 + $0x8] sm:$0xf]  ;;  %v1244_v0 = vld [vmem:[%s2408_s1 + $0xb0] sm:$0xf]  ;;  %v2073_v1 = vor.u32 %v1493_v61, %v1146_v62  ;;  %v1495_v2 = vld [vmem:[%s188_s23 + $0x14] sm:$0xf0]  ;;  %v1409_v17 = vor.u32 %v1559_v57, %v1406_v58 }
  0x2f   : > { %784 = vmatpush.bf16.msra.mxu0 %v1153_v33  ;;  %v1136_v3 = vld [vmem:[%s188_s23] sm:$0xf]  ;;  %v1494_v4 = vld [vmem:[%s188_s23 + $0xc] sm:$0xf0]  ;;  %v2075_v5 = vor.u32 %v1495_v2, %v1144_v63  ;;  %v1519_v8 = vld [vmem:[%s2408_s1 + $0xb8] sm:$0xf0] }
  0x30   : > { %837 = vmatpush.bf16.msrb.mxu3 %v1193_v26  ;;  %798 = vmatpush.bf16.msra.mxu1 %v1249_v37  ;;  %v2077_v7 = vor.u32 %v1494_v4, %v1136_v3  ;;  %v1492_v9 = vld [vmem:[%s188_s23 + $0x4] sm:$0xf]  ;;  %v1138_v10 = vld [vmem:[%s188_s23 + $0x10] sm:$0xf0]  ;;  %v1442_v15 = vld [vmem:[%s2408_s1 + $0x24c] sm:$0xf0]  ;;  %v1245_v21 = vor.u32 %v1519_v8, %v1244_v0 }
  0x31   : > { %1474 = vmatmul.msk.bf16.vlgmr.msra.gmra.mxu3 %vm773_vm0, %v2073_v1  ;;  %v2084_v12 = vor.u32 %v1492_v9, %v1138_v10  ;;  %v1532_v13 = vld [vmem:[%s2408_s1 + $0x124] sm:$0xf]  ;;  %v1298_v18 = vld [vmem:[%s2408_s1 + $0x12c] sm:$0xf0]  ;;  %v1543_v20 = vld [vmem:[%s2408_s1 + $0x178] sm:$0xf0] }
  0x32   : > { %812 = vmatpush.bf16.msra.mxu2 %v1345_v45  ;;  %v1568_v14 = vld [vmem:[%s2408_s1 + $0x244] sm:$0xf]  ;;  %v1340_v19 = vld [vmem:[%s2408_s1 + $0x170] sm:$0xf]  ;;  %785 = vmatmul.bf16.vlgmr.msra.gmra.mxu0 %v2077_v7  ;;  %v1232_v25 = vld [vmem:[%s2408_s1 + $0x98] sm:$0xf]  ;;  %v1301_v27 = vor.u32 %v1532_v13, %v1298_v18 }
  0x33   : > { %847 = vmatpush.bf16.msrb.mxu0 %v1337_v36  ;;  %v1556_v22 = vld [vmem:[%s2408_s1 + $0x1e4] sm:$0xf]  ;;  %v1394_v23 = vld [vmem:[%s2408_s1 + $0x1ec] sm:$0xf0]  ;;  %799 = vmatmul.bf16.vlgmr.msra.gmra.mxu1 %v2084_v12  ;;  %v1445_v24 = vor.u32 %v1568_v14, %v1442_v15  ;;  %v1341_v28 = vor.u32 %v1543_v20, %v1340_v19  ;;  %v1529_v29 = vld [vmem:[%s2408_s1 + $0x10c] sm:$0xf] }
  0x34   : > { %838 = vmatpush.bf16.msrb.mxu3 %v1181_v41  ;;  %861 = vmatpush.bf16.msrb.mxu1 %v1433_v42  ;;  %v1516_v26 = vld [vmem:[%s2408_s1 + $0xa0] sm:$0xf0]  ;;  %v1397_v30 = vor.u32 %v1556_v22, %v1394_v23  ;;  %v1286_v31 = vld [vmem:[%s2408_s1 + $0x114] sm:$0xf0]  ;;  %v1553_v35 = vld [vmem:[%s2408_s1 + $0x1cc] sm:$0xf] }
  0x35   : > { %813 = vmatmul.bf16.vlgmr.msra.gmra.mxu2 %v2075_v5  ;;  %v1328_v32 = vld [vmem:[%s2408_s1 + $0x158] sm:$0xf]  ;;  %v1540_v33 = vld [vmem:[%s2408_s1 + $0x160] sm:$0xf0]  ;;  %v1233_v34 = vor.u32 %v1516_v26, %v1232_v25  ;;  %v1220_v37 = vld [vmem:[%s2408_s1 + $0x80] sm:$0xf]  ;;  %v1289_v39 = vor.u32 %v1529_v29, %v1286_v31 }
  0x36   : > { %880 = vmatpush.bf16.msrb.mxu2 %v1469_v49  ;;  %v1382_v36 = vld [vmem:[%s2408_s1 + $0x1d4] sm:$0xf0]  ;;  %v1513_v38 = vld [vmem:[%s2408_s1 + $0x88] sm:$0xf0]  ;;  %v1329_v40 = vor.u32 %v1540_v33, %v1328_v32  ;;  %v1526_v41 = vld [vmem:[%s2408_s1 + $0xf4] sm:$0xf] }
  0x37   : > { %848 = vmatpush.bf16.msrb.mxu0 %v1325_v54  ;;  %v1385_v42 = vor.u32 %v1553_v35, %v1382_v36  ;;  %v1274_v43 = vld [vmem:[%s2408_s1 + $0xfc] sm:$0xf0]  ;;  %v1537_v45 = vld [vmem:[%s2408_s1 + $0x148] sm:$0xf0]  ;;  %v1221_v46 = vor.u32 %v1513_v38, %v1220_v37  ;;  %v1550_v47 = vld [vmem:[%s2408_s1 + $0x1b4] sm:$0xf] }
  0x38   : > { %839 = vmatpush.bf16.msrb.mxu3 %v1169_v59  ;;  %862 = vmatpush.bf16.msrb.mxu1 %v1421_v60  ;;  %v1316_v44 = vld [vmem:[%s2408_s1 + $0x140] sm:$0xf]  ;;  %v1208_v49 = vld [vmem:[%s2408_s1 + $0x68] sm:$0xf]  ;;  %v1510_v50 = vld [vmem:[%s2408_s1 + $0x70] sm:$0xf0]  ;;  %v1277_v51 = vor.u32 %v1526_v41, %v1274_v43 }
  0x39   : > { %v1370_v48 = vld [vmem:[%s2408_s1 + $0x1bc] sm:$0xf0]  ;;  %v1317_v52 = vor.u32 %v1537_v45, %v1316_v44  ;;  %v1523_v53 = vld [vmem:[%s2408_s1 + $0xdc] sm:$0xf]  ;;  %v1262_v55 = vld [vmem:[%s2408_s1 + $0xe4] sm:$0xf0]  ;;  %v1209_v58 = vor.u32 %v1510_v50, %v1208_v49 }
  0x3a   : > { %881 = vmatpush.bf16.msrb.mxu2 %v1457_v6  ;;  %v1373_v54 = vor.u32 %v1550_v47, %v1370_v48  ;;  %v1304_v56 = vld [vmem:[%s2408_s1 + $0x128] sm:$0xf]  ;;  %v1534_v57 = vld [vmem:[%s2408_s1 + $0x130] sm:$0xf0]  ;;  %v1547_v59 = vld [vmem:[%s2408_s1 + $0x19c] sm:$0xf]  ;;  %v1265_v63 = vor.u32 %v1523_v53, %v1262_v55 }
  0x3b   : > { %849 = vmatpush.bf16.msrb.mxu0 %v1313_v11  ;;  %v1358_v60 = vld [vmem:[%s2408_s1 + $0x1a4] sm:$0xf0]  ;;  %v1196_v61 = vld [vmem:[%s2408_s1 + $0x50] sm:$0xf]  ;;  %v1507_v62 = vld [vmem:[%s2408_s1 + $0x58] sm:$0xf0]  ;;  %v1305_v0 = vor.u32 %v1534_v57, %v1304_v56 }
  0x3c   : > { %840 = vmatpush.bf16.msrb.mxu3 %v1157_v16  ;;  %863 = vmatpush.bf16.msrb.mxu1 %v1409_v17  ;;  %v1520_v2 = vld [vmem:[%s2408_s1 + $0xc4] sm:$0xf]  ;;  %v1250_v3 = vld [vmem:[%s2408_s1 + $0xcc] sm:$0xf0]  ;;  %v1361_v6 = vor.u32 %v1547_v59, %v1358_v60  ;;  %v1531_v8 = vld [vmem:[%s2408_s1 + $0x118] sm:$0xf0]  ;;  %v1197_v11 = vor.u32 %v1507_v62, %v1196_v61 }
  0x3d   : > { %v1292_v4 = vld [vmem:[%s2408_s1 + $0x110] sm:$0xf]  ;;  %v1567_v10 = vld [vmem:[%s2408_s1 + $0x238] sm:$0xf0]  ;;  %v1544_v13 = vld [vmem:[%s2408_s1 + $0x184] sm:$0xf]  ;;  %v1253_v19 = vor.u32 %v1520_v2, %v1250_v3 }
  0x3e   : > { %882 = vmatpush.bf16.msrb.mxu2 %v1445_v24  ;;  %v1436_v9 = vld [vmem:[%s2408_s1 + $0x230] sm:$0xf]  ;;  %v1184_v15 = vld [vmem:[%s2408_s1 + $0x38] sm:$0xf]  ;;  %v1504_v16 = vld [vmem:[%s2408_s1 + $0x40] sm:$0xf0]  ;;  %v1293_v20 = vor.u32 %v1531_v8, %v1292_v4 }
  0x3f   : > { %850 = vmatpush.bf16.msrb.mxu0 %v1301_v27  ;;  %v1346_v14 = vld [vmem:[%s2408_s1 + $0x18c] sm:$0xf0]  ;;  %v1472_v17 = vld [vmem:[%s2408_s1 + $0x278] sm:$0xf]  ;;  %v1576_v18 = vld [vmem:[%s2408_s1 + $0x280] sm:$0xf0]  ;;  %v1185_v25 = vor.u32 %v1504_v16, %v1184_v15 }
  0x40   : > { %889 = vmatpush.bf16.msra.mxu3 %v1245_v21  ;;  %864 = vmatpush.bf16.msrb.mxu1 %v1397_v30  ;;  %v1437_v21 = vor.u32 %v1567_v10, %v1436_v9  ;;  %v1349_v22 = vor.u32 %v1544_v13, %v1346_v14  ;;  %v1280_v23 = vld [vmem:[%s2408_s1 + $0xf8] sm:$0xf]  ;;  %v1528_v24 = vld [vmem:[%s2408_s1 + $0x100] sm:$0xf0]  ;;  %v1473_v29 = vor.u32 %v1576_v18, %v1472_v17  ;;  %v1501_v30 = vld [vmem:[%s2408_s1 + $0x28] sm:$0xf0] }
  0x41   : > { %841 = vmatmul.bf16.vlgmr.msrb.gmra.mxu3 %v2077_v7  ;;  %v1424_v26 = vld [vmem:[%s2408_s1 + $0x218] sm:$0xf]  ;;  %v1564_v27 = vld [vmem:[%s2408_s1 + $0x220] sm:$0xf0]  ;;  %v1460_v31 = vld [vmem:[%s2408_s1 + $0x260] sm:$0xf]  ;;  %v1281_v33 = vor.u32 %v1528_v24, %v1280_v23 }
  0x42   : > { %903 = vmatpush.bf16.msra.mxu2 %v1341_v28  ;;  %v1172_v28 = vld [vmem:[%s2408_s1 + $0x20] sm:$0xf]  ;;  %v1573_v32 = vld [vmem:[%s2408_s1 + $0x268] sm:$0xf0]  ;;  %v1448_v43 = vld [vmem:[%s2408_s1 + $0x248] sm:$0xf] }
  0x43   : > { %851 = vmatpush.bf16.msrb.mxu0 %v1289_v39  ;;  %v1268_v35 = vld [vmem:[%s2408_s1 + $0xe0] sm:$0xf]  ;;  %v1525_v36 = vld [vmem:[%s2408_s1 + $0xe8] sm:$0xf0]  ;;  %v1173_v37 = vor.u32 %v1501_v30, %v1172_v28  ;;  %v1461_v41 = vor.u32 %v1573_v32, %v1460_v31  ;;  %v1570_v44 = vld [vmem:[%s2408_s1 + $0x250] sm:$0xf0] }
  0x44   : > { %890 = vmatpush.bf16.msra.mxu3 %v1233_v34  ;;  %865 = vmatpush.bf16.msrb.mxu1 %v1385_v42  ;;  %v1425_v34 = vor.u32 %v1564_v27, %v1424_v26  ;;  %v1412_v38 = vld [vmem:[%s2408_s1 + $0x200] sm:$0xf]  ;;  %v1561_v39 = vld [vmem:[%s2408_s1 + $0x208] sm:$0xf0]  ;;  %v1498_v42 = vld [vmem:[%s2408_s1 + $0x10] sm:$0xf0]  ;;  %v1269_v45 = vor.u32 %v1525_v36, %v1268_v35 }
  0x45   : > { %1475 = vmatmul.msk.bf16.vlgmr.msrb.gmra.mxu2 %vm773_vm0, %v2073_v1  ;;  %v1256_v47 = vld [vmem:[%s2408_s1 + $0xc8] sm:$0xf]  ;;  %v1522_v48 = vld [vmem:[%s2408_s1 + $0xd0] sm:$0xf0]  ;;  %v1388_v55 = vld [vmem:[%s2408_s1 + $0x1d0] sm:$0xf] }
  0x46   : > { %904 = vmatpush.bf16.msra.mxu2 %v1329_v40  ;;  %v1160_v40 = vld [vmem:[%s2408_s1 + $0x8] sm:$0xf]  ;;  %v1257_v53 = vor.u32 %v1522_v48, %v1256_v47  ;;  %v1555_v56 = vld [vmem:[%s2408_s1 + $0x1d8] sm:$0xf0]  ;;  %v1552_v59 = vld [vmem:[%s2408_s1 + $0x1c0] sm:$0xf0] }
  0x47   : > { %852 = vmatpush.bf16.msrb.mxu0 %v1277_v51  ;;  %v1161_v49 = vor.u32 %v1498_v42, %v1160_v40  ;;  %v1400_v50 = vld [vmem:[%s2408_s1 + $0x1e8] sm:$0xf]  ;;  %v1558_v51 = vld [vmem:[%s2408_s1 + $0x1f0] sm:$0xf0]  ;;  %v1389_v57 = vor.u32 %v1555_v56, %v1388_v55  ;;  %v1364_v61 = vld [vmem:[%s2408_s1 + $0x1a0] sm:$0xf] }
  0x48   : > { %891 = vmatpush.bf16.msra.mxu3 %v1221_v46  ;;  %866 = vmatpush.bf16.msrb.mxu1 %v1373_v54  ;;  %v1413_v46 = vor.u32 %v1561_v39, %v1412_v38  ;;  %v1401_v54 = vor.u32 %v1558_v51, %v1400_v50  ;;  %v314_v2 = vld [vmem:[%s2409_s2] sm:$0x7]  ;;  %s1578_s29 = smul.u32 (%p1800_p4), 48, %s1788_s15  ;;  %p966_p8 = scmp.lt.s32.totalorder (%p1800_p4), %s965_s12, 2 }
  0x49   : > { %v318_v42 = vperm.slane %v314_v2, 2 }
  0x4a   : > { %905 = vmatpush.bf16.msra.mxu2 %v1317_v52  ;;  %v1449_v52 = vor.u32 %v1570_v44, %v1448_v43  ;;  %s2340_s6 = scalar_lea.vmem (%p1800_p4), %s2410_s3, %s1578_s29  }
  0x4b   : > { %853 = vmatpush.bf16.msrb.mxu0 %v1265_v63  ;;  %v1546_v63 = vld [vmem:[%s2408_s1 + $0x190] sm:$0xf0] }
  0x4c   : > { %892 = vmatpush.bf16.msra.mxu3 %v1209_v58  ;;  %867 = vmatpush.bf16.msrb.mxu1 %v1361_v6  ;;  %v1376_v58 = vld [vmem:[%s2408_s1 + $0x1b8] sm:$0xf] }
  0x4d   : > { %v1377_v60 = vor.u32 %v1552_v59, %v1376_v58 }
  0x4e   : > { %906 = vmatpush.bf16.msra.mxu2 %v1305_v0 }
  0x4f   : > { %854 = vmatpush.bf16.msrb.mxu0 %v1253_v19 }
  0x50   : > { %893 = vmatpush.bf16.msra.mxu3 %v1197_v11  ;;  %868 = vmatpush.bf16.msrb.mxu1 %v1349_v22  ;;  %v317_v22 = vperm.slane %v314_v2, 1 }
  0x52   : > { %907 = vmatpush.bf16.msra.mxu2 %v1293_v20  ;;  %855 = vmatmul.bf16.vlgmr.msrb.gmra.mxu0 %v2084_v12 }
  0x53   : > { %917 = vmatpush.bf16.msra.mxu0 %v1437_v21  ;;  %869 = vmatmul.bf16.vlgmr.msrb.gmra.mxu1 %v2075_v5 }
  0x54   : > { %894 = vmatpush.bf16.msra.mxu3 %v1185_v25  ;;  %936 = vmatpush.bf16.msra.mxu1 %v1473_v29 }
  0x56   : > { %908 = vmatpush.bf16.msra.mxu2 %v1281_v33 }
  0x57   : > { %918 = vmatpush.bf16.msra.mxu0 %v1425_v34 }
  0x58   : > { %895 = vmatpush.bf16.msra.mxu3 %v1173_v37  ;;  %937 = vmatpush.bf16.msra.mxu1 %v1461_v41 }
  0x5a   : > { %909 = vmatpush.bf16.msra.mxu2 %v1269_v45 }
  0x5b   : > { %919 = vmatpush.bf16.msra.mxu0 %v1413_v46 }
  0x5c   : > { %896 = vmatpush.bf16.msra.mxu3 %v1161_v49  ;;  %938 = vmatpush.bf16.msra.mxu1 %v1449_v52 }
  0x5e   : > { %910 = vmatpush.bf16.msra.mxu2 %v1257_v53 }
  0x5f   : > { %920 = vmatpush.bf16.msra.mxu0 %v1401_v54  ;;  %897 = vmatmul.bf16.vlgmr.msra.gmra.mxu3 %v2077_v7  ;;  %v1549_v7 = vld [vmem:[%s2408_s1 + $0x1a8] sm:$0xf0] }
  0x60   : > { %v1365_v62 = vor.u32 %v1549_v7, %v1364_v61 }
  0x61   : > { %911 = vmatmul.bf16.vlgmr.msra.gmra.mxu2 %v2084_v12  ;;  %v1352_v12 = vld [vmem:[%s2408_s1 + $0x188] sm:$0xf] }
  0x62   : > { %v1353_v0 = vor.u32 %v1546_v63, %v1352_v12 }
  0x63   : > { %921 = vmatpush.bf16.msra.mxu0 %v1389_v57  ;;  %1476 = vmatmul.msk.bf16.vlgmr.msra.gmra.mxu1 %vm773_vm0, %v2073_v1  ;;  %v316_v1 = vperm.slane %v314_v2, 0 }
  0x67   : > { %922 = vmatpush.bf16.msra.mxu0 %v1377_v60 }
  0x6b   : > { %923 = vmatpush.bf16.msra.mxu0 %v1365_v62 }
  0x6f   : > { %924 = vmatpush.bf16.msra.mxu0 %v1353_v0 }
  0x72   : > { %925 = vmatmul.bf16.vlgmr.msra.gmra.mxu0 %v2075_v5 }
  0xaf   : > { %v786_v3 = vpop.f32.mrf.mxu0 }
  0xb0   : > { %v787_v4 = vadd.f32 %v786_v3, %v316_v1  ;;  %v800_v6 = vpop.f32.mrf.mxu1 }
  0xb2   : > { %v801_v8 = vadd.f32 %v800_v6, %v787_v4 }
  0xb4   : > { %v828_v9 = vpop.f32.mrf.mxu3 }
  0xb7   : > { %v788_v13 = vpop.f32.mrf.mxu0 }
  0xb8   : > { %v814_v10 = vpop.f32.mrf.mxu2  ;;  %v789_v15 = vadd.f32 %v788_v13, %v316_v1  ;;  %v802_v16 = vpop.f32.mrf.mxu1 }
  0xb9   : > { %v815_v11 = vadd.f32 %v814_v10, %v801_v8 }
  0xba   : > { %v803_v5 = vadd.f32 %v802_v16, %v789_v15 }
  0xbb   : > { %v829_v14 = vadd.f32 %v828_v9, %v815_v11 }
  0xbc   : > { %v830_v18 = vpop.f32.mrf.mxu3 }
  0xbd   : > { %v945_v17 = vmax.f32 %v829_v14, 0.0 }
  0xbf   : > { %951 = vst [vmem:[%s2325_s28] sm:$0xff] %v945_v17 }
  0xc0   : > { %v816_v19 = vpop.f32.mrf.mxu2 }
  0xc1   : > { %v817_v20 = vadd.f32 %v816_v19, %v803_v5 }
  0xc3   : > { %v831_v21 = vadd.f32 %v830_v18, %v817_v20 }
  0xc4   : > { %v842_v24 = vpop.f32.mrf.mxu3 }
  0xc5   : > { %v948_v23 = vmax.f32 %v831_v21, 0.0  ;;  %v843_v25 = vadd.f32 %v842_v24, %v317_v22 }
  0xc7   : > { %954 = vst [vmem:[%s2325_s28 + $0x18] sm:$0xff] %v948_v23 }
  0xc8   : > { %v884_v27 = vpop.f32.mrf.mxu2 }
  0xcc   : > { %v844_v31 = vpop.f32.mrf.mxu3 }
  0xcd   : > { %v845_v33 = vadd.f32 %v844_v31, %v317_v22 }
  0xcf   : > { %v856_v26 = vpop.f32.mrf.mxu0 }
  0xd0   : > { %v857_v28 = vadd.f32 %v856_v26, %v843_v25  ;;  %v870_v29 = vpop.f32.mrf.mxu1  ;;  %v886_v38 = vpop.f32.mrf.mxu2 }
  0xd2   : > { %v871_v30 = vadd.f32 %v870_v29, %v857_v28 }
  0xd4   : > { %v885_v32 = vadd.f32 %v884_v27, %v871_v30 }
  0xd6   : > { %v946_v34 = vmax.f32 %v885_v32, 0.0 }
  0xd7   : > { %v858_v35 = vpop.f32.mrf.mxu0 }
  0xd8   : > { %952 = vst [vmem:[%s2325_s28 + $0x8] sm:$0xff] %v946_v34  ;;  %v859_v36 = vadd.f32 %v858_v35, %v845_v33  ;;  %v872_v37 = vpop.f32.mrf.mxu1 }
  0xda   : > { %v873_v39 = vadd.f32 %v872_v37, %v859_v36 }
  0xdc   : > { %v887_v40 = vadd.f32 %v886_v38, %v873_v39 }
  0xde   : > { %v949_v41 = vmax.f32 %v887_v40, 0.0 }
  0xe0   : > { %955 = vst [vmem:[%s2325_s28 + $0x20] sm:$0xff] %v949_v41  ;;  %v940_v47 = vpop.f32.mrf.mxu1 }
  0xe2   : > { %v898_v43 = vpop.f32.mrf.mxu3 }
  0xe3   : > { %v899_v44 = vadd.f32 %v898_v43, %v318_v42 }
  0xe4   : > { %v912_v45 = vpop.f32.mrf.mxu2 }
  0xe5   : > { %v913_v46 = vadd.f32 %v912_v45, %v899_v44 }
  0xe8   : > { %v942_v58 = vpop.f32.mrf.mxu1 }
  0xea   : > { %v900_v48 = vpop.f32.mrf.mxu3 }
  0xeb   : > { %v901_v51 = vadd.f32 %v900_v48, %v318_v42 }
  0xec   : > { %v914_v53 = vpop.f32.mrf.mxu2 }
  0xed   : > { %v915_v55 = vadd.f32 %v914_v53, %v901_v51 }
  0xef   : > { %v926_v49 = vpop.f32.mrf.mxu0 }
  0xf0   : > { %v927_v50 = vadd.f32 %v926_v49, %v913_v46 }
  0xf2   : > { %v941_v52 = vadd.f32 %v940_v47, %v927_v50 }
  0xf4   : > { %v947_v54 = vmax.f32 %v941_v52, 0.0 }
  0xf6   : > { %953 = vst [vmem:[%s2325_s28 + $0x10] sm:$0xff] %v947_v54 }
  0xf7   : > { %v928_v56 = vpop.f32.mrf.mxu0 }
  0xf8   : > { %v929_v57 = vadd.f32 %v928_v56, %v915_v55 }
  0xfa   : > { %v943_v59 = vadd.f32 %v942_v58, %v929_v57  ;;  %963 = sbr.rel (!%p1800_p4) target bundleno = 294 (0x126), region = 36 }
  0xfc   : > { %v950_v60 = vmax.f32 %v943_v59, 0.0 }
  0xfe   : > { %956 = vst [vmem:[%s2325_s28 + $0x28] sm:$0xff] %v950_v60 }
  0xff   : > { %s2420_s12 = smov (!%p966_p8, %s965_s12), 2 }
 0x100   : > { %s1479_s7 = smul.u32 24, %s2420_s12 }
 0x102   : > { %p1483_p9 = scmp.eq.s32.totalorder %s1479_s7, 0 }
 0x103   : > { %s2346_s8 = sshrl.u32 (!%p1483_p9), %s2420_s12, 1 }
 0x104   : > { %976 = sbr.rel (%p1483_p9) target bundleno = 294 (0x126), region = 40  ;;  %p1484_p10 = scmp.le.s32.totalorder (!%p1483_p9), %s2346_s8, 0 }
 0x109   : > { %1083 = sbr.rel (%p1484_p10) target bundleno = 278 (0x116), region = 88  ;;  %s2412_s15 = smov (!%p1484_p10), %s2340_s6 }
 0x10a   : > { %s2413_s20 = smov (!%p1484_p10), %s2325_s28  ;;  %s2355_s4 = smov (!%p1484_p10), 0  }
 0x10b   : > { %s2357_s9 = smov (!%p1484_p10), 0  }
 0x10e LB: >> { %v989_v61 = vld [vmem:[%s1729_s20] sm:$0xff]  ;;  %v991_v7 = vld [vmem:[%s1729_s20 + $0x18] sm:$0xff]  ;;  %v993_v62 = vld [vmem:[%s1729_s20 + $0x8] sm:$0xff]  ;;  %s1001_s10 = sadd.s32 1, %s1733_s4  ;;  %s983_s9 = sadd.s32 1, %s1737_s9   ;;  %s1737_s9 = sphi %s2357_s9, %s983_s9   ;;  %s1733_s4 = sphi %s2355_s4, %s2414_s4   ;;  %s1729_s20 = sphi %s2413_s20, %s1006_s20   ;;  %s1725_s15 = sphi %s2412_s15, %s1007_s15  }
 0x10f   : >> { %990 = vst [vmem:[%s1725_s15] sm:$0xff] %v989_v61  ;;  %v995_v12 = vld [vmem:[%s1729_s20 + $0x20] sm:$0xff]  ;;  %p1002_p11 = scmp.ge.s32.totalorder %s1001_s10, %s2346_s8  ;;  %v997_v63 = vld [vmem:[%s1729_s20 + $0x10] sm:$0xff]  ;;  %v999_v0 = vld [vmem:[%s1729_s20 + $0x28] sm:$0xff]  ;;  %p982_p12 = scmp.ge.s32.totalorder %s983_s9, %s2346_s8 }
 0x110   : >> { %992 = vst [vmem:[%s1725_s15 + $0x18] sm:$0xff] %v991_v7 }
 0x111   : >> { %994 = vst [vmem:[%s1725_s15 + $0x8] sm:$0xff] %v993_v62  ;;  %s2422_s10 = smov (%p1002_p11, %s1001_s10), 0  ;;  %985 = sbr.rel (!%p982_p12) target bundleno = 270 (0x10e), region = 94 }
 0x112   : >> { %996 = vst [vmem:[%s1725_s15 + $0x20] sm:$0xff] %v995_v12  ;;  %s1004_s11 = smul.u32 48, %s2422_s10  ;;  %s2414_s4 = smov %s2422_s10 }
 0x113   : >> { %998 = vst [vmem:[%s1725_s15 + $0x10] sm:$0xff] %v997_v63 }
 0x114   : >> { %1000 = vst [vmem:[%s1725_s15 + $0x28] sm:$0xff] %v999_v0  ;;  %s1006_s20 = scalar_lea.vmem %s2325_s28, %s1004_s11 [#allocation2]   ;;  %s1007_s15 = scalar_lea.vmem %s2340_s6, %s1004_s11  }
 0x116 PF: > { %s2376_s14 = sand.u32 1, %s2420_s12   ;;  %s1486_s17 = smul.u32 48, %s2346_s8 }
 0x117   : > { %p1488_p13 = scmp.le.s32.totalorder %s2376_s14, 0 }
 0x118   : > { %s2380_s18 = scalar_lea.vmem %s2325_s28, %s1486_s17 [#allocation2]   ;;  %s2383_s21 = scalar_lea.vmem %s2340_s6, %s1486_s17  }
 0x119   : > { %1097 = sbr.rel (%p1488_p13) target bundleno = 294 (0x126), region = 99  ;;  %s2415_s22 = smov (!%p1488_p13), %s2383_s21 }
 0x11a   : > { %s1743_s23 = smov (!%p1488_p13), %s2380_s18   ;;  %s1747_s24 = smov (!%p1488_p13), 0  }
 0x11b   : > { %s1751_s25 = smov (!%p1488_p13), 0  }
 0x11e LB: >> { %v1024_v2 = vld [vmem:[%s1745_s23] sm:$0xff]  ;;  %v1026_v1 = vld [vmem:[%s1745_s23 + $0x8] sm:$0xff]  ;;  %v1028_v3 = vld [vmem:[%s1745_s23 + $0x10] sm:$0xff]  ;;  %s1030_s26 = sadd.s32 1, %s1749_s24  ;;  %s1018_s25 = sadd.s32 1, %s1753_s25   ;;  %s1753_s25 = sphi %s1751_s25, %s1018_s25   ;;  %s1749_s24 = sphi %s1747_s24, %s1748_s24   ;;  %s1745_s23 = sphi %s1743_s23, %s1035_s23   ;;  %s1741_s22 = sphi %s2415_s22, %s1036_s22  }
 0x11f   : >> { %1025 = vst [vmem:[%s1741_s22] sm:$0xff] %v1024_v2  ;;  %p1031_p0 = scmp.ge.s32.totalorder %s1030_s26, %s2376_s14  ;;  %p1017_p1 = scmp.ge.s32.totalorder %s1018_s25, %s2376_s14 }
 0x120   : >> { %1027 = vst [vmem:[%s1741_s22 + $0x8] sm:$0xff] %v1026_v1 }
 0x121   : >> { %1029 = vst [vmem:[%s1741_s22 + $0x10] sm:$0xff] %v1028_v3  ;;  %s2424_s26 = smov (%p1031_p0, %s1030_s26), 0  ;;  %1020 = sbr.rel (!%p1017_p1) target bundleno = 286 (0x11e), region = 105 }
 0x122   : >> { %s1033_s27 = smul.u32 24, %s2424_s26  ;;  %s1748_s24 = smov %s2424_s26  }
 0x124   : >> { %s1035_s23 = scalar_lea.vmem %s2380_s18, %s1033_s27 [#allocation2]   ;;  %s1036_s22 = scalar_lea.vmem %s2383_s21, %s1033_s27  }
 0x126 PF: > { %p10_p2 = scmp.ge.s32.totalorder %s1790_s16, 4   ;;  %s2416_s12 = smov %s1717_s13 }
 0x127   : > { %s2417_s13 = smov %s1798_s19  ;;  %s2418_s14 = smov %s1790_s16 }
 0x128   :  { %12 = sbr.rel (!%p10_p2) target bundleno = 2 (0x2), region = 116 }

// kernel: squeezenet_forward.38
= control target key start
LH: loop header
LB: loop body
LE: loop exit
PB: predicated region body
PF: predicated region fallthrough
CT: control target
= control target key end

     0   :  { %s1171_s12 = smov 0   ;;  %s1173_s13 = smov 0   ;;  %s1353_s0 = inlined_call_operand.vmem [shape: bf16[18,512], index: 0, kind: input, shape index: {}]   ;;  %s1354_s1 = inlined_call_operand.vmem [shape: bf16[512,64], index: 1, kind: input, shape index: {}]   ;;  %s1355_s2 = inlined_call_operand.vmem [shape: f32[1,64], index: 2, kind: input, shape index: {}]   ;;  %s1356_s3 = inlined_call_operand.vmem [shape: f32[18,64], index: 3, kind: output, shape index: {}]  }
   0x1   :  { %s1175_s14 = smov 0  }
   0x2 LB: > { %s1184_s15 = sadd.s32 4294967295, %s1117_s14   ;;  %s1186_s16 = sadd.s32 1, %s1117_s14   ;;  %s1117_s14 = sphi %s1175_s14, %s1360_s14   ;;  %s1113_s13 = sphi %s1173_s13, %s1359_s13   ;;  %s1109_s12 = sphi %s1171_s12, %s1358_s12  }
   0x3   : > { %s85_s17 = ssub.s32 %s1117_s14, %s1186_s16  ;;  %s88_s18 = sadd.s32 1, %s1113_s13 }
   0x4   : > { %p86_p0 = scmp.eq.s32.totalorder %s85_s17, 0  ;;  %p98_p1 = scmp.ne.s32.totalorder %s1113_s13, %s1109_s12 }
   0x5   : > { %p99_p2 = scmp.eq.s32.totalorder %s1184_s15, 1  ;;  %p768_p3 = scmp.ge.s32.totalorder %s1117_s14, 1 }
   0x6   : > { %s1194_s19 = scalar_select %p86_p0, %s1113_s13, %s88_s18  }
   0x7   : > { %p1196_p4 = por %p99_p2, %p98_p1  ;;  %p149_p5 = scmp.lt.s32.totalorder %s1117_s14, 3 }
   0x9   : > { %p150_p6 = pnand %p768_p3, %p149_p5 }
   0xa   : > { %s1237_s24 = sshll.u32 (!%p150_p6), %s1184_s15, 1  ;;  %s175_s5 = sand.u32 (!%p150_p6), 1, %s1109_s12  }
   0xb   : > { %153 = sbr.rel (%p150_p6) target bundleno = 236 (0xec), region = 32  ;;  %p184_p7 = scmp.lt.s32.totalorder (!%p150_p6), %s1237_s24, 2 }
   0xc   : > { %s769_s6 = sshll.u32 (!%p150_p6), %s175_s5, 4 }
   0xd   : > { %s1308_s7 = scalar_lea.vmem (!%p150_p6), [#allocation2], %s769_s6  }
  0x10   : > { %v946_v0 = vld [vmem:[%s1354_s1 + $0x38] sm:$0xff]  ;;  %v945_v4 = vld [vmem:[%s1354_s1 + $0x30] sm:$0xff]  ;;  %v944_v8 = vld [vmem:[%s1354_s1 + $0x28] sm:$0xff]  ;;  %s185_s18 = scalar_select %p184_p7, %s1237_s24, 2  ;;  %vm542_vm0 = vcmask 523264  }
  0x11   : > { %v954_v1 = vld [vmem:[%s1354_s1 + $0x78] sm:$0xff]  ;;  %484 = vmatpush.bf16.msra.mxu0 %v946_v0  ;;  %v953_v5 = vld [vmem:[%s1354_s1 + $0x70] sm:$0xff]  ;;  %v952_v9 = vld [vmem:[%s1354_s1 + $0x68] sm:$0xff]  ;;  %s553_s12 = ssub.s32 (%p1196_p4), 3, %s1237_s24  ;;  %s971_s8 = sshll.u32 (%p1196_p4), %s1184_s15, 4 }
  0x12   : > { %v962_v2 = vld [vmem:[%s1354_s1 + $0xb8] sm:$0xff]  ;;  %498 = vmatpush.bf16.msra.mxu1 %v954_v1  ;;  %v961_v6 = vld [vmem:[%s1354_s1 + $0xb0] sm:$0xff]  ;;  %v960_v10 = vld [vmem:[%s1354_s1 + $0xa8] sm:$0xff]  ;;  %s934_s30 = sshll.u32 %s185_s18, 4  ;;  %p554_p8 = scmp.lt.s32.totalorder (%p1196_p4), %s553_s12, 2 }
  0x13   : > { %v970_v3 = vld [vmem:[%s1354_s1 + $0xf8] sm:$0xff]  ;;  %512 = vmatpush.bf16.msra.mxu2 %v962_v2  ;;  %v969_v7 = vld [vmem:[%s1354_s1 + $0xf0] sm:$0xff]  ;;  %v968_v11 = vld [vmem:[%s1354_s1 + $0xe8] sm:$0xff]  ;;  %s188_s10 = scalar_lea.vmem %s1353_s0, %s934_s30  ;;  %s1319_s11 = scalar_lea.vmem (%p1196_p4), %s1356_s3, %s971_s8  }
  0x14   : > { %526 = vmatpush.bf16.msra.mxu3 %v970_v3  ;;  %v943_v12 = vld [vmem:[%s1354_s1 + $0x20] sm:$0xff]  ;;  %v942_v16 = vld [vmem:[%s1354_s1 + $0x18] sm:$0xff]  ;;  %v941_v20 = vld [vmem:[%s1354_s1 + $0x10] sm:$0xff] }
  0x15   : > { %485 = vmatpush.bf16.msra.mxu0 %v945_v4  ;;  %v951_v13 = vld [vmem:[%s1354_s1 + $0x60] sm:$0xff]  ;;  %v950_v17 = vld [vmem:[%s1354_s1 + $0x58] sm:$0xff]  ;;  %v949_v21 = vld [vmem:[%s1354_s1 + $0x50] sm:$0xff] }
  0x16   : > { %499 = vmatpush.bf16.msra.mxu1 %v953_v5  ;;  %v959_v14 = vld [vmem:[%s1354_s1 + $0xa0] sm:$0xff]  ;;  %v958_v18 = vld [vmem:[%s1354_s1 + $0x98] sm:$0xff]  ;;  %v957_v22 = vld [vmem:[%s1354_s1 + $0x90] sm:$0xff] }
  0x17   : > { %513 = vmatpush.bf16.msra.mxu2 %v961_v6  ;;  %v967_v15 = vld [vmem:[%s1354_s1 + $0xe0] sm:$0xff]  ;;  %v966_v19 = vld [vmem:[%s1354_s1 + $0xd8] sm:$0xff]  ;;  %v965_v23 = vld [vmem:[%s1354_s1 + $0xd0] sm:$0xff] }
  0x18   : > { %527 = vmatpush.bf16.msra.mxu3 %v969_v7  ;;  %v940_v24 = vld [vmem:[%s1354_s1 + $0x8] sm:$0xff]  ;;  %v939_v28 = vld [vmem:[%s1354_s1] sm:$0xff]  ;;  %v937_v33 = vld [vmem:[%s188_s10 + $0xc] sm:$0xf0] }
  0x19   : > { %486 = vmatpush.bf16.msra.mxu0 %v944_v8  ;;  %v948_v25 = vld [vmem:[%s1354_s1 + $0x48] sm:$0xff]  ;;  %v947_v29 = vld [vmem:[%s1354_s1 + $0x40] sm:$0xff]  ;;  %v777_v35 = vld [vmem:[%s188_s10 + $0x10] sm:$0xf0] }
  0x1a   : > { %500 = vmatpush.bf16.msra.mxu1 %v952_v9  ;;  %v956_v26 = vld [vmem:[%s1354_s1 + $0x88] sm:$0xff]  ;;  %v955_v30 = vld [vmem:[%s1354_s1 + $0x80] sm:$0xff]  ;;  %v938_v37 = vld [vmem:[%s188_s10 + $0x14] sm:$0xf0] }
  0x1b   : > { %514 = vmatpush.bf16.msra.mxu2 %v960_v10  ;;  %v964_v27 = vld [vmem:[%s1354_s1 + $0xc8] sm:$0xff]  ;;  %v963_v31 = vld [vmem:[%s1354_s1 + $0xc0] sm:$0xff]  ;;  %v785_v39 = vld [vmem:[%s188_s10 + $0x18] sm:$0xf0] }
  0x1c   : > { %528 = vmatpush.bf16.msra.mxu3 %v968_v11  ;;  %v775_v32 = vld [vmem:[%s188_s10] sm:$0xf]  ;;  %v935_v34 = vld [vmem:[%s188_s10 + $0x4] sm:$0xf]  ;;  %v783_v36 = vld [vmem:[%s188_s10 + $0x8] sm:$0xf] }
  0x1d   : > { %487 = vmatpush.bf16.msra.mxu0 %v943_v12  ;;  %v936_v38 = vld [vmem:[%s188_s10 + $0xc] sm:$0xf]  ;;  %v776_v40 = vor.u32 %v937_v33, %v775_v32  ;;  %v780_v41 = vor.u32 %v935_v34, %v777_v35  ;;  %v784_v42 = vor.u32 %v938_v37, %v783_v36  ;;  %v1062_v44 = vld [vmem:[%s1355_s2] ss:$0 sm:$0xff] }
  0x1e   : > { %501 = vmatpush.bf16.msra.mxu1 %v951_v13  ;;  %v788_v43 = vor.u32 %v936_v38, %v785_v39 }
  0x1f   : > { %515 = vmatpush.bf16.msra.mxu2 %v959_v14 }
  0x20   : > { %529 = vmatpush.bf16.msra.mxu3 %v967_v15 }
  0x21   : > { %488 = vmatpush.bf16.msra.mxu0 %v942_v16 }
  0x22   : > { %502 = vmatpush.bf16.msra.mxu1 %v950_v17 }
  0x23   : > { %516 = vmatpush.bf16.msra.mxu2 %v958_v18 }
  0x24   : > { %530 = vmatpush.bf16.msra.mxu3 %v966_v19 }
  0x25   : > { %489 = vmatpush.bf16.msra.mxu0 %v941_v20 }
  0x26   : > { %503 = vmatpush.bf16.msra.mxu1 %v949_v21 }
  0x27   : > { %517 = vmatpush.bf16.msra.mxu2 %v957_v22 }
  0x28   : > { %531 = vmatpush.bf16.msra.mxu3 %v965_v23 }
  0x29   : > { %490 = vmatpush.bf16.msra.mxu0 %v940_v24 }
  0x2a   : > { %504 = vmatpush.bf16.msra.mxu1 %v948_v25 }
  0x2b   : > { %518 = vmatpush.bf16.msra.mxu2 %v956_v26 }
  0x2c   : > { %532 = vmatpush.bf16.msra.mxu3 %v964_v27 }
  0x2d   : > { %491 = vmatpush.bf16.msra.mxu0 %v939_v28 }
  0x2e   : > { %505 = vmatpush.bf16.msra.mxu1 %v947_v29 }
  0x2f   : > { %519 = vmatpush.bf16.msra.mxu2 %v955_v30 }
  0x30   : > { %533 = vmatpush.bf16.msra.mxu3 %v963_v31  ;;  %492 = vmatmul.bf16.vlgmr.msra.gmra.mxu0 %v776_v40 }
  0x31   : > { %506 = vmatmul.bf16.vlgmr.msra.gmra.mxu1 %v780_v41 }
  0x32   : > { %520 = vmatmul.bf16.vlgmr.msra.gmra.mxu2 %v784_v42 }
  0x33   : > { %534 = vmatmul.bf16.vlgmr.msra.gmra.mxu3 %v788_v43 }
  0xad   : > { %v493_v45 = vpop.f32.mrf.mxu0 }
  0xae   : > { %v494_v46 = vadd.f32 %v1062_v44, %v493_v45  ;;  %v507_v47 = vpop.f32.mrf.mxu1 }
  0xb0   : > { %v508_v48 = vadd.f32 %v507_v47, %v494_v46 }
  0xb5   : > { %v521_v49 = vpop.f32.mrf.mxu2  ;;  %v495_v52 = vpop.f32.mrf.mxu0 }
  0xb6   : > { %v535_v50 = vpop.f32.mrf.mxu3  ;;  %v522_v51 = vadd.f32 %v521_v49, %v508_v48  ;;  %v496_v54 = vadd.f32 %v1062_v44, %v495_v52  ;;  %v509_v56 = vpop.f32.mrf.mxu1 }
  0xb8   : > { %v536_v53 = vadd.f32 %v535_v50, %v522_v51  ;;  %v510_v57 = vadd.f32 %v509_v56, %v496_v54 }
  0xba   : > { %v540_v55 = vmax.f32 %v536_v53, 0.0 }
  0xbc   : > { %543 = vst.msk [vmem:[%s1308_s7] sm:$0xff] %vm542_vm0, %v540_v55 }
  0xbd   : > { %v523_v58 = vpop.f32.mrf.mxu2 }
  0xbe   : > { %v524_v59 = vadd.f32 %v523_v58, %v510_v57  ;;  %v537_v60 = vpop.f32.mrf.mxu3 }
  0xc0   : > { %v538_v61 = vadd.f32 %v537_v60, %v524_v59  ;;  %551 = sbr.rel (!%p1196_p4) target bundleno = 236 (0xec), region = 36 }
  0xc2   : > { %v541_v62 = vmax.f32 %v538_v61, 0.0 }
  0xc4   : > { %544 = vst.msk [vmem:[%s1308_s7 + $0x8] sm:$0xff] %vm542_vm0, %v541_v62 }
  0xc5   : > { %s1362_s12 = smov (!%p554_p8, %s553_s12), 2 }
  0xc6   : > { %s919_s14 = sshll.u32 %s1362_s12, 3 }
  0xc7   : > { %p922_p9 = scmp.eq.s32.totalorder %s919_s14, 0 }
  0xc8   : > { %s1325_s17 = sshrl.u32 (!%p922_p9), %s1362_s12, 1 }
  0xc9   : > { %562 = sbr.rel (%p922_p9) target bundleno = 236 (0xec), region = 40  ;;  %p923_p10 = scmp.le.s32.totalorder (!%p922_p9), %s1325_s17, 0 }
  0xce   : > { %721 = sbr.rel (%p923_p10) target bundleno = 219 (0xdb), region = 116  ;;  %s1119_s15 = smov (!%p923_p10), %s1319_s11  }
  0xcf   : > { %s1123_s20 = smov (!%p923_p10), %s1308_s7   ;;  %s1127_s24 = smov (!%p923_p10), 0  }
  0xd0   : > { %s1131_s18 = smov (!%p923_p10), 0  }
  0xd3 LB: >> { %v627_v63 = vld [vmem:[%s1125_s20] sm:$0xff]  ;;  %v629_v0 = vld [vmem:[%s1125_s20 + $0x8] sm:$0xff]  ;;  %s631_s21 = sadd.s32 1, %s1129_s24  ;;  %s621_s18 = sadd.s32 1, %s1133_s18   ;;  %s1133_s18 = sphi %s1131_s18, %s621_s18   ;;  %s1129_s24 = sphi %s1127_s24, %s1128_s24   ;;  %s1125_s20 = sphi %s1123_s20, %s636_s20   ;;  %s1121_s15 = sphi %s1119_s15, %s637_s15  }
  0xd4   : >> { %628 = vst [vmem:[%s1121_s15] sm:$0xff] %v627_v63  ;;  %p632_p11 = scmp.ge.s32.totalorder %s631_s21, %s1325_s17  ;;  %p620_p12 = scmp.ge.s32.totalorder %s621_s18, %s1325_s17 }
  0xd5   : >> { %630 = vst [vmem:[%s1121_s15 + $0x8] sm:$0xff] %v629_v0 }
  0xd6   : >> { %s1364_s21 = smov (%p632_p11, %s631_s21), 0  ;;  %623 = sbr.rel (!%p620_p12) target bundleno = 211 (0xd3), region = 122 }
  0xd7   : >> { %s924_s22 = sshll.u32 %s1364_s21, 4  ;;  %s1128_s24 = smov %s1364_s21  }
  0xd8   : >> { %s636_s20 = scalar_lea.vmem %s1308_s7, %s924_s22 [#allocation2]   ;;  %s637_s15 = scalar_lea.vmem %s1319_s11, %s924_s22  }
  0xdb PF: > { %s1335_s23 = sand.u32 1, %s1362_s12   ;;  %s972_s25 = sshll.u32 %s1325_s17, 4 }
  0xdc   : > { %s642_s26 = scalar_lea.vmem %s1308_s7, %s972_s25 [#allocation2]   ;;  %s644_s27 = scalar_lea.vmem %s1319_s11, %s972_s25  }
  0xdd   : > { %p929_p13 = scmp.le.s32.totalorder %s1335_s23, 0 }
  0xde   : > { %s1135_s28 = smov (!%p929_p13), %s644_s27   ;;  %s1139_s29 = smov (!%p929_p13), %s642_s26  }
  0xdf   : > { %735 = sbr.rel (%p929_p13) target bundleno = 236 (0xec), region = 127  ;;  %s1143_s30 = smov (!%p929_p13), 0  }
  0xe0   : > { %s1147_s4 = smov (!%p929_p13), 0  }
  0xe4 LB: >> { %v654_v1 = vld [vmem:[%s1141_s29] sm:$0xff]  ;;  %s656_s5 = sadd.s32 1, %s1145_s30  ;;  %s648_s4 = sadd.s32 1, %s1149_s4   ;;  %s1149_s4 = sphi %s1147_s4, %s648_s4   ;;  %s1145_s30 = sphi %s1143_s30, %s1144_s30   ;;  %s1141_s29 = sphi %s1139_s29, %s661_s29   ;;  %s1137_s28 = sphi %s1135_s28, %s662_s28  }
  0xe5   : >> { %655 = vst [vmem:[%s1137_s28] sm:$0xff] %v654_v1  ;;  %p657_p0 = scmp.ge.s32.totalorder %s656_s5, %s1335_s23  ;;  %p647_p1 = scmp.ge.s32.totalorder %s648_s4, %s1335_s23 }
  0xe7   : >> { %s1366_s5 = smov (%p657_p0, %s656_s5), 0  ;;  %650 = sbr.rel (!%p647_p1) target bundleno = 228 (0xe4), region = 133 }
  0xe8   : >> { %s930_s6 = sshll.u32 %s1366_s5, 3  ;;  %s1144_s30 = smov %s1366_s5  }
  0xe9   : >> { %s661_s29 = scalar_lea.vmem %s642_s26, %s930_s6 [#allocation2]   ;;  %s662_s28 = scalar_lea.vmem %s644_s27, %s930_s6  }
  0xec PF: > { %p10_p2 = scmp.ge.s32.totalorder %s1186_s16, 4   ;;  %s1358_s12 = smov %s1113_s13 }
  0xed   : > { %s1359_s13 = smov %s1194_s19  ;;  %s1360_s14 = smov %s1186_s16 }
  0xee   :  { %12 = sbr.rel (!%p10_p2) target bundleno = 2 (0x2), region = 144 }

// kernel: squeezenet_forward.37
= control target key start
LH: loop header
LB: loop body
LE: loop exit
PB: predicated region body
PF: predicated region fallthrough
CT: control target
= control target key end

     0   :  { %s2560_s12 = smov 0   ;;  %s2562_s13 = smov 0   ;;  %s3606_s0 = inlined_call_operand.vmem [shape: bf16[18,576], index: 0, kind: input, shape index: {}]   ;;  %s3607_s1 = inlined_call_operand.vmem [shape: bf16[576,512], index: 1, kind: input, shape index: {}]   ;;  %s3608_s2 = inlined_call_operand.vmem [shape: f32[1,512], index: 2, kind: input, shape index: {}]   ;;  %s3609_s3 = inlined_call_operand.vmem [shape: f32[18,512], index: 3, kind: output, shape index: {}]  }
   0x1   :  { %s2564_s14 = smov 0  }
   0x2 LB: > { %s2573_s15 = sadd.s32 4294967295, %s2506_s14   ;;  %s2575_s16 = sadd.s32 1, %s2506_s14   ;;  %s2506_s14 = sphi %s2564_s14, %s3619_s14   ;;  %s2502_s13 = sphi %s2562_s13, %s3618_s13   ;;  %s2498_s12 = sphi %s2560_s12, %s3617_s12  }
   0x3   : > { %s85_s17 = ssub.s32 %s2506_s14, %s2575_s16  ;;  %s88_s18 = sadd.s32 1, %s2502_s13 }
   0x4   : > { %p86_p0 = scmp.eq.s32.totalorder %s85_s17, 0  ;;  %p98_p1 = scmp.ne.s32.totalorder %s2502_s13, %s2498_s12 }
   0x5   : > { %p99_p2 = scmp.eq.s32.totalorder %s2573_s15, 1  ;;  %p1586_p3 = scmp.ge.s32.totalorder %s2506_s14, 1 }
   0x6   : > { %s2583_s19 = scalar_select %p86_p0, %s2502_s13, %s88_s18  }
   0x7   : > { %p2585_p4 = por %p99_p2, %p98_p1  ;;  %p149_p5 = scmp.lt.s32.totalorder %s2506_s14, 3 }
   0x9   : > { %p150_p6 = pnand %p1586_p3, %p149_p5 }
   0xa   : > { %s2779_s21 = sshll.u32 (!%p150_p6), %s2573_s15, 1 }
   0xb   : > { %153 = sbr.rel (%p150_p6) target bundleno = 353 (0x161), region = 32  ;;  %p184_p7 = scmp.lt.s32.totalorder (!%p150_p6), %s2779_s21, 2 }
  0x10   : > { %v1724_v0 = vld [vmem:[%s3607_s1 + $0xe0] sm:$0xf]  ;;  %v2244_v1 = vld [vmem:[%s3607_s1 + $0xec] sm:$0xf0]  ;;  %s185_s9 = scalar_select %p184_p7, %s2779_s21, 2  ;;  %vm1107_vm0 = vcmask 523264  }
  0x11   : > { %v1852_v2 = vld [vmem:[%s3607_s1 + $0x1e0] sm:$0xf]  ;;  %v1725_v3 = vor.u32 %v2244_v1, %v1724_v0  ;;  %v2276_v4 = vld [vmem:[%s3607_s1 + $0x1ec] sm:$0xf0]  ;;  %s2360_s24 = sshll.u32 (%p2585_p4), %s2573_s15, 6 }
  0x12   : > { %v1980_v5 = vld [vmem:[%s3607_s1 + $0x2e0] sm:$0xf]  ;;  %v2308_v6 = vld [vmem:[%s3607_s1 + $0x2ec] sm:$0xf0]  ;;  %v1853_v7 = vor.u32 %v2276_v4, %v1852_v2  ;;  %s2363_s18 = smul.u32 20, %s185_s9  ;;  %s3534_s27 = scalar_lea.vmem (%p2585_p4), %s3609_s3, %s2360_s24  }
  0x13   : > { %v1981_v8 = vor.u32 %v2308_v6, %v1980_v5  ;;  %v2108_v9 = vld [vmem:[%s3607_s1 + $0x3e0] sm:$0xf]  ;;  %v2340_v10 = vld [vmem:[%s3607_s1 + $0x3ec] sm:$0xf0]  ;;  %1111 = vmatpush.bf16.msra.mxu0 %v1725_v3 }
  0x14   : > { %v1708_v11 = vld [vmem:[%s3607_s1 + $0xc0] sm:$0xf]  ;;  %v2109_v12 = vor.u32 %v2340_v10, %v2108_v9  ;;  %v2240_v13 = vld [vmem:[%s3607_s1 + $0xcc] sm:$0xf0]  ;;  %1125 = vmatpush.bf16.msra.mxu1 %v1853_v7  ;;  %s2828_s7 = scalar_lea.vmem %s3606_s0, %s2363_s18 }
  0x15   : > { %v1836_v14 = vld [vmem:[%s3607_s1 + $0x1c0] sm:$0xf]  ;;  %v2272_v15 = vld [vmem:[%s3607_s1 + $0x1cc] sm:$0xf0]  ;;  %1139 = vmatpush.bf16.msra.mxu2 %v1981_v8  ;;  %v1709_v16 = vor.u32 %v2240_v13, %v1708_v11 }
  0x16   : > { %v1837_v17 = vor.u32 %v2272_v15, %v1836_v14  ;;  %v1964_v18 = vld [vmem:[%s3607_s1 + $0x2c0] sm:$0xf]  ;;  %v2304_v19 = vld [vmem:[%s3607_s1 + $0x2cc] sm:$0xf0]  ;;  %1153 = vmatpush.bf16.msra.mxu3 %v2109_v12 }
  0x17   : > { %v2092_v20 = vld [vmem:[%s3607_s1 + $0x3c0] sm:$0xf]  ;;  %v1965_v21 = vor.u32 %v2304_v19, %v1964_v18  ;;  %v2336_v22 = vld [vmem:[%s3607_s1 + $0x3cc] sm:$0xf0]  ;;  %1112 = vmatpush.bf16.msra.mxu0 %v1709_v16 }
  0x18   : > { %v1692_v23 = vld [vmem:[%s3607_s1 + $0xa0] sm:$0xf]  ;;  %v2236_v24 = vld [vmem:[%s3607_s1 + $0xac] sm:$0xf0]  ;;  %v2093_v25 = vor.u32 %v2336_v22, %v2092_v20  ;;  %1126 = vmatpush.bf16.msra.mxu1 %v1837_v17 }
  0x19   : > { %v1820_v26 = vld [vmem:[%s3607_s1 + $0x1a0] sm:$0xf]  ;;  %v2268_v27 = vld [vmem:[%s3607_s1 + $0x1ac] sm:$0xf0]  ;;  %v1693_v29 = vor.u32 %v2236_v24, %v1692_v23  ;;  %1140 = vmatpush.bf16.msra.mxu2 %v1965_v21 }
  0x1a   : > { %v1948_v28 = vld [vmem:[%s3607_s1 + $0x2a0] sm:$0xf]  ;;  %v2300_v30 = vld [vmem:[%s3607_s1 + $0x2ac] sm:$0xf0]  ;;  %v1821_v33 = vor.u32 %v2268_v27, %v1820_v26  ;;  %1154 = vmatpush.bf16.msra.mxu3 %v2093_v25 }
  0x1b   : > { %v2076_v31 = vld [vmem:[%s3607_s1 + $0x3a0] sm:$0xf]  ;;  %v2332_v32 = vld [vmem:[%s3607_s1 + $0x3ac] sm:$0xf0]  ;;  %v1949_v34 = vor.u32 %v2300_v30, %v1948_v28  ;;  %1113 = vmatpush.bf16.msra.mxu0 %v1693_v29  ;;  %v2242_v30 = vld [vmem:[%s3607_s1 + $0xe4] sm:$0xf] }
  0x1c   : > { %v1676_v35 = vld [vmem:[%s3607_s1 + $0x80] sm:$0xf]  ;;  %v2232_v36 = vld [vmem:[%s3607_s1 + $0x8c] sm:$0xf0]  ;;  %v2077_v38 = vor.u32 %v2332_v32, %v2076_v31  ;;  %1127 = vmatpush.bf16.msra.mxu1 %v1821_v33  ;;  %v1726_v31 = vld [vmem:[%s3607_s1 + $0xf0] sm:$0xf0] }
  0x1d   : > { %v1804_v37 = vld [vmem:[%s3607_s1 + $0x180] sm:$0xf]  ;;  %v2264_v39 = vld [vmem:[%s3607_s1 + $0x18c] sm:$0xf0]  ;;  %v1677_v44 = vor.u32 %v2232_v36, %v1676_v35  ;;  %1141 = vmatpush.bf16.msra.mxu2 %v1949_v34  ;;  %v2274_v33 = vld [vmem:[%s3607_s1 + $0x1e4] sm:$0xf] }
  0x1e   : > { %v1932_v40 = vld [vmem:[%s3607_s1 + $0x280] sm:$0xf]  ;;  %v2296_v41 = vld [vmem:[%s3607_s1 + $0x28c] sm:$0xf0]  ;;  %v1805_v45 = vor.u32 %v2264_v39, %v1804_v37  ;;  %1155 = vmatpush.bf16.msra.mxu3 %v2077_v38  ;;  %v1854_v34 = vld [vmem:[%s3607_s1 + $0x1f0] sm:$0xf0] }
  0x1f   : > { %v2060_v42 = vld [vmem:[%s3607_s1 + $0x380] sm:$0xf]  ;;  %v2328_v43 = vld [vmem:[%s3607_s1 + $0x38c] sm:$0xf0]  ;;  %v1933_v46 = vor.u32 %v2296_v41, %v1932_v40  ;;  %1114 = vmatpush.bf16.msra.mxu0 %v1677_v44  ;;  %v2306_v37 = vld [vmem:[%s3607_s1 + $0x2e4] sm:$0xf]  ;;  %v1857_v44 = vor.u32 %v2274_v33, %v1854_v34 }
  0x20   : > { %v1660_v47 = vld [vmem:[%s3607_s1 + $0x60] sm:$0xf]  ;;  %v2228_v48 = vld [vmem:[%s3607_s1 + $0x6c] sm:$0xf0]  ;;  %v2061_v50 = vor.u32 %v2328_v43, %v2060_v42  ;;  %1128 = vmatpush.bf16.msra.mxu1 %v1805_v45  ;;  %v1982_v38 = vld [vmem:[%s3607_s1 + $0x2f0] sm:$0xf0]  ;;  %v1729_v43 = vor.u32 %v2242_v30, %v1726_v31 }
  0x21   : > { %v1788_v49 = vld [vmem:[%s3607_s1 + $0x160] sm:$0xf]  ;;  %v2260_v51 = vld [vmem:[%s3607_s1 + $0x16c] sm:$0xf0]  ;;  %v1661_v56 = vor.u32 %v2228_v48, %v1660_v47  ;;  %1142 = vmatpush.bf16.msra.mxu2 %v1933_v46  ;;  %v2238_v45 = vld [vmem:[%s3607_s1 + $0xc4] sm:$0xf]  ;;  %v1985_v48 = vor.u32 %v2306_v37, %v1982_v38 }
  0x22   : > { %v1916_v52 = vld [vmem:[%s3607_s1 + $0x260] sm:$0xf]  ;;  %v2292_v53 = vld [vmem:[%s3607_s1 + $0x26c] sm:$0xf0]  ;;  %v1789_v57 = vor.u32 %v2260_v51, %v1788_v49  ;;  %1156 = vmatpush.bf16.msra.mxu3 %v2061_v50  ;;  %v1710_v46 = vld [vmem:[%s3607_s1 + $0xd0] sm:$0xf0] }
  0x23   : > { %v2044_v54 = vld [vmem:[%s3607_s1 + $0x360] sm:$0xf]  ;;  %v2324_v55 = vld [vmem:[%s3607_s1 + $0x36c] sm:$0xf0]  ;;  %v1917_v58 = vor.u32 %v2292_v53, %v1916_v52  ;;  %1115 = vmatpush.bf16.msra.mxu0 %v1661_v56  ;;  %v2270_v47 = vld [vmem:[%s3607_s1 + $0x1c4] sm:$0xf] }
  0x24   : > { %v1644_v59 = vld [vmem:[%s3607_s1 + $0x40] sm:$0xf]  ;;  %v2224_v60 = vld [vmem:[%s3607_s1 + $0x4c] sm:$0xf0]  ;;  %v2045_v62 = vor.u32 %v2324_v55, %v2044_v54  ;;  %1129 = vmatpush.bf16.msra.mxu1 %v1789_v57  ;;  %v1838_v49 = vld [vmem:[%s3607_s1 + $0x1d0] sm:$0xf0] }
  0x25   : > { %v1772_v61 = vld [vmem:[%s3607_s1 + $0x140] sm:$0xf]  ;;  %v2256_v63 = vld [vmem:[%s3607_s1 + $0x14c] sm:$0xf0]  ;;  %v1645_v4 = vor.u32 %v2224_v60, %v1644_v59  ;;  %1143 = vmatpush.bf16.msra.mxu2 %v1917_v58  ;;  %v2302_v50 = vld [vmem:[%s3607_s1 + $0x2c4] sm:$0xf]  ;;  %v1713_v59 = vor.u32 %v2238_v45, %v1710_v46 }
  0x26   : > { %v1900_v0 = vld [vmem:[%s3607_s1 + $0x240] sm:$0xf]  ;;  %v2288_v1 = vld [vmem:[%s3607_s1 + $0x24c] sm:$0xf0]  ;;  %v1773_v6 = vor.u32 %v2256_v63, %v1772_v61  ;;  %1157 = vmatpush.bf16.msra.mxu3 %v2045_v62  ;;  %v1966_v51 = vld [vmem:[%s3607_s1 + $0x2d0] sm:$0xf0]  ;;  %v1841_v63 = vor.u32 %v2270_v47, %v1838_v49 }
  0x27   : > { %v2028_v2 = vld [vmem:[%s3607_s1 + $0x340] sm:$0xf]  ;;  %v2320_v3 = vld [vmem:[%s3607_s1 + $0x34c] sm:$0xf0]  ;;  %v1901_v7 = vor.u32 %v2288_v1, %v1900_v0  ;;  %1116 = vmatpush.bf16.msra.mxu0 %v1645_v4  ;;  %v2211_v53 = vld [vmem:[%s2828_s7 + $0x10] sm:$0xf0] }
  0x28   : > { %v1628_v5 = vld [vmem:[%s3607_s1 + $0x20] sm:$0xf]  ;;  %v2220_v8 = vld [vmem:[%s3607_s1 + $0x2c] sm:$0xf0]  ;;  %v2029_v11 = vor.u32 %v2320_v3, %v2028_v2  ;;  %1130 = vmatpush.bf16.msra.mxu1 %v1773_v6  ;;  %v1600_v54 = vld [vmem:[%s2828_s7 + $0x8] sm:$0xf] }
  0x29   : > { %v1756_v9 = vld [vmem:[%s3607_s1 + $0x120] sm:$0xf]  ;;  %v2252_v10 = vld [vmem:[%s3607_s1 + $0x12c] sm:$0xf0]  ;;  %v1629_v18 = vor.u32 %v2220_v8, %v1628_v5  ;;  %1144 = vmatpush.bf16.msra.mxu2 %v1901_v7  ;;  %v2212_v60 = vld [vmem:[%s2828_s7 + $0x18] sm:$0xf0]  ;;  %v1969_v5 = vor.u32 %v2302_v50, %v1966_v51 }
  0x2a   : > { %v1884_v12 = vld [vmem:[%s3607_s1 + $0x220] sm:$0xf]  ;;  %v2284_v13 = vld [vmem:[%s3607_s1 + $0x22c] sm:$0xf0]  ;;  %v1757_v22 = vor.u32 %v2252_v10, %v1756_v9  ;;  %1158 = vmatpush.bf16.msra.mxu3 %v2029_v11  ;;  %v2210_v61 = vld [vmem:[%s2828_s7 + $0xc] sm:$0xf]  ;;  %v2853_v0 = vor.u32 %v2212_v60, %v1600_v54 }
  0x2b   : > { %v2012_v14 = vld [vmem:[%s3607_s1 + $0x320] sm:$0xf]  ;;  %v2316_v15 = vld [vmem:[%s3607_s1 + $0x32c] sm:$0xf0]  ;;  %v1885_v23 = vor.u32 %v2284_v13, %v1884_v12  ;;  %1117 = vmatpush.bf16.msra.mxu0 %v1629_v18  ;;  %v2234_v2 = vld [vmem:[%s3607_s1 + $0xa4] sm:$0xf] }
  0x2c   : > { %v1612_v16 = vld [vmem:[%s3607_s1] sm:$0xf]  ;;  %v2216_v17 = vld [vmem:[%s3607_s1 + $0xc] sm:$0xf0]  ;;  %v2013_v26 = vor.u32 %v2316_v15, %v2012_v14  ;;  %1131 = vmatpush.bf16.msra.mxu1 %v1757_v22  ;;  %v2209_v3 = vld [vmem:[%s2828_s7 + $0x4] sm:$0xf] }
  0x2d   : > { %v1740_v19 = vld [vmem:[%s3607_s1 + $0x100] sm:$0xf]  ;;  %v2248_v20 = vld [vmem:[%s3607_s1 + $0x10c] sm:$0xf0]  ;;  %v1613_v32 = vor.u32 %v2216_v17, %v1612_v16  ;;  %1145 = vmatpush.bf16.msra.mxu2 %v1885_v23  ;;  %v1594_v4 = vld [vmem:[%s2828_s7 + $0x14] sm:$0xf0] }
  0x2e   : > { %v1868_v21 = vld [vmem:[%s3607_s1 + $0x200] sm:$0xf]  ;;  %v2280_v24 = vld [vmem:[%s3607_s1 + $0x20c] sm:$0xf0]  ;;  %v1741_v35 = vor.u32 %v2248_v20, %v1740_v19  ;;  %1159 = vmatpush.bf16.msra.mxu3 %v2013_v26  ;;  %v1694_v6 = vld [vmem:[%s3607_s1 + $0xb0] sm:$0xf0]  ;;  %v2872_v9 = vor.u32 %v2209_v3, %v1594_v4 }
  0x2f   : > { %v1996_v25 = vld [vmem:[%s3607_s1 + $0x300] sm:$0xf]  ;;  %v2312_v27 = vld [vmem:[%s3607_s1 + $0x30c] sm:$0xf0]  ;;  %v1869_v36 = vor.u32 %v2280_v24, %v1868_v21  ;;  %1118 = vmatpush.bf16.msra.mxu0 %v1613_v32  ;;  %v2266_v7 = vld [vmem:[%s3607_s1 + $0x1a4] sm:$0xf]  ;;  %v1697_v14 = vor.u32 %v2234_v2, %v1694_v6 }
  0x30   : > { %v2172_v28 = vld [vmem:[%s3607_s1 + $0x460] sm:$0xf]  ;;  %v2356_v29 = vld [vmem:[%s3607_s1 + $0x46c] sm:$0xf0]  ;;  %v1997_v39 = vor.u32 %v2312_v27, %v1996_v25  ;;  %1132 = vmatpush.bf16.msra.mxu1 %v1741_v35  ;;  %v1822_v8 = vld [vmem:[%s3607_s1 + $0x1b0] sm:$0xf0] }
  0x31   : > { %v2173_v40 = vor.u32 %v2356_v29, %v2172_v28  ;;  %v2156_v41 = vld [vmem:[%s3607_s1 + $0x440] sm:$0xf]  ;;  %v2352_v42 = vld [vmem:[%s3607_s1 + $0x44c] sm:$0xf0]  ;;  %1146 = vmatpush.bf16.msra.mxu2 %v1869_v36  ;;  %v2298_v10 = vld [vmem:[%s3607_s1 + $0x2a4] sm:$0xf]  ;;  %v1825_v15 = vor.u32 %v2266_v7, %v1822_v8 }
  0x32   : > { %v1592_v52 = vld [vmem:[%s2828_s7] sm:$0xf]  ;;  %v2348_v56 = vld [vmem:[%s3607_s1 + $0x42c] sm:$0xf0]  ;;  %1160 = vmatpush.bf16.msra.mxu3 %v1997_v39  ;;  %v2157_v58 = vor.u32 %v2352_v42, %v2156_v41  ;;  %v1950_v11 = vld [vmem:[%s3607_s1 + $0x2b0] sm:$0xf0] }
  0x33   : > { %v2140_v55 = vld [vmem:[%s3607_s1 + $0x420] sm:$0xf]  ;;  %1171 = vmatpush.bf16.msrb.mxu0 %v2173_v40  ;;  %v2848_v57 = vor.u32 %v2211_v53, %v1592_v52  ;;  %1133 = vmatmul.bf16.vlgmr.msra.gmra.mxu1 %v2872_v9  ;;  %v2344_v16 = vld [vmem:[%s3607_s1 + $0x40c] sm:$0xf0]  ;;  %v2230_v17 = vld [vmem:[%s3607_s1 + $0x84] sm:$0xf]  ;;  %v1953_v19 = vor.u32 %v2298_v10, %v1950_v11 }
  0x34   : > { %v1602_v62 = vld [vmem:[%s2828_s7 + $0x1c] sm:$0xf0]  ;;  %1181 = vmatpush.bf16.msrb.mxu1 %v1729_v43  ;;  %1147 = vmatmul.bf16.vlgmr.msra.gmra.mxu2 %v2853_v0  ;;  %v2141_v12 = vor.u32 %v2348_v56, %v2140_v55  ;;  %v1678_v18 = vld [vmem:[%s3607_s1 + $0x90] sm:$0xf0]  ;;  %v2262_v20 = vld [vmem:[%s3607_s1 + $0x184] sm:$0xf] }
  0x35   : > { %1195 = vmatpush.bf16.msrb.mxu2 %v1857_v44  ;;  %v2855_v1 = vor.u32 %v2210_v61, %v1602_v62  ;;  %1119 = vmatmul.bf16.vlgmr.msra.gmra.mxu0 %v2848_v57  ;;  %v2124_v13 = vld [vmem:[%s3607_s1 + $0x400] sm:$0xf]  ;;  %v1806_v21 = vld [vmem:[%s3607_s1 + $0x190] sm:$0xf0]  ;;  %v2294_v22 = vld [vmem:[%s3607_s1 + $0x284] sm:$0xf]  ;;  %v1681_v27 = vor.u32 %v2230_v17, %v1678_v18 }
  0x36   : > { %1209 = vmatpush.bf16.msrb.mxu3 %v1985_v48  ;;  %v1934_v23 = vld [vmem:[%s3607_s1 + $0x290] sm:$0xf0]  ;;  %v2338_v24 = vld [vmem:[%s3607_s1 + $0x3e4] sm:$0xf]  ;;  %v2125_v26 = vor.u32 %v2344_v16, %v2124_v13  ;;  %v1809_v28 = vor.u32 %v2262_v20, %v1806_v21  ;;  %v1608_v39 = vld [vmem:[%s2828_s7 + $0x10] sm:$0xf] }
  0x37   : > { %1161 = vmatmul.bf16.vlgmr.msra.gmra.mxu3 %v2855_v1  ;;  %1172 = vmatpush.bf16.msrb.mxu0 %v2157_v58  ;;  %v2110_v25 = vld [vmem:[%s3607_s1 + $0x3f0] sm:$0xf0]  ;;  %v2226_v29 = vld [vmem:[%s3607_s1 + $0x64] sm:$0xf]  ;;  %v1937_v31 = vor.u32 %v2294_v22, %v1934_v23  ;;  %v1732_v20 = vld [vmem:[%s3607_s1 + $0xe8] sm:$0xf] }
  0x38   : > { %1182 = vmatpush.bf16.msrb.mxu1 %v1713_v59  ;;  %v1662_v30 = vld [vmem:[%s3607_s1 + $0x70] sm:$0xf0]  ;;  %v2113_v32 = vor.u32 %v2338_v24, %v2110_v25  ;;  %v2258_v33 = vld [vmem:[%s3607_s1 + $0x164] sm:$0xf]  ;;  %v2245_v21 = vld [vmem:[%s3607_s1 + $0xf4] sm:$0xf0] }
  0x39   : > { %1196 = vmatpush.bf16.msrb.mxu2 %v1841_v63  ;;  %v1790_v34 = vld [vmem:[%s3607_s1 + $0x170] sm:$0xf0]  ;;  %v2290_v35 = vld [vmem:[%s3607_s1 + $0x264] sm:$0xf]  ;;  %v1665_v41 = vor.u32 %v2226_v29, %v1662_v30  ;;  %v1860_v24 = vld [vmem:[%s3607_s1 + $0x1e8] sm:$0xf]  ;;  %v1733_v29 = vor.u32 %v2245_v21, %v1732_v20 }
  0x3a   : > { %1210 = vmatpush.bf16.msrb.mxu3 %v1969_v5  ;;  %v1918_v36 = vld [vmem:[%s3607_s1 + $0x270] sm:$0xf0]  ;;  %v2334_v37 = vld [vmem:[%s3607_s1 + $0x3c4] sm:$0xf]  ;;  %v1793_v42 = vor.u32 %v2258_v33, %v1790_v34  ;;  %v2277_v25 = vld [vmem:[%s3607_s1 + $0x1f4] sm:$0xf0] }
  0x3b   : > { %1173 = vmatpush.bf16.msrb.mxu0 %v2141_v12  ;;  %v2094_v38 = vld [vmem:[%s3607_s1 + $0x3d0] sm:$0xf0]  ;;  %v2213_v40 = vld [vmem:[%s2828_s7 + $0x20] sm:$0xf0]  ;;  %v1921_v45 = vor.u32 %v2290_v35, %v1918_v36  ;;  %v1861_v33 = vor.u32 %v2277_v25, %v1860_v24  ;;  %v1716_v35 = vld [vmem:[%s3607_s1 + $0xc8] sm:$0xf] }
  0x3c   : > { %1183 = vmatpush.bf16.msrb.mxu1 %v1697_v14  ;;  %v2222_v43 = vld [vmem:[%s3607_s1 + $0x44] sm:$0xf]  ;;  %v1646_v44 = vld [vmem:[%s3607_s1 + $0x50] sm:$0xf0]  ;;  %v2097_v46 = vor.u32 %v2334_v37, %v2094_v38  ;;  %v2954_v50 = vor.u32 %v2213_v40, %v1608_v39  ;;  %v2241_v36 = vld [vmem:[%s3607_s1 + $0xd4] sm:$0xf0] }
  0x3d   : > { %1197 = vmatpush.bf16.msrb.mxu2 %v1825_v15  ;;  %v2254_v47 = vld [vmem:[%s3607_s1 + $0x144] sm:$0xf]  ;;  %v1774_v48 = vld [vmem:[%s3607_s1 + $0x150] sm:$0xf0]  ;;  %v1649_v54 = vor.u32 %v2222_v43, %v1646_v44  ;;  %v1844_v37 = vld [vmem:[%s3607_s1 + $0x1c8] sm:$0xf] }
  0x3e   : > { %1211 = vmatpush.bf16.msrb.mxu3 %v1953_v19  ;;  %v2286_v49 = vld [vmem:[%s3607_s1 + $0x244] sm:$0xf]  ;;  %v1902_v51 = vld [vmem:[%s3607_s1 + $0x250] sm:$0xf0]  ;;  %v1777_v55 = vor.u32 %v2254_v47, %v1774_v48  ;;  %v2273_v38 = vld [vmem:[%s3607_s1 + $0x1d4] sm:$0xf0] }
  0x3f   : > { %1174 = vmatpush.bf16.msrb.mxu0 %v2125_v26  ;;  %v2330_v52 = vld [vmem:[%s3607_s1 + $0x3a4] sm:$0xf]  ;;  %v2078_v53 = vld [vmem:[%s3607_s1 + $0x3b0] sm:$0xf0]  ;;  %v1905_v59 = vor.u32 %v2286_v49, %v1902_v51  ;;  %v1700_v47 = vld [vmem:[%s3607_s1 + $0xa8] sm:$0xf] }
  0x40   : > { %1184 = vmatpush.bf16.msrb.mxu1 %v1681_v27  ;;  %v2218_v56 = vld [vmem:[%s3607_s1 + $0x24] sm:$0xf]  ;;  %v1630_v58 = vld [vmem:[%s3607_s1 + $0x30] sm:$0xf0]  ;;  %v2081_v60 = vor.u32 %v2330_v52, %v2078_v53  ;;  %v2237_v48 = vld [vmem:[%s3607_s1 + $0xb4] sm:$0xf0] }
  0x41   : > { %1198 = vmatpush.bf16.msrb.mxu2 %v1809_v28  ;;  %v2250_v61 = vld [vmem:[%s3607_s1 + $0x124] sm:$0xf]  ;;  %v1758_v62 = vld [vmem:[%s3607_s1 + $0x130] sm:$0xf0]  ;;  %v1633_v5 = vor.u32 %v2218_v56, %v1630_v58  ;;  %v1828_v49 = vld [vmem:[%s3607_s1 + $0x1a8] sm:$0xf] }
  0x42   : > { %1212 = vmatpush.bf16.msrb.mxu3 %v1937_v31  ;;  %v2282_v63 = vld [vmem:[%s3607_s1 + $0x224] sm:$0xf]  ;;  %v1886_v2 = vld [vmem:[%s3607_s1 + $0x230] sm:$0xf0]  ;;  %v1761_v6 = vor.u32 %v2250_v61, %v1758_v62  ;;  %v2269_v51 = vld [vmem:[%s3607_s1 + $0x1b4] sm:$0xf0] }
  0x43   : > { %1223 = vmatpush.bf16.msra.mxu0 %v2113_v32  ;;  %v2326_v3 = vld [vmem:[%s3607_s1 + $0x384] sm:$0xf]  ;;  %v2062_v4 = vld [vmem:[%s3607_s1 + $0x390] sm:$0xf0]  ;;  %v1889_v11 = vor.u32 %v2282_v63, %v1886_v2  ;;  %v1684_v61 = vld [vmem:[%s3607_s1 + $0x88] sm:$0xf] }
  0x44   : > { %1185 = vmatpush.bf16.msrb.mxu1 %v1665_v41  ;;  %v2214_v7 = vld [vmem:[%s3607_s1 + $0x4] sm:$0xf]  ;;  %v1614_v8 = vld [vmem:[%s3607_s1 + $0x10] sm:$0xf0]  ;;  %v2065_v12 = vor.u32 %v2326_v3, %v2062_v4  ;;  %v1717_v41 = vor.u32 %v2241_v36, %v1716_v35  ;;  %v2233_v62 = vld [vmem:[%s3607_s1 + $0x94] sm:$0xf0] }
  0x45   : > { %1199 = vmatpush.bf16.msrb.mxu2 %v1793_v42  ;;  %2186 = vmatmul.msk.bf16.vlgmr.msrb.gmra.mxu0 %vm1107_vm0, %v2954_v50  ;;  %v2246_v10 = vld [vmem:[%s3607_s1 + $0x104] sm:$0xf]  ;;  %v1742_v13 = vld [vmem:[%s3607_s1 + $0x110] sm:$0xf0]  ;;  %v1617_v22 = vor.u32 %v2214_v7, %v1614_v8  ;;  %v1812_v63 = vld [vmem:[%s3607_s1 + $0x188] sm:$0xf] }
  0x46   : > { %1213 = vmatpush.bf16.msrb.mxu3 %v1921_v45  ;;  %v2278_v14 = vld [vmem:[%s3607_s1 + $0x204] sm:$0xf]  ;;  %v1870_v15 = vld [vmem:[%s3607_s1 + $0x210] sm:$0xf0]  ;;  %v1745_v23 = vor.u32 %v2246_v10, %v1742_v13  ;;  %v1845_v45 = vor.u32 %v2273_v38, %v1844_v37  ;;  %v2265_v2 = vld [vmem:[%s3607_s1 + $0x194] sm:$0xf0]  ;;  %v1685_v10 = vor.u32 %v2233_v62, %v1684_v61 }
  0x47   : > { %1224 = vmatpush.bf16.msra.mxu0 %v2097_v46  ;;  %v2322_v16 = vld [vmem:[%s3607_s1 + $0x364] sm:$0xf]  ;;  %v2046_v17 = vld [vmem:[%s3607_s1 + $0x370] sm:$0xf0]  ;;  %v1873_v26 = vor.u32 %v2278_v14, %v1870_v15  ;;  %v1988_v3 = vld [vmem:[%s3607_s1 + $0x2e8] sm:$0xf] }
  0x48   : > { %1186 = vmatpush.bf16.msrb.mxu1 %v1649_v54  ;;  %v2354_v18 = vld [vmem:[%s3607_s1 + $0x464] sm:$0xf]  ;;  %v2174_v19 = vld [vmem:[%s3607_s1 + $0x470] sm:$0xf0]  ;;  %v2049_v27 = vor.u32 %v2322_v16, %v2046_v17  ;;  %v2309_v4 = vld [vmem:[%s3607_s1 + $0x2f4] sm:$0xf0] }
  0x49   : > { %1200 = vmatpush.bf16.msrb.mxu2 %v1777_v55  ;;  %v2177_v28 = vor.u32 %v2354_v18, %v2174_v19  ;;  %v2318_v30 = vld [vmem:[%s3607_s1 + $0x344] sm:$0xf]  ;;  %v2030_v31 = vld [vmem:[%s3607_s1 + $0x350] sm:$0xf0]  ;;  %v1701_v55 = vor.u32 %v2237_v48, %v1700_v47  ;;  %v2341_v7 = vld [vmem:[%s3607_s1 + $0x3f4] sm:$0xf0] }
  0x4a   : > { %1214 = vmatpush.bf16.msrb.mxu3 %v1905_v59  ;;  %v2350_v32 = vld [vmem:[%s3607_s1 + $0x444] sm:$0xf]  ;;  %v2158_v34 = vld [vmem:[%s3607_s1 + $0x450] sm:$0xf0]  ;;  %v2033_v39 = vor.u32 %v2318_v30, %v2030_v31  ;;  %v1668_v13 = vld [vmem:[%s3607_s1 + $0x68] sm:$0xf] }
  0x4b   : > { %1225 = vmatpush.bf16.msra.mxu0 %v2081_v60  ;;  %v2161_v40 = vor.u32 %v2350_v32, %v2158_v34  ;;  %v2314_v42 = vld [vmem:[%s3607_s1 + $0x324] sm:$0xf]  ;;  %v2014_v43 = vld [vmem:[%s3607_s1 + $0x330] sm:$0xf0]  ;;  %v1829_v60 = vor.u32 %v2269_v51, %v1828_v49  ;;  %v2229_v14 = vld [vmem:[%s3607_s1 + $0x74] sm:$0xf0] }
  0x4c   : > { %1187 = vmatpush.bf16.msrb.mxu1 %v1633_v5  ;;  %v2346_v44 = vld [vmem:[%s3607_s1 + $0x424] sm:$0xf]  ;;  %v2142_v46 = vld [vmem:[%s3607_s1 + $0x430] sm:$0xf0]  ;;  %v2017_v52 = vor.u32 %v2314_v42, %v2014_v43  ;;  %v1796_v15 = vld [vmem:[%s3607_s1 + $0x168] sm:$0xf] }
  0x4d   : > { %1201 = vmatpush.bf16.msrb.mxu2 %v1761_v6  ;;  %v2310_v53 = vld [vmem:[%s3607_s1 + $0x304] sm:$0xf]  ;;  %v2145_v54 = vor.u32 %v2346_v44, %v2142_v46  ;;  %v1998_v56 = vld [vmem:[%s3607_s1 + $0x310] sm:$0xf0]  ;;  %v2116_v6 = vld [vmem:[%s3607_s1 + $0x3e8] sm:$0xf] }
  0x4e   : > { %1215 = vmatpush.bf16.msrb.mxu3 %v1889_v11  ;;  %v2342_v58 = vld [vmem:[%s3607_s1 + $0x404] sm:$0xf]  ;;  %v2126_v59 = vld [vmem:[%s3607_s1 + $0x410] sm:$0xf0]  ;;  %v2001_v5 = vor.u32 %v2310_v53, %v1998_v56  ;;  %v1813_v11 = vor.u32 %v2265_v2, %v1812_v63  ;;  %v2117_v16 = vor.u32 %v2341_v7, %v2116_v6  ;;  %v2261_v17 = vld [vmem:[%s3607_s1 + $0x174] sm:$0xf0] }
  0x4f   : > { %1226 = vmatpush.bf16.msra.mxu0 %v2065_v12  ;;  %v2129_v8 = vor.u32 %v2342_v58, %v2126_v59  ;;  %v1989_v12 = vor.u32 %v2309_v4, %v1988_v3  ;;  %v1972_v18 = vld [vmem:[%s3607_s1 + $0x2c8] sm:$0xf]  ;;  %v2305_v19 = vld [vmem:[%s3607_s1 + $0x2d4] sm:$0xf0]  ;;  %v2243_v63 = vld [vmem:[%s3607_s1 + $0xec] sm:$0xf] }
  0x50   : > { %1188 = vmatpush.bf16.msrb.mxu1 %v1617_v22  ;;  %v2100_v20 = vld [vmem:[%s3607_s1 + $0x3c8] sm:$0xf]  ;;  %v2337_v21 = vld [vmem:[%s3607_s1 + $0x3d4] sm:$0xf0]  ;;  %v1669_v22 = vor.u32 %v2229_v14, %v1668_v13  ;;  %v1973_v24 = vor.u32 %v2305_v19, %v1972_v18  ;;  %v1734_v2 = vld [vmem:[%s3607_s1 + $0xf8] sm:$0xf0] }
  0x51   : > { %1202 = vmatpush.bf16.msrb.mxu2 %v1745_v23  ;;  %v1797_v23 = vor.u32 %v2261_v17, %v1796_v15  ;;  %v1652_v25 = vld [vmem:[%s3607_s1 + $0x48] sm:$0xf]  ;;  %v2301_v31 = vld [vmem:[%s3607_s1 + $0x2b4] sm:$0xf0]  ;;  %v2239_v15 = vld [vmem:[%s3607_s1 + $0xcc] sm:$0xf] }
  0x52   : > { %1216 = vmatpush.bf16.msrb.mxu3 %v1873_v26  ;;  %v2225_v26 = vld [vmem:[%s3607_s1 + $0x54] sm:$0xf0]  ;;  %v1956_v30 = vld [vmem:[%s3607_s1 + $0x2a8] sm:$0xf]  ;;  %s175_s7 = sand.u32 1, %s2498_s12   ;;  %s1415_s12 = ssub.s32 (%p2585_p4), 3, %s2779_s21 }
  0x53   : > { %1227 = vmatpush.bf16.msra.mxu0 %v2049_v27  ;;  %1189 = vmatmul.bf16.vlgmr.msrb.gmra.mxu1 %v2848_v57  ;;  %v1780_v27 = vld [vmem:[%s3607_s1 + $0x148] sm:$0xf]  ;;  %v1653_v34 = vor.u32 %v2225_v26, %v1652_v25  ;;  %v1957_v36 = vor.u32 %v2301_v31, %v1956_v30  ;;  %v2221_v38 = vld [vmem:[%s3607_s1 + $0x34] sm:$0xf0]  ;;  %s1587_s22 = sshll.u32 %s175_s7, 6  ;;  %p1416_p8 = scmp.lt.s32.totalorder (%p2585_p4), %s1415_s12, 2 }
  0x54   : > { %1241 = vmatpush.bf16.msra.mxu1 %v2177_v28  ;;  %1203 = vmatmul.bf16.vlgmr.msrb.gmra.mxu2 %v2872_v9  ;;  %v2101_v28 = vor.u32 %v2337_v21, %v2100_v20  ;;  %v2084_v32 = vld [vmem:[%s3607_s1 + $0x3a8] sm:$0xf]  ;;  %v2297_v43 = vld [vmem:[%s3607_s1 + $0x294] sm:$0xf0]  ;;  %s3514_s23 = scalar_lea.vmem [#allocation2], %s1587_s22  }
  0x55   : > { %1251 = vmatpush.bf16.msra.mxu2 %v1733_v29  ;;  %1217 = vmatmul.bf16.vlgmr.msrb.gmra.mxu3 %v2853_v0  ;;  %v2257_v29 = vld [vmem:[%s3607_s1 + $0x154] sm:$0xf0]  ;;  %v1636_v37 = vld [vmem:[%s3607_s1 + $0x28] sm:$0xf] }
  0x56   : > { %1265 = vmatpush.bf16.msra.mxu3 %v1861_v33  ;;  %v2333_v33 = vld [vmem:[%s3607_s1 + $0x3b4] sm:$0xf0]  ;;  %v1781_v35 = vor.u32 %v2257_v29, %v1780_v27  ;;  %v1940_v42 = vld [vmem:[%s3607_s1 + $0x288] sm:$0xf]  ;;  %v1637_v46 = vor.u32 %v2221_v38, %v1636_v37  ;;  %v2235_v27 = vld [vmem:[%s3607_s1 + $0xac] sm:$0xf] }
  0x57   : > { %1228 = vmatpush.bf16.msra.mxu0 %v2033_v39  ;;  %v1764_v39 = vld [vmem:[%s3607_s1 + $0x128] sm:$0xf]  ;;  %v1941_v49 = vor.u32 %v2297_v43, %v1940_v42  ;;  %v2217_v51 = vld [vmem:[%s3607_s1 + $0x14] sm:$0xf0]  ;;  %v1862_v42 = vld [vmem:[%s3607_s1 + $0x1f8] sm:$0xf0] }
  0x58   : > { %1242 = vmatpush.bf16.msra.mxu1 %v2161_v40  ;;  %v2085_v40 = vor.u32 %v2333_v33, %v2084_v32  ;;  %v2068_v44 = vld [vmem:[%s3607_s1 + $0x388] sm:$0xf]  ;;  %v2249_v53 = vld [vmem:[%s3607_s1 + $0x114] sm:$0xf0]  ;;  %v2307_v43 = vld [vmem:[%s3607_s1 + $0x2ec] sm:$0xf] }
  0x59   : > { %1252 = vmatpush.bf16.msra.mxu2 %v1717_v41  ;;  %v2253_v41 = vld [vmem:[%s3607_s1 + $0x134] sm:$0xf0]  ;;  %v1620_v47 = vld [vmem:[%s3607_s1 + $0x8] sm:$0xf] }
  0x5a   : > { %1266 = vmatpush.bf16.msra.mxu3 %v1845_v45  ;;  %v2329_v45 = vld [vmem:[%s3607_s1 + $0x394] sm:$0xf0]  ;;  %v1765_v48 = vor.u32 %v2253_v41, %v1764_v39  ;;  %v2052_v58 = vld [vmem:[%s3607_s1 + $0x368] sm:$0xf]  ;;  %v1621_v62 = vor.u32 %v2217_v51, %v1620_v47  ;;  %v2231_v39 = vld [vmem:[%s3607_s1 + $0x8c] sm:$0xf] }
  0x5b   : > { %1229 = vmatpush.bf16.msra.mxu0 %v2017_v52  ;;  %v1748_v52 = vld [vmem:[%s3607_s1 + $0x108] sm:$0xf]  ;;  %v2293_v56 = vld [vmem:[%s3607_s1 + $0x274] sm:$0xf0]  ;;  %v2275_v41 = vld [vmem:[%s3607_s1 + $0x1ec] sm:$0xf] }
  0x5c   : > { %1243 = vmatpush.bf16.msra.mxu1 %v2145_v54  ;;  %v2069_v54 = vor.u32 %v2329_v45, %v2068_v44  ;;  %v2325_v59 = vld [vmem:[%s3607_s1 + $0x374] sm:$0xf0]  ;;  %v1749_v3 = vor.u32 %v2249_v53, %v1748_v52  ;;  %v1908_v7 = vld [vmem:[%s3607_s1 + $0x248] sm:$0xf]  ;;  %v1990_v45 = vld [vmem:[%s3607_s1 + $0x2f8] sm:$0xf0]  ;;  %v1865_v52 = vor.u32 %v2275_v41, %v1862_v42 }
  0x5d   : > { %1253 = vmatpush.bf16.msra.mxu2 %v1701_v55  ;;  %v1924_v55 = vld [vmem:[%s3607_s1 + $0x268] sm:$0xf]  ;;  %v2357_v61 = vld [vmem:[%s3607_s1 + $0x474] sm:$0xf0]  ;;  %v2118_v47 = vld [vmem:[%s3607_s1 + $0x3f8] sm:$0xf0] }
  0x5e   : > { %1267 = vmatpush.bf16.msra.mxu3 %v1829_v60  ;;  %v2180_v60 = vld [vmem:[%s3607_s1 + $0x468] sm:$0xf]  ;;  %v1925_v4 = vor.u32 %v2293_v56, %v1924_v55  ;;  %v2353_v14 = vld [vmem:[%s3607_s1 + $0x454] sm:$0xf0]  ;;  %v2227_v53 = vld [vmem:[%s3607_s1 + $0x6c] sm:$0xf]  ;;  %v1993_v55 = vor.u32 %v2307_v43, %v1990_v45 }
  0x5f   : > { %1230 = vmatpush.bf16.msra.mxu0 %v2001_v5  ;;  %v2053_v5 = vor.u32 %v2325_v59, %v2052_v58  ;;  %v2181_v6 = vor.u32 %v2357_v61, %v2180_v60  ;;  %v2164_v13 = vld [vmem:[%s3607_s1 + $0x448] sm:$0xf]  ;;  %v2285_v21 = vld [vmem:[%s3607_s1 + $0x234] sm:$0xf0]  ;;  %v2271_v58 = vld [vmem:[%s3607_s1 + $0x1cc] sm:$0xf] }
  0x60   : > { %1244 = vmatpush.bf16.msra.mxu1 %v2129_v8  ;;  %v2289_v8 = vld [vmem:[%s3607_s1 + $0x254] sm:$0xf0]  ;;  %v2165_v19 = vor.u32 %v2353_v14, %v2164_v13  ;;  %v1892_v20 = vld [vmem:[%s3607_s1 + $0x228] sm:$0xf]  ;;  %v1846_v59 = vld [vmem:[%s3607_s1 + $0x1d8] sm:$0xf0] }
  0x61   : > { %1254 = vmatpush.bf16.msra.mxu2 %v1685_v10  ;;  %v2036_v10 = vld [vmem:[%s3607_s1 + $0x348] sm:$0xf]  ;;  %v1909_v17 = vor.u32 %v2289_v8, %v1908_v7  ;;  %v2349_v26 = vld [vmem:[%s3607_s1 + $0x434] sm:$0xf0]  ;;  %v1893_v29 = vor.u32 %v2285_v21, %v1892_v20  ;;  %v2303_v60 = vld [vmem:[%s3607_s1 + $0x2cc] sm:$0xf] }
  0x62   : > { %1268 = vmatpush.bf16.msra.mxu3 %v1813_v11  ;;  %1231 = vmatmul.bf16.vlgmr.msra.gmra.mxu0 %v2855_v1  ;;  %v1737_v11 = vor.u32 %v2243_v63, %v1734_v2  ;;  %v2148_v25 = vld [vmem:[%s3607_s1 + $0x428] sm:$0xf]  ;;  %v2281_v31 = vld [vmem:[%s3607_s1 + $0x214] sm:$0xf0]  ;;  %v1974_v61 = vld [vmem:[%s3607_s1 + $0x2d8] sm:$0xf0] }
  0x63   : > { %1279 = vmatpush.bf16.msrb.mxu0 %v1989_v12  ;;  %2187 = vmatmul.msk.bf16.vlgmr.msra.gmra.mxu1 %vm1107_vm0, %v2954_v50  ;;  %v2321_v12 = vld [vmem:[%s3607_s1 + $0x354] sm:$0xf0]  ;;  %v1876_v30 = vld [vmem:[%s3607_s1 + $0x208] sm:$0xf]  ;;  %v2149_v33 = vor.u32 %v2349_v26, %v2148_v25  ;;  %v2102_v63 = vld [vmem:[%s3607_s1 + $0x3d8] sm:$0xf0] }
  0x64   : > { %1293 = vmatpush.bf16.msrb.mxu1 %v2117_v16  ;;  %v1718_v16 = vld [vmem:[%s3607_s1 + $0xd8] sm:$0xf0]  ;;  %v2037_v18 = vor.u32 %v2321_v12, %v2036_v10  ;;  %v2345_v38 = vld [vmem:[%s3607_s1 + $0x414] sm:$0xf0]  ;;  %v1877_v44 = vor.u32 %v2281_v31, %v1876_v30  ;;  %v2267_v8 = vld [vmem:[%s3607_s1 + $0x1ac] sm:$0xf] }
  0x65   : > { %1255 = vmatpush.bf16.msra.mxu2 %v1669_v22  ;;  %v2020_v22 = vld [vmem:[%s3607_s1 + $0x328] sm:$0xf]  ;;  %v1830_v10 = vld [vmem:[%s3607_s1 + $0x1b8] sm:$0xf0]  ;;  %v2331_v13 = vld [vmem:[%s3607_s1 + $0x3ac] sm:$0xf] }
  0x66   : > { %1269 = vmatpush.bf16.msra.mxu3 %v1797_v23  ;;  %v1721_v23 = vor.u32 %v2239_v15, %v1718_v16  ;;  %v1958_v12 = vld [vmem:[%s3607_s1 + $0x2b8] sm:$0xf0]  ;;  %v1833_v16 = vor.u32 %v2267_v8, %v1830_v10  ;;  %v2263_v21 = vld [vmem:[%s3607_s1 + $0x18c] sm:$0xf] }
  0x67   : > { %1280 = vmatpush.bf16.msrb.mxu0 %v1973_v24  ;;  %v2317_v24 = vld [vmem:[%s3607_s1 + $0x334] sm:$0xf0]  ;;  %v2086_v14 = vld [vmem:[%s3607_s1 + $0x3b8] sm:$0xf0]  ;;  %v2327_v25 = vld [vmem:[%s3607_s1 + $0x38c] sm:$0xf] }
  0x68   : > { %1294 = vmatpush.bf16.msrb.mxu1 %v2101_v28  ;;  %v1702_v28 = vld [vmem:[%s3607_s1 + $0xb8] sm:$0xf0]  ;;  %v2021_v32 = vor.u32 %v2317_v24, %v2020_v22  ;;  %v2089_v20 = vor.u32 %v2331_v13, %v2086_v14  ;;  %v2255_v45 = vld [vmem:[%s3607_s1 + $0x14c] sm:$0xf] }
  0x69   : > { %1256 = vmatpush.bf16.msra.mxu2 %v1653_v34  ;;  %v2004_v34 = vld [vmem:[%s3607_s1 + $0x308] sm:$0xf]  ;;  %v1705_v37 = vor.u32 %v2235_v27, %v1702_v28  ;;  %v1814_v22 = vld [vmem:[%s3607_s1 + $0x198] sm:$0xf0]  ;;  %v2247_v10 = vld [vmem:[%s3607_s1 + $0x10c] sm:$0xf] }
  0x6a   : > { %1270 = vmatpush.bf16.msra.mxu3 %v1781_v35  ;;  %v2313_v35 = vld [vmem:[%s3607_s1 + $0x314] sm:$0xf0]  ;;  %v1942_v24 = vld [vmem:[%s3607_s1 + $0x298] sm:$0xf0]  ;;  %v1817_v28 = vor.u32 %v2263_v21, %v1814_v22  ;;  %v2311_v14 = vld [vmem:[%s3607_s1 + $0x30c] sm:$0xf] }
  0x6b   : > { %1281 = vmatpush.bf16.msrb.mxu0 %v1957_v36  ;;  %v2132_v36 = vld [vmem:[%s3607_s1 + $0x408] sm:$0xf]  ;;  %v2070_v26 = vld [vmem:[%s3607_s1 + $0x398] sm:$0xf0]  ;;  %v3510_v22 = vld [vmem:[%s3608_s2] sm:$0xf] }
  0x6c   : > { %1295 = vmatpush.bf16.msrb.mxu1 %v2085_v40  ;;  %v1686_v40 = vld [vmem:[%s3607_s1 + $0x98] sm:$0xf0] }
  0x6d   : > { %1257 = vmatpush.bf16.msra.mxu2 %v1637_v46  ;;  %v2339_v46 = vld [vmem:[%s3607_s1 + $0x3ec] sm:$0xf]  ;;  %v1689_v51 = vor.u32 %v2231_v39, %v1686_v40  ;;  %v1622_v30 = vld [vmem:[%s3607_s1 + $0x18] sm:$0xf0] }
  0x6e   : > { %1271 = vmatpush.bf16.msra.mxu3 %v1765_v48  ;;  %v2005_v48 = vor.u32 %v2313_v35, %v2004_v34  ;;  %v2121_v56 = vor.u32 %v2339_v46, %v2118_v47  ;;  %v1798_v34 = vld [vmem:[%s3607_s1 + $0x178] sm:$0xf0]  ;;  %v2291_v35 = vld [vmem:[%s3607_s1 + $0x26c] sm:$0xf] }
  0x6f   : > { %1282 = vmatpush.bf16.msrb.mxu0 %v1941_v49  ;;  %v2133_v49 = vor.u32 %v2345_v38, %v2132_v36  ;;  %v1926_v36 = vld [vmem:[%s3607_s1 + $0x278] sm:$0xf0]  ;;  %v2355_v39 = vld [vmem:[%s3607_s1 + $0x46c] sm:$0xf] }
  0x70   : > { %1296 = vmatpush.bf16.msrb.mxu1 %v2069_v54  ;;  %v1670_v54 = vld [vmem:[%s3607_s1 + $0x78] sm:$0xf0]  ;;  %v1929_v43 = vor.u32 %v2291_v35, %v1926_v36  ;;  %v2287_v47 = vld [vmem:[%s3607_s1 + $0x24c] sm:$0xf] }
  0x71   : > { %1258 = vmatpush.bf16.msra.mxu2 %v1621_v62  ;;  %v2335_v62 = vld [vmem:[%s3607_s1 + $0x3cc] sm:$0xf]  ;;  %v1673_v2 = vor.u32 %v2227_v53, %v1670_v54  ;;  %v2054_v38 = vld [vmem:[%s3607_s1 + $0x378] sm:$0xf0] }
  0x72   : > { %1272 = vmatpush.bf16.msra.mxu3 %v1749_v3  ;;  %v1849_v3 = vor.u32 %v2271_v58, %v1846_v59  ;;  %v2105_v7 = vor.u32 %v2335_v62, %v2102_v63  ;;  %v2182_v40 = vld [vmem:[%s3607_s1 + $0x478] sm:$0xf0]  ;;  %v2351_v53 = vld [vmem:[%s3607_s1 + $0x44c] sm:$0xf] }
  0x73   : > { %1283 = vmatpush.bf16.msrb.mxu0 %v1925_v4  ;;  %v2223_v4 = vld [vmem:[%s3607_s1 + $0x4c] sm:$0xf]  ;;  %v1782_v46 = vld [vmem:[%s3607_s1 + $0x158] sm:$0xf0] }
  0x74   : > { %1297 = vmatpush.bf16.msrb.mxu1 %v2053_v5  ;;  %1259 = vmatmul.bf16.vlgmr.msra.gmra.mxu2 %v2848_v57  ;;  %v1654_v5 = vld [vmem:[%s3607_s1 + $0x58] sm:$0xf0]  ;;  %v2251_v59 = vld [vmem:[%s3607_s1 + $0x12c] sm:$0xf] }
  0x75   : > { %1311 = vmatpush.bf16.msrb.mxu2 %v2181_v6  ;;  %1273 = vmatmul.bf16.vlgmr.msra.gmra.mxu3 %v2872_v9  ;;  %v1977_v6 = vor.u32 %v2303_v60, %v1974_v61  ;;  %v1657_v15 = vor.u32 %v2223_v4, %v1654_v5  ;;  %v2166_v54 = vld [vmem:[%s3607_s1 + $0x458] sm:$0xf0]  ;;  %v2283_v61 = vld [vmem:[%s3607_s1 + $0x22c] sm:$0xf] }
  0x76   : > { %1321 = vmatpush.bf16.msrb.mxu3 %v1737_v11  ;;  %v2299_v11 = vld [vmem:[%s3607_s1 + $0x2ac] sm:$0xf]  ;;  %v1766_v60 = vld [vmem:[%s3607_s1 + $0x138] sm:$0xf0]  ;;  %v2169_v62 = vor.u32 %v2351_v53, %v2166_v54 }
  0x77   : > { %1284 = vmatpush.bf16.msrb.mxu0 %v1909_v17  ;;  %v2219_v17 = vld [vmem:[%s3607_s1 + $0x2c] sm:$0xf]  ;;  %v1894_v63 = vld [vmem:[%s3607_s1 + $0x238] sm:$0xf0] }
  0x78   : > { %1298 = vmatpush.bf16.msrb.mxu1 %v2037_v18  ;;  %v1638_v18 = vld [vmem:[%s3607_s1 + $0x38] sm:$0xf0]  ;;  %v2347_v4 = vld [vmem:[%s3607_s1 + $0x42c] sm:$0xf] }
  0x79   : > { %1312 = vmatpush.bf16.msrb.mxu2 %v2165_v19  ;;  %v1961_v19 = vor.u32 %v2299_v11, %v1958_v12  ;;  %v1641_v27 = vor.u32 %v2219_v17, %v1638_v18  ;;  %v2150_v5 = vld [vmem:[%s3607_s1 + $0x438] sm:$0xf0]  ;;  %v2279_v11 = vld [vmem:[%s3607_s1 + $0x20c] sm:$0xf] }
  0x7a   : > { %1322 = vmatpush.bf16.msrb.mxu3 %v1721_v23  ;;  %v2295_v23 = vld [vmem:[%s3607_s1 + $0x28c] sm:$0xf]  ;;  %v2153_v12 = vor.u32 %v2347_v4, %v2150_v5  ;;  %v1878_v13 = vld [vmem:[%s3607_s1 + $0x218] sm:$0xf0]  ;;  %v356_v5 = vperm.slane %v3510_v22, 2 }
  0x7b   : > { %1285 = vmatpush.bf16.msrb.mxu0 %v1893_v29  ;;  %v2215_v29 = vld [vmem:[%s3607_s1 + $0xc] sm:$0xf]  ;;  %v1945_v31 = vor.u32 %v2295_v23, %v1942_v24  ;;  %v2134_v17 = vld [vmem:[%s3607_s1 + $0x418] sm:$0xf0]  ;;  %v354_v23 = vperm.slane %v3510_v22, 0 }
  0x7c   : > { %1299 = vmatpush.bf16.msrb.mxu1 %v2021_v32  ;;  %v2073_v32 = vor.u32 %v2327_v25, %v2070_v26  ;;  %v1625_v41 = vor.u32 %v2215_v29, %v1622_v30 }
  0x7d   : > { %1313 = vmatpush.bf16.msrb.mxu2 %v2149_v33  ;;  %v2259_v33 = vld [vmem:[%s3607_s1 + $0x16c] sm:$0xf] }
  0x7e   : > { %1323 = vmatpush.bf16.msrb.mxu3 %v1705_v37  ;;  %v2323_v37 = vld [vmem:[%s3607_s1 + $0x36c] sm:$0xf]  ;;  %v1801_v42 = vor.u32 %v2259_v33, %v1798_v34 }
  0x7f   : > { %1286 = vmatpush.bf16.msrb.mxu0 %v1877_v44  ;;  %v2057_v44 = vor.u32 %v2323_v37, %v2054_v38 }
  0x80   : > { %1300 = vmatpush.bf16.msrb.mxu1 %v2005_v48  ;;  %v2185_v48 = vor.u32 %v2355_v39, %v2182_v40 }
  0x81   : > { %1314 = vmatpush.bf16.msrb.mxu2 %v2133_v49  ;;  %v1910_v49 = vld [vmem:[%s3607_s1 + $0x258] sm:$0xf0] }
  0x82   : > { %1324 = vmatpush.bf16.msrb.mxu3 %v1689_v51  ;;  %1287 = vmatmul.bf16.vlgmr.msrb.gmra.mxu0 %v2853_v0  ;;  %v2319_v51 = vld [vmem:[%s3607_s1 + $0x34c] sm:$0xf] }
  0x83   : > { %1335 = vmatpush.bf16.msra.mxu0 %v1865_v52  ;;  %1301 = vmatmul.bf16.vlgmr.msrb.gmra.mxu1 %v2855_v1  ;;  %v2038_v52 = vld [vmem:[%s3607_s1 + $0x358] sm:$0xf0] }
  0x84   : > { %1349 = vmatpush.bf16.msra.mxu1 %v1993_v55  ;;  %2188 = vmatmul.msk.bf16.vlgmr.msrb.gmra.mxu2 %vm1107_vm0, %v2954_v50  ;;  %v1785_v55 = vor.u32 %v2255_v45, %v1782_v46  ;;  %v2041_v58 = vor.u32 %v2319_v51, %v2038_v52 }
  0x85   : > { %1363 = vmatpush.bf16.msra.mxu2 %v2121_v56  ;;  %v1913_v56 = vor.u32 %v2287_v47, %v1910_v49 }
  0x86   : > { %1325 = vmatpush.bf16.msrb.mxu3 %v1673_v2  ;;  %v2315_v2 = vld [vmem:[%s3607_s1 + $0x32c] sm:$0xf] }
  0x87   : > { %1336 = vmatpush.bf16.msra.mxu0 %v1849_v3  ;;  %v2022_v3 = vld [vmem:[%s3607_s1 + $0x338] sm:$0xf0] }
  0x88   : > { %1350 = vmatpush.bf16.msra.mxu1 %v1977_v6  ;;  %v1769_v6 = vor.u32 %v2251_v59, %v1766_v60  ;;  %v2025_v8 = vor.u32 %v2315_v2, %v2022_v3 }
  0x89   : > { %1364 = vmatpush.bf16.msra.mxu2 %v2105_v7  ;;  %v1897_v7 = vor.u32 %v2283_v61, %v1894_v63 }
  0x8a   : > { %1326 = vmatpush.bf16.msrb.mxu3 %v1657_v15  ;;  %v2006_v15 = vld [vmem:[%s3607_s1 + $0x318] sm:$0xf0] }
  0x8b   : > { %1337 = vmatpush.bf16.msra.mxu0 %v1833_v16  ;;  %v2343_v16 = vld [vmem:[%s3607_s1 + $0x40c] sm:$0xf] }
  0x8c   : > { %1351 = vmatpush.bf16.msra.mxu1 %v1961_v19  ;;  %v1881_v19 = vor.u32 %v2279_v11, %v1878_v13  ;;  %v2137_v21 = vor.u32 %v2343_v16, %v2134_v17 }
  0x8d   : > { %1365 = vmatpush.bf16.msra.mxu2 %v2089_v20  ;;  %v2009_v20 = vor.u32 %v2311_v14, %v2006_v15 }
  0x8e   : > { %1327 = vmatpush.bf16.msrb.mxu3 %v1641_v27 }
  0x8f   : > { %1338 = vmatpush.bf16.msra.mxu0 %v1817_v28 }
  0x90   : > { %1352 = vmatpush.bf16.msra.mxu1 %v1945_v31 }
  0x91   : > { %1366 = vmatpush.bf16.msra.mxu2 %v2073_v32 }
  0x92   : > { %1328 = vmatpush.bf16.msrb.mxu3 %v1625_v41 }
  0x93   : > { %1339 = vmatpush.bf16.msra.mxu0 %v1801_v42  ;;  %v355_v42 = vperm.slane %v3510_v22, 1 }
  0x94   : > { %1353 = vmatpush.bf16.msra.mxu1 %v1929_v43 }
  0x95   : > { %1367 = vmatpush.bf16.msra.mxu2 %v2057_v44  ;;  %1329 = vmatmul.bf16.vlgmr.msrb.gmra.mxu3 %v2848_v57  ;;  %v1750_v57 = vld [vmem:[%s3607_s1 + $0x118] sm:$0xf0] }
  0x96   : > { %1381 = vmatpush.bf16.msra.mxu3 %v2185_v48  ;;  %v1753_v18 = vor.u32 %v2247_v10, %v1750_v57 }
  0x97   : > { %1340 = vmatpush.bf16.msra.mxu0 %v1785_v55 }
  0x98   : > { %1354 = vmatpush.bf16.msra.mxu1 %v1913_v56 }
  0x99   : > { %1368 = vmatpush.bf16.msra.mxu2 %v2041_v58 }
  0x9a   : > { %1382 = vmatpush.bf16.msra.mxu3 %v2169_v62 }
  0x9b   : > { %1341 = vmatpush.bf16.msra.mxu0 %v1769_v6 }
  0x9c   : > { %1355 = vmatpush.bf16.msra.mxu1 %v1897_v7 }
  0x9d   : > { %1369 = vmatpush.bf16.msra.mxu2 %v2025_v8 }
  0x9e   : > { %1383 = vmatpush.bf16.msra.mxu3 %v2153_v12 }
  0x9f   : > { %1342 = vmatpush.bf16.msra.mxu0 %v1753_v18 }
  0xa0   : > { %1356 = vmatpush.bf16.msra.mxu1 %v1881_v19 }
  0xa1   : > { %1370 = vmatpush.bf16.msra.mxu2 %v2009_v20 }
  0xa2   : > { %1384 = vmatpush.bf16.msra.mxu3 %v2137_v21  ;;  %1343 = vmatmul.bf16.vlgmr.msra.gmra.mxu0 %v2872_v9 }
  0xa3   : > { %1357 = vmatmul.bf16.vlgmr.msra.gmra.mxu1 %v2853_v0 }
  0xa4   : > { %1371 = vmatmul.bf16.vlgmr.msra.gmra.mxu2 %v2855_v1 }
  0xa5   : > { %2189 = vmatmul.msk.bf16.vlgmr.msra.gmra.mxu3 %vm1107_vm0, %v2954_v50 }
  0xb0   : > { %v1134_v26 = vpop.f32.mrf.mxu1 }
  0xb2   : > { %v1120_v24 = vpop.f32.mrf.mxu0 }
  0xb3   : > { %v1121_v25 = vadd.f32 %v1120_v24, %v354_v23 }
  0xb5   : > { %v1135_v27 = vadd.f32 %v1134_v26, %v1121_v25 }
  0xb7   : > { %v1148_v9 = vpop.f32.mrf.mxu2 }
  0xb8   : > { %v1149_v29 = vadd.f32 %v1148_v9, %v1135_v27  ;;  %v1136_v1 = vpop.f32.mrf.mxu1 }
  0xba   : > { %v1122_v28 = vpop.f32.mrf.mxu0  ;;  %v1162_v0 = vpop.f32.mrf.mxu3 }
  0xbb   : > { %v1123_v30 = vadd.f32 %v1122_v28, %v354_v23  ;;  %v1163_v31 = vadd.f32 %v1162_v0, %v1149_v29  ;;  %v357_v29 = vperm.slane %v3510_v22, 3 }
  0xbd   : > { %v1137_v50 = vadd.f32 %v1136_v1, %v1123_v30 }
  0xbf   : > { %v1150_v33 = vpop.f32.mrf.mxu2 }
  0xc0   : > { %v1151_v36 = vadd.f32 %v1150_v33, %v1137_v50 }
  0xc2   : > { %v1176_v32 = vpop.f32.mrf.mxu0  ;;  %v1164_v37 = vpop.f32.mrf.mxu3 }
  0xc3   : > { %v1177_v34 = vadd.f32 %v1176_v32, %v1163_v31  ;;  %v1165_v38 = vadd.f32 %v1164_v37, %v1151_v36 }
  0xc5   : > { %v1391_v35 = vmax.f32 %v1177_v34, 0.0 }
  0xc7   : > { %1399 = vst [vmem:[%s3514_s23] sm:$0xff] %v1391_v35 }
  0xca   : > { %v1178_v39 = vpop.f32.mrf.mxu0 }
  0xcb   : > { %v1179_v40 = vadd.f32 %v1178_v39, %v1165_v38 }
  0xcd   : > { %v1395_v41 = vmax.f32 %v1179_v40, 0.0 }
  0xcf   : > { %1403 = vst [vmem:[%s3514_s23 + $0x20] sm:$0xff] %v1395_v41 }
  0xd0   : > { %v1190_v43 = vpop.f32.mrf.mxu1 }
  0xd1   : > { %v1191_v44 = vadd.f32 %v1190_v43, %v355_v42 }
  0xd7   : > { %v1204_v45 = vpop.f32.mrf.mxu2 }
  0xd8   : > { %v1218_v46 = vpop.f32.mrf.mxu3  ;;  %v1192_v47 = vpop.f32.mrf.mxu1  ;;  %v1205_v48 = vadd.f32 %v1204_v45, %v1191_v44 }
  0xd9   : > { %v1193_v51 = vadd.f32 %v1192_v47, %v355_v42 }
  0xda   : > { %v1219_v49 = vadd.f32 %v1218_v46, %v1205_v48 }
  0xdf   : > { %v1232_v52 = vpop.f32.mrf.mxu0  ;;  %v1206_v54 = vpop.f32.mrf.mxu2 }
  0xe0   : > { %v1233_v53 = vadd.f32 %v1232_v52, %v1219_v49  ;;  %v1207_v55 = vadd.f32 %v1206_v54, %v1193_v51  ;;  %v1220_v56 = vpop.f32.mrf.mxu3  ;;  %v1246_v58 = vpop.f32.mrf.mxu1 }
  0xe2   : > { %v1247_v59 = vadd.f32 %v1246_v58, %v1233_v53  ;;  %v1221_v60 = vadd.f32 %v1220_v56, %v1207_v55 }
  0xe4   : > { %v1392_v61 = vmax.f32 %v1247_v59, 0.0 }
  0xe6   : > { %1400 = vst [vmem:[%s3514_s23 + $0x8] sm:$0xff] %v1392_v61 }
  0xe7   : > { %v1234_v62 = vpop.f32.mrf.mxu0 }
  0xe8   : > { %v1235_v63 = vadd.f32 %v1234_v62, %v1221_v60  ;;  %v1248_v2 = vpop.f32.mrf.mxu1 }
  0xea   : > { %v1249_v3 = vadd.f32 %v1248_v2, %v1235_v63 }
  0xec   : > { %v1396_v4 = vmax.f32 %v1249_v3, 0.0 }
  0xee   : > { %1404 = vst [vmem:[%s3514_s23 + $0x28] sm:$0xff] %v1396_v4 }
  0xf7   : > { %v1260_v6 = vpop.f32.mrf.mxu2 }
  0xf8   : > { %v1261_v7 = vadd.f32 %v1260_v6, %v356_v5  ;;  %v1274_v8 = vpop.f32.mrf.mxu3 }
  0xfa   : > { %v1275_v10 = vadd.f32 %v1274_v8, %v1261_v7 }
  0xff   : > { %v1288_v57 = vpop.f32.mrf.mxu0  ;;  %v1262_v11 = vpop.f32.mrf.mxu2 }
 0x100   : > { %v1289_v12 = vadd.f32 %v1288_v57, %v1275_v10  ;;  %v1302_v13 = vpop.f32.mrf.mxu1  ;;  %v1263_v14 = vadd.f32 %v1262_v11, %v356_v5  ;;  %v1276_v15 = vpop.f32.mrf.mxu3 }
 0x102   : > { %v1303_v16 = vadd.f32 %v1302_v13, %v1289_v12  ;;  %v1277_v17 = vadd.f32 %v1276_v15, %v1263_v14 }
 0x107   : > { %v1290_v18 = vpop.f32.mrf.mxu0  ;;  %v1316_v19 = vpop.f32.mrf.mxu2 }
 0x108   : > { %v1317_v20 = vadd.f32 %v1316_v19, %v1303_v16  ;;  %v1291_v21 = vadd.f32 %v1290_v18, %v1277_v17  ;;  %v1304_v24 = vpop.f32.mrf.mxu1 }
 0x10a   : > { %v1393_v23 = vmax.f32 %v1317_v20, 0.0  ;;  %v1305_v25 = vadd.f32 %v1304_v24, %v1291_v21 }
 0x10c   : > { %1401 = vst [vmem:[%s3514_s23 + $0x10] sm:$0xff] %v1393_v23 }
 0x10f   : > { %v1318_v26 = vpop.f32.mrf.mxu2 }
 0x110   : > { %v1319_v27 = vadd.f32 %v1318_v26, %v1305_v25 }
 0x112   : > { %v1397_v9 = vmax.f32 %v1319_v27, 0.0 }
 0x114   : > { %1405 = vst [vmem:[%s3514_s23 + $0x30] sm:$0xff] %v1397_v9 }
 0x118   : > { %v1330_v28 = vpop.f32.mrf.mxu3 }
 0x119   : > { %v1331_v0 = vadd.f32 %v1330_v28, %v357_v29 }
 0x11f   : > { %v1344_v30 = vpop.f32.mrf.mxu0 }
 0x120   : > { %v1345_v1 = vadd.f32 %v1344_v30, %v1331_v0  ;;  %v1332_v31 = vpop.f32.mrf.mxu3  ;;  %v1358_v50 = vpop.f32.mrf.mxu1 }
 0x121   : > { %v1333_v34 = vadd.f32 %v1332_v31, %v357_v29 }
 0x122   : > { %v1359_v32 = vadd.f32 %v1358_v50, %v1345_v1 }
 0x127   : > { %v1372_v33 = vpop.f32.mrf.mxu2  ;;  %v1346_v36 = vpop.f32.mrf.mxu0 }
 0x128   : > { %v1373_v35 = vadd.f32 %v1372_v33, %v1359_v32  ;;  %v1347_v37 = vadd.f32 %v1346_v36, %v1333_v34  ;;  %v1386_v38 = vpop.f32.mrf.mxu3  ;;  %v1360_v40 = vpop.f32.mrf.mxu1 }
 0x12a   : > { %v1387_v39 = vadd.f32 %v1386_v38, %v1373_v35  ;;  %v1361_v42 = vadd.f32 %v1360_v40, %v1347_v37 }
 0x12c   : > { %v1394_v41 = vmax.f32 %v1387_v39, 0.0 }
 0x12e   : > { %1402 = vst [vmem:[%s3514_s23 + $0x18] sm:$0xff] %v1394_v41 }
 0x12f   : > { %v1374_v22 = vpop.f32.mrf.mxu2 }
 0x130   : > { %v1375_v43 = vadd.f32 %v1374_v22, %v1361_v42  ;;  %v1388_v44 = vpop.f32.mrf.mxu3 }
 0x132   : > { %v1389_v45 = vadd.f32 %v1388_v44, %v1375_v43  ;;  %1413 = sbr.rel (!%p2585_p4) target bundleno = 353 (0x161), region = 36 }
 0x134   : > { %v1398_v46 = vmax.f32 %v1389_v45, 0.0 }
 0x136   : > { %1406 = vst [vmem:[%s3514_s23 + $0x38] sm:$0xff] %v1398_v46 }
 0x137   : > { %s3621_s12 = smov (!%p1416_p8, %s1415_s12), 2 }
 0x138   : > { %s2358_s28 = sshll.u32 %s3621_s12, 5 }
 0x139   : > { %p2197_p9 = scmp.eq.s32.totalorder %s2358_s28, 0 }
 0x13a   : > { %s3540_s29 = sshrl.u32 (!%p2197_p9), %s3621_s12, 1 }
 0x13b   : > { %1426 = sbr.rel (%p2197_p9) target bundleno = 353 (0x161), region = 40  ;;  %p2198_p10 = scmp.le.s32.totalorder (!%p2197_p9), %s3540_s29, 0 }
 0x140   : > { %1539 = sbr.rel (%p2198_p10) target bundleno = 336 (0x150), region = 88  ;;  %s3611_s15 = smov (!%p2198_p10), %s3534_s27 }
 0x141   : > { %s3612_s20 = smov (!%p2198_p10), %s3514_s23  ;;  %s3549_s21 = smov (!%p2198_p10), 0  }
 0x142   : > { %s3551_s30 = smov (!%p2198_p10), 0  }
 0x145 LB: >> { %v1439_v47 = vld [vmem:[%s2514_s20] sm:$0xff]  ;;  %v1443_v49 = vld [vmem:[%s2514_s20 + $0x8] sm:$0xff]  ;;  %s1455_s4 = sadd.s32 1, %s2518_s21  ;;  %v1447_v52 = vld [vmem:[%s2514_s20 + $0x10] sm:$0xff]  ;;  %s1433_s30 = sadd.s32 1, %s2522_s30   ;;  %s2522_s30 = sphi %s3551_s30, %s1433_s30   ;;  %s2518_s21 = sphi %s3549_s21, %s3614_s21   ;;  %s2514_s20 = sphi %s3612_s20, %s1460_s20   ;;  %s2510_s15 = sphi %s3611_s15, %s3613_s15  }
 0x146   : >> { %v1441_v48 = vld [vmem:[%s2514_s20 + $0x20] sm:$0xff]  ;;  %1440 = vst [vmem:[%s2510_s15] sm:$0xff] %v1439_v47  ;;  %v1445_v51 = vld [vmem:[%s2514_s20 + $0x28] sm:$0xff]  ;;  %p1456_p11 = scmp.ge.s32.totalorder %s1455_s4, %s3540_s29  ;;  %v1449_v53 = vld [vmem:[%s2514_s20 + $0x30] sm:$0xff]  ;;  %p1432_p12 = scmp.ge.s32.totalorder %s1433_s30, %s3540_s29 }
 0x147   : >> { %1442 = vst [vmem:[%s2510_s15 + $0x20] sm:$0xff] %v1441_v48  ;;  %v1451_v54 = vld [vmem:[%s2514_s20 + $0x18] sm:$0xff] }
 0x148   : >> { %1444 = vst [vmem:[%s2510_s15 + $0x8] sm:$0xff] %v1443_v49  ;;  %s3623_s4 = smov (%p1456_p11, %s1455_s4), 0  ;;  %v1453_v55 = vld [vmem:[%s2514_s20 + $0x38] sm:$0xff] }
 0x149   : >> { %1446 = vst [vmem:[%s2510_s15 + $0x28] sm:$0xff] %v1445_v51  ;;  %s2199_s5 = sshll.u32 %s3623_s4, 6  ;;  %s3614_s21 = smov %s3623_s4 }
 0x14a   : >> { %1448 = vst [vmem:[%s2510_s15 + $0x10] sm:$0xff] %v1447_v52  ;;  %s1460_s20 = scalar_lea.vmem %s3514_s23, %s2199_s5 [#allocation2]   ;;  %s1461_s6 = scalar_lea.vmem %s3534_s27, %s2199_s5  }
 0x14b   : >> { %1450 = vst [vmem:[%s2510_s15 + $0x30] sm:$0xff] %v1449_v53  ;;  %1435 = sbr.rel (!%p1432_p12) target bundleno = 325 (0x145), region = 94 }
 0x14c   : >> { %1452 = vst [vmem:[%s2510_s15 + $0x18] sm:$0xff] %v1451_v54 }
 0x14d   : >> { %1454 = vst [vmem:[%s2510_s15 + $0x38] sm:$0xff] %v1453_v55  ;;  %s3613_s15 = smov %s1461_s6 }
 0x150 PF: > { %s3570_s8 = sand.u32 1, %s3621_s12   ;;  %s2361_s9 = sshll.u32 %s3540_s29, 6 }
 0x151   : > { %s3574_s10 = scalar_lea.vmem %s3514_s23, %s2361_s9 [#allocation2]   ;;  %s3577_s11 = scalar_lea.vmem %s3534_s27, %s2361_s9  }
 0x152   : > { %p2204_p13 = scmp.le.s32.totalorder %s3570_s8, 0 }
 0x153   : > { %s3615_s14 = smov (!%p2204_p13), %s3577_s11  ;;  %s3616_s17 = smov (!%p2204_p13), %s3574_s10 }
 0x154   : > { %1553 = sbr.rel (%p2204_p13) target bundleno = 353 (0x161), region = 99  ;;  %s2532_s18 = smov (!%p2204_p13), 0  }
 0x155   : > { %s2536_s7 = smov (!%p2204_p13), 0  }
 0x159 LB: >> { %v1478_v56 = vld [vmem:[%s2530_s17] sm:$0xff]  ;;  %v1480_v58 = vld [vmem:[%s2530_s17 + $0x8] sm:$0xff]  ;;  %v1482_v59 = vld [vmem:[%s2530_s17 + $0x10] sm:$0xff]  ;;  %s1486_s22 = sadd.s32 1, %s2534_s18  ;;  %s1472_s7 = sadd.s32 1, %s2538_s7   ;;  %s2538_s7 = sphi %s2536_s7, %s1472_s7   ;;  %s2534_s18 = sphi %s2532_s18, %s2533_s18   ;;  %s2530_s17 = sphi %s3616_s17, %s1491_s17   ;;  %s2526_s14 = sphi %s3615_s14, %s1492_s14  }
 0x15a   : >> { %1479 = vst [vmem:[%s2526_s14] sm:$0xff] %v1478_v56  ;;  %v1484_v60 = vld [vmem:[%s2530_s17 + $0x18] sm:$0xff]  ;;  %p1487_p0 = scmp.ge.s32.totalorder %s1486_s22, %s3570_s8  ;;  %p1471_p1 = scmp.ge.s32.totalorder %s1472_s7, %s3570_s8 }
 0x15b   : >> { %1481 = vst [vmem:[%s2526_s14 + $0x8] sm:$0xff] %v1480_v58 }
 0x15c   : >> { %1483 = vst [vmem:[%s2526_s14 + $0x10] sm:$0xff] %v1482_v59  ;;  %s3625_s22 = smov (%p1487_p0, %s1486_s22), 0  ;;  %1474 = sbr.rel (!%p1471_p1) target bundleno = 345 (0x159), region = 105 }
 0x15d   : >> { %1485 = vst [vmem:[%s2526_s14 + $0x18] sm:$0xff] %v1484_v60  ;;  %s2205_s23 = sshll.u32 %s3625_s22, 5  ;;  %s2533_s18 = smov %s3625_s22  }
 0x15e   : >> { %s1491_s17 = scalar_lea.vmem %s3574_s10, %s2205_s23 [#allocation2]   ;;  %s1492_s14 = scalar_lea.vmem %s3577_s11, %s2205_s23  }
 0x161 PF: > { %p10_p2 = scmp.ge.s32.totalorder %s2575_s16, 4   ;;  %s3617_s12 = smov %s2502_s13 }
 0x162   : > { %s3618_s13 = smov %s2583_s19  ;;  %s3619_s14 = smov %s2575_s16 }
 0x163   :  { %12 = sbr.rel (!%p10_p2) target bundleno = 2 (0x2), region = 116 }

</bundles_post_ra>
